<compile_context>
chip_gen: v6e
topology: v6e:2x2x1
jax: 0.10.0
libtpu: 0.0.40
codegen_flags: <defaults>
</compile_context>

<pallas_src>
import functools

import jax
import jax.numpy as jnp
from jax.experimental import pallas as pl
from jax.experimental.pallas import tpu as pltpu

# ---- module hyper-parameters (defaults of the PyTorch NeRF) ----------------
D = 8
W = 256
INPUT_CH = 3          # xyz positional input
INPUT_CH_BONES = 0
INPUT_CH_VIEWS = 3    # view-direction input (unused when use_viewdirs=False)
OUTPUT_CH = 4
SKIPS = (4,)
CAM_CH = 0            # use_framecode=False
DNET_IN = INPUT_CH + INPUT_CH_BONES          # 3
X_CH = DNET_IN + INPUT_CH_VIEWS + CAM_CH     # 6  (pts | views | frame_idx)

# ---- kernel layout constants ------------------------------------------------
PAD_K = 8       # pad the 3-wide pts contraction up to one sublane
OUT_PAD = 128   # pad the 4-wide output head to a lane-dense 128 columns
TILE_N = 512    # rows per grid step (tunable; keep grid >= 2 for v7x megacore)


def _nerf_kernel(x_ref,
                 w0, b0, w1, b1, w2, b2, w3, b3, w4, b4,
                 w5p, w5h, b5, w6, b6, w7, b7,
                 wo, bo,
                 out_ref):
    """One tile of TILE_N samples through the full density MLP + output head.

    x_ref: (tile_n, PAD_K) bf16  -- pts padded to 8 channels
    weights: bf16, biases: f32; all matmuls accumulate in f32 on the MXU.
    out_ref: (tile_n, OUT_PAD) f32  -- lane-dense padded output (cols 4.. are 0)
    """
    pts = x_ref[...]                                   # (tile_n, 8) bf16

    def lin_relu(h, w, b):
        y = jnp.dot(h, w[...], preferred_element_type=jnp.float32) + b[...]
        return jnp.maximum(y, 0.0).astype(jnp.bfloat16)

    # pts_linears[0]: Linear(3, 256) + ReLU   (K padded 3 -> 8, zero rows)
    h = lin_relu(pts, w0, b0)
    # pts_linears[1..4]: Linear(256, 256) + ReLU
    h = lin_relu(h, w1, b1)
    h = lin_relu(h, w2, b2)
    h = lin_relu(h, w3, b3)
    h = lin_relu(h, w4, b4)
    # skip at i==4: cat([pts, h]) @ W5  ==  pts @ W5[:K] + h @ W5[K:]
    y5 = (jnp.dot(pts, w5p[...], preferred_element_type=jnp.float32)
          + jnp.dot(h, w5h[...], preferred_element_type=jnp.float32)
          + b5[...])
    h = jnp.maximum(y5, 0.0).astype(jnp.bfloat16)
    # pts_linears[6..7]: Linear(256, 256) + ReLU
    h = lin_relu(h, w6, b6)
    h = lin_relu(h, w7, b7)
    # output_linear: Linear(256, 4) (padded to 128 lanes), no activation
    out = jnp.dot(h, wo[...], preferred_element_type=jnp.float32) + bo[...]
    out_ref[...] = out.astype(out_ref.dtype)


def _resident_spec(shape):
    # Constant index_map -> the block stays resident in VMEM across the grid.
    return pl.BlockSpec(shape, lambda i: tuple(0 for _ in shape))


@functools.partial(jax.jit, static_argnames=("tile_n",))
def nerf_forward(x, kparams, *, tile_n=TILE_N):
    """x: (N, X_CH) float32. Returns (N, OUTPUT_CH) float32."""
    n = x.shape[0]
    n_pad = -(-n // tile_n) * tile_n          # round up to tile multiple

    # input_views / frame_idxs are split off but unused
    # (use_viewdirs=False, use_framecode=False).  Keep only pts, cast to bf16
    # for the MXU, pad K: 3 -> 8 and N up to a tile multiple (rows sliced off).
    pts = x[:, :DNET_IN].astype(jnp.bfloat16)
    pts = jnp.pad(pts, ((0, n_pad - n), (0, PAD_K - DNET_IN)))

    in_specs = [pl.BlockSpec((tile_n, PAD_K), lambda i: (i, 0))]
    in_specs += [_resident_spec(a.shape) for a in kparams]

    # Advisory cost estimate (bf16 weights + input, f32 padded output).
    flops = 2 * n_pad * (2 * PAD_K * W + 7 * W * W + W * OUT_PAD)
    bytes_accessed = (sum(a.size * a.dtype.itemsize for a in kparams)
                      + n_pad * (PAD_K * 2 + OUT_PAD * 4))

    out = pl.pallas_call(
        _nerf_kernel,
        out_shape=jax.ShapeDtypeStruct((n_pad, OUT_PAD), jnp.float32),
        grid=(n_pad // tile_n,),
        in_specs=in_specs,
        out_specs=pl.BlockSpec((tile_n, OUT_PAD), lambda i: (i, 0)),
        compiler_params=pltpu.CompilerParams(
            dimension_semantics=("parallel",)),
        cost_estimate=pl.CostEstimate(
            flops=flops, transcendentals=0, bytes_accessed=bytes_accessed),
    )(pts, *kparams)

    return out[:n, :OUTPUT_CH]


# ---- parameter handling ------------------------------------------------------
def _init_linear(key, fan_in, fan_out):
    # PyTorch nn.Linear default: U(-k, k), k = 1/sqrt(fan_in)
    k = 1.0 / jnp.sqrt(jnp.float32(fan_in))
    kw, kb = jax.random.split(key)
    w = jax.random.uniform(kw, (fan_in, fan_out), jnp.float32, -k, k)
    b = jax.random.uniform(kb, (1, fan_out), jnp.float32, -k, k)
    return w, b


def make_params(key):
    """Logical f32 parameters, laid out [in_features, out_features]."""
    keys = jax.random.split(key, 9)
    w0, b0 = _init_linear(keys[0], DNET_IN, W)       # pts_linears[0]
    w1, b1 = _init_linear(keys[1], W, W)
    w2, b2 = _init_linear(keys[2], W, W)
    w3, b3 = _init_linear(keys[3], W, W)
    w4, b4 = _init_linear(keys[4], W, W)
    w5, b5 = _init_linear(keys[5], W + DNET_IN, W)   # skip layer: Linear(259, 256)
    w6, b6 = _init_linear(keys[6], W, W)
    w7, b7 = _init_linear(keys[7], W, W)
    wo, bo = _init_linear(keys[8], W, OUTPUT_CH)     # output_linear
    return (w0, b0, w1, b1, w2, b2, w3, b3, w4, b4,
            w5, b5, w6, b6, w7, b7, wo, bo)


def prepare_kernel_params(params):
    """One-time prep: split the skip weight, pad skinny dims, cast weights bf16."""
    (w0, b0, w1, b1, w2, b2, w3, b3, w4, b4,
     w5, b5, w6, b6, w7, b7, wo, bo) = params
    bf = lambda a: a.astype(jnp.bfloat16)
    w0p = bf(jnp.pad(w0, ((0, PAD_K - DNET_IN), (0, 0))))            # (8, 256)
    w5p = bf(jnp.pad(w5[:DNET_IN], ((0, PAD_K - DNET_IN), (0, 0))))  # (8, 256)
    w5h = bf(w5[DNET_IN:])                                           # (256, 256)
    wop = bf(jnp.pad(wo, ((0, 0), (0, OUT_PAD - OUTPUT_CH))))        # (256, 128)
    bop = jnp.pad(bo, ((0, 0), (0, OUT_PAD - OUTPUT_CH)))            # (1, 128) f32
    return (w0p, b0, bf(w1), b1, bf(w2), b2, bf(w3), b3, bf(w4), b4,
            w5p, w5h, b5, bf(w6), b6, bf(w7), b7, wop, bop)


# ---- pure-JAX references -----------------------------------------------------
def nerf_ref(x, params):
    """Exact f32 mirror of the PyTorch forward (use_viewdirs=False)."""
    (w0, b0, w1, b1, w2, b2, w3, b3, w4, b4,
     w5, b5, w6, b6, w7, b7, wo, bo) = params
    pts = x[:, :DNET_IN]
    h = jax.nn.relu(pts @ w0 + b0)
    for w, b in ((w1, b1), (w2, b2), (w3, b3), (w4, b4)):
        h = jax.nn.relu(h @ w + b)
    h = jnp.concatenate([pts, h], axis=-1)           # skip at i == 4
    h = jax.nn.relu(h @ w5 + b5)
    h = jax.nn.relu(h @ w6 + b6)
    h = jax.nn.relu(h @ w7 + b7)
    return h @ wo + bo


def nerf_ref_bf16(x, params):
    """Reference with the same bf16-matmul / f32-accumulate math as the kernel."""
    (w0, b0, w1, b1, w2, b2, w3, b3, w4, b4,
     w5, b5, w6, b6, w7, b7, wo, bo) = params
    bf = lambda a: a.astype(jnp.bfloat16)
    pts = bf(x[:, :DNET_IN])

    def lin_relu(h, w, b):
        y = jnp.dot(h, bf(w), preferred_element_type=jnp.float32) + b
        return bf(jax.nn.relu(y))

    h = lin_relu(pts, w0, b0)
    for w, b in ((w1, b1), (w2, b2), (w3, b3), (w4, b4)):
        h = lin_relu(h, w, b)
    y5 = (jnp.dot(pts, bf(w5[:DNET_IN]), preferred_element_type=jnp.float32)
          + jnp.dot(h, bf(w5[DNET_IN:]), preferred_element_type=jnp.float32) + b5)
    h = bf(jax.nn.relu(y5))
    h = lin_relu(h, w6, b6)
    h = lin_relu(h, w7, b7)
    return jnp.dot(h, bf(wo), preferred_element_type=jnp.float32) + bo


if __name__ == "__main__":
    key = jax.random.PRNGKey(0)
    kx, kp = jax.random.split(key)

    # N=1024 with TILE_N=512 -> 2 grid steps, so both v7x TensorCores get work.
    N = 1024
    x = jax.random.normal(kx, (N, X_CH), jnp.float32)
    params = make_params(kp)
    kparams = prepare_kernel_params(params)

    out = nerf_forward(x, kparams, tile_n=TILE_N)
    out = jax.block_until_ready(out)
    assert out.shape == (N, OUTPUT_CH)

    # Kernel must match a reference doing the identical bf16/f32 math.
    ref_bf16 = nerf_ref_bf16(x, params)
    assert jnp.allclose(out, ref_bf16, atol=2e-2, rtol=2e-2), \
        "mismatch vs bf16-matched reference"

    # And stay within the expected bf16 quantization gap of the f32 reference.
    ref_f32 = nerf_ref(x, params)
    assert float(jnp.max(jnp.abs(out - ref_f32))) < 0.25, \
        "bf16 quantization gap unexpectedly large"

    print("KERNEL_OK")
</pallas_src>

<mosaic_0001>
module attributes {stable_mosaic.version = 11 : i64} {
  func.func @_nerf_kernel(%arg0: i32, %arg1: memref<512x8xbf16, #tpu.memory_space<vmem>>, %arg2: memref<8x256xbf16, #tpu.memory_space<vmem>>, %arg3: memref<1x256xf32, #tpu.memory_space<vmem>>, %arg4: memref<256x256xbf16, #tpu.memory_space<vmem>>, %arg5: memref<1x256xf32, #tpu.memory_space<vmem>>, %arg6: memref<256x256xbf16, #tpu.memory_space<vmem>>, %arg7: memref<1x256xf32, #tpu.memory_space<vmem>>, %arg8: memref<256x256xbf16, #tpu.memory_space<vmem>>, %arg9: memref<1x256xf32, #tpu.memory_space<vmem>>, %arg10: memref<256x256xbf16, #tpu.memory_space<vmem>>, %arg11: memref<1x256xf32, #tpu.memory_space<vmem>>, %arg12: memref<8x256xbf16, #tpu.memory_space<vmem>>, %arg13: memref<256x256xbf16, #tpu.memory_space<vmem>>, %arg14: memref<1x256xf32, #tpu.memory_space<vmem>>, %arg15: memref<256x256xbf16, #tpu.memory_space<vmem>>, %arg16: memref<1x256xf32, #tpu.memory_space<vmem>>, %arg17: memref<256x256xbf16, #tpu.memory_space<vmem>>, %arg18: memref<1x256xf32, #tpu.memory_space<vmem>>, %arg19: memref<256x128xbf16, #tpu.memory_space<vmem>>, %arg20: memref<1x128xf32, #tpu.memory_space<vmem>>, %arg21: memref<512x128xf32, #tpu.memory_space<vmem>>) attributes {dimension_semantics = [#tpu.dimension_semantics<parallel>], iteration_bounds = array<i64: 2>, scalar_prefetch = 0 : i64, scratch_operands = 0 : i64, tpu.core_type = #tpu.core_type<tc>, window_params = [{transform_indices = @transform_0, window_bounds = array<i64: 512, 8>}, {pipeline_mode = #tpu.pipeline_mode<synchronous>, transform_indices = @transform_1, window_bounds = array<i64: 8, 256>}, {pipeline_mode = #tpu.pipeline_mode<synchronous>, transform_indices = @transform_2, window_bounds = array<i64: 1, 256>}, {pipeline_mode = #tpu.pipeline_mode<synchronous>, transform_indices = @transform_3, window_bounds = array<i64: 256, 256>}, {pipeline_mode = #tpu.pipeline_mode<synchronous>, transform_indices = @transform_4, window_bounds = array<i64: 1, 256>}, {pipeline_mode = #tpu.pipeline_mode<synchronous>, transform_indices = @transform_5, window_bounds = array<i64: 256, 256>}, {pipeline_mode = #tpu.pipeline_mode<synchronous>, transform_indices = @transform_6, window_bounds = array<i64: 1, 256>}, {pipeline_mode = #tpu.pipeline_mode<synchronous>, transform_indices = @transform_7, window_bounds = array<i64: 256, 256>}, {pipeline_mode = #tpu.pipeline_mode<synchronous>, transform_indices = @transform_8, window_bounds = array<i64: 1, 256>}, {pipeline_mode = #tpu.pipeline_mode<synchronous>, transform_indices = @transform_9, window_bounds = array<i64: 256, 256>}, {pipeline_mode = #tpu.pipeline_mode<synchronous>, transform_indices = @transform_10, window_bounds = array<i64: 1, 256>}, {pipeline_mode = #tpu.pipeline_mode<synchronous>, transform_indices = @transform_11, window_bounds = array<i64: 8, 256>}, {pipeline_mode = #tpu.pipeline_mode<synchronous>, transform_indices = @transform_12, window_bounds = array<i64: 256, 256>}, {pipeline_mode = #tpu.pipeline_mode<synchronous>, transform_indices = @transform_13, window_bounds = array<i64: 1, 256>}, {pipeline_mode = #tpu.pipeline_mode<synchronous>, transform_indices = @transform_14, window_bounds = array<i64: 256, 256>}, {pipeline_mode = #tpu.pipeline_mode<synchronous>, transform_indices = @transform_15, window_bounds = array<i64: 1, 256>}, {pipeline_mode = #tpu.pipeline_mode<synchronous>, transform_indices = @transform_16, window_bounds = array<i64: 256, 256>}, {pipeline_mode = #tpu.pipeline_mode<synchronous>, transform_indices = @transform_17, window_bounds = array<i64: 1, 256>}, {pipeline_mode = #tpu.pipeline_mode<synchronous>, transform_indices = @transform_18, window_bounds = array<i64: 256, 128>}, {pipeline_mode = #tpu.pipeline_mode<synchronous>, transform_indices = @transform_19, window_bounds = array<i64: 1, 128>}, {transform_indices = @transform_20, window_bounds = array<i64: 512, 128>}]} {
    %c0 = arith.constant 0 : index
    %c0_0 = arith.constant 0 : index
    %0 = vector.load %arg1[%c0, %c0_0] : memref<512x8xbf16, #tpu.memory_space<vmem>>, vector<512x8xbf16>
    %c0_1 = arith.constant 0 : index
    %c0_2 = arith.constant 0 : index
    %1 = vector.load %arg2[%c0_1, %c0_2] : memref<8x256xbf16, #tpu.memory_space<vmem>>, vector<8x256xbf16>
    %cst = arith.constant dense<0.000000e+00> : vector<512x256xf32>
    %2 = tpu.matmul %0, %1, %cst {dimension_numbers = #tpu.dot_dimension_numbers<[1], [0], [0], [1], [0, 0, 1, 1], [], []>} : vector<512x8xbf16>, vector<8x256xbf16>, vector<512x256xf32> -> vector<512x256xf32>
    %c0_3 = arith.constant 0 : index
    %c0_4 = arith.constant 0 : index
    %3 = vector.load %arg3[%c0_3, %c0_4] : memref<1x256xf32, #tpu.memory_space<vmem>>, vector<1x256xf32>
    %4 = vector.broadcast %3 : vector<1x256xf32> to vector<512x256xf32>
    %5 = arith.addf %2, %4 : vector<512x256xf32>
    %cst_5 = arith.constant 0.000000e+00 : f32
    %6 = vector.broadcast %cst_5 : f32 to vector<512x256xf32>
    %7 = arith.maximumf %5, %6 : vector<512x256xf32>
    %8 = arith.truncf %7 : vector<512x256xf32> to vector<512x256xbf16>
    %c0_6 = arith.constant 0 : index
    %c0_7 = arith.constant 0 : index
    %9 = vector.load %arg4[%c0_6, %c0_7] : memref<256x256xbf16, #tpu.memory_space<vmem>>, vector<256x256xbf16>
    %cst_8 = arith.constant dense<0.000000e+00> : vector<512x256xf32>
    %10 = tpu.matmul %8, %9, %cst_8 {dimension_numbers = #tpu.dot_dimension_numbers<[1], [0], [0], [1], [0, 0, 1, 1], [], []>} : vector<512x256xbf16>, vector<256x256xbf16>, vector<512x256xf32> -> vector<512x256xf32>
    %c0_9 = arith.constant 0 : index
    %c0_10 = arith.constant 0 : index
    %11 = vector.load %arg5[%c0_9, %c0_10] : memref<1x256xf32, #tpu.memory_space<vmem>>, vector<1x256xf32>
    %12 = vector.broadcast %11 : vector<1x256xf32> to vector<512x256xf32>
    %13 = arith.addf %10, %12 : vector<512x256xf32>
    %cst_11 = arith.constant 0.000000e+00 : f32
    %14 = vector.broadcast %cst_11 : f32 to vector<512x256xf32>
    %15 = arith.maximumf %13, %14 : vector<512x256xf32>
    %16 = arith.truncf %15 : vector<512x256xf32> to vector<512x256xbf16>
    %c0_12 = arith.constant 0 : index
    %c0_13 = arith.constant 0 : index
    %17 = vector.load %arg6[%c0_12, %c0_13] : memref<256x256xbf16, #tpu.memory_space<vmem>>, vector<256x256xbf16>
    %cst_14 = arith.constant dense<0.000000e+00> : vector<512x256xf32>
    %18 = tpu.matmul %16, %17, %cst_14 {dimension_numbers = #tpu.dot_dimension_numbers<[1], [0], [0], [1], [0, 0, 1, 1], [], []>} : vector<512x256xbf16>, vector<256x256xbf16>, vector<512x256xf32> -> vector<512x256xf32>
    %c0_15 = arith.constant 0 : index
    %c0_16 = arith.constant 0 : index
    %19 = vector.load %arg7[%c0_15, %c0_16] : memref<1x256xf32, #tpu.memory_space<vmem>>, vector<1x256xf32>
    %20 = vector.broadcast %19 : vector<1x256xf32> to vector<512x256xf32>
    %21 = arith.addf %18, %20 : vector<512x256xf32>
    %cst_17 = arith.constant 0.000000e+00 : f32
    %22 = vector.broadcast %cst_17 : f32 to vector<512x256xf32>
    %23 = arith.maximumf %21, %22 : vector<512x256xf32>
    %24 = arith.truncf %23 : vector<512x256xf32> to vector<512x256xbf16>
    %c0_18 = arith.constant 0 : index
    %c0_19 = arith.constant 0 : index
    %25 = vector.load %arg8[%c0_18, %c0_19] : memref<256x256xbf16, #tpu.memory_space<vmem>>, vector<256x256xbf16>
    %cst_20 = arith.constant dense<0.000000e+00> : vector<512x256xf32>
    %26 = tpu.matmul %24, %25, %cst_20 {dimension_numbers = #tpu.dot_dimension_numbers<[1], [0], [0], [1], [0, 0, 1, 1], [], []>} : vector<512x256xbf16>, vector<256x256xbf16>, vector<512x256xf32> -> vector<512x256xf32>
    %c0_21 = arith.constant 0 : index
    %c0_22 = arith.constant 0 : index
    %27 = vector.load %arg9[%c0_21, %c0_22] : memref<1x256xf32, #tpu.memory_space<vmem>>, vector<1x256xf32>
    %28 = vector.broadcast %27 : vector<1x256xf32> to vector<512x256xf32>
    %29 = arith.addf %26, %28 : vector<512x256xf32>
    %cst_23 = arith.constant 0.000000e+00 : f32
    %30 = vector.broadcast %cst_23 : f32 to vector<512x256xf32>
    %31 = arith.maximumf %29, %30 : vector<512x256xf32>
    %32 = arith.truncf %31 : vector<512x256xf32> to vector<512x256xbf16>
    %c0_24 = arith.constant 0 : index
    %c0_25 = arith.constant 0 : index
    %33 = vector.load %arg10[%c0_24, %c0_25] : memref<256x256xbf16, #tpu.memory_space<vmem>>, vector<256x256xbf16>
    %cst_26 = arith.constant dense<0.000000e+00> : vector<512x256xf32>
    %34 = tpu.matmul %32, %33, %cst_26 {dimension_numbers = #tpu.dot_dimension_numbers<[1], [0], [0], [1], [0, 0, 1, 1], [], []>} : vector<512x256xbf16>, vector<256x256xbf16>, vector<512x256xf32> -> vector<512x256xf32>
    %c0_27 = arith.constant 0 : index
    %c0_28 = arith.constant 0 : index
    %35 = vector.load %arg11[%c0_27, %c0_28] : memref<1x256xf32, #tpu.memory_space<vmem>>, vector<1x256xf32>
    %36 = vector.broadcast %35 : vector<1x256xf32> to vector<512x256xf32>
    %37 = arith.addf %34, %36 : vector<512x256xf32>
    %cst_29 = arith.constant 0.000000e+00 : f32
    %38 = vector.broadcast %cst_29 : f32 to vector<512x256xf32>
    %39 = arith.maximumf %37, %38 : vector<512x256xf32>
    %40 = arith.truncf %39 : vector<512x256xf32> to vector<512x256xbf16>
    %c0_30 = arith.constant 0 : index
    %c0_31 = arith.constant 0 : index
    %41 = vector.load %arg12[%c0_30, %c0_31] : memref<8x256xbf16, #tpu.memory_space<vmem>>, vector<8x256xbf16>
    %cst_32 = arith.constant dense<0.000000e+00> : vector<512x256xf32>
    %42 = tpu.matmul %0, %41, %cst_32 {dimension_numbers = #tpu.dot_dimension_numbers<[1], [0], [0], [1], [0, 0, 1, 1], [], []>} : vector<512x8xbf16>, vector<8x256xbf16>, vector<512x256xf32> -> vector<512x256xf32>
    %c0_33 = arith.constant 0 : index
    %c0_34 = arith.constant 0 : index
    %43 = vector.load %arg13[%c0_33, %c0_34] : memref<256x256xbf16, #tpu.memory_space<vmem>>, vector<256x256xbf16>
    %cst_35 = arith.constant dense<0.000000e+00> : vector<512x256xf32>
    %44 = tpu.matmul %40, %43, %cst_35 {dimension_numbers = #tpu.dot_dimension_numbers<[1], [0], [0], [1], [0, 0, 1, 1], [], []>} : vector<512x256xbf16>, vector<256x256xbf16>, vector<512x256xf32> -> vector<512x256xf32>
    %45 = arith.addf %42, %44 : vector<512x256xf32>
    %c0_36 = arith.constant 0 : index
    %c0_37 = arith.constant 0 : index
    %46 = vector.load %arg14[%c0_36, %c0_37] : memref<1x256xf32, #tpu.memory_space<vmem>>, vector<1x256xf32>
    %47 = vector.broadcast %46 : vector<1x256xf32> to vector<512x256xf32>
    %48 = arith.addf %45, %47 : vector<512x256xf32>
    %cst_38 = arith.constant 0.000000e+00 : f32
    %49 = vector.broadcast %cst_38 : f32 to vector<512x256xf32>
    %50 = arith.maximumf %48, %49 : vector<512x256xf32>
    %51 = arith.truncf %50 : vector<512x256xf32> to vector<512x256xbf16>
    %c0_39 = arith.constant 0 : index
    %c0_40 = arith.constant 0 : index
    %52 = vector.load %arg15[%c0_39, %c0_40] : memref<256x256xbf16, #tpu.memory_space<vmem>>, vector<256x256xbf16>
    %cst_41 = arith.constant dense<0.000000e+00> : vector<512x256xf32>
    %53 = tpu.matmul %51, %52, %cst_41 {dimension_numbers = #tpu.dot_dimension_numbers<[1], [0], [0], [1], [0, 0, 1, 1], [], []>} : vector<512x256xbf16>, vector<256x256xbf16>, vector<512x256xf32> -> vector<512x256xf32>
    %c0_42 = arith.constant 0 : index
    %c0_43 = arith.constant 0 : index
    %54 = vector.load %arg16[%c0_42, %c0_43] : memref<1x256xf32, #tpu.memory_space<vmem>>, vector<1x256xf32>
    %55 = vector.broadcast %54 : vector<1x256xf32> to vector<512x256xf32>
    %56 = arith.addf %53, %55 : vector<512x256xf32>
    %cst_44 = arith.constant 0.000000e+00 : f32
    %57 = vector.broadcast %cst_44 : f32 to vector<512x256xf32>
    %58 = arith.maximumf %56, %57 : vector<512x256xf32>
    %59 = arith.truncf %58 : vector<512x256xf32> to vector<512x256xbf16>
    %c0_45 = arith.constant 0 : index
    %c0_46 = arith.constant 0 : index
    %60 = vector.load %arg17[%c0_45, %c0_46] : memref<256x256xbf16, #tpu.memory_space<vmem>>, vector<256x256xbf16>
    %cst_47 = arith.constant dense<0.000000e+00> : vector<512x256xf32>
    %61 = tpu.matmul %59, %60, %cst_47 {dimension_numbers = #tpu.dot_dimension_numbers<[1], [0], [0], [1], [0, 0, 1, 1], [], []>} : vector<512x256xbf16>, vector<256x256xbf16>, vector<512x256xf32> -> vector<512x256xf32>
    %c0_48 = arith.constant 0 : index
    %c0_49 = arith.constant 0 : index
    %62 = vector.load %arg18[%c0_48, %c0_49] : memref<1x256xf32, #tpu.memory_space<vmem>>, vector<1x256xf32>
    %63 = vector.broadcast %62 : vector<1x256xf32> to vector<512x256xf32>
    %64 = arith.addf %61, %63 : vector<512x256xf32>
    %cst_50 = arith.constant 0.000000e+00 : f32
    %65 = vector.broadcast %cst_50 : f32 to vector<512x256xf32>
    %66 = arith.maximumf %64, %65 : vector<512x256xf32>
    %67 = arith.truncf %66 : vector<512x256xf32> to vector<512x256xbf16>
    %c0_51 = arith.constant 0 : index
    %c0_52 = arith.constant 0 : index
    %68 = vector.load %arg19[%c0_51, %c0_52] : memref<256x128xbf16, #tpu.memory_space<vmem>>, vector<256x128xbf16>
    %cst_53 = arith.constant dense<0.000000e+00> : vector<512x128xf32>
    %69 = tpu.matmul %67, %68, %cst_53 {dimension_numbers = #tpu.dot_dimension_numbers<[1], [0], [0], [1], [0, 0, 1, 1], [], []>} : vector<512x256xbf16>, vector<256x128xbf16>, vector<512x128xf32> -> vector<512x128xf32>
    %c0_54 = arith.constant 0 : index
    %c0_55 = arith.constant 0 : index
    %70 = vector.load %arg20[%c0_54, %c0_55] : memref<1x128xf32, #tpu.memory_space<vmem>>, vector<1x128xf32>
    %71 = vector.broadcast %70 : vector<1x128xf32> to vector<512x128xf32>
    %72 = arith.addf %69, %71 : vector<512x128xf32>
    %c0_56 = arith.constant 0 : index
    %c0_57 = arith.constant 0 : index
    %73 = vector.load %arg21[%c0_56, %c0_57] : memref<512x128xf32, #tpu.memory_space<vmem>>, vector<512x128xf32>
    tpu.vector_store %arg21[%c0_56, %c0_57], %72 {strides = array<i32>} : memref<512x128xf32, #tpu.memory_space<vmem>>, vector<512x128xf32>,
    return
  }
  func.func @transform_0(%arg0: i32) -> (i32, i32) {
    %c0_i32 = arith.constant 0 : i32
    %c0_i32_0 = arith.constant 0 : i32
    return %arg0, %c0_i32 : i32, i32
  }
  func.func @transform_1(%arg0: i32) -> (i32, i32) {
    %c0_i32 = arith.constant 0 : i32
    %c0_i32_0 = arith.constant 0 : i32
    %c0_i32_1 = arith.constant 0 : i32
    return %c0_i32, %c0_i32_0 : i32, i32
  }
  func.func @transform_2(%arg0: i32) -> (i32, i32) {
    %c0_i32 = arith.constant 0 : i32
    %c0_i32_0 = arith.constant 0 : i32
    %c0_i32_1 = arith.constant 0 : i32
    return %c0_i32, %c0_i32_0 : i32, i32
  }
  func.func @transform_3(%arg0: i32) -> (i32, i32) {
    %c0_i32 = arith.constant 0 : i32
    %c0_i32_0 = arith.constant 0 : i32
    %c0_i32_1 = arith.constant 0 : i32
    return %c0_i32, %c0_i32_0 : i32, i32
  }
  func.func @transform_4(%arg0: i32) -> (i32, i32) {
    %c0_i32 = arith.constant 0 : i32
    %c0_i32_0 = arith.constant 0 : i32
    %c0_i32_1 = arith.constant 0 : i32
    return %c0_i32, %c0_i32_0 : i32, i32
  }
  func.func @transform_5(%arg0: i32) -> (i32, i32) {
    %c0_i32 = arith.constant 0 : i32
    %c0_i32_0 = arith.constant 0 : i32
    %c0_i32_1 = arith.constant 0 : i32
    return %c0_i32, %c0_i32_0 : i32, i32
  }
  func.func @transform_6(%arg0: i32) -> (i32, i32) {
    %c0_i32 = arith.constant 0 : i32
    %c0_i32_0 = arith.constant 0 : i32
    %c0_i32_1 = arith.constant 0 : i32
    return %c0_i32, %c0_i32_0 : i32, i32
  }
  func.func @transform_7(%arg0: i32) -> (i32, i32) {
    %c0_i32 = arith.constant 0 : i32
    %c0_i32_0 = arith.constant 0 : i32
    %c0_i32_1 = arith.constant 0 : i32
    return %c0_i32, %c0_i32_0 : i32, i32
  }
  func.func @transform_8(%arg0: i32) -> (i32, i32) {
    %c0_i32 = arith.constant 0 : i32
    %c0_i32_0 = arith.constant 0 : i32
    %c0_i32_1 = arith.constant 0 : i32
    return %c0_i32, %c0_i32_0 : i32, i32
  }
  func.func @transform_9(%arg0: i32) -> (i32, i32) {
    %c0_i32 = arith.constant 0 : i32
    %c0_i32_0 = arith.constant 0 : i32
    %c0_i32_1 = arith.constant 0 : i32
    return %c0_i32, %c0_i32_0 : i32, i32
  }
  func.func @transform_10(%arg0: i32) -> (i32, i32) {
    %c0_i32 = arith.constant 0 : i32
    %c0_i32_0 = arith.constant 0 : i32
    %c0_i32_1 = arith.constant 0 : i32
    return %c0_i32, %c0_i32_0 : i32, i32
  }
  func.func @transform_11(%arg0: i32) -> (i32, i32) {
    %c0_i32 = arith.constant 0 : i32
    %c0_i32_0 = arith.constant 0 : i32
    %c0_i32_1 = arith.constant 0 : i32
    return %c0_i32, %c0_i32_0 : i32, i32
  }
  func.func @transform_12(%arg0: i32) -> (i32, i32) {
    %c0_i32 = arith.constant 0 : i32
    %c0_i32_0 = arith.constant 0 : i32
    %c0_i32_1 = arith.constant 0 : i32
    return %c0_i32, %c0_i32_0 : i32, i32
  }
  func.func @transform_13(%arg0: i32) -> (i32, i32) {
    %c0_i32 = arith.constant 0 : i32
    %c0_i32_0 = arith.constant 0 : i32
    %c0_i32_1 = arith.constant 0 : i32
    return %c0_i32, %c0_i32_0 : i32, i32
  }
  func.func @transform_14(%arg0: i32) -> (i32, i32) {
    %c0_i32 = arith.constant 0 : i32
    %c0_i32_0 = arith.constant 0 : i32
    %c0_i32_1 = arith.constant 0 : i32
    return %c0_i32, %c0_i32_0 : i32, i32
  }
  func.func @transform_15(%arg0: i32) -> (i32, i32) {
    %c0_i32 = arith.constant 0 : i32
    %c0_i32_0 = arith.constant 0 : i32
    %c0_i32_1 = arith.constant 0 : i32
    return %c0_i32, %c0_i32_0 : i32, i32
  }
  func.func @transform_16(%arg0: i32) -> (i32, i32) {
    %c0_i32 = arith.constant 0 : i32
    %c0_i32_0 = arith.constant 0 : i32
    %c0_i32_1 = arith.constant 0 : i32
    return %c0_i32, %c0_i32_0 : i32, i32
  }
  func.func @transform_17(%arg0: i32) -> (i32, i32) {
    %c0_i32 = arith.constant 0 : i32
    %c0_i32_0 = arith.constant 0 : i32
    %c0_i32_1 = arith.constant 0 : i32
    return %c0_i32, %c0_i32_0 : i32, i32
  }
  func.func @transform_18(%arg0: i32) -> (i32, i32) {
    %c0_i32 = arith.constant 0 : i32
    %c0_i32_0 = arith.constant 0 : i32
    %c0_i32_1 = arith.constant 0 : i32
    return %c0_i32, %c0_i32_0 : i32, i32
  }
  func.func @transform_19(%arg0: i32) -> (i32, i32) {
    %c0_i32 = arith.constant 0 : i32
    %c0_i32_0 = arith.constant 0 : i32
    %c0_i32_1 = arith.constant 0 : i32
    return %c0_i32, %c0_i32_0 : i32, i32
  }
  func.func @transform_20(%arg0: i32) -> (i32, i32) {
    %c0_i32 = arith.constant 0 : i32
    %c0_i32_0 = arith.constant 0 : i32
    return %arg0, %c0_i32 : i32, i32
  }
}

</mosaic_0001>

<bundles_post_ra>
// kernel: nerf_forward.1
= control target key start
LH: loop header
LB: loop body
LE: loop exit
PB: predicated region body
PF: predicated region fallthrough
CT: control target
= control target key end

     0   :  { %s11462_s0 = inlined_call_operand.vmem [shape: bf16[1024,8], index: 0, kind: input, shape index: {}]   ;;  %s11463_s1 = inlined_call_operand.vmem [shape: bf16[8,256], index: 1, kind: input, shape index: {}]   ;;  %s11464_s2 = inlined_call_operand.vmem [shape: f32[1,256], index: 2, kind: input, shape index: {}]   ;;  %s11465_s3 = inlined_call_operand.vmem [shape: bf16[256,256], index: 3, kind: input, shape index: {}]   ;;  %s11466_s4 = inlined_call_operand.vmem [shape: f32[1,256], index: 4, kind: input, shape index: {}]   ;;  %s11467_s5 = inlined_call_operand.vmem [shape: bf16[256,256], index: 5, kind: input, shape index: {}]   ;;  %s11468_s6 = inlined_call_operand.vmem [shape: f32[1,256], index: 6, kind: input, shape index: {}]   ;;  %s11469_s7 = inlined_call_operand.vmem [shape: bf16[256,256], index: 7, kind: input, shape index: {}]   ;;  %s11470_s8 = inlined_call_operand.vmem [shape: f32[1,256], index: 8, kind: input, shape index: {}]   ;;  %s11471_s9 = inlined_call_operand.vmem [shape: bf16[256,256], index: 9, kind: input, shape index: {}]   ;;  %s11472_s10 = inlined_call_operand.vmem [shape: f32[1,256], index: 10, kind: input, shape index: {}]   ;;  %s11473_s11 = inlined_call_operand.vmem [shape: bf16[8,256], index: 11, kind: input, shape index: {}]   ;;  %s11474_s12 = inlined_call_operand.vmem [shape: bf16[256,256], index: 12, kind: input, shape index: {}]   ;;  %s11475_s13 = inlined_call_operand.vmem [shape: f32[1,256], index: 13, kind: input, shape index: {}]   ;;  %s11476_s14 = inlined_call_operand.vmem [shape: bf16[256,256], index: 14, kind: input, shape index: {}]   ;;  %s11477_s15 = inlined_call_operand.vmem [shape: f32[1,256], index: 15, kind: input, shape index: {}]   ;;  %s11478_s16 = inlined_call_operand.hbm [shape: bf16[256,256], index: 16, kind: input, shape index: {}]   ;;  %s11479_s17 = inlined_call_operand.vmem [shape: f32[1,256], index: 17, kind: input, shape index: {}]   ;;  %s11480_s18 = inlined_call_operand.hbm [shape: bf16[256,128], index: 18, kind: input, shape index: {}]   ;;  %s11481_s19 = inlined_call_operand.vmem [shape: f32[1,128], index: 19, kind: input, shape index: {}]   ;;  %s11482_s20 = inlined_call_operand.vmem [shape: f32[1024,128], index: 20, kind: output, shape index: {}]  }
   0x1   :  { %11485 = sst [smem:[#allocation8_spill]] %s11462_s0 }
   0x2   :  { %11486 = sst [smem:[#allocation9_spill]] %s11463_s1 }
   0x3   :  { %11487 = sst [smem:[#allocation10_spill]] %s11464_s2 }
   0x4   :  { %11488 = sst [smem:[#allocation11_spill]] %s11465_s3 }
   0x5   :  { %11489 = sst [smem:[#allocation12_spill]] %s11466_s4 }
   0x6   :  { %25 = vsyncpa [#allocation3], 0 }
   0x7   :  { %26 = vsyncpa [#allocation5], 0  ;;  %s8881_s1 = smov 0  }
   0x8 LB: > { %s8769_s22 = smov [#allocation2]   ;;  %s11484_s24 = sadd.s32 4294967295, %s8767_s1   ;;  %s8767_s1 = sphi %s8881_s1, %s32_s1  }
   0x9   : > { %s545_s23 = sshll.u32 %s8769_s22, 4  ;;  %p7859_p0 = scmp.ge.s32.totalorder %s8767_s1, 1  ;;  %s546_s23 = int_to_ptr.vmem [resolvable:$true] %s545_s23 }
   0xa   : > { %p488_p1 = scmp.lt.s32.totalorder %s8767_s1, 3  ;;  %p8895_p3 = scmp.eq.s32.totalorder %s11484_s24, 0 }
   0xb   : > { %s8770_s3 = smov [#allocation4]   ;;  %s8712_s28 = scalar_lea.vmem %s546_s23, 4096 }
   0xc   : > { %p8889_p2 = pnand %p7859_p0, %p488_p1  ;;  %s561_s26 = sshll.u32 %s8770_s3, 4  ;;  %s562_s26 = int_to_ptr.vmem [resolvable:$true] %s561_s26 }
   0xd   : > { %p8713_p7 = scmp.ne.s32.totalorder %s546_s23, %s8712_s28  ;;  %p8720_p10 = scmp.lt.s32.totalorder %s546_s23, %s546_s23 }
   0xe   : > { %p8255_p4 = pneg %p8889_p2  ;;  %p8721_p11 = scmp.lt.s32.totalorder %s8712_s28, %s8712_s28 }
  0x10   : > { %p8903_p5 = pnand %p8895_p3, %p8255_p4  ;;  %p8722_p12 = por %p8721_p11, %p8720_p10 }
  0x12   : > { %p8703_p6 = pneg %p8903_p5 }
  0x14   : > { %p8715_p8 = pnand %p8713_p7, %p8703_p6 }
  0x16   : > { %p8716_p9 = pneg %p8715_p8 }
  0x18   : > { %p8723_p13 = pnand %p8722_p12, %p8716_p9 }
  0x1a   : > { %8726 = shalt.err (!%p8723_p13)
}
  0x1b   : > { %s8771_s4 = smov 128   ;;  %s8772_s29 = smov 8  }
  0x1c   : > { %8258 = dma.hbm_to_vmem [thread:$0]  (!%p8903_p5), %s11478_s16, 4096, %s546_s23, [#allocation3], %s8771_s4, %s8771_s4, %s8772_s29  }
  0x1d   : > { %s8738_s21 = scalar_lea.vmem %s562_s26, 2048  ;;  %p8746_p7 = scmp.lt.s32.totalorder %s562_s26, %s562_s26 }
  0x1e   : > { %p8739_p0 = scmp.ne.s32.totalorder %s562_s26, %s8738_s21  ;;  %p8747_p8 = scmp.lt.s32.totalorder %s8738_s21, %s8738_s21 }
  0x20   : > { %p8741_p1 = pnand %p8739_p0, %p8703_p6  ;;  %p8748_p10 = por %p8747_p8, %p8746_p7 }
  0x22   : > { %p8742_p4 = pneg %p8741_p1 }
  0x24   : > { %p8749_p9 = pnand %p8748_p10, %p8742_p4 }
  0x26   : > { %8752 = shalt.err (!%p8749_p9)
}
  0x27   : > { %s8773_s22 = smov 64   ;;  %s8774_s3 = smov 4  }
  0x28   : > { %8261 = dma.hbm_to_vmem [thread:$0]  (!%p8903_p5), %s11480_s18, 2048, %s562_s26, [#allocation5], %s8773_s22, %s8773_s22, %s8774_s3  }
  0x29   : > { %589 = sbr.rel (%p8889_p2) target bundleno = 2235 (0x8bb), region = 100 }
  0x2e   : > { %8758 = dma.done.wait (%p8895_p3), [#allocation3], 4096  }
  0x2f   : > { %8760 = vsyncadd (%p8895_p3), [#allocation3], 4294963200 }
  0x30   : > { %8762 = dma.done.wait (%p8895_p3), [#allocation5], 2048  }
  0x31   : > { %8764 = vsyncadd (%p8895_p3), [#allocation5], 4294965248  ;;  %s11493_s23 = sadd.s32 4294967295, %s8767_s1   ;;  %v8775_v0 = vmov 0   ;;  %s11494_s4 = sld [smem:[#allocation8_spill]]  ;;  %vm1003_vm0 = vcmask 1043456  }
  0x32   : > { %s7866_s27 = sshll.u32 %s11493_s23, 6  ;;  %1042 = vmatprep.mubr.bf16.mxu0 %v8775_v0  ;;  %s11495_s25 = sld [smem:[#allocation9_spill]]  ;;  %vm906_vm1 = vcmask 64512   ;;  %v8315_v17 = vld [vmem:[%s11467_s5 + $0x70] ss:$8 sps:$4 sm:$0xff]  }
  0x33   : > { %p652_p5 = scmp.lt.s32.totalorder %s7866_s27, 127  ;;  %s11496_s3 = sld [smem:[#allocation11_spill]]  ;;  %v8317_v18 = vld [vmem:[%s11467_s5 + $0x74] ss:$8 sps:$4 sm:$0xff]   ;;  %v8332_v29 = vld [vmem:[%s11467_s5 + $0x60] ss:$8 sps:$4 sm:$0xff]  }
  0x34   : > { %v8334_v30 = vld [vmem:[%s11467_s5 + $0x64] ss:$8 sps:$4 sm:$0xff]   ;;  %v8349_v41 = vld [vmem:[%s11467_s5 + $0x50] ss:$8 sps:$4 sm:$0xff]   ;;  %v8351_v42 = vld [vmem:[%s11467_s5 + $0x54] ss:$8 sps:$4 sm:$0xff]  }
  0x35   : > { %s11500_s27 = smov (!%p652_p5, %s7866_s27), 127  ;;  %v8366_v54 = vld [vmem:[%s11467_s5 + $0x40] ss:$8 sps:$4 sm:$0xff]   ;;  %v8368_v55 = vld [vmem:[%s11467_s5 + $0x44] ss:$8 sps:$4 sm:$0xff]   ;;  %s11497_s21 = sld [smem:[#allocation10_spill]] }
  0x36   : > { %s7867_s24 = sshll.u32 %s11500_s27, 2  ;;  %v8371_v58 = vld [vmem:[%s11467_s5 + $0x30] ss:$8 sps:$4 sm:$0xff]   ;;  %v8373_v59 = vld [vmem:[%s11467_s5 + $0x34] ss:$8 sps:$4 sm:$0xff]   ;;  %s11498_s22 = sld [smem:[#allocation12_spill]] }
  0x37   : > { %s8944_s29 = scalar_lea.vmem %s11494_s4, %s7867_s24  ;;  %v8376_v62 = vld [vmem:[%s11467_s5 + $0x20] ss:$8 sps:$4 sm:$0xff]   ;;  %v8378_v63 = vld [vmem:[%s11467_s5 + $0x24] ss:$8 sps:$4 sm:$0xff]   ;;  %s7869_s4 = sshll.u32 %s11500_s27, 3 }
  0x38   : > { %v728_v1 = vld [vmem:[%s11495_s25] sm:$0xff]  ;;  %v8284_v6 = vld [vmem:[%s8944_s29 + $0x8] sm:$0xff]   ;;  %v8285_v7 = vld [vmem:[%s8944_s29 + $0x10] sm:$0xff]   ;;  %s11305_s27 = scalar_lea.vmem %s11482_s20, %s7869_s4 }
  0x39   : > { %v7903_v2 = vcombine.high %v728_v1, %v728_v1  ;;  %v7902_v3 = vcombine.low %v728_v1, %v728_v1  ;;  %v8283_v5 = vld [vmem:[%s8944_s29] sm:$0xff]   ;;  %v8301_v8 = vld [vmem:[%s11496_s3 + $0x74] ss:$8 sps:$4 sm:$0xff]   ;;  %v8303_v9 = vld [vmem:[%s11496_s3 + $0x70] ss:$8 sps:$4 sm:$0xff]  }
  0x3a   : > { %1759 = vmatprep.subr.bf16.mxu1 %v8301_v8  ;;  %v8305_v10 = vld [vmem:[%s11496_s3 + $0x64] ss:$8 sps:$4 sm:$0xff]   ;;  %v8307_v11 = vld [vmem:[%s11496_s3 + $0x60] ss:$8 sps:$4 sm:$0xff]   ;;  %v8308_v12 = vld [vmem:[%s11496_s3 + $0x54] ss:$8 sps:$4 sm:$0xff]  }
  0x3b   : > { %7904 = vmatprep.subr.msk.bf16.mxu0 %vm1003_vm0, %v7903_v2  ;;  %v1005_v4 = vsel %vm1003_vm0, %v7902_v3, 0  ;;  %1760 = vmatpush1.bf16.msra.mxu1 %v8303_v9  ;;  %v8310_v13 = vld [vmem:[%s11496_s3 + $0x50] ss:$8 sps:$4 sm:$0xff]   ;;  %v8312_v15 = vld [vmem:[%s11496_s3 + $0x44] ss:$8 sps:$4 sm:$0xff]  }
  0x3c   : > { %1025 = vmatpush1.bf16.msra.mxu0 %v1005_v4  ;;  %v8286_v14 = vld [vmem:[%s8944_s29 + $0x18] sm:$0xff]   ;;  %1761 = vmatprep.subr.bf16.mxu1 %v8305_v10  ;;  %v8314_v16 = vld [vmem:[%s11496_s3 + $0x40] ss:$8 sps:$4 sm:$0xff]   ;;  %v8322_v22 = vld [vmem:[%s11496_s3 + $0x24] ss:$8 sps:$4 sm:$0xff]  }
  0x3d   : > { %v8318_v19 = vld [vmem:[%s11496_s3 + $0x34] ss:$8 sps:$4 sm:$0xff]   ;;  %v8287_v20 = vld [vmem:[%s8944_s29 + $0x20] sm:$0xff]   ;;  %v8320_v21 = vld [vmem:[%s11496_s3 + $0x30] ss:$8 sps:$4 sm:$0xff]   ;;  %2508 = vmatprep.subr.bf16.mxu0 %v8317_v18  ;;  %v731_v18 = vlaneseq }
  0x3e   : > { %v8324_v23 = vld [vmem:[%s11496_s3 + $0x20] ss:$8 sps:$4 sm:$0xff]   ;;  %v8325_v24 = vld [vmem:[%s11496_s3 + $0x14] ss:$8 sps:$4 sm:$0xff]   ;;  %v8327_v25 = vld [vmem:[%s11496_s3 + $0x10] ss:$8 sps:$4 sm:$0xff]  }
  0x3f   : > { %7905 = vmatmul.mubr.msk.bf16.vlgmr.msra.gmra.mxu0 %vm906_vm1, %v8283_v5  ;;  %1762 = vmatpush1.bf16.msra.mxu1 %v8307_v11  ;;  %v8288_v26 = vld [vmem:[%s8944_s29 + $0x28] sm:$0xff]   ;;  %v8335_v31 = vld [vmem:[%s11496_s3 + $0xf4] ss:$8 sps:$4 sm:$0xff]   ;;  %v8337_v33 = vld [vmem:[%s11496_s3 + $0xf0] ss:$8 sps:$4 sm:$0xff]  }
  0x40   : > { %1052 = vmatprep.mubr.bf16.mxu0 %v8775_v0  ;;  %1763 = vmatprep.subr.bf16.mxu1 %v8308_v12  ;;  %v8329_v27 = vld [vmem:[%s11496_s3 + $0x4] ss:$8 sps:$4 sm:$0xff]   ;;  %v8331_v28 = vld [vmem:[%s11496_s3] ss:$8 sps:$4 sm:$0xff]   ;;  %v8289_v32 = vld [vmem:[%s8944_s29 + $0x30] sm:$0xff]  }
  0x41   : > { %2509 = vmatpush1.bf16.msra.mxu0 %v8315_v17  ;;  %v8339_v34 = vld [vmem:[%s11496_s3 + $0xe4] ss:$8 sps:$4 sm:$0xff]   ;;  %v8341_v35 = vld [vmem:[%s11496_s3 + $0xe0] ss:$8 sps:$4 sm:$0xff]   ;;  %v8342_v36 = vld [vmem:[%s11496_s3 + $0xd4] ss:$8 sps:$4 sm:$0xff]  }
  0x42   : > { %2510 = vmatprep.subr.bf16.mxu0 %v8334_v30  ;;  %v8344_v37 = vld [vmem:[%s11496_s3 + $0xd0] ss:$8 sps:$4 sm:$0xff]   ;;  %v8346_v39 = vld [vmem:[%s11496_s3 + $0xc4] ss:$8 sps:$4 sm:$0xff]   ;;  %v8348_v40 = vld [vmem:[%s11496_s3 + $0xc0] ss:$8 sps:$4 sm:$0xff]  }
  0x43   : > { %1764 = vmatpush1.bf16.msra.mxu1 %v8310_v13  ;;  %v8290_v38 = vld [vmem:[%s8944_s29 + $0x38] sm:$0xff]   ;;  %v8291_v44 = vld [vmem:[%s8944_s29 + $0x40] sm:$0xff]   ;;  %v8292_v48 = vld [vmem:[%s8944_s29 + $0x48] sm:$0xff]  }
  0x44   : > { %1765 = vmatprep.subr.bf16.mxu1 %v8312_v15  ;;  %v8352_v43 = vld [vmem:[%s11496_s3 + $0xb4] ss:$8 sps:$4 sm:$0xff]   ;;  %v8354_v45 = vld [vmem:[%s11496_s3 + $0xb0] ss:$8 sps:$4 sm:$0xff]   ;;  %v8356_v46 = vld [vmem:[%s11496_s3 + $0xa4] ss:$8 sps:$4 sm:$0xff]  }
  0x45   : > { %2511 = vmatpush1.bf16.msra.mxu0 %v8332_v29  ;;  %v8358_v47 = vld [vmem:[%s11496_s3 + $0xa0] ss:$8 sps:$4 sm:$0xff]   ;;  %v8359_v49 = vld [vmem:[%s11496_s3 + $0x94] ss:$8 sps:$4 sm:$0xff]   ;;  %v8361_v50 = vld [vmem:[%s11496_s3 + $0x90] ss:$8 sps:$4 sm:$0xff]  }
  0x46   : > { %2512 = vmatprep.subr.bf16.mxu0 %v8351_v42  ;;  %v8363_v51 = vld [vmem:[%s11496_s3 + $0x84] ss:$8 sps:$4 sm:$0xff]   ;;  %v8365_v52 = vld [vmem:[%s11496_s3 + $0x80] ss:$8 sps:$4 sm:$0xff]   ;;  %v8293_v53 = vld [vmem:[%s8944_s29 + $0x50] sm:$0xff]  }
  0x47   : > { %7906 = vmatmul.mubr.msk.bf16.gmra.mxu0 %vm906_vm1, %v8284_v6  ;;  %1766 = vmatpush1.bf16.msra.mxu1 %v8314_v16  ;;  %v8294_v56 = vld [vmem:[%s8944_s29 + $0x58] sm:$0xff]   ;;  %v8295_v57 = vld [vmem:[%s8944_s29 + $0x60] sm:$0xff]   ;;  %v8296_v60 = vld [vmem:[%s8944_s29 + $0x68] sm:$0xff]  }
  0x48   : > { %1062 = vmatprep.mubr.bf16.mxu0 %v8775_v0  ;;  %1767 = vmatprep.subr.bf16.mxu1 %v8318_v19  ;;  %v8297_v61 = vld [vmem:[%s8944_s29 + $0x70] sm:$0xff]   ;;  %v8298_v1 = vld [vmem:[%s8944_s29 + $0x78] sm:$0xff]   ;;  %v8299_v2 = vld [vmem:[%s8944_s29 + $0x80] sm:$0xff]   ;;  %v732_v19 = vshrl.u32 %v731_v18, 7 }
  0x49   : > { %2513 = vmatpush1.bf16.msra.mxu0 %v8349_v41  ;;  %v8381_v3 = vld [vmem:[%s11467_s5 + $0x10] ss:$8 sps:$4 sm:$0xff]   ;;  %v8383_v4 = vld [vmem:[%s11467_s5 + $0x14] ss:$8 sps:$4 sm:$0xff]   ;;  %v8300_v5 = vld [vmem:[%s8944_s29 + $0x88] sm:$0xff]  }
  0x4a   : > { %2514 = vmatprep.subr.bf16.mxu0 %v8368_v55  ;;  %v8304_v6 = vld [vmem:[%s8944_s29 + $0x90] sm:$0xff]   ;;  %v8386_v8 = vld [vmem:[%s11467_s5 + $0x4] ss:$8 sps:$4 sm:$0xff]   ;;  %v8311_v9 = vld [vmem:[%s8944_s29 + $0x98] sm:$0xff]  }
  0x4b   : > { %1768 = vmatpush1.bf16.msra.mxu1 %v8320_v21  ;;  %v8321_v10 = vld [vmem:[%s8944_s29 + $0xa0] sm:$0xff]   ;;  %v8387_v11 = vld [vmem:[%s11467_s5 + $0xf0] ss:$8 sps:$4 sm:$0xff]   ;;  %v8389_v12 = vld [vmem:[%s11467_s5 + $0xf4] ss:$8 sps:$4 sm:$0xff]   ;;  %v9180_v21 = vsub.s32 1, %v732_v19 }
  0x4c   : > { %1769 = vmatprep.subr.bf16.mxu1 %v8322_v22  ;;  %v8328_v13 = vld [vmem:[%s8944_s29 + $0xa8] sm:$0xff]   ;;  %v8345_v17 = vld [vmem:[%s8944_s29 + $0xb8] sm:$0xff]  }
  0x4d   : > { %2515 = vmatpush1.bf16.msra.mxu0 %v8366_v54  ;;  %v8390_v15 = vld [vmem:[%s11467_s5 + $0xe0] ss:$8 sps:$4 sm:$0xff]   ;;  %v8392_v16 = vld [vmem:[%s11467_s5 + $0xe4] ss:$8 sps:$4 sm:$0xff]   ;;  %v8393_v22 = vld [vmem:[%s11467_s5 + $0xd0] ss:$8 sps:$4 sm:$0xff]  }
  0x4e   : > { %2516 = vmatprep.subr.bf16.mxu0 %v8373_v59  ;;  %v8399_v18 = vld [vmem:[%s11467_s5 + $0xb0] ss:$8 sps:$4 sm:$0xff]  }
  0x4f   : > { %7907 = vmatmul.mubr.msk.bf16.gmra.mxu0 %vm906_vm1, %v8285_v7  ;;  %1770 = vmatpush1.bf16.msra.mxu1 %v8324_v23  ;;  %v8384_v7 = vld [vmem:[%s11467_s5] ss:$8 sps:$4 sm:$0xff]   ;;  %v8395_v23 = vld [vmem:[%s11467_s5 + $0xd4] ss:$8 sps:$4 sm:$0xff]  }
  0x50   : > { %1072 = vmatprep.mubr.bf16.mxu0 %v8775_v0  ;;  %1771 = vmatprep.subr.bf16.mxu1 %v8325_v24  ;;  %v9188_v24 = vsub.s32 0, %v732_v19  ;;  %v8401_v19 = vld [vmem:[%s11467_s5 + $0xb4] ss:$8 sps:$4 sm:$0xff]  }
  0x51   : > { %2517 = vmatpush1.bf16.msra.mxu0 %v8371_v58 }
  0x52   : > { %2518 = vmatprep.subr.bf16.mxu0 %v8378_v63  ;;  %v8370_v63 = vld [vmem:[%s8944_s29 + $0xd8] sm:$0xff]  }
  0x53   : > { %1772 = vmatpush1.bf16.msra.mxu1 %v8327_v25  ;;  %v729_v25 = vld [vmem:[%s11497_s21] sm:$0x3] }
  0x54   : > { %1773 = vmatprep.subr.bf16.mxu1 %v8329_v27  ;;  %v9195_v27 = vrot.slane %v729_v25, %v9180_v21 }
  0x55   : > { %2519 = vmatpush1.bf16.msra.mxu0 %v8376_v62 }
  0x56   : > { %2520 = vmatprep.subr.bf16.mxu0 %v8383_v4 }
  0x57   : > { %7908 = vmatmul.mubr.msk.bf16.gmra.mxu0 %vm906_vm1, %v8286_v14  ;;  %1774 = vmatpush1.bf16.msra.mxu1 %v8331_v28  ;;  %v8338_v14 = vld [vmem:[%s8944_s29 + $0xb0] sm:$0xff]   ;;  %v9199_v28 = vrot.slane %v729_v25, %v9188_v24 }
  0x58   : > { %1082 = vmatprep.mubr.bf16.mxu0 %v8775_v0  ;;  %1775 = vmatprep.subr.bf16.mxu1 %v8335_v31  ;;  %v8362_v31 = vld [vmem:[%s8944_s29 + $0xc8] sm:$0xff]  }
  0x59   : > { %2521 = vmatpush1.bf16.msra.mxu0 %v8381_v3 }
  0x5a   : > { %2522 = vmatprep.subr.bf16.mxu0 %v8386_v8 }
  0x5b   : > { %1776 = vmatpush2.bf16.msra.mxu1 %v8337_v33 }
  0x5c   : > { %1777 = vmatprep.subr.bf16.mxu1 %v8339_v34 }
  0x5d   : > { %2523 = vmatpush1.bf16.msra.mxu0 %v8384_v7 }
  0x5e   : > { %2524 = vmatprep.subr.bf16.mxu0 %v8389_v12 }
  0x5f   : > { %7909 = vmatmul.mubr.msk.bf16.gmra.mxu0 %vm906_vm1, %v8287_v20  ;;  %1778 = vmatpush2.bf16.msra.mxu1 %v8341_v35  ;;  %v8355_v20 = vld [vmem:[%s8944_s29 + $0xc0] sm:$0xff]  }
  0x60   : > { %1092 = vmatprep.mubr.bf16.mxu0 %v8775_v0  ;;  %1779 = vmatprep.subr.bf16.mxu1 %v8342_v36 }
  0x61   : > { %2525 = vmatpush2.bf16.msra.mxu0 %v8387_v11 }
  0x62   : > { %2526 = vmatprep.subr.bf16.mxu0 %v8392_v16 }
  0x63   : > { %1780 = vmatpush2.bf16.msra.mxu1 %v8344_v37 }
  0x64   : > { %1781 = vmatprep.subr.bf16.mxu1 %v8346_v39 }
  0x65   : > { %2527 = vmatpush2.bf16.msra.mxu0 %v8390_v15  ;;  %v8374_v15 = vld [vmem:[%s8944_s29 + $0xe0] sm:$0xff]  }
  0x66   : > { %2528 = vmatprep.subr.bf16.mxu0 %v8395_v23 }
  0x67   : > { %7910 = vmatmul.mubr.msk.bf16.gmra.mxu0 %vm906_vm1, %v8288_v26  ;;  %1782 = vmatpush2.bf16.msra.mxu1 %v8348_v40 }
  0x68   : > { %1102 = vmatprep.mubr.bf16.mxu0 %v8775_v0  ;;  %1783 = vmatprep.subr.bf16.mxu1 %v8352_v43 }
  0x69   : > { %2529 = vmatpush2.bf16.msra.mxu0 %v8393_v22 }
  0x6b   : > { %1784 = vmatpush2.bf16.msra.mxu1 %v8354_v45 }
  0x6c   : > { %1785 = vmatprep.subr.bf16.mxu1 %v8356_v46  ;;  %v8369_v46 = vld [vmem:[%s8944_s29 + $0xd0] sm:$0xff]  }
  0x6f   : > { %7911 = vmatmul.mubr.msk.bf16.gmra.mxu0 %vm906_vm1, %v8289_v32  ;;  %1786 = vmatpush2.bf16.msra.mxu1 %v8358_v47 }
  0x70   : > { %1112 = vmatprep.mubr.bf16.mxu0 %v8775_v0  ;;  %1787 = vmatprep.subr.bf16.mxu1 %v8359_v49  ;;  %v8396_v49 = vld [vmem:[%s11467_s5 + $0xc0] ss:$8 sps:$4 sm:$0xff]  }
  0x73   : > { %1788 = vmatpush2.bf16.msra.mxu1 %v8361_v50  ;;  %v8398_v50 = vld [vmem:[%s11467_s5 + $0xc4] ss:$8 sps:$4 sm:$0xff]  }
  0x74   : > { %1789 = vmatprep.subr.bf16.mxu1 %v8363_v51  ;;  %2530 = vmatprep.subr.bf16.mxu0 %v8398_v50  ;;  %v8404_v50 = vld [vmem:[%s11469_s7 + $0x74] ss:$8 sps:$4 sm:$0xff]  }
  0x75   : > { %2531 = vmatpush2.bf16.msra.mxu0 %v8396_v49  ;;  %v8402_v49 = vld [vmem:[%s11469_s7 + $0x70] ss:$8 sps:$4 sm:$0xff]  }
  0x76   : > { %2532 = vmatprep.subr.bf16.mxu0 %v8401_v19 }
  0x77   : > { %7912 = vmatmul.mubr.msk.bf16.gmra.mxu0 %vm906_vm1, %v8290_v38  ;;  %1790 = vmatpush2.bf16.msra.mxu1 %v8365_v52 }
  0x78   : > { %1122 = vmatprep.mubr.bf16.mxu0 %v8775_v0  ;;  %3257 = vmatprep.subr.bf16.mxu1 %v8404_v50 }
  0x79   : > { %2533 = vmatpush2.bf16.msra.mxu0 %v8399_v18 }
  0x7f   : > { %7913 = vmatmul.mubr.msk.bf16.gmra.mxu0 %vm906_vm1, %v8291_v44 }
  0x80   : > { %1132 = vmatprep.mubr.bf16.mxu0 %v8775_v0 }
  0x87   : > { %7914 = vmatmul.mubr.msk.bf16.gmra.mxu0 %vm906_vm1, %v8292_v48 }
  0x88   : > { %1142 = vmatprep.mubr.bf16.mxu0 %v8775_v0 }
  0x8f   : > { %7915 = vmatmul.mubr.msk.bf16.gmra.mxu0 %vm906_vm1, %v8293_v53 }
  0x90   : > { %1152 = vmatprep.mubr.bf16.mxu0 %v8775_v0 }
  0x97   : > { %7916 = vmatmul.mubr.msk.bf16.gmra.mxu0 %vm906_vm1, %v8294_v56 }
  0x98   : > { %1162 = vmatprep.mubr.bf16.mxu0 %v8775_v0 }
  0x9f   : > { %7917 = vmatmul.mubr.msk.bf16.gmra.mxu0 %vm906_vm1, %v8295_v57 }
  0xa0   : > { %1172 = vmatprep.mubr.bf16.mxu0 %v8775_v0 }
  0xa7   : > { %7918 = vmatmul.mubr.msk.bf16.gmra.mxu0 %vm906_vm1, %v8296_v60 }
  0xa8   : > { %1182 = vmatprep.mubr.bf16.mxu0 %v8775_v0 }
  0xaf   : > { %7919 = vmatmul.mubr.msk.bf16.gmra.mxu0 %vm906_vm1, %v8297_v61 }
  0xb0   : > { %1192 = vmatprep.mubr.bf16.mxu0 %v8775_v0 }
  0xb7   : > { %7920 = vmatmul.mubr.msk.bf16.gmra.mxu0 %vm906_vm1, %v8298_v1 }
  0xb8   : > { %1202 = vmatprep.mubr.bf16.mxu0 %v8775_v0 }
  0xbf   : > { %7921 = vmatmul.mubr.msk.bf16.gmra.mxu0 %vm906_vm1, %v8299_v2 }
  0xc0   : > { %1212 = vmatprep.mubr.bf16.mxu0 %v8775_v0 }
  0xc7   : > { %7922 = vmatmul.mubr.msk.bf16.gmra.mxu0 %vm906_vm1, %v8300_v5 }
  0xc8   : > { %1222 = vmatprep.mubr.bf16.mxu0 %v8775_v0 }
  0xcf   : > { %7923 = vmatmul.mubr.msk.bf16.gmra.mxu0 %vm906_vm1, %v8304_v6 }
  0xd0   : > { %1232 = vmatprep.mubr.bf16.mxu0 %v8775_v0 }
  0xd7   : > { %7924 = vmatmul.mubr.msk.bf16.gmra.mxu0 %vm906_vm1, %v8311_v9 }
  0xd8   : > { %1242 = vmatprep.mubr.bf16.mxu0 %v8775_v0 }
  0xdf   : > { %7925 = vmatmul.mubr.msk.bf16.gmra.mxu0 %vm906_vm1, %v8321_v10 }
  0xe0   : > { %1252 = vmatprep.mubr.bf16.mxu0 %v8775_v0 }
  0xe7   : > { %7926 = vmatmul.mubr.msk.bf16.gmra.mxu0 %vm906_vm1, %v8328_v13 }
  0xe8   : > { %1262 = vmatprep.mubr.bf16.mxu0 %v8775_v0 }
  0xef   : > { %7927 = vmatmul.mubr.msk.bf16.gmra.mxu0 %vm906_vm1, %v8338_v14 }
  0xf0   : > { %1272 = vmatprep.mubr.bf16.mxu0 %v8775_v0 }
  0xf7   : > { %7928 = vmatmul.mubr.msk.bf16.gmra.mxu0 %vm906_vm1, %v8345_v17 }
  0xf8   : > { %1282 = vmatprep.mubr.bf16.mxu0 %v8775_v0 }
  0xff   : > { %v1044_v26 = vpop.f32.mrf.mxu0  ;;  %7929 = vmatmul.mubr.msk.bf16.gmra.mxu0 %vm906_vm1, %v8355_v20 }
 0x100   : > { %1292 = vmatprep.mubr.bf16.mxu0 %v8775_v0  ;;  %v1045_v34 = vadd.f32 %v1044_v26, %v9199_v28 }
 0x101   : > { %v1046_v29 = vpop.f32.mrf.mxu0 }
 0x102   : > { %v1047_v32 = vadd.f32 %v1046_v29, %v9195_v27  ;;  %v1363_v41 = vmax.f32 %v1045_v34, 0.0 }
 0x103   : > { %v1048_v30 = vpop.f32.mrf.mxu0 }
 0x104   : > { %v1049_v33 = vadd.f32 %v1048_v30, %v9199_v28  ;;  %v1364_v39 = vmax.f32 %v1047_v32, 0.0 }
 0x105   : > { %v1050_v35 = vpop.f32.mrf.mxu0 }
 0x106   : > { %v1051_v36 = vadd.f32 %v1050_v35, %v9195_v27  ;;  %v1365_v37 = vmax.f32 %v1049_v33, 0.0 }
 0x107   : > { %v1054_v38 = vpop.f32.mrf.mxu0  ;;  %7930 = vmatmul.mubr.msk.bf16.gmra.mxu0 %vm906_vm1, %v8362_v31 }
 0x108   : > { %v1366_v40 = vmax.f32 %v1051_v36, 0.0  ;;  %1302 = vmatprep.mubr.bf16.mxu0 %v8775_v0  ;;  %v1491_v44 = vpack.c.bf16 %v1365_v37, %v1363_v41  ;;  %v1055_v51 = vadd.f32 %v1054_v38, %v9199_v28  ;;  %v8375_v36 = vld [vmem:[%s8944_s29 + $0xe8] sm:$0xff]  }
 0x109   : > { %v1056_v42 = vpop.f32.mrf.mxu0 }
 0x10a   : > { %v1492_v43 = vpack.c.bf16 %v1366_v40, %v1364_v39  ;;  %v1057_v47 = vadd.f32 %v1056_v42, %v9195_v27  ;;  %v1367_v58 = vmax.f32 %v1055_v51, 0.0 }
 0x10b   : > { %v1058_v45 = vpop.f32.mrf.mxu0 }
 0x10c   : > { %v1059_v48 = vadd.f32 %v1058_v45, %v9199_v28  ;;  %1791 = vmatprep.mubr.bf16.mxu1 %v1492_v43  ;;  %v1368_v56 = vmax.f32 %v1057_v47, 0.0 }
 0x10d   : > { %v1060_v52 = vpop.f32.mrf.mxu0  ;;  %1792 = vmatmul.mubr.bf16.vlgmr.msra.gmra.mxu1 %v1491_v44 }
 0x10e   : > { %v1061_v53 = vadd.f32 %v1060_v52, %v9195_v27  ;;  %v1369_v54 = vmax.f32 %v1059_v48, 0.0  ;;  %3258 = vmatpush1.bf16.msra.mxu1 %v8402_v49 }
 0x10f   : > { %v1064_v55 = vpop.f32.mrf.mxu0  ;;  %7931 = vmatmul.mubr.msk.bf16.gmra.mxu0 %vm906_vm1, %v8369_v46 }
 0x110   : > { %v1370_v57 = vmax.f32 %v1061_v53, 0.0  ;;  %1312 = vmatprep.mubr.bf16.mxu0 %v8775_v0  ;;  %v1493_v61 = vpack.c.bf16 %v1369_v54, %v1367_v58  ;;  %v1065_v3 = vadd.f32 %v1064_v55, %v9199_v28  ;;  %v8379_v53 = vld [vmem:[%s8944_s29 + $0xf0] sm:$0xff]  }
 0x111   : > { %v1066_v59 = vpop.f32.mrf.mxu0 }
 0x112   : > { %v1494_v60 = vpack.c.bf16 %v1370_v57, %v1368_v56  ;;  %v1067_v1 = vadd.f32 %v1066_v59, %v9195_v27  ;;  %v1371_v10 = vmax.f32 %v1065_v3, 0.0  ;;  %v8405_v56 = vld [vmem:[%s11467_s5 + $0xa0] ss:$8 sps:$4 sm:$0xff]   ;;  %v8407_v57 = vld [vmem:[%s11467_s5 + $0xa4] ss:$8 sps:$4 sm:$0xff]  }
 0x113   : > { %v1068_v62 = vpop.f32.mrf.mxu0  ;;  %2534 = vmatprep.subr.bf16.mxu0 %v8407_v57  ;;  %v8416_v57 = vld [vmem:[%s11469_s7 + $0x54] ss:$8 sps:$4 sm:$0xff]  }
 0x114   : > { %v1069_v2 = vadd.f32 %v1068_v62, %v9199_v28  ;;  %1801 = vmatprep.mubr.bf16.mxu1 %v1494_v60  ;;  %v1372_v8 = vmax.f32 %v1067_v1, 0.0  ;;  %2535 = vmatpush2.bf16.msra.mxu0 %v8405_v56  ;;  %v8414_v56 = vld [vmem:[%s11469_s7 + $0x50] ss:$8 sps:$4 sm:$0xff]  }
 0x115   : > { %v1070_v4 = vpop.f32.mrf.mxu0  ;;  %1802 = vmatmul.mubr.bf16.gmra.mxu1 %v1493_v61 }
 0x116   : > { %v1071_v5 = vadd.f32 %v1070_v4, %v9195_v27  ;;  %v1373_v6 = vmax.f32 %v1069_v2, 0.0 }
 0x117   : > { %v1074_v7 = vpop.f32.mrf.mxu0  ;;  %7932 = vmatmul.mubr.msk.bf16.gmra.mxu0 %vm906_vm1, %v8370_v63 }
 0x118   : > { %v1374_v9 = vmax.f32 %v1071_v5, 0.0  ;;  %1322 = vmatprep.mubr.bf16.mxu0 %v8775_v0  ;;  %v1495_v13 = vpack.c.bf16 %v1373_v6, %v1371_v10  ;;  %v1075_v20 = vadd.f32 %v1074_v7, %v9199_v28  ;;  %v8380_v7 = vld [vmem:[%s8944_s29 + $0xf8] sm:$0xff]  }
 0x119   : > { %v1076_v11 = vpop.f32.mrf.mxu0 }
 0x11a   : > { %v1496_v12 = vpack.c.bf16 %v1374_v9, %v1372_v8  ;;  %v1077_v16 = vadd.f32 %v1076_v11, %v9195_v27  ;;  %v1375_v31 = vmax.f32 %v1075_v20, 0.0  ;;  %v8408_v20 = vld [vmem:[%s11469_s7 + $0x60] ss:$8 sps:$4 sm:$0xff]  }
 0x11b   : > { %v1078_v14 = vpop.f32.mrf.mxu0 }
 0x11c   : > { %v1079_v17 = vadd.f32 %v1078_v14, %v9199_v28  ;;  %1811 = vmatprep.mubr.bf16.mxu1 %v1496_v12  ;;  %v1376_v29 = vmax.f32 %v1077_v16, 0.0 }
 0x11d   : > { %v1080_v22 = vpop.f32.mrf.mxu0  ;;  %1812 = vmatmul.mubr.bf16.gmra.mxu1 %v1495_v13 }
 0x11e   : > { %v1081_v23 = vadd.f32 %v1080_v22, %v9195_v27  ;;  %v1377_v25 = vmax.f32 %v1079_v17, 0.0  ;;  %v8410_v22 = vld [vmem:[%s11469_s7 + $0x64] ss:$8 sps:$4 sm:$0xff]  }
 0x11f   : > { %v1084_v26 = vpop.f32.mrf.mxu0  ;;  %7933 = vmatmul.mubr.msk.bf16.gmra.mxu0 %vm906_vm1, %v8374_v15  ;;  %3259 = vmatprep.subr.bf16.mxu1 %v8410_v22 }
 0x120   : > { %v1378_v30 = vmax.f32 %v1081_v23, 0.0  ;;  %1332 = vmatprep.mubr.bf16.mxu0 %v8775_v0  ;;  %v1497_v34 = vpack.c.bf16 %v1377_v25, %v1375_v31  ;;  %v1085_v39 = vadd.f32 %v1084_v26, %v9199_v28  ;;  %v8413_v31 = vld [vmem:[%s11467_s5 + $0x94] ss:$8 sps:$4 sm:$0xff]   ;;  %3260 = vmatpush1.bf16.msra.mxu1 %v8408_v20 }
 0x121   : > { %v1086_v32 = vpop.f32.mrf.mxu0  ;;  %2536 = vmatprep.subr.bf16.mxu0 %v8413_v31  ;;  %3261 = vmatprep.subr.bf16.mxu1 %v8416_v57 }
 0x122   : > { %v1498_v33 = vpack.c.bf16 %v1378_v30, %v1376_v29  ;;  %v1087_v37 = vadd.f32 %v1086_v32, %v9195_v27  ;;  %v1379_v46 = vmax.f32 %v1085_v39, 0.0  ;;  %v8411_v30 = vld [vmem:[%s11467_s5 + $0x90] ss:$8 sps:$4 sm:$0xff]  }
 0x123   : > { %v1088_v35 = vpop.f32.mrf.mxu0  ;;  %2537 = vmatpush2.bf16.msra.mxu0 %v8411_v30  ;;  %v8422_v30 = vld [vmem:[%s11469_s7 + $0x44] ss:$8 sps:$4 sm:$0xff]  }
 0x124   : > { %v1089_v38 = vadd.f32 %v1088_v35, %v9199_v28  ;;  %1821 = vmatprep.mubr.bf16.mxu1 %v1498_v33  ;;  %v1380_v44 = vmax.f32 %v1087_v37, 0.0  ;;  %3262 = vmatpush1.bf16.msra.mxu1 %v8414_v56 }
 0x125   : > { %v1090_v40 = vpop.f32.mrf.mxu0  ;;  %1822 = vmatmul.mubr.bf16.gmra.mxu1 %v1497_v34  ;;  %3263 = vmatprep.subr.bf16.mxu1 %v8422_v30  ;;  %v8426_v30 = vld [vmem:[%s11469_s7 + $0x20] ss:$8 sps:$4 sm:$0xff]  }
 0x126   : > { %v1091_v41 = vadd.f32 %v1090_v40, %v9195_v27  ;;  %v1381_v42 = vmax.f32 %v1089_v38, 0.0 }
 0x127   : > { %v1094_v43 = vpop.f32.mrf.mxu0  ;;  %7934 = vmatmul.mubr.msk.bf16.gmra.mxu0 %vm906_vm1, %v8375_v36 }
 0x128   : > { %v1382_v45 = vmax.f32 %v1091_v41, 0.0  ;;  %1342 = vmatprep.mubr.bf16.mxu0 %v8775_v0  ;;  %v1499_v51 = vpack.c.bf16 %v1381_v42, %v1379_v46  ;;  %v1095_v58 = vadd.f32 %v1094_v43, %v9199_v28 }
 0x129   : > { %v1096_v47 = vpop.f32.mrf.mxu0 }
 0x12a   : > { %v1500_v48 = vpack.c.bf16 %v1382_v45, %v1380_v44  ;;  %v1097_v54 = vadd.f32 %v1096_v47, %v9195_v27  ;;  %v1383_v2 = vmax.f32 %v1095_v58, 0.0 }
 0x12b   : > { %v1098_v52 = vpop.f32.mrf.mxu0 }
 0x12c   : > { %v1099_v55 = vadd.f32 %v1098_v52, %v9199_v28  ;;  %1831 = vmatprep.mubr.bf16.mxu1 %v1500_v48  ;;  %v1384_v63 = vmax.f32 %v1097_v54, 0.0 }
 0x12d   : > { %v1100_v59 = vpop.f32.mrf.mxu0  ;;  %1832 = vmatmul.mubr.bf16.gmra.mxu1 %v1499_v51 }
 0x12e   : > { %v1101_v60 = vadd.f32 %v1100_v59, %v9195_v27  ;;  %v1385_v61 = vmax.f32 %v1099_v55, 0.0 }
 0x12f   : > { %v1104_v62 = vpop.f32.mrf.mxu0  ;;  %7935 = vmatmul.mubr.msk.bf16.gmra.mxu0 %vm906_vm1, %v8379_v53 }
 0x130   : > { %v1386_v1 = vmax.f32 %v1101_v60, 0.0  ;;  %1352 = vmatprep.mubr.bf16.mxu0 %v8775_v0  ;;  %v1501_v5 = vpack.c.bf16 %v1385_v61, %v1383_v2  ;;  %v1105_v10 = vadd.f32 %v1104_v62, %v9199_v28  ;;  %v8417_v62 = vld [vmem:[%s11467_s5 + $0x80] ss:$8 sps:$4 sm:$0xff]  }
 0x131   : > { %v1106_v3 = vpop.f32.mrf.mxu0 }
 0x132   : > { %v1502_v4 = vpack.c.bf16 %v1386_v1, %v1384_v63  ;;  %v1107_v8 = vadd.f32 %v1106_v3, %v9195_v27  ;;  %v1387_v17 = vmax.f32 %v1105_v10, 0.0  ;;  %v8419_v63 = vld [vmem:[%s11467_s5 + $0x84] ss:$8 sps:$4 sm:$0xff]  }
 0x133   : > { %v1108_v6 = vpop.f32.mrf.mxu0  ;;  %2538 = vmatprep.subr.bf16.mxu0 %v8419_v63 }
 0x134   : > { %v1109_v9 = vadd.f32 %v1108_v6, %v9199_v28  ;;  %1841 = vmatprep.mubr.bf16.mxu1 %v1502_v4  ;;  %v1388_v15 = vmax.f32 %v1107_v8, 0.0  ;;  %2539 = vmatpush2.bf16.msra.mxu0 %v8417_v62 }
 0x135   : > { %v1110_v11 = vpop.f32.mrf.mxu0  ;;  %1842 = vmatmul.mubr.bf16.gmra.mxu1 %v1501_v5 }
 0x136   : > { %v1111_v12 = vadd.f32 %v1110_v11, %v9195_v27  ;;  %v1389_v13 = vmax.f32 %v1109_v9, 0.0 }
 0x137   : > { %v1114_v14 = vpop.f32.mrf.mxu0  ;;  %7936 = vmatmul.mubr.msk.bf16.gmra.mxu0 %vm906_vm1, %v8380_v7 }
 0x138   : > { %v1390_v16 = vmax.f32 %v1111_v12, 0.0  ;;  %v1503_v23 = vpack.c.bf16 %v1389_v13, %v1387_v17  ;;  %v1115_v32 = vadd.f32 %v1114_v14, %v9199_v28 }
 0x139   : > { %v1116_v18 = vpop.f32.mrf.mxu0 }
 0x13a   : > { %v1504_v19 = vpack.c.bf16 %v1390_v16, %v1388_v15  ;;  %v1117_v26 = vadd.f32 %v1116_v18, %v9195_v27  ;;  %v1391_v39 = vmax.f32 %v1115_v32, 0.0 }
 0x13b   : > { %v1118_v25 = vpop.f32.mrf.mxu0 }
 0x13c   : > { %v1119_v29 = vadd.f32 %v1118_v25, %v9199_v28  ;;  %1851 = vmatprep.mubr.bf16.mxu1 %v1504_v19  ;;  %v1392_v37 = vmax.f32 %v1117_v26, 0.0 }
 0x13d   : > { %v1120_v33 = vpop.f32.mrf.mxu0  ;;  %1852 = vmatmul.mubr.bf16.gmra.mxu1 %v1503_v23 }
 0x13e   : > { %v1121_v34 = vadd.f32 %v1120_v33, %v9195_v27  ;;  %v1393_v35 = vmax.f32 %v1119_v29, 0.0  ;;  %v8420_v29 = vld [vmem:[%s11469_s7 + $0x40] ss:$8 sps:$4 sm:$0xff]  }
 0x13f   : > { %v1124_v36 = vpop.f32.mrf.mxu0  ;;  %3264 = vmatpush1.bf16.msra.mxu1 %v8420_v29 }
 0x140   : > { %v1394_v38 = vmax.f32 %v1121_v34, 0.0  ;;  %v1505_v42 = vpack.c.bf16 %v1393_v35, %v1391_v39  ;;  %v1125_v46 = vadd.f32 %v1124_v36, %v9199_v28 }
 0x141   : > { %v1126_v40 = vpop.f32.mrf.mxu0 }
 0x142   : > { %v1506_v41 = vpack.c.bf16 %v1394_v38, %v1392_v37  ;;  %v1127_v44 = vadd.f32 %v1126_v40, %v9195_v27  ;;  %v1395_v53 = vmax.f32 %v1125_v46, 0.0 }
 0x143   : > { %v1128_v43 = vpop.f32.mrf.mxu0 }
 0x144   : > { %v1129_v45 = vadd.f32 %v1128_v43, %v9199_v28  ;;  %1861 = vmatprep.mubr.bf16.mxu1 %v1506_v41  ;;  %v1396_v51 = vmax.f32 %v1127_v44, 0.0 }
 0x145   : > { %v1130_v47 = vpop.f32.mrf.mxu0  ;;  %1862 = vmatmul.mubr.bf16.gmra.mxu1 %v1505_v42 }
 0x146   : > { %v1131_v48 = vadd.f32 %v1130_v47, %v9195_v27  ;;  %v1397_v49 = vmax.f32 %v1129_v45, 0.0 }
 0x147   : > { %v1134_v50 = vpop.f32.mrf.mxu0 }
 0x148   : > { %v1398_v52 = vmax.f32 %v1131_v48, 0.0  ;;  %v1507_v58 = vpack.c.bf16 %v1397_v49, %v1395_v53  ;;  %v1135_v1 = vadd.f32 %v1134_v50, %v9199_v28 }
 0x149   : > { %v1136_v54 = vpop.f32.mrf.mxu0 }
 0x14a   : > { %v1508_v55 = vpack.c.bf16 %v1398_v52, %v1396_v51  ;;  %v1137_v60 = vadd.f32 %v1136_v54, %v9195_v27  ;;  %v1399_v8 = vmax.f32 %v1135_v1, 0.0 }
 0x14b   : > { %v1138_v59 = vpop.f32.mrf.mxu0 }
 0x14c   : > { %v1139_v61 = vadd.f32 %v1138_v59, %v9199_v28  ;;  %1871 = vmatprep.mubr.bf16.mxu1 %v1508_v55  ;;  %v1400_v6 = vmax.f32 %v1137_v60, 0.0  ;;  %v8423_v59 = vld [vmem:[%s11469_s7 + $0x30] ss:$8 sps:$4 sm:$0xff]   ;;  %v8425_v60 = vld [vmem:[%s11469_s7 + $0x34] ss:$8 sps:$4 sm:$0xff]  }
 0x14d   : > { %v1140_v2 = vpop.f32.mrf.mxu0  ;;  %1872 = vmatmul.mubr.bf16.gmra.mxu1 %v1507_v58  ;;  %3265 = vmatprep.subr.bf16.mxu1 %v8425_v60  ;;  %v8429_v60 = vld [vmem:[%s11469_s7 + $0x10] ss:$8 sps:$4 sm:$0xff]  }
 0x14e   : > { %v1141_v3 = vadd.f32 %v1140_v2, %v9195_v27  ;;  %v1401_v4 = vmax.f32 %v1139_v61, 0.0  ;;  %3266 = vmatpush1.bf16.msra.mxu1 %v8423_v59 }
 0x14f   : > { %v1144_v5 = vpop.f32.mrf.mxu0 }
 0x150   : > { %v1402_v7 = vmax.f32 %v1141_v3, 0.0  ;;  %v1509_v11 = vpack.c.bf16 %v1401_v4, %v1399_v8  ;;  %v1145_v15 = vadd.f32 %v1144_v5, %v9199_v28 }
 0x151   : > { %v1146_v9 = vpop.f32.mrf.mxu0 }
 0x152   : > { %v1510_v10 = vpack.c.bf16 %v1402_v7, %v1400_v6  ;;  %v1147_v13 = vadd.f32 %v1146_v9, %v9195_v27  ;;  %v1403_v23 = vmax.f32 %v1145_v15, 0.0 }
 0x153   : > { %v1148_v12 = vpop.f32.mrf.mxu0 }
 0x154   : > { %v1149_v14 = vadd.f32 %v1148_v12, %v9199_v28  ;;  %1881 = vmatprep.mubr.bf16.mxu1 %v1510_v10  ;;  %v1404_v20 = vmax.f32 %v1147_v13, 0.0 }
 0x155   : > { %v1150_v16 = vpop.f32.mrf.mxu0  ;;  %1882 = vmatmul.mubr.bf16.gmra.mxu1 %v1509_v11 }
 0x156   : > { %v1151_v17 = vadd.f32 %v1150_v16, %v9195_v27  ;;  %v1405_v18 = vmax.f32 %v1149_v14, 0.0 }
 0x157   : > { %v1154_v19 = vpop.f32.mrf.mxu0 }
 0x158   : > { %v1406_v22 = vmax.f32 %v1151_v17, 0.0  ;;  %v1511_v31 = vpack.c.bf16 %v1405_v18, %v1403_v23  ;;  %v1155_v35 = vadd.f32 %v1154_v19, %v9199_v28 }
 0x159   : > { %v1156_v25 = vpop.f32.mrf.mxu0 }
 0x15a   : > { %v1512_v26 = vpack.c.bf16 %v1406_v22, %v1404_v20  ;;  %v1157_v33 = vadd.f32 %v1156_v25, %v9195_v27  ;;  %v1407_v42 = vmax.f32 %v1155_v35, 0.0 }
 0x15b   : > { %v1158_v32 = vpop.f32.mrf.mxu0 }
 0x15c   : > { %v1159_v34 = vadd.f32 %v1158_v32, %v9199_v28  ;;  %1891 = vmatprep.mubr.bf16.mxu1 %v1512_v26  ;;  %v1408_v40 = vmax.f32 %v1157_v33, 0.0 }
 0x15d   : > { %v1160_v36 = vpop.f32.mrf.mxu0  ;;  %1892 = vmatmul.mubr.bf16.gmra.mxu1 %v1511_v31  ;;  %v8428_v31 = vld [vmem:[%s11469_s7 + $0x24] ss:$8 sps:$4 sm:$0xff]  }
 0x15e   : > { %v1161_v37 = vadd.f32 %v1160_v36, %v9195_v27  ;;  %v1409_v38 = vmax.f32 %v1159_v34, 0.0  ;;  %3267 = vmatprep.subr.bf16.mxu1 %v8428_v31  ;;  %v8432_v31 = vld [vmem:[%s11469_s7] ss:$8 sps:$4 sm:$0xff]  }
 0x15f   : > { %v1164_v39 = vpop.f32.mrf.mxu0  ;;  %3268 = vmatpush1.bf16.msra.mxu1 %v8426_v30 }
 0x160   : > { %v1410_v41 = vmax.f32 %v1161_v37, 0.0  ;;  %v1513_v45 = vpack.c.bf16 %v1409_v38, %v1407_v42  ;;  %v1165_v49 = vadd.f32 %v1164_v39, %v9199_v28 }
 0x161   : > { %v1166_v43 = vpop.f32.mrf.mxu0 }
 0x162   : > { %v1514_v44 = vpack.c.bf16 %v1410_v41, %v1408_v40  ;;  %v1167_v47 = vadd.f32 %v1166_v43, %v9195_v27  ;;  %v1411_v56 = vmax.f32 %v1165_v49, 0.0 }
 0x163   : > { %v1168_v46 = vpop.f32.mrf.mxu0 }
 0x164   : > { %v1169_v48 = vadd.f32 %v1168_v46, %v9199_v28  ;;  %1901 = vmatprep.mubr.bf16.mxu1 %v1514_v44  ;;  %v1412_v54 = vmax.f32 %v1167_v47, 0.0 }
 0x165   : > { %v1170_v50 = vpop.f32.mrf.mxu0  ;;  %1902 = vmatmul.mubr.bf16.gmra.mxu1 %v1513_v45 }
 0x166   : > { %v1171_v51 = vadd.f32 %v1170_v50, %v9195_v27  ;;  %v1413_v52 = vmax.f32 %v1169_v48, 0.0 }
 0x167   : > { %v1174_v53 = vpop.f32.mrf.mxu0 }
 0x168   : > { %v1414_v55 = vmax.f32 %v1171_v51, 0.0  ;;  %v1515_v61 = vpack.c.bf16 %v1413_v52, %v1411_v56  ;;  %v1175_v2 = vadd.f32 %v1174_v53, %v9199_v28 }
 0x169   : > { %v1176_v57 = vpop.f32.mrf.mxu0 }
 0x16a   : > { %v1516_v58 = vpack.c.bf16 %v1414_v55, %v1412_v54  ;;  %v1177_v63 = vadd.f32 %v1176_v57, %v9195_v27  ;;  %v1415_v9 = vmax.f32 %v1175_v2, 0.0 }
 0x16b   : > { %v1178_v62 = vpop.f32.mrf.mxu0 }
 0x16c   : > { %v1179_v1 = vadd.f32 %v1178_v62, %v9199_v28  ;;  %1911 = vmatprep.mubr.bf16.mxu1 %v1516_v58  ;;  %v1416_v7 = vmax.f32 %v1177_v63, 0.0 }
 0x16d   : > { %v1180_v3 = vpop.f32.mrf.mxu0  ;;  %1912 = vmatmul.mubr.bf16.gmra.mxu1 %v1515_v61  ;;  %v8431_v61 = vld [vmem:[%s11469_s7 + $0x14] ss:$8 sps:$4 sm:$0xff]  }
 0x16e   : > { %v1181_v4 = vadd.f32 %v1180_v3, %v9195_v27  ;;  %v1417_v5 = vmax.f32 %v1179_v1, 0.0  ;;  %3269 = vmatprep.subr.bf16.mxu1 %v8431_v61  ;;  %v8435_v61 = vld [vmem:[%s11469_s7 + $0xf0] ss:$8 sps:$4 sm:$0xff]  }
 0x16f   : > { %v1184_v6 = vpop.f32.mrf.mxu0  ;;  %3270 = vmatpush1.bf16.msra.mxu1 %v8429_v60 }
 0x170   : > { %v1418_v8 = vmax.f32 %v1181_v4, 0.0  ;;  %v1517_v12 = vpack.c.bf16 %v1417_v5, %v1415_v9  ;;  %v1185_v16 = vadd.f32 %v1184_v6, %v9199_v28 }
 0x171   : > { %v1186_v10 = vpop.f32.mrf.mxu0 }
 0x172   : > { %v1518_v11 = vpack.c.bf16 %v1418_v8, %v1416_v7  ;;  %v1187_v14 = vadd.f32 %v1186_v10, %v9195_v27  ;;  %v1419_v25 = vmax.f32 %v1185_v16, 0.0 }
 0x173   : > { %v1188_v13 = vpop.f32.mrf.mxu0 }
 0x174   : > { %v1189_v15 = vadd.f32 %v1188_v13, %v9199_v28  ;;  %1921 = vmatprep.mubr.bf16.mxu1 %v1518_v11  ;;  %v1420_v22 = vmax.f32 %v1187_v14, 0.0 }
 0x175   : > { %v1190_v17 = vpop.f32.mrf.mxu0  ;;  %1922 = vmatmul.mubr.bf16.gmra.mxu1 %v1517_v12 }
 0x176   : > { %v1191_v18 = vadd.f32 %v1190_v17, %v9195_v27  ;;  %v1421_v19 = vmax.f32 %v1189_v15, 0.0 }
 0x177   : > { %v1194_v20 = vpop.f32.mrf.mxu0 }
 0x178   : > { %v1422_v23 = vmax.f32 %v1191_v18, 0.0  ;;  %v1519_v32 = vpack.c.bf16 %v1421_v19, %v1419_v25  ;;  %v1195_v36 = vadd.f32 %v1194_v20, %v9199_v28 }
 0x179   : > { %v1196_v26 = vpop.f32.mrf.mxu0 }
 0x17a   : > { %v1520_v29 = vpack.c.bf16 %v1422_v23, %v1420_v22  ;;  %v1197_v34 = vadd.f32 %v1196_v26, %v9195_v27  ;;  %v1423_v43 = vmax.f32 %v1195_v36, 0.0 }
 0x17b   : > { %v1198_v33 = vpop.f32.mrf.mxu0 }
 0x17c   : > { %v1199_v35 = vadd.f32 %v1198_v33, %v9199_v28  ;;  %1931 = vmatprep.mubr.bf16.mxu1 %v1520_v29  ;;  %v1424_v41 = vmax.f32 %v1197_v34, 0.0 }
 0x17d   : > { %v1200_v37 = vpop.f32.mrf.mxu0  ;;  %1932 = vmatmul.mubr.bf16.gmra.mxu1 %v1519_v32  ;;  %v8434_v32 = vld [vmem:[%s11469_s7 + $0x4] ss:$8 sps:$4 sm:$0xff]  }
 0x17e   : > { %v1201_v38 = vadd.f32 %v1200_v37, %v9195_v27  ;;  %v1425_v39 = vmax.f32 %v1199_v35, 0.0  ;;  %3271 = vmatprep.subr.bf16.mxu1 %v8434_v32  ;;  %v8438_v32 = vld [vmem:[%s11469_s7 + $0xe0] ss:$8 sps:$4 sm:$0xff]  }
 0x17f   : > { %v1204_v40 = vpop.f32.mrf.mxu0  ;;  %3272 = vmatpush1.bf16.msra.mxu1 %v8432_v31 }
 0x180   : > { %v1426_v42 = vmax.f32 %v1201_v38, 0.0  ;;  %v1521_v46 = vpack.c.bf16 %v1425_v39, %v1423_v43  ;;  %v1205_v50 = vadd.f32 %v1204_v40, %v9199_v28 }
 0x181   : > { %v1206_v44 = vpop.f32.mrf.mxu0 }
 0x182   : > { %v1522_v45 = vpack.c.bf16 %v1426_v42, %v1424_v41  ;;  %v1207_v48 = vadd.f32 %v1206_v44, %v9195_v27  ;;  %v1427_v57 = vmax.f32 %v1205_v50, 0.0 }
 0x183   : > { %v1208_v47 = vpop.f32.mrf.mxu0 }
 0x184   : > { %v1209_v49 = vadd.f32 %v1208_v47, %v9199_v28  ;;  %1941 = vmatprep.mubr.bf16.mxu1 %v1522_v45  ;;  %v1428_v55 = vmax.f32 %v1207_v48, 0.0 }
 0x185   : > { %v1210_v51 = vpop.f32.mrf.mxu0  ;;  %1942 = vmatmul.mubr.bf16.gmra.mxu1 %v1521_v46 }
 0x186   : > { %v1211_v52 = vadd.f32 %v1210_v51, %v9195_v27  ;;  %v1429_v53 = vmax.f32 %v1209_v49, 0.0 }
 0x187   : > { %v1214_v54 = vpop.f32.mrf.mxu0 }
 0x188   : > { %v1430_v56 = vmax.f32 %v1211_v52, 0.0  ;;  %v1523_v62 = vpack.c.bf16 %v1429_v53, %v1427_v57  ;;  %v1215_v3 = vadd.f32 %v1214_v54, %v9199_v28 }
 0x189   : > { %v1216_v58 = vpop.f32.mrf.mxu0 }
 0x18a   : > { %v1524_v59 = vpack.c.bf16 %v1430_v56, %v1428_v55  ;;  %v1217_v1 = vadd.f32 %v1216_v58, %v9195_v27  ;;  %v1431_v10 = vmax.f32 %v1215_v3, 0.0 }
 0x18b   : > { %v1218_v63 = vpop.f32.mrf.mxu0 }
 0x18c   : > { %v1219_v2 = vadd.f32 %v1218_v63, %v9199_v28  ;;  %1951 = vmatprep.mubr.bf16.mxu1 %v1524_v59  ;;  %v1432_v8 = vmax.f32 %v1217_v1, 0.0 }
 0x18d   : > { %v1220_v4 = vpop.f32.mrf.mxu0  ;;  %1952 = vmatmul.mubr.bf16.gmra.mxu1 %v1523_v62  ;;  %v8437_v62 = vld [vmem:[%s11469_s7 + $0xf4] ss:$8 sps:$4 sm:$0xff]  }
 0x18e   : > { %v1221_v5 = vadd.f32 %v1220_v4, %v9195_v27  ;;  %v1433_v6 = vmax.f32 %v1219_v2, 0.0  ;;  %3273 = vmatprep.subr.bf16.mxu1 %v8437_v62  ;;  %v8441_v62 = vld [vmem:[%s11469_s7 + $0xd0] ss:$8 sps:$4 sm:$0xff]  }
 0x18f   : > { %v1224_v7 = vpop.f32.mrf.mxu0  ;;  %3274 = vmatpush2.bf16.msra.mxu1 %v8435_v61 }
 0x190   : > { %v1434_v9 = vmax.f32 %v1221_v5, 0.0  ;;  %v1525_v13 = vpack.c.bf16 %v1433_v6, %v1431_v10  ;;  %v1225_v17 = vadd.f32 %v1224_v7, %v9199_v28 }
 0x191   : > { %v1226_v11 = vpop.f32.mrf.mxu0 }
 0x192   : > { %v1526_v12 = vpack.c.bf16 %v1434_v9, %v1432_v8  ;;  %v1227_v15 = vadd.f32 %v1226_v11, %v9195_v27  ;;  %v1435_v26 = vmax.f32 %v1225_v17, 0.0 }
 0x193   : > { %v1228_v14 = vpop.f32.mrf.mxu0 }
 0x194   : > { %v1229_v16 = vadd.f32 %v1228_v14, %v9199_v28  ;;  %1961 = vmatprep.mubr.bf16.mxu1 %v1526_v12  ;;  %v1436_v23 = vmax.f32 %v1227_v15, 0.0 }
 0x195   : > { %v1230_v18 = vpop.f32.mrf.mxu0  ;;  %1962 = vmatmul.mubr.bf16.gmra.mxu1 %v1525_v13 }
 0x196   : > { %v1231_v19 = vadd.f32 %v1230_v18, %v9195_v27  ;;  %v1437_v20 = vmax.f32 %v1229_v16, 0.0 }
 0x197   : > { %v1234_v22 = vpop.f32.mrf.mxu0 }
 0x198   : > { %v1438_v25 = vmax.f32 %v1231_v19, 0.0  ;;  %v1527_v33 = vpack.c.bf16 %v1437_v20, %v1435_v26  ;;  %v1235_v37 = vadd.f32 %v1234_v22, %v9199_v28 }
 0x199   : > { %v1236_v29 = vpop.f32.mrf.mxu0 }
 0x19a   : > { %v1528_v30 = vpack.c.bf16 %v1438_v25, %v1436_v23  ;;  %v1237_v35 = vadd.f32 %v1236_v29, %v9195_v27  ;;  %v1439_v44 = vmax.f32 %v1235_v37, 0.0 }
 0x19b   : > { %v1238_v34 = vpop.f32.mrf.mxu0 }
 0x19c   : > { %v1239_v36 = vadd.f32 %v1238_v34, %v9199_v28  ;;  %1971 = vmatprep.mubr.bf16.mxu1 %v1528_v30  ;;  %v1440_v42 = vmax.f32 %v1237_v35, 0.0 }
 0x19d   : > { %v1240_v38 = vpop.f32.mrf.mxu0  ;;  %1972 = vmatmul.mubr.bf16.gmra.mxu1 %v1527_v33  ;;  %v8440_v33 = vld [vmem:[%s11469_s7 + $0xe4] ss:$8 sps:$4 sm:$0xff]  }
 0x19e   : > { %v1241_v39 = vadd.f32 %v1240_v38, %v9195_v27  ;;  %v1441_v40 = vmax.f32 %v1239_v36, 0.0  ;;  %3275 = vmatprep.subr.bf16.mxu1 %v8440_v33 }
 0x19f   : > { %v1244_v41 = vpop.f32.mrf.mxu0  ;;  %3276 = vmatpush2.bf16.msra.mxu1 %v8438_v32 }
 0x1a0   : > { %v1442_v43 = vmax.f32 %v1241_v39, 0.0  ;;  %v1529_v47 = vpack.c.bf16 %v1441_v40, %v1439_v44  ;;  %v1245_v51 = vadd.f32 %v1244_v41, %v9199_v28 }
 0x1a1   : > { %v1246_v45 = vpop.f32.mrf.mxu0 }
 0x1a2   : > { %v1530_v46 = vpack.c.bf16 %v1442_v43, %v1440_v42  ;;  %v1247_v49 = vadd.f32 %v1246_v45, %v9195_v27  ;;  %v1443_v58 = vmax.f32 %v1245_v51, 0.0 }
 0x1a3   : > { %v1248_v48 = vpop.f32.mrf.mxu0 }
 0x1a4   : > { %v1249_v50 = vadd.f32 %v1248_v48, %v9199_v28  ;;  %1981 = vmatprep.mubr.bf16.mxu1 %v1530_v46  ;;  %v1444_v56 = vmax.f32 %v1247_v49, 0.0 }
 0x1a5   : > { %v1250_v52 = vpop.f32.mrf.mxu0  ;;  %1982 = vmatmul.mubr.bf16.gmra.mxu1 %v1529_v47 }
 0x1a6   : > { %v1251_v53 = vadd.f32 %v1250_v52, %v9195_v27  ;;  %v1445_v54 = vmax.f32 %v1249_v50, 0.0 }
 0x1a7   : > { %v1254_v55 = vpop.f32.mrf.mxu0 }
 0x1a8   : > { %v1446_v57 = vmax.f32 %v1251_v53, 0.0  ;;  %v1531_v63 = vpack.c.bf16 %v1445_v54, %v1443_v58  ;;  %v1255_v4 = vadd.f32 %v1254_v55, %v9199_v28 }
 0x1a9   : > { %v1256_v59 = vpop.f32.mrf.mxu0 }
 0x1aa   : > { %v1532_v60 = vpack.c.bf16 %v1446_v57, %v1444_v56  ;;  %v1257_v2 = vadd.f32 %v1256_v59, %v9195_v27  ;;  %v1447_v11 = vmax.f32 %v1255_v4, 0.0 }
 0x1ab   : > { %v1258_v1 = vpop.f32.mrf.mxu0 }
 0x1ac   : > { %v1259_v3 = vadd.f32 %v1258_v1, %v9199_v28  ;;  %1991 = vmatprep.mubr.bf16.mxu1 %v1532_v60  ;;  %v1448_v9 = vmax.f32 %v1257_v2, 0.0 }
 0x1ad   : > { %v1260_v5 = vpop.f32.mrf.mxu0  ;;  %1992 = vmatmul.mubr.bf16.gmra.mxu1 %v1531_v63  ;;  %v8443_v63 = vld [vmem:[%s11469_s7 + $0xd4] ss:$8 sps:$4 sm:$0xff]  }
 0x1ae   : > { %v1261_v6 = vadd.f32 %v1260_v5, %v9195_v27  ;;  %v1449_v7 = vmax.f32 %v1259_v3, 0.0  ;;  %3277 = vmatprep.subr.bf16.mxu1 %v8443_v63 }
 0x1af   : > { %v1264_v8 = vpop.f32.mrf.mxu0  ;;  %3278 = vmatpush2.bf16.msra.mxu1 %v8441_v62 }
 0x1b0   : > { %v1450_v10 = vmax.f32 %v1261_v6, 0.0  ;;  %v1533_v14 = vpack.c.bf16 %v1449_v7, %v1447_v11  ;;  %v1265_v18 = vadd.f32 %v1264_v8, %v9199_v28  ;;  %v1587_v7 = vld [vmem:[%s11498_s22] sm:$0x3] }
 0x1b1   : > { %v1266_v12 = vpop.f32.mrf.mxu0 }
 0x1b2   : > { %v1534_v13 = vpack.c.bf16 %v1450_v10, %v1448_v9  ;;  %v1267_v16 = vadd.f32 %v1266_v12, %v9195_v27  ;;  %v1451_v29 = vmax.f32 %v1265_v18, 0.0  ;;  %v9425_v12 = vrot.slane %v1587_v7, %v9180_v21 }
 0x1b3   : > { %v1268_v15 = vpop.f32.mrf.mxu0 }
 0x1b4   : > { %v1269_v17 = vadd.f32 %v1268_v15, %v9199_v28  ;;  %2001 = vmatprep.mubr.bf16.mxu1 %v1534_v13  ;;  %v1452_v25 = vmax.f32 %v1267_v16, 0.0  ;;  %v9428_v16 = vrot.slane %v1587_v7, %v9188_v24 }
 0x1b5   : > { %v1270_v19 = vpop.f32.mrf.mxu0  ;;  %2002 = vmatmul.mubr.bf16.gmra.mxu1 %v1533_v14 }
 0x1b6   : > { %v1271_v20 = vadd.f32 %v1270_v19, %v9195_v27  ;;  %v1453_v22 = vmax.f32 %v1269_v17, 0.0 }
 0x1b7   : > { %v1274_v23 = vpop.f32.mrf.mxu0 }
 0x1b8   : > { %v1454_v26 = vmax.f32 %v1271_v20, 0.0  ;;  %v1535_v34 = vpack.c.bf16 %v1453_v22, %v1451_v29  ;;  %v1275_v38 = vadd.f32 %v1274_v23, %v9199_v28 }
 0x1b9   : > { %v1276_v30 = vpop.f32.mrf.mxu0 }
 0x1ba   : > { %v1536_v31 = vpack.c.bf16 %v1454_v26, %v1452_v25  ;;  %v1277_v36 = vadd.f32 %v1276_v30, %v9195_v27  ;;  %v1455_v45 = vmax.f32 %v1275_v38, 0.0 }
 0x1bb   : > { %v1278_v35 = vpop.f32.mrf.mxu0 }
 0x1bc   : > { %v1279_v37 = vadd.f32 %v1278_v35, %v9199_v28  ;;  %2011 = vmatprep.mubr.bf16.mxu1 %v1536_v31  ;;  %v1456_v43 = vmax.f32 %v1277_v36, 0.0 }
 0x1bd   : > { %v1280_v39 = vpop.f32.mrf.mxu0  ;;  %2012 = vmatmul.mubr.bf16.gmra.mxu1 %v1535_v34 }
 0x1be   : > { %v1281_v40 = vadd.f32 %v1280_v39, %v9195_v27  ;;  %v1457_v41 = vmax.f32 %v1279_v37, 0.0 }
 0x1bf   : > { %v1284_v42 = vpop.f32.mrf.mxu0 }
 0x1c0   : > { %v1458_v44 = vmax.f32 %v1281_v40, 0.0  ;;  %v1537_v48 = vpack.c.bf16 %v1457_v41, %v1455_v45  ;;  %v1285_v52 = vadd.f32 %v1284_v42, %v9199_v28 }
 0x1c1   : > { %v1286_v46 = vpop.f32.mrf.mxu0 }
 0x1c2   : > { %v1538_v47 = vpack.c.bf16 %v1458_v44, %v1456_v43  ;;  %v1287_v50 = vadd.f32 %v1286_v46, %v9195_v27  ;;  %v1459_v59 = vmax.f32 %v1285_v52, 0.0 }
 0x1c3   : > { %v1288_v49 = vpop.f32.mrf.mxu0 }
 0x1c4   : > { %v1289_v51 = vadd.f32 %v1288_v49, %v9199_v28  ;;  %2021 = vmatprep.mubr.bf16.mxu1 %v1538_v47  ;;  %v1460_v57 = vmax.f32 %v1287_v50, 0.0 }
 0x1c5   : > { %v1290_v53 = vpop.f32.mrf.mxu0  ;;  %2022 = vmatmul.mubr.bf16.gmra.mxu1 %v1537_v48 }
 0x1c6   : > { %v1291_v54 = vadd.f32 %v1290_v53, %v9195_v27  ;;  %v1461_v55 = vmax.f32 %v1289_v51, 0.0  ;;  %v8444_v53 = vld [vmem:[%s11469_s7 + $0xc0] ss:$8 sps:$4 sm:$0xff]  }
 0x1c7   : > { %v1294_v56 = vpop.f32.mrf.mxu0 }
 0x1c8   : > { %v1462_v58 = vmax.f32 %v1291_v54, 0.0  ;;  %v1539_v1 = vpack.c.bf16 %v1461_v55, %v1459_v59  ;;  %v1295_v5 = vadd.f32 %v1294_v56, %v9199_v28  ;;  %v8446_v54 = vld [vmem:[%s11469_s7 + $0xc4] ss:$8 sps:$4 sm:$0xff]  }
 0x1c9   : > { %v1296_v60 = vpop.f32.mrf.mxu0  ;;  %3279 = vmatprep.subr.bf16.mxu1 %v8446_v54  ;;  %v8447_v54 = vld [vmem:[%s11469_s7 + $0xb0] ss:$8 sps:$4 sm:$0xff]  }
 0x1ca   : > { %v1540_v61 = vpack.c.bf16 %v1462_v58, %v1460_v57  ;;  %v1297_v3 = vadd.f32 %v1296_v60, %v9195_v27  ;;  %v1463_v17 = vmax.f32 %v1295_v5, 0.0  ;;  %3280 = vmatpush2.bf16.msra.mxu1 %v8444_v53 }
 0x1cb   : > { %v1298_v2 = vpop.f32.mrf.mxu0 }
 0x1cc   : > { %v1299_v4 = vadd.f32 %v1298_v2, %v9199_v28  ;;  %2031 = vmatprep.mubr.bf16.mxu1 %v1540_v61  ;;  %v1464_v14 = vmax.f32 %v1297_v3, 0.0 }
 0x1cd   : > { %v1300_v6 = vpop.f32.mrf.mxu0  ;;  %v1793_v8 = vpop.f32.mrf.mxu1  ;;  %2032 = vmatmul.mubr.bf16.gmra.mxu1 %v1539_v1 }
 0x1ce   : > { %v1301_v9 = vadd.f32 %v1300_v6, %v9195_v27  ;;  %v1465_v10 = vmax.f32 %v1299_v4, 0.0  ;;  %v1794_v30 = vadd.f32 %v1793_v8, %v9428_v16 }
 0x1cf   : > { %v1304_v11 = vpop.f32.mrf.mxu0  ;;  %v1795_v13 = vpop.f32.mrf.mxu1 }
 0x1d0   : > { %v1466_v15 = vmax.f32 %v1301_v9, 0.0  ;;  %v1541_v23 = vpack.c.bf16 %v1465_v10, %v1463_v17  ;;  %v1796_v25 = vadd.f32 %v1795_v13, %v9425_v12  ;;  %v1305_v36 = vadd.f32 %v1304_v11, %v9199_v28 }
 0x1d1   : > { %v1306_v18 = vpop.f32.mrf.mxu0  ;;  %v1797_v19 = vpop.f32.mrf.mxu1  ;;  %v2112_v43 = vmax.f32 %v1794_v30, 0.0 }
 0x1d2   : > { %v1798_v20 = vadd.f32 %v1797_v19, %v9428_v16  ;;  %v1542_v22 = vpack.c.bf16 %v1466_v15, %v1464_v14  ;;  %v1307_v33 = vadd.f32 %v1306_v18, %v9195_v27  ;;  %v2113_v40 = vmax.f32 %v1796_v25, 0.0 }
 0x1d3   : > { %v1308_v26 = vpop.f32.mrf.mxu0  ;;  %v1799_v29 = vpop.f32.mrf.mxu1  ;;  %v1467_v50 = vmax.f32 %v1305_v36, 0.0 }
 0x1d4   : > { %v1309_v31 = vadd.f32 %v1308_v26, %v9199_v28  ;;  %v1800_v32 = vadd.f32 %v1799_v29, %v9425_v12  ;;  %2041 = vmatprep.mubr.bf16.mxu1 %v1542_v22  ;;  %v2114_v37 = vmax.f32 %v1798_v20, 0.0  ;;  %v1468_v46 = vmax.f32 %v1307_v33, 0.0 }
 0x1d5   : > { %v1310_v34 = vpop.f32.mrf.mxu0  ;;  %v1803_v35 = vpop.f32.mrf.mxu1  ;;  %2042 = vmatmul.mubr.bf16.gmra.mxu1 %v1541_v23 }
 0x1d6   : > { %v2115_v38 = vmax.f32 %v1800_v32, 0.0  ;;  %v1311_v39 = vadd.f32 %v1310_v34, %v9195_v27  ;;  %v1469_v44 = vmax.f32 %v1309_v31, 0.0  ;;  %v2240_v51 = vpack.c.bf16 %v2114_v37, %v2112_v43 }
 0x1d7   : > { %v1314_v41 = vpop.f32.mrf.mxu0  ;;  %v1805_v42 = vpop.f32.mrf.mxu1  ;;  %v1804_v55 = vadd.f32 %v1803_v35, %v9428_v16 }
 0x1d8   : > { %v1470_v45 = vmax.f32 %v1311_v39, 0.0  ;;  %v2241_v49 = vpack.c.bf16 %v2115_v38, %v2113_v40  ;;  %v1806_v56 = vadd.f32 %v1805_v42, %v9425_v12  ;;  %v1543_v60 = vpack.c.bf16 %v1469_v44, %v1467_v50 }
 0x1d9   : > { %v1316_v47 = vpop.f32.mrf.mxu0  ;;  %v1807_v48 = vpop.f32.mrf.mxu1  ;;  %v1315_v3 = vadd.f32 %v1314_v41, %v9199_v28  ;;  %v2116_v10 = vmax.f32 %v1804_v55, 0.0  ;;  %v8449_v55 = vld [vmem:[%s11469_s7 + $0xb4] ss:$8 sps:$4 sm:$0xff]  }
 0x1da   : > { %v1808_v52 = vadd.f32 %v1807_v48, %v9428_v16  ;;  %2540 = vmatprep.mubr.bf16.mxu0 %v2241_v49  ;;  %v1544_v59 = vpack.c.bf16 %v1470_v45, %v1468_v46  ;;  %v1317_v63 = vadd.f32 %v1316_v47, %v9195_v27  ;;  %v2117_v7 = vmax.f32 %v1806_v56, 0.0  ;;  %3281 = vmatprep.subr.bf16.mxu1 %v8449_v55 }
 0x1db   : > { %v1318_v57 = vpop.f32.mrf.mxu0  ;;  %v1809_v58 = vpop.f32.mrf.mxu1  ;;  %2541 = vmatmul.mubr.bf16.vlgmr.msra.gmra.mxu0 %v2240_v51  ;;  %v1471_v19 = vmax.f32 %v1315_v3, 0.0  ;;  %3282 = vmatpush2.bf16.msra.mxu1 %v8447_v54 }
 0x1dc   : > { %v1319_v61 = vadd.f32 %v1318_v57, %v9199_v28  ;;  %v1810_v62 = vadd.f32 %v1809_v58, %v9425_v12  ;;  %2051 = vmatprep.mubr.bf16.mxu1 %v1544_v59  ;;  %v2118_v4 = vmax.f32 %v1808_v52, 0.0  ;;  %v1472_v14 = vmax.f32 %v1317_v63, 0.0 }
 0x1dd   : > { %v1320_v1 = vpop.f32.mrf.mxu0  ;;  %v1813_v2 = vpop.f32.mrf.mxu1  ;;  %2052 = vmatmul.mubr.bf16.gmra.mxu1 %v1543_v60 }
 0x1de   : > { %v2119_v5 = vmax.f32 %v1810_v62, 0.0  ;;  %v1321_v6 = vadd.f32 %v1320_v1, %v9195_v27  ;;  %v1473_v11 = vmax.f32 %v1319_v61, 0.0  ;;  %v2242_v20 = vpack.c.bf16 %v2118_v4, %v2116_v10 }
 0x1df   : > { %v1324_v8 = vpop.f32.mrf.mxu0  ;;  %v1815_v9 = vpop.f32.mrf.mxu1  ;;  %v1814_v31 = vadd.f32 %v1813_v2, %v9428_v16 }
 0x1e0   : > { %v1474_v13 = vmax.f32 %v1321_v6, 0.0  ;;  %v2243_v18 = vpack.c.bf16 %v2119_v5, %v2117_v7  ;;  %v1816_v23 = vadd.f32 %v1815_v9, %v9425_v12  ;;  %v1545_v30 = vpack.c.bf16 %v1473_v11, %v1471_v19 }
 0x1e1   : > { %v1326_v15 = vpop.f32.mrf.mxu0  ;;  %v1817_v17 = vpop.f32.mrf.mxu1  ;;  %v1325_v37 = vadd.f32 %v1324_v8, %v9199_v28  ;;  %v2120_v44 = vmax.f32 %v1814_v31, 0.0 }
 0x1e2   : > { %v1818_v22 = vadd.f32 %v1817_v17, %v9428_v16  ;;  %2550 = vmatprep.mubr.bf16.mxu0 %v2243_v18  ;;  %v1546_v29 = vpack.c.bf16 %v1474_v13, %v1472_v14  ;;  %v1327_v34 = vadd.f32 %v1326_v15, %v9195_v27  ;;  %v2121_v41 = vmax.f32 %v1816_v23, 0.0 }
 0x1e3   : > { %v1328_v25 = vpop.f32.mrf.mxu0  ;;  %v1819_v26 = vpop.f32.mrf.mxu1  ;;  %2551 = vmatmul.mubr.bf16.gmra.mxu0 %v2242_v20  ;;  %v1475_v51 = vmax.f32 %v1325_v37, 0.0 }
 0x1e4   : > { %v1329_v32 = vadd.f32 %v1328_v25, %v9199_v28  ;;  %v1820_v33 = vadd.f32 %v1819_v26, %v9425_v12  ;;  %2061 = vmatprep.mubr.bf16.mxu1 %v1546_v29  ;;  %v2122_v38 = vmax.f32 %v1818_v22, 0.0  ;;  %v1476_v47 = vmax.f32 %v1327_v34, 0.0 }
 0x1e5   : > { %v1330_v35 = vpop.f32.mrf.mxu0  ;;  %v1823_v36 = vpop.f32.mrf.mxu1  ;;  %2062 = vmatmul.mubr.bf16.gmra.mxu1 %v1545_v30 }
 0x1e6   : > { %v2123_v39 = vmax.f32 %v1820_v33, 0.0  ;;  %v1331_v40 = vadd.f32 %v1330_v35, %v9195_v27  ;;  %v1477_v45 = vmax.f32 %v1329_v32, 0.0  ;;  %v2244_v52 = vpack.c.bf16 %v2122_v38, %v2120_v44 }
 0x1e7   : > { %v1334_v42 = vpop.f32.mrf.mxu0  ;;  %v1825_v43 = vpop.f32.mrf.mxu1  ;;  %v1824_v56 = vadd.f32 %v1823_v36, %v9428_v16 }
 0x1e8   : > { %v1478_v46 = vmax.f32 %v1331_v40, 0.0  ;;  %v2245_v50 = vpack.c.bf16 %v2123_v39, %v2121_v41  ;;  %v1826_v57 = vadd.f32 %v1825_v43, %v9425_v12  ;;  %v1547_v61 = vpack.c.bf16 %v1477_v45, %v1475_v51 }
 0x1e9   : > { %v1336_v48 = vpop.f32.mrf.mxu0  ;;  %v1827_v49 = vpop.f32.mrf.mxu1  ;;  %v1335_v4 = vadd.f32 %v1334_v42, %v9199_v28  ;;  %v2124_v11 = vmax.f32 %v1824_v56, 0.0 }
 0x1ea   : > { %v1828_v53 = vadd.f32 %v1827_v49, %v9428_v16  ;;  %2560 = vmatprep.mubr.bf16.mxu0 %v2245_v50  ;;  %v1548_v60 = vpack.c.bf16 %v1478_v46, %v1476_v47  ;;  %v1337_v1 = vadd.f32 %v1336_v48, %v9195_v27  ;;  %v2125_v8 = vmax.f32 %v1826_v57, 0.0  ;;  %v8450_v48 = vld [vmem:[%s11471_s9 + $0x70] ss:$8 sps:$4 sm:$0xff]   ;;  %v8452_v49 = vld [vmem:[%s11471_s9 + $0x74] ss:$8 sps:$4 sm:$0xff]  }
 0x1eb   : > { %v1338_v58 = vpop.f32.mrf.mxu0  ;;  %v1829_v59 = vpop.f32.mrf.mxu1  ;;  %2561 = vmatmul.mubr.bf16.gmra.mxu0 %v2244_v52  ;;  %v1479_v20 = vmax.f32 %v1335_v4, 0.0  ;;  %4006 = vmatprep.subr.bf16.mxu0 %v8452_v49 }
 0x1ec   : > { %v1339_v62 = vadd.f32 %v1338_v58, %v9199_v28  ;;  %v1830_v63 = vadd.f32 %v1829_v59, %v9425_v12  ;;  %2071 = vmatprep.mubr.bf16.mxu1 %v1548_v60  ;;  %v2126_v5 = vmax.f32 %v1828_v53, 0.0  ;;  %v1480_v15 = vmax.f32 %v1337_v1, 0.0  ;;  %v8453_v58 = vld [vmem:[%s11469_s7 + $0xa0] ss:$8 sps:$4 sm:$0xff]   ;;  %v8455_v59 = vld [vmem:[%s11469_s7 + $0xa4] ss:$8 sps:$4 sm:$0xff]   ;;  %4007 = vmatpush1.bf16.msra.mxu0 %v8450_v48 }
 0x1ed   : > { %v1340_v2 = vpop.f32.mrf.mxu0  ;;  %v1833_v3 = vpop.f32.mrf.mxu1  ;;  %2072 = vmatmul.mubr.bf16.gmra.mxu1 %v1547_v61  ;;  %3283 = vmatprep.subr.bf16.mxu1 %v8455_v59 }
 0x1ee   : > { %v2127_v6 = vmax.f32 %v1830_v63, 0.0  ;;  %v1341_v7 = vadd.f32 %v1340_v2, %v9195_v27  ;;  %v1481_v13 = vmax.f32 %v1339_v62, 0.0  ;;  %v2246_v22 = vpack.c.bf16 %v2126_v5, %v2124_v11  ;;  %3284 = vmatpush2.bf16.msra.mxu1 %v8453_v58 }
 0x1ef   : > { %v1344_v9 = vpop.f32.mrf.mxu0  ;;  %v1835_v10 = vpop.f32.mrf.mxu1  ;;  %v1834_v32 = vadd.f32 %v1833_v3, %v9428_v16 }
 0x1f0   : > { %v1482_v14 = vmax.f32 %v1341_v7, 0.0  ;;  %v2247_v19 = vpack.c.bf16 %v2127_v6, %v2125_v8  ;;  %v1836_v25 = vadd.f32 %v1835_v10, %v9425_v12  ;;  %v1549_v31 = vpack.c.bf16 %v1481_v13, %v1479_v20 }
 0x1f1   : > { %v1346_v17 = vpop.f32.mrf.mxu0  ;;  %v1837_v18 = vpop.f32.mrf.mxu1  ;;  %v1345_v35 = vadd.f32 %v1344_v9, %v9199_v28  ;;  %v2128_v46 = vmax.f32 %v1834_v32, 0.0 }
 0x1f2   : > { %v1838_v23 = vadd.f32 %v1837_v18, %v9428_v16  ;;  %2570 = vmatprep.mubr.bf16.mxu0 %v2247_v19  ;;  %v1550_v30 = vpack.c.bf16 %v1482_v14, %v1480_v15  ;;  %v1347_v36 = vadd.f32 %v1346_v17, %v9195_v27  ;;  %v2129_v42 = vmax.f32 %v1836_v25, 0.0 }
 0x1f3   : > { %v1348_v26 = vpop.f32.mrf.mxu0  ;;  %v1839_v29 = vpop.f32.mrf.mxu1  ;;  %2571 = vmatmul.mubr.bf16.gmra.mxu0 %v2246_v22  ;;  %v1483_v50 = vmax.f32 %v1345_v35, 0.0 }
 0x1f4   : > { %v1349_v33 = vadd.f32 %v1348_v26, %v9199_v28  ;;  %v1840_v34 = vadd.f32 %v1839_v29, %v9425_v12  ;;  %2081 = vmatprep.mubr.bf16.mxu1 %v1550_v30  ;;  %v2130_v39 = vmax.f32 %v1838_v23, 0.0  ;;  %v1484_v51 = vmax.f32 %v1347_v36, 0.0 }
 0x1f5   : > { %v1350_v37 = vpop.f32.mrf.mxu0  ;;  %v1843_v38 = vpop.f32.mrf.mxu1  ;;  %2082 = vmatmul.mubr.bf16.gmra.mxu1 %v1549_v31 }
 0x1f6   : > { %v2131_v40 = vmax.f32 %v1840_v34, 0.0  ;;  %v1351_v41 = vadd.f32 %v1350_v37, %v9195_v27  ;;  %v1485_v43 = vmax.f32 %v1349_v33, 0.0  ;;  %v2248_v55 = vpack.c.bf16 %v2130_v39, %v2128_v46  ;;  %v8456_v39 = vld [vmem:[%s11471_s9 + $0x60] ss:$8 sps:$4 sm:$0xff]   ;;  %v8461_v46 = vld [vmem:[%s11469_s7 + $0x94] ss:$8 sps:$4 sm:$0xff]  }
 0x1f7   : > { %v1354_v44 = vpop.f32.mrf.mxu0  ;;  %v1845_v45 = vpop.f32.mrf.mxu1  ;;  %v1844_v61 = vadd.f32 %v1843_v38, %v9428_v16  ;;  %3285 = vmatprep.subr.bf16.mxu1 %v8461_v46  ;;  %v8470_v46 = vld [vmem:[%s11471_s9 + $0x44] ss:$8 sps:$4 sm:$0xff]  }
 0x1f8   : > { %v1486_v47 = vmax.f32 %v1351_v41, 0.0  ;;  %v2249_v54 = vpack.c.bf16 %v2131_v40, %v2129_v42  ;;  %v1846_v56 = vadd.f32 %v1845_v45, %v9425_v12  ;;  %v1551_v60 = vpack.c.bf16 %v1485_v43, %v1483_v50  ;;  %v8458_v40 = vld [vmem:[%s11471_s9 + $0x64] ss:$8 sps:$4 sm:$0xff]   ;;  %v8459_v45 = vld [vmem:[%s11469_s7 + $0x90] ss:$8 sps:$4 sm:$0xff]  }
 0x1f9   : > { %v1356_v52 = vpop.f32.mrf.mxu0  ;;  %v1847_v53 = vpop.f32.mrf.mxu1  ;;  %v1355_v5 = vadd.f32 %v1354_v44, %v9199_v28  ;;  %v2132_v13 = vmax.f32 %v1844_v61, 0.0  ;;  %4008 = vmatprep.subr.bf16.mxu0 %v8458_v40  ;;  %3286 = vmatpush2.bf16.msra.mxu1 %v8459_v45  ;;  %v8468_v45 = vld [vmem:[%s11471_s9 + $0x40] ss:$8 sps:$4 sm:$0xff]  }
 0x1fa   : > { %v1848_v57 = vadd.f32 %v1847_v53, %v9428_v16  ;;  %2580 = vmatprep.mubr.bf16.mxu0 %v2249_v54  ;;  %v1552_v1 = vpack.c.bf16 %v1486_v47, %v1484_v51  ;;  %v1357_v2 = vadd.f32 %v1356_v52, %v9195_v27  ;;  %v2133_v8 = vmax.f32 %v1846_v56, 0.0  ;;  %4009 = vmatpush1.bf16.msra.mxu0 %v8456_v39 }
 0x1fb   : > { %v1358_v62 = vpop.f32.mrf.mxu0  ;;  %v1849_v63 = vpop.f32.mrf.mxu1  ;;  %2581 = vmatmul.mubr.bf16.gmra.mxu0 %v2248_v55  ;;  %v1487_v20 = vmax.f32 %v1355_v5, 0.0 }
 0x1fc   : > { %v1359_v3 = vadd.f32 %v1358_v62, %v9199_v28  ;;  %v1850_v4 = vadd.f32 %v1849_v63, %v9425_v12  ;;  %2091 = vmatprep.mubr.bf16.mxu1 %v1552_v1  ;;  %v2134_v9 = vmax.f32 %v1848_v57, 0.0  ;;  %v1488_v15 = vmax.f32 %v1357_v2, 0.0 }
 0x1fd   : > { %v1360_v6 = vpop.f32.mrf.mxu0  ;;  %v1853_v7 = vpop.f32.mrf.mxu1  ;;  %2092 = vmatmul.mubr.bf16.gmra.mxu1 %v1551_v60 }
 0x1fe   : > { %v2135_v10 = vmax.f32 %v1850_v4, 0.0  ;;  %v1361_v11 = vadd.f32 %v1360_v6, %v9195_v27  ;;  %v1489_v17 = vmax.f32 %v1359_v3, 0.0  ;;  %v2250_v23 = vpack.c.bf16 %v2134_v9, %v2132_v13  ;;  %v8464_v9 = vld [vmem:[%s11471_s9 + $0x54] ss:$8 sps:$4 sm:$0xff]  }
 0x1ff   : > { %v1855_v14 = vpop.f32.mrf.mxu1  ;;  %v1854_v27 = vadd.f32 %v1853_v7, %v9428_v16  ;;  %4010 = vmatprep.subr.bf16.mxu0 %v8464_v9 }
 0x200   : > { %v1490_v18 = vmax.f32 %v1361_v11, 0.0  ;;  %v2251_v19 = vpack.c.bf16 %v2135_v10, %v2133_v8  ;;  %v1856_v28 = vadd.f32 %v1855_v14, %v9425_v12  ;;  %v1553_v30 = vpack.c.bf16 %v1489_v17, %v1487_v20  ;;  %v8462_v8 = vld [vmem:[%s11471_s9 + $0x50] ss:$8 sps:$4 sm:$0xff]   ;;  %v8467_v17 = vld [vmem:[%s11469_s7 + $0x84] ss:$8 sps:$4 sm:$0xff]  }
 0x201   : > { %v1857_v22 = vpop.f32.mrf.mxu1  ;;  %v2136_v37 = vmax.f32 %v1854_v27, 0.0  ;;  %4011 = vmatpush1.bf16.msra.mxu0 %v8462_v8  ;;  %3287 = vmatprep.subr.bf16.mxu1 %v8467_v17 }
 0x202   : > { %v1858_v25 = vadd.f32 %v1857_v22, %v9428_v16  ;;  %2590 = vmatprep.mubr.bf16.mxu0 %v2251_v19  ;;  %v1554_v26 = vpack.c.bf16 %v1490_v18, %v1488_v15  ;;  %v2137_v33 = vmax.f32 %v1856_v28, 0.0  ;;  %v8465_v15 = vld [vmem:[%s11469_s7 + $0x80] ss:$8 sps:$4 sm:$0xff]   ;;  %4012 = vmatprep.subr.bf16.mxu0 %v8470_v46 }
 0x203   : > { %v1859_v29 = vpop.f32.mrf.mxu1  ;;  %2591 = vmatmul.mubr.bf16.gmra.mxu0 %v2250_v23  ;;  %3288 = vmatpush2.bf16.msra.mxu1 %v8465_v15  ;;  %v8474_v46 = vld [vmem:[%s11471_s9 + $0x20] ss:$8 sps:$4 sm:$0xff]  }
 0x204   : > { %v1860_v31 = vadd.f32 %v1859_v29, %v9425_v12  ;;  %2101 = vmatprep.mubr.bf16.mxu1 %v1554_v26  ;;  %v2138_v34 = vmax.f32 %v1858_v25, 0.0 }
 0x205   : > { %v1863_v32 = vpop.f32.mrf.mxu1  ;;  %2102 = vmatmul.mubr.bf16.gmra.mxu1 %v1553_v30  ;;  %4013 = vmatpush1.bf16.msra.mxu0 %v8468_v45 }
 0x206   : > { %v2139_v35 = vmax.f32 %v1860_v31, 0.0  ;;  %v2252_v42 = vpack.c.bf16 %v2138_v34, %v2136_v37  ;;  %v1864_v48 = vadd.f32 %v1863_v32, %v9428_v16 }
 0x207   : > { %v1865_v36 = vpop.f32.mrf.mxu1 }
 0x208   : > { %v2253_v38 = vpack.c.bf16 %v2139_v35, %v2137_v33  ;;  %v1866_v43 = vadd.f32 %v1865_v36, %v9425_v12  ;;  %v2140_v55 = vmax.f32 %v1864_v48, 0.0 }
 0x209   : > { %v1867_v41 = vpop.f32.mrf.mxu1 }
 0x20a   : > { %v1868_v44 = vadd.f32 %v1867_v41, %v9428_v16  ;;  %2600 = vmatprep.mubr.bf16.mxu0 %v2253_v38  ;;  %v2141_v51 = vmax.f32 %v1866_v43, 0.0 }
 0x20b   : > { %v1869_v47 = vpop.f32.mrf.mxu1  ;;  %2601 = vmatmul.mubr.bf16.gmra.mxu0 %v2252_v42 }
 0x20c   : > { %v1870_v49 = vadd.f32 %v1869_v47, %v9425_v12  ;;  %v2142_v52 = vmax.f32 %v1868_v44, 0.0 }
 0x20d   : > { %v1873_v50 = vpop.f32.mrf.mxu1 }
 0x20e   : > { %v2143_v53 = vmax.f32 %v1870_v49, 0.0  ;;  %v2254_v58 = vpack.c.bf16 %v2142_v52, %v2140_v55  ;;  %v1874_v62 = vadd.f32 %v1873_v50, %v9428_v16 }
 0x20f   : > { %v1875_v54 = vpop.f32.mrf.mxu1 }
 0x210   : > { %v2255_v56 = vpack.c.bf16 %v2143_v53, %v2141_v51  ;;  %v1876_v59 = vadd.f32 %v1875_v54, %v9425_v12  ;;  %v2144_v6 = vmax.f32 %v1874_v62, 0.0 }
 0x211   : > { %v1877_v57 = vpop.f32.mrf.mxu1 }
 0x212   : > { %v1878_v60 = vadd.f32 %v1877_v57, %v9428_v16  ;;  %2610 = vmatprep.mubr.bf16.mxu0 %v2255_v56  ;;  %v2145_v2 = vmax.f32 %v1876_v59, 0.0 }
 0x213   : > { %v1879_v61 = vpop.f32.mrf.mxu1  ;;  %2611 = vmatmul.mubr.bf16.gmra.mxu0 %v2254_v58 }
 0x214   : > { %v1880_v63 = vadd.f32 %v1879_v61, %v9425_v12  ;;  %v2146_v3 = vmax.f32 %v1878_v60, 0.0 }
 0x215   : > { %v1883_v1 = vpop.f32.mrf.mxu1 }
 0x216   : > { %v2147_v4 = vmax.f32 %v1880_v63, 0.0  ;;  %v2256_v11 = vpack.c.bf16 %v2146_v3, %v2144_v6  ;;  %v1884_v19 = vadd.f32 %v1883_v1, %v9428_v16 }
 0x217   : > { %v1885_v5 = vpop.f32.mrf.mxu1 }
 0x218   : > { %v2257_v7 = vpack.c.bf16 %v2147_v4, %v2145_v2  ;;  %v1886_v13 = vadd.f32 %v1885_v5, %v9425_v12  ;;  %v2148_v29 = vmax.f32 %v1884_v19, 0.0 }
 0x219   : > { %v1887_v10 = vpop.f32.mrf.mxu1 }
 0x21a   : > { %v1888_v14 = vadd.f32 %v1887_v10, %v9428_v16  ;;  %2620 = vmatprep.mubr.bf16.mxu0 %v2257_v7  ;;  %v2149_v23 = vmax.f32 %v1886_v13, 0.0  ;;  %v8471_v13 = vld [vmem:[%s11471_s9 + $0x30] ss:$8 sps:$4 sm:$0xff]  }
 0x21b   : > { %v1889_v18 = vpop.f32.mrf.mxu1  ;;  %2621 = vmatmul.mubr.bf16.gmra.mxu0 %v2256_v11 }
 0x21c   : > { %v1890_v20 = vadd.f32 %v1889_v18, %v9425_v12  ;;  %v2150_v28 = vmax.f32 %v1888_v14, 0.0  ;;  %v8473_v14 = vld [vmem:[%s11471_s9 + $0x34] ss:$8 sps:$4 sm:$0xff]  }
 0x21d   : > { %v1893_v22 = vpop.f32.mrf.mxu1  ;;  %4014 = vmatprep.subr.bf16.mxu0 %v8473_v14  ;;  %v8477_v14 = vld [vmem:[%s11471_s9 + $0x10] ss:$8 sps:$4 sm:$0xff]  }
 0x21e   : > { %v2151_v25 = vmax.f32 %v1890_v20, 0.0  ;;  %v2258_v31 = vpack.c.bf16 %v2150_v28, %v2148_v29  ;;  %v1894_v35 = vadd.f32 %v1893_v22, %v9428_v16  ;;  %4015 = vmatpush1.bf16.msra.mxu0 %v8471_v13 }
 0x21f   : > { %v1895_v26 = vpop.f32.mrf.mxu1 }
 0x220   : > { %v2259_v30 = vpack.c.bf16 %v2151_v25, %v2149_v23  ;;  %v1896_v32 = vadd.f32 %v1895_v26, %v9425_v12  ;;  %v2152_v42 = vmax.f32 %v1894_v35, 0.0 }
 0x221   : > { %v1897_v27 = vpop.f32.mrf.mxu1 }
 0x222   : > { %v1898_v33 = vadd.f32 %v1897_v27, %v9428_v16  ;;  %2630 = vmatprep.mubr.bf16.mxu0 %v2259_v30  ;;  %v2153_v38 = vmax.f32 %v1896_v32, 0.0 }
 0x223   : > { %v1899_v34 = vpop.f32.mrf.mxu1  ;;  %2631 = vmatmul.mubr.bf16.gmra.mxu0 %v2258_v31 }
 0x224   : > { %v1900_v36 = vadd.f32 %v1899_v34, %v9425_v12  ;;  %v2154_v39 = vmax.f32 %v1898_v33, 0.0 }
 0x225   : > { %v1903_v37 = vpop.f32.mrf.mxu1 }
 0x226   : > { %v2155_v40 = vmax.f32 %v1900_v36, 0.0  ;;  %v2260_v47 = vpack.c.bf16 %v2154_v39, %v2152_v42  ;;  %v1904_v51 = vadd.f32 %v1903_v37, %v9428_v16 }
 0x227   : > { %v1905_v41 = vpop.f32.mrf.mxu1 }
 0x228   : > { %v2261_v43 = vpack.c.bf16 %v2155_v40, %v2153_v38  ;;  %v1906_v48 = vadd.f32 %v1905_v41, %v9425_v12  ;;  %v2156_v58 = vmax.f32 %v1904_v51, 0.0 }
 0x229   : > { %v1907_v44 = vpop.f32.mrf.mxu1 }
 0x22a   : > { %v1908_v49 = vadd.f32 %v1907_v44, %v9428_v16  ;;  %2640 = vmatprep.mubr.bf16.mxu0 %v2261_v43  ;;  %v2157_v54 = vmax.f32 %v1906_v48, 0.0 }
 0x22b   : > { %v1909_v50 = vpop.f32.mrf.mxu1  ;;  %2641 = vmatmul.mubr.bf16.gmra.mxu0 %v2260_v47  ;;  %v8476_v47 = vld [vmem:[%s11471_s9 + $0x24] ss:$8 sps:$4 sm:$0xff]  }
 0x22c   : > { %v1910_v52 = vadd.f32 %v1909_v50, %v9425_v12  ;;  %v2158_v55 = vmax.f32 %v1908_v49, 0.0  ;;  %4016 = vmatprep.subr.bf16.mxu0 %v8476_v47  ;;  %v8480_v47 = vld [vmem:[%s11471_s9] ss:$8 sps:$4 sm:$0xff]  }
 0x22d   : > { %v1913_v53 = vpop.f32.mrf.mxu1  ;;  %4017 = vmatpush1.bf16.msra.mxu0 %v8474_v46 }
 0x22e   : > { %v2159_v56 = vmax.f32 %v1910_v52, 0.0  ;;  %v2262_v61 = vpack.c.bf16 %v2158_v55, %v2156_v58  ;;  %v1914_v2 = vadd.f32 %v1913_v53, %v9428_v16 }
 0x22f   : > { %v1915_v57 = vpop.f32.mrf.mxu1 }
 0x230   : > { %v2263_v59 = vpack.c.bf16 %v2159_v56, %v2157_v54  ;;  %v1916_v62 = vadd.f32 %v1915_v57, %v9425_v12  ;;  %v2160_v9 = vmax.f32 %v1914_v2, 0.0 }
 0x231   : > { %v1917_v60 = vpop.f32.mrf.mxu1 }
 0x232   : > { %v1918_v63 = vadd.f32 %v1917_v60, %v9428_v16  ;;  %2650 = vmatprep.mubr.bf16.mxu0 %v2263_v59  ;;  %v2161_v5 = vmax.f32 %v1916_v62, 0.0 }
 0x233   : > { %v1919_v1 = vpop.f32.mrf.mxu1  ;;  %2651 = vmatmul.mubr.bf16.gmra.mxu0 %v2262_v61 }
 0x234   : > { %v1920_v3 = vadd.f32 %v1919_v1, %v9425_v12  ;;  %v2162_v6 = vmax.f32 %v1918_v63, 0.0 }
 0x235   : > { %v1923_v4 = vpop.f32.mrf.mxu1 }
 0x236   : > { %v2163_v7 = vmax.f32 %v1920_v3, 0.0  ;;  %v2264_v15 = vpack.c.bf16 %v2162_v6, %v2160_v9  ;;  %v1924_v20 = vadd.f32 %v1923_v4, %v9428_v16 }
 0x237   : > { %v1925_v8 = vpop.f32.mrf.mxu1 }
 0x238   : > { %v2265_v10 = vpack.c.bf16 %v2163_v7, %v2161_v5  ;;  %v1926_v17 = vadd.f32 %v1925_v8, %v9425_v12  ;;  %v2164_v30 = vmax.f32 %v1924_v20, 0.0 }
 0x239   : > { %v1927_v11 = vpop.f32.mrf.mxu1 }
 0x23a   : > { %v1928_v18 = vadd.f32 %v1927_v11, %v9428_v16  ;;  %2660 = vmatprep.mubr.bf16.mxu0 %v2265_v10  ;;  %v2165_v28 = vmax.f32 %v1926_v17, 0.0 }
 0x23b   : > { %v1929_v19 = vpop.f32.mrf.mxu1  ;;  %2661 = vmatmul.mubr.bf16.gmra.mxu0 %v2264_v15  ;;  %v8479_v15 = vld [vmem:[%s11471_s9 + $0x14] ss:$8 sps:$4 sm:$0xff]  }
 0x23c   : > { %v1930_v22 = vadd.f32 %v1929_v19, %v9425_v12  ;;  %v2166_v25 = vmax.f32 %v1928_v18, 0.0  ;;  %4018 = vmatprep.subr.bf16.mxu0 %v8479_v15  ;;  %v8483_v15 = vld [vmem:[%s11471_s9 + $0xf0] ss:$8 sps:$4 sm:$0xff]  }
 0x23d   : > { %v1933_v23 = vpop.f32.mrf.mxu1  ;;  %4019 = vmatpush1.bf16.msra.mxu0 %v8477_v14 }
 0x23e   : > { %v2167_v26 = vmax.f32 %v1930_v22, 0.0  ;;  %v2266_v32 = vpack.c.bf16 %v2166_v25, %v2164_v30  ;;  %v1934_v36 = vadd.f32 %v1933_v23, %v9428_v16 }
 0x23f   : > { %v1935_v29 = vpop.f32.mrf.mxu1 }
 0x240   : > { %v2267_v27 = vpack.c.bf16 %v2167_v26, %v2165_v28  ;;  %v1936_v33 = vadd.f32 %v1935_v29, %v9425_v12  ;;  %v2168_v43 = vmax.f32 %v1934_v36, 0.0 }
 0x241   : > { %v1937_v31 = vpop.f32.mrf.mxu1 }
 0x242   : > { %v1938_v34 = vadd.f32 %v1937_v31, %v9428_v16  ;;  %2670 = vmatprep.mubr.bf16.mxu0 %v2267_v27  ;;  %v2169_v39 = vmax.f32 %v1936_v33, 0.0 }
 0x243   : > { %v1939_v35 = vpop.f32.mrf.mxu1  ;;  %2671 = vmatmul.mubr.bf16.gmra.mxu0 %v2266_v32 }
 0x244   : > { %v1940_v37 = vadd.f32 %v1939_v35, %v9425_v12  ;;  %v2170_v40 = vmax.f32 %v1938_v34, 0.0 }
 0x245   : > { %v1943_v38 = vpop.f32.mrf.mxu1 }
 0x246   : > { %v2171_v41 = vmax.f32 %v1940_v37, 0.0  ;;  %v2268_v48 = vpack.c.bf16 %v2170_v40, %v2168_v43  ;;  %v1944_v52 = vadd.f32 %v1943_v38, %v9428_v16 }
 0x247   : > { %v1945_v42 = vpop.f32.mrf.mxu1 }
 0x248   : > { %v2269_v44 = vpack.c.bf16 %v2171_v41, %v2169_v39  ;;  %v1946_v49 = vadd.f32 %v1945_v42, %v9425_v12  ;;  %v2172_v59 = vmax.f32 %v1944_v52, 0.0 }
 0x249   : > { %v1947_v45 = vpop.f32.mrf.mxu1 }
 0x24a   : > { %v1948_v50 = vadd.f32 %v1947_v45, %v9428_v16  ;;  %2680 = vmatprep.mubr.bf16.mxu0 %v2269_v44  ;;  %v2173_v55 = vmax.f32 %v1946_v49, 0.0 }
 0x24b   : > { %v1949_v51 = vpop.f32.mrf.mxu1  ;;  %2681 = vmatmul.mubr.bf16.gmra.mxu0 %v2268_v48  ;;  %v8482_v48 = vld [vmem:[%s11471_s9 + $0x4] ss:$8 sps:$4 sm:$0xff]  }
 0x24c   : > { %v1950_v53 = vadd.f32 %v1949_v51, %v9425_v12  ;;  %v2174_v56 = vmax.f32 %v1948_v50, 0.0  ;;  %4020 = vmatprep.subr.bf16.mxu0 %v8482_v48  ;;  %v8486_v48 = vld [vmem:[%s11471_s9 + $0xe0] ss:$8 sps:$4 sm:$0xff]  }
 0x24d   : > { %v1953_v54 = vpop.f32.mrf.mxu1  ;;  %4021 = vmatpush1.bf16.msra.mxu0 %v8480_v47 }
 0x24e   : > { %v2175_v57 = vmax.f32 %v1950_v53, 0.0  ;;  %v2270_v62 = vpack.c.bf16 %v2174_v56, %v2172_v59  ;;  %v1954_v3 = vadd.f32 %v1953_v54, %v9428_v16 }
 0x24f   : > { %v1955_v58 = vpop.f32.mrf.mxu1 }
 0x250   : > { %v2271_v60 = vpack.c.bf16 %v2175_v57, %v2173_v55  ;;  %v1956_v63 = vadd.f32 %v1955_v58, %v9425_v12  ;;  %v2176_v10 = vmax.f32 %v1954_v3, 0.0 }
 0x251   : > { %v1957_v61 = vpop.f32.mrf.mxu1 }
 0x252   : > { %v1958_v1 = vadd.f32 %v1957_v61, %v9428_v16  ;;  %2690 = vmatprep.mubr.bf16.mxu0 %v2271_v60  ;;  %v2177_v6 = vmax.f32 %v1956_v63, 0.0 }
 0x253   : > { %v1959_v2 = vpop.f32.mrf.mxu1  ;;  %2691 = vmatmul.mubr.bf16.gmra.mxu0 %v2270_v62 }
 0x254   : > { %v1960_v4 = vadd.f32 %v1959_v2, %v9425_v12  ;;  %v2178_v7 = vmax.f32 %v1958_v1, 0.0 }
 0x255   : > { %v1963_v5 = vpop.f32.mrf.mxu1 }
 0x256   : > { %v2179_v8 = vmax.f32 %v1960_v4, 0.0  ;;  %v2272_v17 = vpack.c.bf16 %v2178_v7, %v2176_v10  ;;  %v1964_v22 = vadd.f32 %v1963_v5, %v9428_v16 }
 0x257   : > { %v1965_v9 = vpop.f32.mrf.mxu1 }
 0x258   : > { %v2273_v11 = vpack.c.bf16 %v2179_v8, %v2177_v6  ;;  %v1966_v18 = vadd.f32 %v1965_v9, %v9425_v12  ;;  %v2180_v27 = vmax.f32 %v1964_v22, 0.0 }
 0x259   : > { %v1967_v13 = vpop.f32.mrf.mxu1 }
 0x25a   : > { %v1968_v19 = vadd.f32 %v1967_v13, %v9428_v16  ;;  %2700 = vmatprep.mubr.bf16.mxu0 %v2273_v11  ;;  %v2181_v25 = vmax.f32 %v1966_v18, 0.0 }
 0x25b   : > { %v1969_v20 = vpop.f32.mrf.mxu1  ;;  %2701 = vmatmul.mubr.bf16.gmra.mxu0 %v2272_v17  ;;  %v8485_v17 = vld [vmem:[%s11471_s9 + $0xf4] ss:$8 sps:$4 sm:$0xff]  }
 0x25c   : > { %v1970_v23 = vadd.f32 %v1969_v20, %v9425_v12  ;;  %v2182_v26 = vmax.f32 %v1968_v19, 0.0  ;;  %4022 = vmatprep.subr.bf16.mxu0 %v8485_v17  ;;  %v8489_v17 = vld [vmem:[%s11471_s9 + $0xd0] ss:$8 sps:$4 sm:$0xff]  }
 0x25d   : > { %v1973_v28 = vpop.f32.mrf.mxu1  ;;  %4023 = vmatpush2.bf16.msra.mxu0 %v8483_v15 }
 0x25e   : > { %v2183_v29 = vmax.f32 %v1970_v23, 0.0  ;;  %v2274_v33 = vpack.c.bf16 %v2182_v26, %v2180_v27  ;;  %v1974_v37 = vadd.f32 %v1973_v28, %v9428_v16 }
 0x25f   : > { %v1975_v30 = vpop.f32.mrf.mxu1 }
 0x260   : > { %v2275_v31 = vpack.c.bf16 %v2183_v29, %v2181_v25  ;;  %v1976_v34 = vadd.f32 %v1975_v30, %v9425_v12  ;;  %v2184_v44 = vmax.f32 %v1974_v37, 0.0 }
 0x261   : > { %v1977_v32 = vpop.f32.mrf.mxu1 }
 0x262   : > { %v1978_v35 = vadd.f32 %v1977_v32, %v9428_v16  ;;  %2710 = vmatprep.mubr.bf16.mxu0 %v2275_v31  ;;  %v2185_v40 = vmax.f32 %v1976_v34, 0.0 }
 0x263   : > { %v1979_v36 = vpop.f32.mrf.mxu1  ;;  %2711 = vmatmul.mubr.bf16.gmra.mxu0 %v2274_v33 }
 0x264   : > { %v1980_v38 = vadd.f32 %v1979_v36, %v9425_v12  ;;  %v2186_v41 = vmax.f32 %v1978_v35, 0.0 }
 0x265   : > { %v1983_v39 = vpop.f32.mrf.mxu1 }
 0x266   : > { %v2187_v42 = vmax.f32 %v1980_v38, 0.0  ;;  %v2276_v49 = vpack.c.bf16 %v2186_v41, %v2184_v44  ;;  %v1984_v53 = vadd.f32 %v1983_v39, %v9428_v16 }
 0x267   : > { %v1985_v43 = vpop.f32.mrf.mxu1 }
 0x268   : > { %v2277_v45 = vpack.c.bf16 %v2187_v42, %v2185_v40  ;;  %v1986_v50 = vadd.f32 %v1985_v43, %v9425_v12  ;;  %v2188_v60 = vmax.f32 %v1984_v53, 0.0 }
 0x269   : > { %v1987_v46 = vpop.f32.mrf.mxu1 }
 0x26a   : > { %v1988_v51 = vadd.f32 %v1987_v46, %v9428_v16  ;;  %2720 = vmatprep.mubr.bf16.mxu0 %v2277_v45  ;;  %v2189_v56 = vmax.f32 %v1986_v50, 0.0 }
 0x26b   : > { %v1989_v52 = vpop.f32.mrf.mxu1  ;;  %2721 = vmatmul.mubr.bf16.gmra.mxu0 %v2276_v49  ;;  %v8488_v49 = vld [vmem:[%s11471_s9 + $0xe4] ss:$8 sps:$4 sm:$0xff]  }
 0x26c   : > { %v1990_v54 = vadd.f32 %v1989_v52, %v9425_v12  ;;  %v2190_v57 = vmax.f32 %v1988_v51, 0.0  ;;  %4024 = vmatprep.subr.bf16.mxu0 %v8488_v49 }
 0x26d   : > { %v1993_v55 = vpop.f32.mrf.mxu1  ;;  %4025 = vmatpush2.bf16.msra.mxu0 %v8486_v48 }
 0x26e   : > { %v2191_v58 = vmax.f32 %v1990_v54, 0.0  ;;  %v2278_v63 = vpack.c.bf16 %v2190_v57, %v2188_v60  ;;  %v1994_v4 = vadd.f32 %v1993_v55, %v9428_v16 }
 0x26f   : > { %v1995_v59 = vpop.f32.mrf.mxu1 }
 0x270   : > { %v2279_v61 = vpack.c.bf16 %v2191_v58, %v2189_v56  ;;  %v1996_v1 = vadd.f32 %v1995_v59, %v9425_v12  ;;  %v2192_v11 = vmax.f32 %v1994_v4, 0.0 }
 0x271   : > { %v1997_v62 = vpop.f32.mrf.mxu1 }
 0x272   : > { %v1998_v2 = vadd.f32 %v1997_v62, %v9428_v16  ;;  %2730 = vmatprep.mubr.bf16.mxu0 %v2279_v61  ;;  %v2193_v7 = vmax.f32 %v1996_v1, 0.0 }
 0x273   : > { %v1999_v3 = vpop.f32.mrf.mxu1  ;;  %2731 = vmatmul.mubr.bf16.gmra.mxu0 %v2278_v63 }
 0x274   : > { %v2000_v5 = vadd.f32 %v1999_v3, %v9425_v12  ;;  %v2194_v8 = vmax.f32 %v1998_v2, 0.0 }
 0x275   : > { %v2003_v6 = vpop.f32.mrf.mxu1 }
 0x276   : > { %v2195_v9 = vmax.f32 %v2000_v5, 0.0  ;;  %v2280_v18 = vpack.c.bf16 %v2194_v8, %v2192_v11  ;;  %v2004_v23 = vadd.f32 %v2003_v6, %v9428_v16 }
 0x277   : > { %v2005_v10 = vpop.f32.mrf.mxu1 }
 0x278   : > { %v2281_v13 = vpack.c.bf16 %v2195_v9, %v2193_v7  ;;  %v2006_v19 = vadd.f32 %v2005_v10, %v9425_v12  ;;  %v2196_v31 = vmax.f32 %v2004_v23, 0.0 }
 0x279   : > { %v2007_v14 = vpop.f32.mrf.mxu1 }
 0x27a   : > { %v2008_v20 = vadd.f32 %v2007_v14, %v9428_v16  ;;  %2740 = vmatprep.mubr.bf16.mxu0 %v2281_v13  ;;  %v2197_v26 = vmax.f32 %v2006_v19, 0.0 }
 0x27b   : > { %v2009_v22 = vpop.f32.mrf.mxu1  ;;  %2741 = vmatmul.mubr.bf16.gmra.mxu0 %v2280_v18  ;;  %v8491_v18 = vld [vmem:[%s11471_s9 + $0xd4] ss:$8 sps:$4 sm:$0xff]  }
 0x27c   : > { %v2010_v28 = vadd.f32 %v2009_v22, %v9425_v12  ;;  %v2198_v29 = vmax.f32 %v2008_v20, 0.0  ;;  %4026 = vmatprep.subr.bf16.mxu0 %v8491_v18 }
 0x27d   : > { %v2013_v25 = vpop.f32.mrf.mxu1  ;;  %4027 = vmatpush2.bf16.msra.mxu0 %v8489_v17 }
 0x27e   : > { %v2199_v30 = vmax.f32 %v2010_v28, 0.0  ;;  %v2282_v34 = vpack.c.bf16 %v2198_v29, %v2196_v31  ;;  %v2014_v38 = vadd.f32 %v2013_v25, %v9428_v16 }
 0x27f   : > { %v2015_v27 = vpop.f32.mrf.mxu1 }
 0x280   : > { %v2283_v32 = vpack.c.bf16 %v2199_v30, %v2197_v26  ;;  %v2016_v35 = vadd.f32 %v2015_v27, %v9425_v12  ;;  %v2200_v45 = vmax.f32 %v2014_v38, 0.0  ;;  %v2336_v26 = vld [vmem:[%s11468_s6] sm:$0x3] }
 0x281   : > { %v2017_v33 = vpop.f32.mrf.mxu1 }
 0x282   : > { %v2018_v36 = vadd.f32 %v2017_v33, %v9428_v16  ;;  %2750 = vmatprep.mubr.bf16.mxu0 %v2283_v32  ;;  %v2201_v41 = vmax.f32 %v2016_v35, 0.0  ;;  %v9658_v33 = vrot.slane %v2336_v26, %v9180_v21  ;;  %v9661_v35 = vrot.slane %v2336_v26, %v9188_v24 }
 0x283   : > { %v2019_v37 = vpop.f32.mrf.mxu1  ;;  %2751 = vmatmul.mubr.bf16.gmra.mxu0 %v2282_v34 }
 0x284   : > { %v2020_v39 = vadd.f32 %v2019_v37, %v9425_v12  ;;  %v2202_v42 = vmax.f32 %v2018_v36, 0.0 }
 0x285   : > { %v2023_v40 = vpop.f32.mrf.mxu1 }
 0x286   : > { %v2203_v43 = vmax.f32 %v2020_v39, 0.0  ;;  %v2284_v50 = vpack.c.bf16 %v2202_v42, %v2200_v45  ;;  %v2024_v54 = vadd.f32 %v2023_v40, %v9428_v16 }
 0x287   : > { %v2025_v44 = vpop.f32.mrf.mxu1 }
 0x288   : > { %v2285_v46 = vpack.c.bf16 %v2203_v43, %v2201_v41  ;;  %v2026_v51 = vadd.f32 %v2025_v44, %v9425_v12  ;;  %v2204_v61 = vmax.f32 %v2024_v54, 0.0 }
 0x289   : > { %v2027_v47 = vpop.f32.mrf.mxu1 }
 0x28a   : > { %v2028_v52 = vadd.f32 %v2027_v47, %v9428_v16  ;;  %2760 = vmatprep.mubr.bf16.mxu0 %v2285_v46  ;;  %v2205_v57 = vmax.f32 %v2026_v51, 0.0 }
 0x28b   : > { %v2029_v53 = vpop.f32.mrf.mxu1  ;;  %2761 = vmatmul.mubr.bf16.gmra.mxu0 %v2284_v50 }
 0x28c   : > { %v2030_v55 = vadd.f32 %v2029_v53, %v9425_v12  ;;  %v2206_v58 = vmax.f32 %v2028_v52, 0.0 }
 0x28d   : > { %v2033_v56 = vpop.f32.mrf.mxu1 }
 0x28e   : > { %v2207_v59 = vmax.f32 %v2030_v55, 0.0  ;;  %v2286_v1 = vpack.c.bf16 %v2206_v58, %v2204_v61  ;;  %v2034_v5 = vadd.f32 %v2033_v56, %v9428_v16 }
 0x28f   : > { %v2035_v60 = vpop.f32.mrf.mxu1 }
 0x290   : > { %v2287_v62 = vpack.c.bf16 %v2207_v59, %v2205_v57  ;;  %v2036_v2 = vadd.f32 %v2035_v60, %v9425_v12  ;;  %v2208_v13 = vmax.f32 %v2034_v5, 0.0  ;;  %v8492_v5 = vld [vmem:[%s11471_s9 + $0xc0] ss:$8 sps:$4 sm:$0xff]  }
 0x291   : > { %v2037_v63 = vpop.f32.mrf.mxu1 }
 0x292   : > { %v2038_v3 = vadd.f32 %v2037_v63, %v9428_v16  ;;  %2770 = vmatprep.mubr.bf16.mxu0 %v2287_v62  ;;  %v2209_v8 = vmax.f32 %v2036_v2, 0.0 }
 0x293   : > { %v2039_v4 = vpop.f32.mrf.mxu1  ;;  %2771 = vmatmul.mubr.bf16.gmra.mxu0 %v2286_v1 }
 0x294   : > { %v2040_v6 = vadd.f32 %v2039_v4, %v9425_v12  ;;  %v2210_v9 = vmax.f32 %v2038_v3, 0.0 }
 0x295   : > { %v2043_v7 = vpop.f32.mrf.mxu1 }
 0x296   : > { %v2211_v10 = vmax.f32 %v2040_v6, 0.0  ;;  %v2288_v19 = vpack.c.bf16 %v2210_v9, %v2208_v13  ;;  %v2044_v28 = vadd.f32 %v2043_v7, %v9428_v16  ;;  %v8494_v6 = vld [vmem:[%s11471_s9 + $0xc4] ss:$8 sps:$4 sm:$0xff]  }
 0x297   : > { %v2045_v11 = vpop.f32.mrf.mxu1  ;;  %4028 = vmatprep.subr.bf16.mxu0 %v8494_v6  ;;  %v8495_v6 = vld [vmem:[%s11471_s9 + $0xb0] ss:$8 sps:$4 sm:$0xff]  }
 0x298   : > { %v2289_v14 = vpack.c.bf16 %v2211_v10, %v2209_v8  ;;  %v2046_v20 = vadd.f32 %v2045_v11, %v9425_v12  ;;  %v2212_v36 = vmax.f32 %v2044_v28, 0.0  ;;  %4029 = vmatpush2.bf16.msra.mxu0 %v8492_v5 }
 0x299   : > { %v2047_v15 = vpop.f32.mrf.mxu1 }
 0x29a   : > { %v2048_v22 = vadd.f32 %v2047_v15, %v9428_v16  ;;  %2780 = vmatprep.mubr.bf16.mxu0 %v2289_v14  ;;  %v2213_v30 = vmax.f32 %v2046_v20, 0.0 }
 0x29b   : > { %v2049_v23 = vpop.f32.mrf.mxu1  ;;  %v2542_v29 = vpop.f32.mrf.mxu0  ;;  %2781 = vmatmul.mubr.bf16.gmra.mxu0 %v2288_v19 }
 0x29c   : > { %v2050_v25 = vadd.f32 %v2049_v23, %v9425_v12  ;;  %v2214_v27 = vmax.f32 %v2048_v22, 0.0  ;;  %v2543_v45 = vadd.f32 %v2542_v29, %v9661_v35 }
 0x29d   : > { %v2053_v32 = vpop.f32.mrf.mxu1  ;;  %v2544_v34 = vpop.f32.mrf.mxu0 }
 0x29e   : > { %v2215_v31 = vmax.f32 %v2050_v25, 0.0  ;;  %v2290_v41 = vpack.c.bf16 %v2214_v27, %v2212_v36  ;;  %v2545_v42 = vadd.f32 %v2544_v34, %v9658_v33  ;;  %v2054_v51 = vadd.f32 %v2053_v32, %v9428_v16 }
 0x29f   : > { %v2055_v37 = vpop.f32.mrf.mxu1  ;;  %v2546_v38 = vpop.f32.mrf.mxu0  ;;  %v2861_v58 = vmax.f32 %v2543_v45, 0.0 }
 0x2a0   : > { %v2291_v39 = vpack.c.bf16 %v2215_v31, %v2213_v30  ;;  %v2547_v40 = vadd.f32 %v2546_v38, %v9661_v35  ;;  %v2056_v48 = vadd.f32 %v2055_v37, %v9425_v12  ;;  %v2862_v55 = vmax.f32 %v2545_v42, 0.0 }
 0x2a1   : > { %v2057_v43 = vpop.f32.mrf.mxu1  ;;  %v2548_v44 = vpop.f32.mrf.mxu0  ;;  %v2216_v2 = vmax.f32 %v2054_v51, 0.0 }
 0x2a2   : > { %2790 = vmatprep.mubr.bf16.mxu0 %v2291_v39  ;;  %v2058_v46 = vadd.f32 %v2057_v43, %v9428_v16  ;;  %v2549_v47 = vadd.f32 %v2548_v44, %v9658_v33  ;;  %v2863_v52 = vmax.f32 %v2547_v40, 0.0  ;;  %v2217_v61 = vmax.f32 %v2056_v48, 0.0 }
 0x2a3   : > { %v2059_v49 = vpop.f32.mrf.mxu1  ;;  %v2552_v50 = vpop.f32.mrf.mxu0  ;;  %2791 = vmatmul.mubr.bf16.gmra.mxu0 %v2290_v41 }
 0x2a4   : > { %v2864_v53 = vmax.f32 %v2549_v47, 0.0  ;;  %v2060_v54 = vadd.f32 %v2059_v49, %v9425_v12  ;;  %v2218_v59 = vmax.f32 %v2058_v46, 0.0  ;;  %v2989_v3 = vpack.c.bf16 %v2863_v52, %v2861_v58 }
 0x2a5   : > { %v2063_v56 = vpop.f32.mrf.mxu1  ;;  %v2554_v57 = vpop.f32.mrf.mxu0  ;;  %v2553_v7 = vadd.f32 %v2552_v50, %v9661_v35 }
 0x2a6   : > { %v2219_v60 = vmax.f32 %v2060_v54, 0.0  ;;  %v2990_v1 = vpack.c.bf16 %v2864_v53, %v2862_v55  ;;  %v2555_v8 = vadd.f32 %v2554_v57, %v9658_v33  ;;  %v2292_v13 = vpack.c.bf16 %v2218_v59, %v2216_v2 }
 0x2a7   : > { %v2065_v62 = vpop.f32.mrf.mxu1  ;;  %v2556_v63 = vpop.f32.mrf.mxu0  ;;  %v2064_v20 = vadd.f32 %v2063_v56, %v9428_v16  ;;  %v2865_v30 = vmax.f32 %v2553_v7, 0.0  ;;  %v8497_v7 = vld [vmem:[%s11471_s9 + $0xb4] ss:$8 sps:$4 sm:$0xff]  }
 0x2a8   : > { %v2557_v4 = vadd.f32 %v2556_v63, %v9661_v35  ;;  %3289 = vmatprep.mubr.bf16.mxu1 %v2990_v1  ;;  %v2293_v11 = vpack.c.bf16 %v2219_v60, %v2217_v61  ;;  %v2066_v17 = vadd.f32 %v2065_v62, %v9425_v12  ;;  %v2866_v25 = vmax.f32 %v2555_v8, 0.0  ;;  %4030 = vmatprep.subr.bf16.mxu0 %v8497_v7 }
 0x2a9   : > { %v2067_v9 = vpop.f32.mrf.mxu1  ;;  %v2558_v10 = vpop.f32.mrf.mxu0  ;;  %3290 = vmatmul.mubr.bf16.vlgmr.msra.gmra.mxu1 %v2989_v3  ;;  %v2220_v38 = vmax.f32 %v2064_v20, 0.0  ;;  %4031 = vmatpush2.bf16.msra.mxu0 %v8495_v6 }
 0x2aa   : > { %v2068_v14 = vadd.f32 %v2067_v9, %v9428_v16  ;;  %v2559_v15 = vadd.f32 %v2558_v10, %v9658_v33  ;;  %2800 = vmatprep.mubr.bf16.mxu0 %v2293_v11  ;;  %v2867_v22 = vmax.f32 %v2557_v4, 0.0  ;;  %v2221_v32 = vmax.f32 %v2066_v17, 0.0 }
 0x2ab   : > { %v2069_v18 = vpop.f32.mrf.mxu1  ;;  %v2562_v19 = vpop.f32.mrf.mxu0  ;;  %2801 = vmatmul.mubr.bf16.gmra.mxu0 %v2292_v13 }
 0x2ac   : > { %v2868_v23 = vmax.f32 %v2559_v15, 0.0  ;;  %v2070_v28 = vadd.f32 %v2069_v18, %v9425_v12  ;;  %v2222_v27 = vmax.f32 %v2068_v14, 0.0  ;;  %v2991_v39 = vpack.c.bf16 %v2867_v22, %v2865_v30 }
 0x2ad   : > { %v2073_v26 = vpop.f32.mrf.mxu1  ;;  %v2564_v29 = vpop.f32.mrf.mxu0  ;;  %v2563_v46 = vadd.f32 %v2562_v19, %v9661_v35 }
 0x2ae   : > { %v2223_v31 = vmax.f32 %v2070_v28, 0.0  ;;  %v2992_v37 = vpack.c.bf16 %v2868_v23, %v2866_v25  ;;  %v2565_v41 = vadd.f32 %v2564_v29, %v9658_v33  ;;  %v2294_v45 = vpack.c.bf16 %v2222_v27, %v2220_v38 }
 0x2af   : > { %v2075_v34 = vpop.f32.mrf.mxu1  ;;  %v2566_v36 = vpop.f32.mrf.mxu0  ;;  %v2074_v52 = vadd.f32 %v2073_v26, %v9428_v16  ;;  %v2869_v59 = vmax.f32 %v2563_v46, 0.0 }
 0x2b0   : > { %v2567_v40 = vadd.f32 %v2566_v36, %v9661_v35  ;;  %3299 = vmatprep.mubr.bf16.mxu1 %v2992_v37  ;;  %v2295_v44 = vpack.c.bf16 %v2223_v31, %v2221_v32  ;;  %v2076_v49 = vadd.f32 %v2075_v34, %v9425_v12  ;;  %v2870_v56 = vmax.f32 %v2565_v41, 0.0 }
 0x2b1   : > { %v2077_v42 = vpop.f32.mrf.mxu1  ;;  %v2568_v43 = vpop.f32.mrf.mxu0  ;;  %3300 = vmatmul.mubr.bf16.gmra.mxu1 %v2991_v39  ;;  %v2224_v3 = vmax.f32 %v2074_v52, 0.0 }
 0x2b2   : > { %v2078_v47 = vadd.f32 %v2077_v42, %v9428_v16  ;;  %v2569_v48 = vadd.f32 %v2568_v43, %v9658_v33  ;;  %2810 = vmatprep.mubr.bf16.mxu0 %v2295_v44  ;;  %v2871_v53 = vmax.f32 %v2567_v40, 0.0  ;;  %v2225_v62 = vmax.f32 %v2076_v49, 0.0 }
 0x2b3   : > { %v2079_v50 = vpop.f32.mrf.mxu1  ;;  %v2572_v51 = vpop.f32.mrf.mxu0  ;;  %2811 = vmatmul.mubr.bf16.gmra.mxu0 %v2294_v45 }
 0x2b4   : > { %v2872_v54 = vmax.f32 %v2569_v48, 0.0  ;;  %v2080_v55 = vadd.f32 %v2079_v50, %v9425_v12  ;;  %v2226_v60 = vmax.f32 %v2078_v47, 0.0  ;;  %v2993_v4 = vpack.c.bf16 %v2871_v53, %v2869_v59 }
 0x2b5   : > { %v2083_v57 = vpop.f32.mrf.mxu1  ;;  %v2574_v58 = vpop.f32.mrf.mxu0  ;;  %v2573_v8 = vadd.f32 %v2572_v51, %v9661_v35 }
 0x2b6   : > { %v2227_v61 = vmax.f32 %v2080_v55, 0.0  ;;  %v2994_v2 = vpack.c.bf16 %v2872_v54, %v2870_v56  ;;  %v2575_v9 = vadd.f32 %v2574_v58, %v9658_v33  ;;  %v2296_v14 = vpack.c.bf16 %v2226_v60, %v2224_v3 }
 0x2b7   : > { %v2085_v63 = vpop.f32.mrf.mxu1  ;;  %v2576_v1 = vpop.f32.mrf.mxu0  ;;  %v2084_v22 = vadd.f32 %v2083_v57, %v9428_v16  ;;  %v2873_v27 = vmax.f32 %v2573_v8, 0.0  ;;  %v8498_v8 = vld [vmem:[%s11471_s9 + $0xa0] ss:$8 sps:$4 sm:$0xff]  }
 0x2b8   : > { %v2577_v5 = vadd.f32 %v2576_v1, %v9661_v35  ;;  %3309 = vmatprep.mubr.bf16.mxu1 %v2994_v2  ;;  %v2297_v13 = vpack.c.bf16 %v2227_v61, %v2225_v62  ;;  %v2086_v18 = vadd.f32 %v2085_v63, %v9425_v12  ;;  %v2874_v26 = vmax.f32 %v2575_v9, 0.0  ;;  %v8500_v9 = vld [vmem:[%s11471_s9 + $0xa4] ss:$8 sps:$4 sm:$0xff]  }
 0x2b9   : > { %v2087_v10 = vpop.f32.mrf.mxu1  ;;  %v2578_v11 = vpop.f32.mrf.mxu0  ;;  %3310 = vmatmul.mubr.bf16.gmra.mxu1 %v2993_v4  ;;  %v2228_v39 = vmax.f32 %v2084_v22, 0.0  ;;  %4032 = vmatprep.subr.bf16.mxu0 %v8500_v9 }
 0x2ba   : > { %v2088_v15 = vadd.f32 %v2087_v10, %v9428_v16  ;;  %v2579_v17 = vadd.f32 %v2578_v11, %v9658_v33  ;;  %2820 = vmatprep.mubr.bf16.mxu0 %v2297_v13  ;;  %v2875_v23 = vmax.f32 %v2577_v5, 0.0  ;;  %v2229_v34 = vmax.f32 %v2086_v18, 0.0  ;;  %4033 = vmatpush2.bf16.msra.mxu0 %v8498_v8 }
 0x2bb   : > { %v2089_v19 = vpop.f32.mrf.mxu1  ;;  %v2582_v20 = vpop.f32.mrf.mxu0  ;;  %2821 = vmatmul.mubr.bf16.gmra.mxu0 %v2296_v14 }
 0x2bc   : > { %v2876_v28 = vmax.f32 %v2579_v17, 0.0  ;;  %v2090_v25 = vadd.f32 %v2089_v19, %v9425_v12  ;;  %v2230_v31 = vmax.f32 %v2088_v15, 0.0  ;;  %v2995_v40 = vpack.c.bf16 %v2875_v23, %v2873_v27 }
 0x2bd   : > { %v2093_v29 = vpop.f32.mrf.mxu1  ;;  %v2584_v30 = vpop.f32.mrf.mxu0  ;;  %v2583_v47 = vadd.f32 %v2582_v20, %v9661_v35 }
 0x2be   : > { %v2231_v32 = vmax.f32 %v2090_v25, 0.0  ;;  %v2996_v38 = vpack.c.bf16 %v2876_v28, %v2874_v26  ;;  %v2585_v42 = vadd.f32 %v2584_v30, %v9658_v33  ;;  %v2298_v46 = vpack.c.bf16 %v2230_v31, %v2228_v39 }
 0x2bf   : > { %v2095_v36 = vpop.f32.mrf.mxu1  ;;  %v2586_v37 = vpop.f32.mrf.mxu0  ;;  %v2094_v50 = vadd.f32 %v2093_v29, %v9428_v16  ;;  %v2877_v61 = vmax.f32 %v2583_v47, 0.0 }
 0x2c0   : > { %v2587_v41 = vadd.f32 %v2586_v37, %v9661_v35  ;;  %3319 = vmatprep.mubr.bf16.mxu1 %v2996_v38  ;;  %v2299_v45 = vpack.c.bf16 %v2231_v32, %v2229_v34  ;;  %v2096_v51 = vadd.f32 %v2095_v36, %v9425_v12  ;;  %v2878_v57 = vmax.f32 %v2585_v42, 0.0 }
 0x2c1   : > { %v2097_v43 = vpop.f32.mrf.mxu1  ;;  %v2588_v44 = vpop.f32.mrf.mxu0  ;;  %3320 = vmatmul.mubr.bf16.gmra.mxu1 %v2995_v40  ;;  %v2232_v63 = vmax.f32 %v2094_v50, 0.0 }
 0x2c2   : > { %v2098_v48 = vadd.f32 %v2097_v43, %v9428_v16  ;;  %v2589_v49 = vadd.f32 %v2588_v44, %v9658_v33  ;;  %2830 = vmatprep.mubr.bf16.mxu0 %v2299_v45  ;;  %v2879_v54 = vmax.f32 %v2587_v41, 0.0  ;;  %v2233_v1 = vmax.f32 %v2096_v51, 0.0 }
 0x2c3   : > { %v2099_v52 = vpop.f32.mrf.mxu1  ;;  %v2592_v53 = vpop.f32.mrf.mxu0  ;;  %2831 = vmatmul.mubr.bf16.gmra.mxu0 %v2298_v46 }
 0x2c4   : > { %v2880_v55 = vmax.f32 %v2589_v49, 0.0  ;;  %v2100_v56 = vadd.f32 %v2099_v52, %v9425_v12  ;;  %v2234_v58 = vmax.f32 %v2098_v48, 0.0  ;;  %v2997_v5 = vpack.c.bf16 %v2879_v54, %v2877_v61 }
 0x2c5   : > { %v2103_v59 = vpop.f32.mrf.mxu1  ;;  %v2594_v60 = vpop.f32.mrf.mxu0  ;;  %v2593_v11 = vadd.f32 %v2592_v53, %v9661_v35 }
 0x2c6   : > { %v2235_v62 = vmax.f32 %v2100_v56, 0.0  ;;  %v2998_v4 = vpack.c.bf16 %v2880_v55, %v2878_v57  ;;  %v2595_v6 = vadd.f32 %v2594_v60, %v9658_v33  ;;  %v2300_v10 = vpack.c.bf16 %v2234_v58, %v2232_v63  ;;  %v8501_v56 = vld [vmem:[%s11471_s9 + $0x90] ss:$8 sps:$4 sm:$0xff]   ;;  %v8503_v57 = vld [vmem:[%s11471_s9 + $0x94] ss:$8 sps:$4 sm:$0xff]  }
 0x2c7   : > { %v2105_v2 = vpop.f32.mrf.mxu1  ;;  %v2596_v3 = vpop.f32.mrf.mxu0  ;;  %v2104_v20 = vadd.f32 %v2103_v59, %v9428_v16  ;;  %v2881_v30 = vmax.f32 %v2593_v11, 0.0  ;;  %4034 = vmatprep.subr.bf16.mxu0 %v8503_v57 }
 0x2c8   : > { %v2597_v7 = vadd.f32 %v2596_v3, %v9661_v35  ;;  %3329 = vmatprep.mubr.bf16.mxu1 %v2998_v4  ;;  %v2301_v15 = vpack.c.bf16 %v2235_v62, %v2233_v1  ;;  %v2106_v17 = vadd.f32 %v2105_v2, %v9425_v12  ;;  %v2882_v28 = vmax.f32 %v2595_v6, 0.0  ;;  %4035 = vmatpush2.bf16.msra.mxu0 %v8501_v56 }
 0x2c9   : > { %v2107_v13 = vpop.f32.mrf.mxu1  ;;  %v2598_v14 = vpop.f32.mrf.mxu0  ;;  %3330 = vmatmul.mubr.bf16.gmra.mxu1 %v2997_v5  ;;  %v2236_v37 = vmax.f32 %v2104_v20, 0.0 }
 0x2ca   : > { %v2108_v18 = vadd.f32 %v2107_v13, %v9428_v16  ;;  %v2599_v19 = vadd.f32 %v2598_v14, %v9658_v33  ;;  %2840 = vmatprep.mubr.bf16.mxu0 %v2301_v15  ;;  %v2883_v25 = vmax.f32 %v2597_v7, 0.0  ;;  %v2237_v31 = vmax.f32 %v2106_v17, 0.0 }
 0x2cb   : > { %v2109_v22 = vpop.f32.mrf.mxu1  ;;  %v2602_v23 = vpop.f32.mrf.mxu0  ;;  %2841 = vmatmul.mubr.bf16.gmra.mxu0 %v2300_v10 }
 0x2cc   : > { %v2884_v26 = vmax.f32 %v2599_v19, 0.0  ;;  %v2110_v29 = vadd.f32 %v2109_v22, %v9425_v12  ;;  %v2238_v32 = vmax.f32 %v2108_v18, 0.0  ;;  %v2999_v39 = vpack.c.bf16 %v2883_v25, %v2881_v30 }
 0x2cd   : > { %v2604_v27 = vpop.f32.mrf.mxu0  ;;  %v2603_v12 = vadd.f32 %v2602_v23, %v9661_v35 }
 0x2ce   : > { %v2239_v34 = vmax.f32 %v2110_v29, 0.0  ;;  %v3000_v36 = vpack.c.bf16 %v2884_v26, %v2882_v28  ;;  %v2605_v16 = vadd.f32 %v2604_v27, %v9658_v33  ;;  %v2302_v43 = vpack.c.bf16 %v2238_v32, %v2236_v37  ;;  %v8504_v26 = vld [vmem:[%s11471_s9 + $0x80] ss:$8 sps:$4 sm:$0xff]   ;;  %v8506_v29 = vld [vmem:[%s11471_s9 + $0x84] ss:$8 sps:$4 sm:$0xff]  }
 0x2cf   : > { %v2606_v38 = vpop.f32.mrf.mxu0  ;;  %v2885_v50 = vmax.f32 %v2603_v12, 0.0  ;;  %4036 = vmatprep.subr.bf16.mxu0 %v8506_v29 }
 0x2d0   : > { %v2607_v40 = vadd.f32 %v2606_v38, %v9661_v35  ;;  %3339 = vmatprep.mubr.bf16.mxu1 %v3000_v36  ;;  %v2303_v41 = vpack.c.bf16 %v2239_v34, %v2237_v31  ;;  %v2886_v46 = vmax.f32 %v2605_v16, 0.0  ;;  %4037 = vmatpush2.bf16.msra.mxu0 %v8504_v26 }
 0x2d1   : > { %v2608_v42 = vpop.f32.mrf.mxu0  ;;  %3340 = vmatmul.mubr.bf16.gmra.mxu1 %v2999_v39 }
 0x2d2   : > { %v2609_v44 = vadd.f32 %v2608_v42, %v9658_v33  ;;  %2850 = vmatprep.mubr.bf16.mxu0 %v2303_v41  ;;  %v2887_v47 = vmax.f32 %v2607_v40, 0.0 }
 0x2d3   : > { %v2612_v45 = vpop.f32.mrf.mxu0  ;;  %2851 = vmatmul.mubr.bf16.gmra.mxu0 %v2302_v43 }
 0x2d4   : > { %v2888_v48 = vmax.f32 %v2609_v44, 0.0  ;;  %v3001_v53 = vpack.c.bf16 %v2887_v47, %v2885_v50  ;;  %v2613_v59 = vadd.f32 %v2612_v45, %v9661_v35 }
 0x2d5   : > { %v2614_v49 = vpop.f32.mrf.mxu0 }
 0x2d6   : > { %v3002_v51 = vpack.c.bf16 %v2888_v48, %v2886_v46  ;;  %v2615_v54 = vadd.f32 %v2614_v49, %v9658_v33  ;;  %v2889_v3 = vmax.f32 %v2613_v59, 0.0 }
 0x2d7   : > { %v2616_v52 = vpop.f32.mrf.mxu0 }
 0x2d8   : > { %v2617_v55 = vadd.f32 %v2616_v52, %v9661_v35  ;;  %3349 = vmatprep.mubr.bf16.mxu1 %v3002_v51  ;;  %v2890_v62 = vmax.f32 %v2615_v54, 0.0 }
 0x2d9   : > { %v2618_v58 = vpop.f32.mrf.mxu0  ;;  %3350 = vmatmul.mubr.bf16.gmra.mxu1 %v3001_v53 }
 0x2da   : > { %v2619_v60 = vadd.f32 %v2618_v58, %v9658_v33  ;;  %v2891_v63 = vmax.f32 %v2617_v55, 0.0 }
 0x2db   : > { %v2622_v61 = vpop.f32.mrf.mxu0 }
 0x2dc   : > { %v2892_v1 = vmax.f32 %v2619_v60, 0.0  ;;  %v3003_v6 = vpack.c.bf16 %v2891_v63, %v2889_v3  ;;  %v2623_v10 = vadd.f32 %v2622_v61, %v9661_v35  ;;  %v9768_v61 = vld [vmem:[%s11474_s12 + $0x70] ss:$8 sps:$4 sm:$0xff]  }
 0x2dd   : > { %v2624_v2 = vpop.f32.mrf.mxu0 }
 0x2de   : > { %v3004_v4 = vpack.c.bf16 %v2892_v1, %v2890_v62  ;;  %v2625_v7 = vadd.f32 %v2624_v2, %v9658_v33  ;;  %v2893_v19 = vmax.f32 %v2623_v10, 0.0  ;;  %v8509_v62 = vld [vmem:[%s11474_s12 + $0x74] ss:$8 sps:$4 sm:$0xff]  }
 0x2df   : > { %v2626_v5 = vpop.f32.mrf.mxu0  ;;  %4744 = vmatprep.subr.bf16.mxu0 %v8509_v62  ;;  %8215 = vmatprep.subr.bf16.mxu1 %v8509_v62 }
 0x2e0   : > { %v2627_v8 = vadd.f32 %v2626_v5, %v9661_v35  ;;  %3359 = vmatprep.mubr.bf16.mxu1 %v3004_v4  ;;  %v2894_v14 = vmax.f32 %v2625_v7, 0.0  ;;  %8231 = vmatpush1.bf16.msra.mxu1 %v9768_v61 }
 0x2e1   : > { %v2628_v9 = vpop.f32.mrf.mxu0  ;;  %3360 = vmatmul.mubr.bf16.gmra.mxu1 %v3003_v6 }
 0x2e2   : > { %v2629_v11 = vadd.f32 %v2628_v9, %v9658_v33  ;;  %v2895_v15 = vmax.f32 %v2627_v8, 0.0 }
 0x2e3   : > { %v2632_v13 = vpop.f32.mrf.mxu0 }
 0x2e4   : > { %v2896_v17 = vmax.f32 %v2629_v11, 0.0  ;;  %v3005_v23 = vpack.c.bf16 %v2895_v15, %v2893_v19  ;;  %v2633_v27 = vadd.f32 %v2632_v13, %v9661_v35 }
 0x2e5   : > { %v2634_v18 = vpop.f32.mrf.mxu0 }
 0x2e6   : > { %v3006_v20 = vpack.c.bf16 %v2896_v17, %v2894_v14  ;;  %v2635_v28 = vadd.f32 %v2634_v18, %v9658_v33  ;;  %v2897_v39 = vmax.f32 %v2633_v27, 0.0 }
 0x2e7   : > { %v2636_v22 = vpop.f32.mrf.mxu0 }
 0x2e8   : > { %v2637_v25 = vadd.f32 %v2636_v22, %v9661_v35  ;;  %3369 = vmatprep.mubr.bf16.mxu1 %v3006_v20  ;;  %v2898_v34 = vmax.f32 %v2635_v28, 0.0 }
 0x2e9   : > { %v2638_v30 = vpop.f32.mrf.mxu0  ;;  %3370 = vmatmul.mubr.bf16.gmra.mxu1 %v3005_v23 }
 0x2ea   : > { %v2639_v31 = vadd.f32 %v2638_v30, %v9658_v33  ;;  %v2899_v36 = vmax.f32 %v2637_v25, 0.0 }
 0x2eb   : > { %v2642_v32 = vpop.f32.mrf.mxu0 }
 0x2ec   : > { %v2900_v37 = vmax.f32 %v2639_v31, 0.0  ;;  %v3007_v41 = vpack.c.bf16 %v2899_v36, %v2897_v39  ;;  %v2643_v44 = vadd.f32 %v2642_v32, %v9661_v35  ;;  %v9785_v32 = vld [vmem:[%s11474_s12 + $0x60] ss:$8 sps:$4 sm:$0xff]  }
 0x2ed   : > { %v2644_v38 = vpop.f32.mrf.mxu0 }
 0x2ee   : > { %v3008_v16 = vpack.c.bf16 %v2900_v37, %v2898_v34  ;;  %v2645_v42 = vadd.f32 %v2644_v38, %v9658_v33  ;;  %v2901_v51 = vmax.f32 %v2643_v44, 0.0  ;;  %v9790_v34 = vld [vmem:[%s11474_s12 + $0x64] ss:$8 sps:$4 sm:$0xff]  }
 0x2ef   : > { %v2646_v40 = vpop.f32.mrf.mxu0  ;;  %8216 = vmatprep.subr.bf16.mxu1 %v9790_v34 }
 0x2f0   : > { %v2647_v43 = vadd.f32 %v2646_v40, %v9661_v35  ;;  %3379 = vmatprep.mubr.bf16.mxu1 %v3008_v16  ;;  %v2902_v47 = vmax.f32 %v2645_v42, 0.0  ;;  %8232 = vmatpush1.bf16.msra.mxu1 %v9785_v32 }
 0x2f1   : > { %v2648_v12 = vpop.f32.mrf.mxu0  ;;  %3380 = vmatmul.mubr.bf16.gmra.mxu1 %v3007_v41 }
 0x2f2   : > { %v2649_v45 = vadd.f32 %v2648_v12, %v9658_v33  ;;  %v2903_v48 = vmax.f32 %v2647_v43, 0.0 }
 0x2f3   : > { %v2652_v46 = vpop.f32.mrf.mxu0 }
 0x2f4   : > { %v2904_v49 = vmax.f32 %v2649_v45, 0.0  ;;  %v3009_v54 = vpack.c.bf16 %v2903_v48, %v2901_v51  ;;  %v2653_v58 = vadd.f32 %v2652_v46, %v9661_v35 }
 0x2f5   : > { %v2654_v50 = vpop.f32.mrf.mxu0 }
 0x2f6   : > { %v3010_v52 = vpack.c.bf16 %v2904_v49, %v2902_v47  ;;  %v2655_v55 = vadd.f32 %v2654_v50, %v9658_v33  ;;  %v2905_v4 = vmax.f32 %v2653_v58, 0.0 }
 0x2f7   : > { %v2656_v53 = vpop.f32.mrf.mxu0 }
 0x2f8   : > { %v2657_v56 = vadd.f32 %v2656_v53, %v9661_v35  ;;  %3389 = vmatprep.mubr.bf16.mxu1 %v3010_v52  ;;  %v2906_v63 = vmax.f32 %v2655_v55, 0.0 }
 0x2f9   : > { %v2658_v57 = vpop.f32.mrf.mxu0  ;;  %3390 = vmatmul.mubr.bf16.gmra.mxu1 %v3009_v54 }
 0x2fa   : > { %v2659_v59 = vadd.f32 %v2658_v57, %v9658_v33  ;;  %v2907_v1 = vmax.f32 %v2657_v56, 0.0 }
 0x2fb   : > { %v2662_v60 = vpop.f32.mrf.mxu0 }
 0x2fc   : > { %v2908_v2 = vmax.f32 %v2659_v59, 0.0  ;;  %v3011_v7 = vpack.c.bf16 %v2907_v1, %v2905_v4  ;;  %v2663_v11 = vadd.f32 %v2662_v60, %v9661_v35  ;;  %v9810_v1 = vld [vmem:[%s11474_s12 + $0x54] ss:$8 sps:$4 sm:$0xff]  }
 0x2fd   : > { %v2664_v3 = vpop.f32.mrf.mxu0  ;;  %8217 = vmatprep.subr.bf16.mxu1 %v9810_v1 }
 0x2fe   : > { %v3012_v5 = vpack.c.bf16 %v2908_v2, %v2906_v63  ;;  %v2665_v8 = vadd.f32 %v2664_v3, %v9658_v33  ;;  %v2909_v20 = vmax.f32 %v2663_v11, 0.0  ;;  %v9805_v63 = vld [vmem:[%s11474_s12 + $0x50] ss:$8 sps:$4 sm:$0xff]  }
 0x2ff   : > { %v2666_v6 = vpop.f32.mrf.mxu0  ;;  %8233 = vmatpush1.bf16.msra.mxu1 %v9805_v63 }
 0x300   : > { %v2667_v9 = vadd.f32 %v2666_v6, %v9661_v35  ;;  %3399 = vmatprep.mubr.bf16.mxu1 %v3012_v5  ;;  %v2910_v15 = vmax.f32 %v2665_v8, 0.0 }
 0x301   : > { %v2668_v10 = vpop.f32.mrf.mxu0  ;;  %3400 = vmatmul.mubr.bf16.gmra.mxu1 %v3011_v7 }
 0x302   : > { %v2669_v13 = vadd.f32 %v2668_v10, %v9658_v33  ;;  %v2911_v17 = vmax.f32 %v2667_v9, 0.0 }
 0x303   : > { %v2672_v14 = vpop.f32.mrf.mxu0 }
 0x304   : > { %v2912_v18 = vmax.f32 %v2669_v13, 0.0  ;;  %v3013_v28 = vpack.c.bf16 %v2911_v17, %v2909_v20  ;;  %v2673_v30 = vadd.f32 %v2672_v14, %v9661_v35 }
 0x305   : > { %v2674_v19 = vpop.f32.mrf.mxu0 }
 0x306   : > { %v3014_v22 = vpack.c.bf16 %v2912_v18, %v2910_v15  ;;  %v2675_v25 = vadd.f32 %v2674_v19, %v9658_v33  ;;  %v2913_v16 = vmax.f32 %v2673_v30, 0.0 }
 0x307   : > { %v2676_v23 = vpop.f32.mrf.mxu0 }
 0x308   : > { %v2677_v26 = vadd.f32 %v2676_v23, %v9661_v35  ;;  %3409 = vmatprep.mubr.bf16.mxu1 %v3014_v22  ;;  %v2914_v36 = vmax.f32 %v2675_v25, 0.0 }
 0x309   : > { %v2678_v29 = vpop.f32.mrf.mxu0  ;;  %3410 = vmatmul.mubr.bf16.gmra.mxu1 %v3013_v28 }
 0x30a   : > { %v2679_v27 = vadd.f32 %v2678_v29, %v9658_v33  ;;  %v2915_v37 = vmax.f32 %v2677_v26, 0.0 }
 0x30b   : > { %v2682_v31 = vpop.f32.mrf.mxu0 }
 0x30c   : > { %v2916_v38 = vmax.f32 %v2679_v27, 0.0  ;;  %v3015_v42 = vpack.c.bf16 %v2915_v37, %v2913_v16  ;;  %v2683_v45 = vadd.f32 %v2682_v31, %v9661_v35 }
 0x30d   : > { %v2684_v39 = vpop.f32.mrf.mxu0 }
 0x30e   : > { %v3016_v40 = vpack.c.bf16 %v2916_v38, %v2914_v36  ;;  %v2685_v43 = vadd.f32 %v2684_v39, %v9658_v33  ;;  %v2917_v52 = vmax.f32 %v2683_v45, 0.0  ;;  %v9825_v38 = vld [vmem:[%s11474_s12 + $0x40] ss:$8 sps:$4 sm:$0xff]   ;;  %v9830_v39 = vld [vmem:[%s11474_s12 + $0x44] ss:$8 sps:$4 sm:$0xff]  }
 0x30f   : > { %v2686_v41 = vpop.f32.mrf.mxu0  ;;  %8218 = vmatprep.subr.bf16.mxu1 %v9830_v39 }
 0x310   : > { %v2687_v12 = vadd.f32 %v2686_v41, %v9661_v35  ;;  %3419 = vmatprep.mubr.bf16.mxu1 %v3016_v40  ;;  %v2918_v48 = vmax.f32 %v2685_v43, 0.0  ;;  %8234 = vmatpush1.bf16.msra.mxu1 %v9825_v38 }
 0x311   : > { %v2688_v44 = vpop.f32.mrf.mxu0  ;;  %3420 = vmatmul.mubr.bf16.gmra.mxu1 %v3015_v42 }
 0x312   : > { %v2689_v46 = vadd.f32 %v2688_v44, %v9658_v33  ;;  %v2919_v49 = vmax.f32 %v2687_v12, 0.0 }
 0x313   : > { %v2692_v47 = vpop.f32.mrf.mxu0 }
 0x314   : > { %v2920_v50 = vmax.f32 %v2689_v46, 0.0  ;;  %v3017_v55 = vpack.c.bf16 %v2919_v49, %v2917_v52  ;;  %v2693_v59 = vadd.f32 %v2692_v47, %v9661_v35 }
 0x315   : > { %v2694_v51 = vpop.f32.mrf.mxu0 }
 0x316   : > { %v3018_v53 = vpack.c.bf16 %v2920_v50, %v2918_v48  ;;  %v2695_v56 = vadd.f32 %v2694_v51, %v9658_v33  ;;  %v2921_v6 = vmax.f32 %v2693_v59, 0.0 }
 0x317   : > { %v2696_v54 = vpop.f32.mrf.mxu0 }
 0x318   : > { %v2697_v57 = vadd.f32 %v2696_v54, %v9661_v35  ;;  %3429 = vmatprep.mubr.bf16.mxu1 %v3018_v53  ;;  %v2922_v2 = vmax.f32 %v2695_v56, 0.0 }
 0x319   : > { %v2698_v58 = vpop.f32.mrf.mxu0  ;;  %3430 = vmatmul.mubr.bf16.gmra.mxu1 %v3017_v55 }
 0x31a   : > { %v2699_v60 = vadd.f32 %v2698_v58, %v9658_v33  ;;  %v2923_v3 = vmax.f32 %v2697_v57, 0.0 }
 0x31b   : > { %v2702_v62 = vpop.f32.mrf.mxu0 }
 0x31c   : > { %v2924_v4 = vmax.f32 %v2699_v60, 0.0  ;;  %v3019_v9 = vpack.c.bf16 %v2923_v3, %v2921_v6  ;;  %v2703_v14 = vadd.f32 %v2702_v62, %v9661_v35  ;;  %v9845_v6 = vld [vmem:[%s11474_s12 + $0x30] ss:$8 sps:$4 sm:$0xff]  }
 0x31d   : > { %v2704_v5 = vpop.f32.mrf.mxu0 }
 0x31e   : > { %v3020_v7 = vpack.c.bf16 %v2924_v4, %v2922_v2  ;;  %v2705_v10 = vadd.f32 %v2704_v5, %v9658_v33  ;;  %v2925_v23 = vmax.f32 %v2703_v14, 0.0 }
 0x31f   : > { %v2706_v8 = vpop.f32.mrf.mxu0 }
 0x320   : > { %v2707_v11 = vadd.f32 %v2706_v8, %v9661_v35  ;;  %3439 = vmatprep.mubr.bf16.mxu1 %v3020_v7  ;;  %v2926_v18 = vmax.f32 %v2705_v10, 0.0  ;;  %v9850_v7 = vld [vmem:[%s11474_s12 + $0x34] ss:$8 sps:$4 sm:$0xff]  }
 0x321   : > { %v2708_v13 = vpop.f32.mrf.mxu0  ;;  %3440 = vmatmul.mubr.bf16.gmra.mxu1 %v3019_v9  ;;  %8219 = vmatprep.subr.bf16.mxu1 %v9850_v7 }
 0x322   : > { %v2709_v15 = vadd.f32 %v2708_v13, %v9658_v33  ;;  %v2927_v19 = vmax.f32 %v2707_v11, 0.0  ;;  %8235 = vmatpush1.bf16.msra.mxu1 %v9845_v6 }
 0x323   : > { %v2712_v17 = vpop.f32.mrf.mxu0 }
 0x324   : > { %v2928_v20 = vmax.f32 %v2709_v15, 0.0  ;;  %v3021_v26 = vpack.c.bf16 %v2927_v19, %v2925_v23  ;;  %v2713_v31 = vadd.f32 %v2712_v17, %v9661_v35 }
 0x325   : > { %v2714_v22 = vpop.f32.mrf.mxu0 }
 0x326   : > { %v3022_v28 = vpack.c.bf16 %v2928_v20, %v2926_v18  ;;  %v2715_v29 = vadd.f32 %v2714_v22, %v9658_v33  ;;  %v2929_v43 = vmax.f32 %v2713_v31, 0.0 }
 0x327   : > { %v2716_v25 = vpop.f32.mrf.mxu0 }
 0x328   : > { %v2717_v30 = vadd.f32 %v2716_v25, %v9661_v35  ;;  %3449 = vmatprep.mubr.bf16.mxu1 %v3022_v28  ;;  %v2930_v16 = vmax.f32 %v2715_v29, 0.0 }
 0x329   : > { %v2718_v27 = vpop.f32.mrf.mxu0  ;;  %3450 = vmatmul.mubr.bf16.gmra.mxu1 %v3021_v26 }
 0x32a   : > { %v2719_v36 = vadd.f32 %v2718_v27, %v9658_v33  ;;  %v2931_v40 = vmax.f32 %v2717_v30, 0.0 }
 0x32b   : > { %v2722_v37 = vpop.f32.mrf.mxu0 }
 0x32c   : > { %v2932_v41 = vmax.f32 %v2719_v36, 0.0  ;;  %v3023_v45 = vpack.c.bf16 %v2931_v40, %v2929_v43  ;;  %v2723_v49 = vadd.f32 %v2722_v37, %v9661_v35 }
 0x32d   : > { %v2724_v42 = vpop.f32.mrf.mxu0 }
 0x32e   : > { %v3024_v12 = vpack.c.bf16 %v2932_v41, %v2930_v16  ;;  %v2725_v46 = vadd.f32 %v2724_v42, %v9658_v33  ;;  %v2933_v56 = vmax.f32 %v2723_v49, 0.0 }
 0x32f   : > { %v2726_v44 = vpop.f32.mrf.mxu0 }
 0x330   : > { %v2727_v47 = vadd.f32 %v2726_v44, %v9661_v35  ;;  %3459 = vmatprep.mubr.bf16.mxu1 %v3024_v12  ;;  %v2934_v52 = vmax.f32 %v2725_v46, 0.0  ;;  %v9865_v44 = vld [vmem:[%s11474_s12 + $0x20] ss:$8 sps:$4 sm:$0xff]  }
 0x331   : > { %v2728_v48 = vpop.f32.mrf.mxu0  ;;  %3460 = vmatmul.mubr.bf16.gmra.mxu1 %v3023_v45  ;;  %v9870_v45 = vld [vmem:[%s11474_s12 + $0x24] ss:$8 sps:$4 sm:$0xff]  }
 0x332   : > { %v2729_v50 = vadd.f32 %v2728_v48, %v9658_v33  ;;  %v2935_v53 = vmax.f32 %v2727_v47, 0.0  ;;  %8220 = vmatprep.subr.bf16.mxu1 %v9870_v45 }
 0x333   : > { %v2732_v51 = vpop.f32.mrf.mxu0  ;;  %8236 = vmatpush1.bf16.msra.mxu1 %v9865_v44 }
 0x334   : > { %v2936_v54 = vmax.f32 %v2729_v50, 0.0  ;;  %v3025_v59 = vpack.c.bf16 %v2935_v53, %v2933_v56  ;;  %v2733_v3 = vadd.f32 %v2732_v51, %v9661_v35 }
 0x335   : > { %v2734_v55 = vpop.f32.mrf.mxu0 }
 0x336   : > { %v3026_v57 = vpack.c.bf16 %v2936_v54, %v2934_v52  ;;  %v2735_v60 = vadd.f32 %v2734_v55, %v9658_v33  ;;  %v2937_v13 = vmax.f32 %v2733_v3, 0.0 }
 0x337   : > { %v2736_v58 = vpop.f32.mrf.mxu0 }
 0x338   : > { %v2737_v62 = vadd.f32 %v2736_v58, %v9661_v35  ;;  %3469 = vmatprep.mubr.bf16.mxu1 %v3026_v57  ;;  %v2938_v8 = vmax.f32 %v2735_v60, 0.0 }
 0x339   : > { %v2738_v2 = vpop.f32.mrf.mxu0  ;;  %3470 = vmatmul.mubr.bf16.gmra.mxu1 %v3025_v59 }
 0x33a   : > { %v2739_v4 = vadd.f32 %v2738_v2, %v9658_v33  ;;  %v2939_v9 = vmax.f32 %v2737_v62, 0.0 }
 0x33b   : > { %v2742_v5 = vpop.f32.mrf.mxu0 }
 0x33c   : > { %v2940_v10 = vmax.f32 %v2739_v4, 0.0  ;;  %v3027_v17 = vpack.c.bf16 %v2939_v9, %v2937_v13  ;;  %v2743_v22 = vadd.f32 %v2742_v5, %v9661_v35 }
 0x33d   : > { %v2744_v11 = vpop.f32.mrf.mxu0 }
 0x33e   : > { %v3028_v14 = vpack.c.bf16 %v2940_v10, %v2938_v8  ;;  %v2745_v18 = vadd.f32 %v2744_v11, %v9658_v33  ;;  %v2941_v27 = vmax.f32 %v2743_v22, 0.0 }
 0x33f   : > { %v2746_v15 = vpop.f32.mrf.mxu0 }
 0x340   : > { %v2747_v19 = vadd.f32 %v2746_v15, %v9661_v35  ;;  %3479 = vmatprep.mubr.bf16.mxu1 %v3028_v14  ;;  %v2942_v25 = vmax.f32 %v2745_v18, 0.0  ;;  %v9885_v18 = vld [vmem:[%s11474_s12 + $0x10] ss:$8 sps:$4 sm:$0xff]  }
 0x341   : > { %v2748_v20 = vpop.f32.mrf.mxu0  ;;  %3480 = vmatmul.mubr.bf16.gmra.mxu1 %v3027_v17 }
 0x342   : > { %v2749_v23 = vadd.f32 %v2748_v20, %v9658_v33  ;;  %v2943_v26 = vmax.f32 %v2747_v19, 0.0  ;;  %v9890_v19 = vld [vmem:[%s11474_s12 + $0x14] ss:$8 sps:$4 sm:$0xff]  }
 0x343   : > { %v2752_v28 = vpop.f32.mrf.mxu0  ;;  %8221 = vmatprep.subr.bf16.mxu1 %v9890_v19 }
 0x344   : > { %v2944_v29 = vmax.f32 %v2749_v23, 0.0  ;;  %v3029_v37 = vpack.c.bf16 %v2943_v26, %v2941_v27  ;;  %v2753_v42 = vadd.f32 %v2752_v28, %v9661_v35  ;;  %8237 = vmatpush1.bf16.msra.mxu1 %v9885_v18 }
 0x345   : > { %v2754_v30 = vpop.f32.mrf.mxu0 }
 0x346   : > { %v3030_v31 = vpack.c.bf16 %v2944_v29, %v2942_v25  ;;  %v2755_v16 = vadd.f32 %v2754_v30, %v9658_v33  ;;  %v2945_v50 = vmax.f32 %v2753_v42, 0.0 }
 0x347   : > { %v2756_v36 = vpop.f32.mrf.mxu0 }
 0x348   : > { %v2757_v40 = vadd.f32 %v2756_v36, %v9661_v35  ;;  %3489 = vmatprep.mubr.bf16.mxu1 %v3030_v31  ;;  %v2946_v46 = vmax.f32 %v2755_v16, 0.0 }
 0x349   : > { %v2758_v41 = vpop.f32.mrf.mxu0  ;;  %3490 = vmatmul.mubr.bf16.gmra.mxu1 %v3029_v37 }
 0x34a   : > { %v2759_v43 = vadd.f32 %v2758_v41, %v9658_v33  ;;  %v2947_v47 = vmax.f32 %v2757_v40, 0.0 }
 0x34b   : > { %v2762_v12 = vpop.f32.mrf.mxu0 }
 0x34c   : > { %v2948_v48 = vmax.f32 %v2759_v43, 0.0  ;;  %v3031_v53 = vpack.c.bf16 %v2947_v47, %v2945_v50  ;;  %v2763_v57 = vadd.f32 %v2762_v12, %v9661_v35 }
 0x34d   : > { %v2764_v49 = vpop.f32.mrf.mxu0 }
 0x34e   : > { %v3032_v51 = vpack.c.bf16 %v2948_v48, %v2946_v46  ;;  %v2765_v54 = vadd.f32 %v2764_v49, %v9658_v33  ;;  %v2949_v4 = vmax.f32 %v2763_v57, 0.0  ;;  %v9908_v57 = vld [vmem:[%s11474_s12] ss:$8 sps:$4 sm:$0xff]  }
 0x34f   : > { %v2766_v52 = vpop.f32.mrf.mxu0 }
 0x350   : > { %v2767_v55 = vadd.f32 %v2766_v52, %v9661_v35  ;;  %3499 = vmatprep.mubr.bf16.mxu1 %v3032_v51  ;;  %v2950_v60 = vmax.f32 %v2765_v54, 0.0 }
 0x351   : > { %v2768_v56 = vpop.f32.mrf.mxu0  ;;  %3500 = vmatmul.mubr.bf16.gmra.mxu1 %v3031_v53 }
 0x352   : > { %v2769_v58 = vadd.f32 %v2768_v56, %v9658_v33  ;;  %v2951_v62 = vmax.f32 %v2767_v55, 0.0  ;;  %v3085_v55 = vld [vmem:[%s11470_s8] sm:$0x3] }
 0x353   : > { %v2772_v59 = vpop.f32.mrf.mxu0 }
 0x354   : > { %v2952_v2 = vmax.f32 %v2769_v58, 0.0  ;;  %v3033_v9 = vpack.c.bf16 %v2951_v62, %v2949_v4  ;;  %v2773_v14 = vadd.f32 %v2772_v59, %v9661_v35  ;;  %v9913_v58 = vld [vmem:[%s11474_s12 + $0x4] ss:$8 sps:$4 sm:$0xff]  }
 0x355   : > { %v2774_v3 = vpop.f32.mrf.mxu0  ;;  %8222 = vmatprep.subr.bf16.mxu1 %v9913_v58 }
 0x356   : > { %v3034_v5 = vpack.c.bf16 %v2952_v2, %v2950_v60  ;;  %v2775_v10 = vadd.f32 %v2774_v3, %v9658_v33  ;;  %v2953_v25 = vmax.f32 %v2773_v14, 0.0  ;;  %v9916_v3 = vrot.slane %v3085_v55, %v9180_v21  ;;  %8238 = vmatpush1.bf16.msra.mxu1 %v9908_v57 }
 0x357   : > { %v2776_v8 = vpop.f32.mrf.mxu0 }
 0x358   : > { %v2777_v11 = vadd.f32 %v2776_v8, %v9661_v35  ;;  %3509 = vmatprep.mubr.bf16.mxu1 %v3034_v5  ;;  %v2954_v20 = vmax.f32 %v2775_v10, 0.0  ;;  %v9919_v5 = vrot.slane %v3085_v55, %v9188_v24 }
 0x359   : > { %v2778_v13 = vpop.f32.mrf.mxu0  ;;  %3510 = vmatmul.mubr.bf16.gmra.mxu1 %v3033_v9 }
 0x35a   : > { %v2779_v15 = vadd.f32 %v2778_v13, %v9658_v33  ;;  %v2955_v22 = vmax.f32 %v2777_v11, 0.0 }
 0x35b   : > { %v2782_v17 = vpop.f32.mrf.mxu0 }
 0x35c   : > { %v2956_v23 = vmax.f32 %v2779_v15, 0.0  ;;  %v3035_v30 = vpack.c.bf16 %v2955_v22, %v2953_v25  ;;  %v2783_v37 = vadd.f32 %v2782_v17, %v9661_v35 }
 0x35d   : > { %v2784_v28 = vpop.f32.mrf.mxu0 }
 0x35e   : > { %v3036_v26 = vpack.c.bf16 %v2956_v23, %v2954_v20  ;;  %v2785_v27 = vadd.f32 %v2784_v28, %v9658_v33  ;;  %v2957_v46 = vmax.f32 %v2783_v37, 0.0 }
 0x35f   : > { %v2786_v29 = vpop.f32.mrf.mxu0 }
 0x360   : > { %v2787_v31 = vadd.f32 %v2786_v29, %v9661_v35  ;;  %3519 = vmatprep.mubr.bf16.mxu1 %v3036_v26  ;;  %v2958_v41 = vmax.f32 %v2785_v27, 0.0 }
 0x361   : > { %v2788_v36 = vpop.f32.mrf.mxu0  ;;  %3520 = vmatmul.mubr.bf16.gmra.mxu1 %v3035_v30 }
 0x362   : > { %v2789_v16 = vadd.f32 %v2788_v36, %v9658_v33  ;;  %v2959_v42 = vmax.f32 %v2787_v31, 0.0 }
 0x363   : > { %v2792_v40 = vpop.f32.mrf.mxu0 }
 0x364   : > { %v2960_v43 = vmax.f32 %v2789_v16, 0.0  ;;  %v3037_v49 = vpack.c.bf16 %v2959_v42, %v2957_v46  ;;  %v2793_v53 = vadd.f32 %v2792_v40, %v9661_v35 }
 0x365   : > { %v2794_v12 = vpop.f32.mrf.mxu0 }
 0x366   : > { %v3038_v47 = vpack.c.bf16 %v2960_v43, %v2958_v41  ;;  %v2795_v50 = vadd.f32 %v2794_v12, %v9658_v33  ;;  %v2961_v8 = vmax.f32 %v2793_v53, 0.0 }
 0x367   : > { %v2796_v48 = vpop.f32.mrf.mxu0 }
 0x368   : > { %v2797_v51 = vadd.f32 %v2796_v48, %v9661_v35  ;;  %3529 = vmatprep.mubr.bf16.mxu1 %v3038_v47  ;;  %v2962_v59 = vmax.f32 %v2795_v50, 0.0 }
 0x369   : > { %v2798_v52 = vpop.f32.mrf.mxu0  ;;  %v3291_v56 = vpop.f32.mrf.mxu1  ;;  %3530 = vmatmul.mubr.bf16.gmra.mxu1 %v3037_v49 }
 0x36a   : > { %v2799_v54 = vadd.f32 %v2798_v52, %v9658_v33  ;;  %v2963_v60 = vmax.f32 %v2797_v51, 0.0  ;;  %v3292_v22 = vadd.f32 %v3291_v56, %v9919_v5 }
 0x36b   : > { %v2802_v2 = vpop.f32.mrf.mxu0  ;;  %v3293_v4 = vpop.f32.mrf.mxu1 }
 0x36c   : > { %v2964_v62 = vmax.f32 %v2799_v54, 0.0  ;;  %v3039_v14 = vpack.c.bf16 %v2963_v60, %v2961_v8  ;;  %v3294_v15 = vadd.f32 %v3293_v4, %v9916_v3  ;;  %v2803_v30 = vadd.f32 %v2802_v2, %v9661_v35 }
 0x36d   : > { %v2804_v9 = vpop.f32.mrf.mxu0  ;;  %v3295_v10 = vpop.f32.mrf.mxu1  ;;  %v3610_v41 = vmax.f32 %v3292_v22, 0.0 }
 0x36e   : > { %v3040_v11 = vpack.c.bf16 %v2964_v62, %v2962_v59  ;;  %v3296_v13 = vadd.f32 %v3295_v10, %v9919_v5  ;;  %v2805_v25 = vadd.f32 %v2804_v9, %v9658_v33  ;;  %v3611_v37 = vmax.f32 %v3294_v15, 0.0 }
 0x36f   : > { %v2806_v17 = vpop.f32.mrf.mxu0  ;;  %v3297_v20 = vpop.f32.mrf.mxu1  ;;  %v2965_v49 = vmax.f32 %v2803_v30, 0.0 }
 0x370   : > { %3539 = vmatprep.mubr.bf16.mxu1 %v3040_v11  ;;  %v2807_v23 = vadd.f32 %v2806_v17, %v9661_v35  ;;  %v3298_v28 = vadd.f32 %v3297_v20, %v9916_v3  ;;  %v3612_v27 = vmax.f32 %v3296_v13, 0.0  ;;  %v2966_v12 = vmax.f32 %v2805_v25, 0.0 }
 0x371   : > { %v2808_v26 = vpop.f32.mrf.mxu0  ;;  %v3301_v29 = vpop.f32.mrf.mxu1  ;;  %3540 = vmatmul.mubr.bf16.gmra.mxu1 %v3039_v14  ;;  %v9944_v14 = vld [vmem:[%s11474_s12 + $0xf0] ss:$8 sps:$4 sm:$0xff]  }
 0x372   : > { %v3613_v31 = vmax.f32 %v3298_v28, 0.0  ;;  %v2809_v36 = vadd.f32 %v2808_v26, %v9658_v33  ;;  %v2967_v42 = vmax.f32 %v2807_v23, 0.0  ;;  %v3738_v50 = vpack.c.bf16 %v3612_v27, %v3610_v41 }
 0x373   : > { %v2812_v16 = vpop.f32.mrf.mxu0  ;;  %v3303_v40 = vpop.f32.mrf.mxu1  ;;  %v3302_v59 = vadd.f32 %v3301_v29, %v9919_v5 }
 0x374   : > { %v2968_v43 = vmax.f32 %v2809_v36, 0.0  ;;  %v3739_v48 = vpack.c.bf16 %v3613_v31, %v3611_v37  ;;  %v3304_v52 = vadd.f32 %v3303_v40, %v9916_v3  ;;  %v3041_v56 = vpack.c.bf16 %v2967_v42, %v2965_v49 }
 0x375   : > { %v2814_v46 = vpop.f32.mrf.mxu0  ;;  %v3305_v47 = vpop.f32.mrf.mxu1  ;;  %v2813_v9 = vadd.f32 %v2812_v16, %v9661_v35  ;;  %v3614_v22 = vmax.f32 %v3302_v59, 0.0 }
 0x376   : > { %v3306_v51 = vadd.f32 %v3305_v47, %v9919_v5  ;;  %4038 = vmatprep.mubr.bf16.mxu0 %v3739_v48  ;;  %v3042_v55 = vpack.c.bf16 %v2968_v43, %v2966_v12  ;;  %v2815_v2 = vadd.f32 %v2814_v46, %v9658_v33  ;;  %v3615_v15 = vmax.f32 %v3304_v52, 0.0 }
 0x377   : > { %v2816_v53 = vpop.f32.mrf.mxu0  ;;  %v3307_v54 = vpop.f32.mrf.mxu1  ;;  %4039 = vmatmul.mubr.bf16.vlgmr.msra.gmra.mxu0 %v3738_v50  ;;  %v2969_v30 = vmax.f32 %v2813_v9, 0.0 }
 0x378   : > { %v2817_v60 = vadd.f32 %v2816_v53, %v9661_v35  ;;  %v3308_v62 = vadd.f32 %v3307_v54, %v9916_v3  ;;  %4745 = vmatpush1.bf16.msra.mxu0 %v9768_v61  ;;  %3549 = vmatprep.mubr.bf16.mxu1 %v3042_v55  ;;  %v3616_v10 = vmax.f32 %v3306_v51, 0.0  ;;  %v9949_v61 = vld [vmem:[%s11474_s12 + $0xf4] ss:$8 sps:$4 sm:$0xff]   ;;  %v2970_v25 = vmax.f32 %v2815_v2, 0.0 }
 0x379   : > { %v2818_v4 = vpop.f32.mrf.mxu0  ;;  %v3311_v8 = vpop.f32.mrf.mxu1  ;;  %3550 = vmatmul.mubr.bf16.gmra.mxu1 %v3041_v56  ;;  %4746 = vmatprep.subr.bf16.mxu0 %v9790_v34 }
 0x37a   : > { %v3617_v11 = vmax.f32 %v3308_v62, 0.0  ;;  %v2819_v13 = vadd.f32 %v2818_v4, %v9658_v33  ;;  %v2971_v23 = vmax.f32 %v2817_v60, 0.0  ;;  %8223 = vmatprep.subr.bf16.mxu1 %v9949_v61  ;;  %v3740_v27 = vpack.c.bf16 %v3616_v10, %v3614_v22 }
 0x37b   : > { %v2822_v17 = vpop.f32.mrf.mxu0  ;;  %v3313_v20 = vpop.f32.mrf.mxu1  ;;  %8239 = vmatpush2.bf16.msra.mxu1 %v9944_v14  ;;  %v3312_v42 = vadd.f32 %v3311_v8, %v9919_v5 }
 0x37c   : > { %v2972_v28 = vmax.f32 %v2819_v13, 0.0  ;;  %v3741_v29 = vpack.c.bf16 %v3617_v11, %v3615_v15  ;;  %4747 = vmatpush1.bf16.msra.mxu0 %v9785_v32  ;;  %v3314_v36 = vadd.f32 %v3313_v20, %v9916_v3  ;;  %v3043_v41 = vpack.c.bf16 %v2971_v23, %v2969_v30 }
 0x37d   : > { %v2824_v34 = vpop.f32.mrf.mxu0  ;;  %v3315_v26 = vpop.f32.mrf.mxu1  ;;  %4748 = vmatprep.subr.bf16.mxu0 %v9810_v1  ;;  %v2823_v1 = vadd.f32 %v2822_v17, %v9661_v35  ;;  %v3618_v54 = vmax.f32 %v3312_v42, 0.0 }
 0x37e   : > { %v3316_v31 = vadd.f32 %v3315_v26, %v9919_v5  ;;  %4048 = vmatprep.mubr.bf16.mxu0 %v3741_v29  ;;  %v3044_v40 = vpack.c.bf16 %v2972_v28, %v2970_v25  ;;  %v2825_v12 = vadd.f32 %v2824_v34, %v9658_v33  ;;  %v3619_v51 = vmax.f32 %v3314_v36, 0.0  ;;  %v9980_v26 = vld [vmem:[%s11474_s12 + $0xe0] ss:$8 sps:$4 sm:$0xff]   ;;  %v9985_v29 = vld [vmem:[%s11474_s12 + $0xe4] ss:$8 sps:$4 sm:$0xff]  }
 0x37f   : > { %v2826_v37 = vpop.f32.mrf.mxu0  ;;  %v3317_v16 = vpop.f32.mrf.mxu1  ;;  %4049 = vmatmul.mubr.bf16.gmra.mxu0 %v3740_v27  ;;  %8224 = vmatprep.subr.bf16.mxu1 %v9985_v29 }
 0x380   : > { %v2827_v43 = vadd.f32 %v2826_v37, %v9661_v35  ;;  %v3318_v32 = vadd.f32 %v3317_v16, %v9916_v3  ;;  %3559 = vmatprep.mubr.bf16.mxu1 %v3044_v40  ;;  %4749 = vmatpush1.bf16.msra.mxu0 %v9805_v63  ;;  %v3620_v48 = vmax.f32 %v3316_v31, 0.0  ;;  %v2974_v59 = vmax.f32 %v2825_v12, 0.0 }
 0x381   : > { %v2828_v46 = vpop.f32.mrf.mxu0  ;;  %v3321_v47 = vpop.f32.mrf.mxu1  ;;  %3560 = vmatmul.mubr.bf16.gmra.mxu1 %v3043_v41  ;;  %4750 = vmatprep.subr.bf16.mxu0 %v9830_v39  ;;  %v2973_v63 = vmax.f32 %v2823_v1, 0.0 }
 0x382   : > { %v3621_v49 = vmax.f32 %v3318_v32, 0.0  ;;  %v2829_v50 = vadd.f32 %v2828_v46, %v9658_v33  ;;  %v2975_v55 = vmax.f32 %v2827_v43, 0.0  ;;  %v3742_v4 = vpack.c.bf16 %v3620_v48, %v3618_v54  ;;  %8240 = vmatpush2.bf16.msra.mxu1 %v9980_v26 }
 0x383   : > { %v2832_v52 = vpop.f32.mrf.mxu0  ;;  %v3323_v53 = vpop.f32.mrf.mxu1  ;;  %v3322_v15 = vadd.f32 %v3321_v47, %v9919_v5 }
 0x384   : > { %v2976_v56 = vmax.f32 %v2829_v50, 0.0  ;;  %v3743_v2 = vpack.c.bf16 %v3621_v49, %v3619_v51  ;;  %4751 = vmatpush1.bf16.msra.mxu0 %v9825_v38  ;;  %v3324_v39 = vadd.f32 %v3323_v53, %v9916_v3  ;;  %v3045_v13 = vpack.c.bf16 %v2975_v55, %v2973_v63 }
 0x385   : > { %v2834_v60 = vpop.f32.mrf.mxu0  ;;  %v3325_v62 = vpop.f32.mrf.mxu1  ;;  %4752 = vmatprep.subr.bf16.mxu0 %v9850_v7  ;;  %v2833_v7 = vadd.f32 %v2832_v52, %v9661_v35  ;;  %v3622_v31 = vmax.f32 %v3322_v15, 0.0 }
 0x386   : > { %v3326_v8 = vadd.f32 %v3325_v62, %v9919_v5  ;;  %4058 = vmatprep.mubr.bf16.mxu0 %v3743_v2  ;;  %v3046_v11 = vpack.c.bf16 %v2976_v56, %v2974_v59  ;;  %v2835_v38 = vadd.f32 %v2834_v60, %v9658_v33 }
 0x387   : > { %v2836_v9 = vpop.f32.mrf.mxu0  ;;  %v3327_v10 = vpop.f32.mrf.mxu1  ;;  %4059 = vmatmul.mubr.bf16.gmra.mxu0 %v3742_v4  ;;  %v2977_v42 = vmax.f32 %v2833_v7, 0.0 }
 0x388   : > { %v2837_v17 = vadd.f32 %v2836_v9, %v9661_v35  ;;  %v3328_v20 = vadd.f32 %v3327_v10, %v9916_v3  ;;  %3569 = vmatprep.mubr.bf16.mxu1 %v3046_v11  ;;  %4753 = vmatpush1.bf16.msra.mxu0 %v9845_v6  ;;  %v3624_v28 = vmax.f32 %v3326_v8, 0.0  ;;  %v3623_v6 = vmax.f32 %v3324_v39, 0.0 }
 0x389   : > { %v2838_v22 = vpop.f32.mrf.mxu0  ;;  %v3331_v23 = vpop.f32.mrf.mxu1  ;;  %3570 = vmatmul.mubr.bf16.gmra.mxu1 %v3045_v13  ;;  %4754 = vmatprep.subr.bf16.mxu0 %v9870_v45  ;;  %v2978_v16 = vmax.f32 %v2835_v38, 0.0 }
 0x38a   : > { %v3625_v25 = vmax.f32 %v3328_v20, 0.0  ;;  %v2839_v34 = vadd.f32 %v2838_v22, %v9658_v33  ;;  %v2979_v36 = vmax.f32 %v2837_v17, 0.0  ;;  %v3744_v43 = vpack.c.bf16 %v3624_v28, %v3622_v31  ;;  %v8537_v31 = vld [vmem:[%s11474_s12 + $0xd0] ss:$8 sps:$4 sm:$0xff]  }
 0x38b   : > { %v2842_v30 = vpop.f32.mrf.mxu0  ;;  %v3333_v27 = vpop.f32.mrf.mxu1  ;;  %v3332_v49 = vadd.f32 %v3331_v23, %v9919_v5 }
 0x38c   : > { %v2980_v37 = vmax.f32 %v2839_v34, 0.0  ;;  %v3745_v41 = vpack.c.bf16 %v3625_v25, %v3623_v6  ;;  %4755 = vmatpush1.bf16.msra.mxu0 %v9865_v44  ;;  %v3334_v12 = vadd.f32 %v3333_v27, %v9916_v3  ;;  %v3047_v48 = vpack.c.bf16 %v2979_v36, %v2977_v42  ;;  %v8539_v36 = vld [vmem:[%s11474_s12 + $0xd4] ss:$8 sps:$4 sm:$0xff]  }
 0x38d   : > { %v2844_v45 = vpop.f32.mrf.mxu0  ;;  %v3335_v40 = vpop.f32.mrf.mxu1  ;;  %4756 = vmatprep.subr.bf16.mxu0 %v9890_v19  ;;  %v2843_v19 = vadd.f32 %v2842_v30, %v9661_v35  ;;  %v3626_v2 = vmax.f32 %v3332_v49, 0.0  ;;  %8225 = vmatprep.subr.bf16.mxu1 %v8539_v36 }
 0x38e   : > { %v3336_v32 = vadd.f32 %v3335_v40, %v9919_v5  ;;  %4068 = vmatprep.mubr.bf16.mxu0 %v3745_v41  ;;  %v3048_v1 = vpack.c.bf16 %v2980_v37, %v2978_v16  ;;  %v2845_v51 = vadd.f32 %v2844_v45, %v9658_v33  ;;  %v3627_v59 = vmax.f32 %v3334_v12, 0.0  ;;  %8241 = vmatpush2.bf16.msra.mxu1 %v8537_v31 }
 0x38f   : > { %v2846_v46 = vpop.f32.mrf.mxu0  ;;  %v3337_v47 = vpop.f32.mrf.mxu1  ;;  %4069 = vmatmul.mubr.bf16.gmra.mxu0 %v3744_v43 }
 0x390   : > { %v2847_v50 = vadd.f32 %v2846_v46, %v9661_v35  ;;  %v3338_v44 = vadd.f32 %v3337_v47, %v9916_v3  ;;  %3579 = vmatprep.mubr.bf16.mxu1 %v3048_v1  ;;  %4757 = vmatpush1.bf16.msra.mxu0 %v9885_v18  ;;  %v3628_v54 = vmax.f32 %v3336_v32, 0.0  ;;  %v2982_v8 = vmax.f32 %v2845_v51, 0.0 }
 0x391   : > { %v2848_v52 = vpop.f32.mrf.mxu0  ;;  %v3341_v53 = vpop.f32.mrf.mxu1  ;;  %3580 = vmatmul.mubr.bf16.gmra.mxu1 %v3047_v48  ;;  %4758 = vmatprep.subr.bf16.mxu0 %v9913_v58  ;;  %v2981_v18 = vmax.f32 %v2843_v19, 0.0 }
 0x392   : > { %v3629_v55 = vmax.f32 %v3338_v44, 0.0  ;;  %v2849_v56 = vadd.f32 %v2848_v52, %v9658_v33  ;;  %v2983_v63 = vmax.f32 %v2847_v50, 0.0  ;;  %v3746_v11 = vpack.c.bf16 %v3628_v54, %v3626_v2 }
 0x393   : > { %v2852_v60 = vpop.f32.mrf.mxu0  ;;  %v3343_v62 = vpop.f32.mrf.mxu1  ;;  %v3342_v58 = vadd.f32 %v3341_v53, %v9919_v5 }
 0x394   : > { %v2984_v4 = vmax.f32 %v2849_v56, 0.0  ;;  %v3747_v10 = vpack.c.bf16 %v3629_v55, %v3627_v59  ;;  %4759 = vmatpush1.bf16.msra.mxu0 %v9908_v57  ;;  %v3344_v13 = vadd.f32 %v3343_v62, %v9916_v3  ;;  %v3049_v22 = vpack.c.bf16 %v2983_v63, %v2981_v18 }
 0x395   : > { %v2854_v39 = vpop.f32.mrf.mxu0  ;;  %v3345_v9 = vpop.f32.mrf.mxu1  ;;  %4760 = vmatprep.subr.bf16.mxu0 %v9949_v61  ;;  %v2853_v61 = vadd.f32 %v2852_v60, %v9661_v35  ;;  %v3630_v37 = vmax.f32 %v3342_v58, 0.0 }
 0x396   : > { %v3346_v15 = vadd.f32 %v3345_v9, %v9919_v5  ;;  %4078 = vmatprep.mubr.bf16.mxu0 %v3747_v10  ;;  %v3050_v38 = vpack.c.bf16 %v2984_v4, %v2982_v8  ;;  %v2855_v23 = vadd.f32 %v2854_v39, %v9658_v33  ;;  %v3631_v6 = vmax.f32 %v3344_v13, 0.0  ;;  %v8540_v8 = vld [vmem:[%s11474_s12 + $0xc0] ss:$8 sps:$4 sm:$0xff]   ;;  %v8542_v39 = vld [vmem:[%s11474_s12 + $0xc4] ss:$8 sps:$4 sm:$0xff]  }
 0x397   : > { %v2856_v17 = vpop.f32.mrf.mxu0  ;;  %v3347_v20 = vpop.f32.mrf.mxu1  ;;  %4079 = vmatmul.mubr.bf16.gmra.mxu0 %v3746_v11  ;;  %8226 = vmatprep.subr.bf16.mxu1 %v8542_v39 }
 0x398   : > { %v2857_v7 = vadd.f32 %v2856_v17, %v9661_v35  ;;  %v3348_v57 = vadd.f32 %v3347_v20, %v9916_v3  ;;  %v3632_v28 = vmax.f32 %v3346_v15, 0.0  ;;  %3589 = vmatprep.mubr.bf16.mxu1 %v3050_v38  ;;  %4761 = vmatpush2.bf16.msra.mxu0 %v9944_v14  ;;  %v2986_v14 = vmax.f32 %v2855_v23, 0.0 }
 0x399   : > { %v2858_v25 = vpop.f32.mrf.mxu0  ;;  %v3351_v34 = vpop.f32.mrf.mxu1  ;;  %3590 = vmatmul.mubr.bf16.gmra.mxu1 %v3049_v22  ;;  %4762 = vmatprep.subr.bf16.mxu0 %v9985_v29  ;;  %v2985_v29 = vmax.f32 %v2853_v61, 0.0 }
 0x39a   : > { %v3633_v30 = vmax.f32 %v3348_v57, 0.0  ;;  %v2859_v27 = vadd.f32 %v2858_v25, %v9658_v33  ;;  %v2987_v45 = vmax.f32 %v2857_v7, 0.0  ;;  %v3748_v41 = vpack.c.bf16 %v3632_v28, %v3630_v37  ;;  %8242 = vmatpush2.bf16.msra.mxu1 %v8540_v8 }
 0x39b   : > { %v3353_v16 = vpop.f32.mrf.mxu1  ;;  %v3352_v47 = vadd.f32 %v3351_v34, %v9919_v5 }
 0x39c   : > { %v2988_v35 = vmax.f32 %v2859_v27, 0.0  ;;  %v3749_v40 = vpack.c.bf16 %v3633_v30, %v3631_v6  ;;  %4763 = vmatpush2.bf16.msra.mxu0 %v9980_v26  ;;  %v3354_v42 = vadd.f32 %v3353_v16, %v9916_v3  ;;  %v3051_v46 = vpack.c.bf16 %v2987_v45, %v2985_v29 }
 0x39d   : > { %v3355_v33 = vpop.f32.mrf.mxu1  ;;  %4764 = vmatprep.subr.bf16.mxu0 %v8539_v36  ;;  %v3634_v51 = vmax.f32 %v3352_v47, 0.0 }
 0x39e   : > { %v3356_v43 = vadd.f32 %v3355_v33, %v9919_v5  ;;  %4088 = vmatprep.mubr.bf16.mxu0 %v3749_v40  ;;  %v3052_v32 = vpack.c.bf16 %v2988_v35, %v2986_v14  ;;  %v3635_v26 = vmax.f32 %v3354_v42, 0.0  ;;  %v8543_v40 = vld [vmem:[%s11474_s12 + $0xb0] ss:$8 sps:$4 sm:$0xff]  }
 0x39f   : > { %v3357_v12 = vpop.f32.mrf.mxu1  ;;  %4089 = vmatmul.mubr.bf16.gmra.mxu0 %v3748_v41  ;;  %v8545_v41 = vld [vmem:[%s11474_s12 + $0xb4] ss:$8 sps:$4 sm:$0xff]  }
 0x3a0   : > { %v3358_v1 = vadd.f32 %v3357_v12, %v9916_v3  ;;  %3599 = vmatprep.mubr.bf16.mxu1 %v3052_v32  ;;  %4765 = vmatpush2.bf16.msra.mxu0 %v8537_v31  ;;  %v3636_v49 = vmax.f32 %v3356_v43, 0.0 }
 0x3a1   : > { %v3361_v48 = vpop.f32.mrf.mxu1  ;;  %3600 = vmatmul.mubr.bf16.gmra.mxu1 %v3051_v46  ;;  %4766 = vmatprep.subr.bf16.mxu0 %v8542_v39 }
 0x3a2   : > { %v3637_v50 = vmax.f32 %v3358_v1, 0.0  ;;  %v3750_v54 = vpack.c.bf16 %v3636_v49, %v3634_v51  ;;  %v3362_v59 = vadd.f32 %v3361_v48, %v9919_v5  ;;  %8227 = vmatprep.subr.bf16.mxu1 %v8545_v41 }
 0x3a3   : > { %v3363_v44 = vpop.f32.mrf.mxu1  ;;  %8243 = vmatpush2.bf16.msra.mxu1 %v8543_v40 }
 0x3a4   : > { %v3751_v52 = vpack.c.bf16 %v3637_v50, %v3635_v26  ;;  %v3364_v53 = vadd.f32 %v3363_v44, %v9916_v3  ;;  %v3638_v10 = vmax.f32 %v3362_v59, 0.0  ;;  %4767 = vmatpush2.bf16.msra.mxu0 %v8540_v8 }
 0x3a5   : > { %v3365_v19 = vpop.f32.mrf.mxu1  ;;  %4768 = vmatprep.subr.bf16.mxu0 %v8545_v41 }
 0x3a6   : > { %v3366_v55 = vadd.f32 %v3365_v19, %v9919_v5  ;;  %4098 = vmatprep.mubr.bf16.mxu0 %v3751_v52  ;;  %v3639_v62 = vmax.f32 %v3364_v53, 0.0 }
 0x3a7   : > { %v3367_v56 = vpop.f32.mrf.mxu1  ;;  %4099 = vmatmul.mubr.bf16.gmra.mxu0 %v3750_v54 }
 0x3a8   : > { %v3368_v60 = vadd.f32 %v3367_v56, %v9916_v3  ;;  %v3640_v63 = vmax.f32 %v3366_v55, 0.0  ;;  %4769 = vmatpush2.bf16.msra.mxu0 %v8543_v40  ;;  %v8554_v40 = vld [vmem:[%s11474_s12 + $0x84] ss:$8 sps:$4 sm:$0xff]  }
 0x3a9   : > { %v3371_v2 = vpop.f32.mrf.mxu1 }
 0x3aa   : > { %v3641_v4 = vmax.f32 %v3368_v60, 0.0  ;;  %v3752_v13 = vpack.c.bf16 %v3640_v63, %v3638_v10  ;;  %v3372_v20 = vadd.f32 %v3371_v2, %v9919_v5  ;;  %v8548_v10 = vld [vmem:[%s11474_s12 + $0xa4] ss:$8 sps:$4 sm:$0xff]  }
 0x3ab   : > { %v3373_v9 = vpop.f32.mrf.mxu1  ;;  %4770 = vmatprep.subr.bf16.mxu0 %v8548_v10  ;;  %8228 = vmatprep.subr.bf16.mxu1 %v8548_v10 }
 0x3ac   : > { %v3753_v18 = vpack.c.bf16 %v3641_v4, %v3639_v62  ;;  %v3374_v15 = vadd.f32 %v3373_v9, %v9916_v3  ;;  %v3642_v25 = vmax.f32 %v3372_v20, 0.0  ;;  %v8546_v9 = vld [vmem:[%s11474_s12 + $0xa0] ss:$8 sps:$4 sm:$0xff]  }
 0x3ad   : > { %v3375_v11 = vpop.f32.mrf.mxu1  ;;  %4771 = vmatpush2.bf16.msra.mxu0 %v8546_v9  ;;  %8244 = vmatpush2.bf16.msra.mxu1 %v8546_v9 }
 0x3ae   : > { %v3376_v58 = vadd.f32 %v3375_v11, %v9919_v5  ;;  %4108 = vmatprep.mubr.bf16.mxu0 %v3753_v18  ;;  %v3643_v23 = vmax.f32 %v3374_v15, 0.0 }
 0x3af   : > { %v3377_v17 = vpop.f32.mrf.mxu1  ;;  %4109 = vmatmul.mubr.bf16.gmra.mxu0 %v3752_v13 }
 0x3b0   : > { %v3378_v38 = vadd.f32 %v3377_v17, %v9916_v3  ;;  %v3644_v7 = vmax.f32 %v3376_v58, 0.0 }
 0x3b1   : > { %v3381_v22 = vpop.f32.mrf.mxu1 }
 0x3b2   : > { %v3645_v57 = vmax.f32 %v3378_v38, 0.0  ;;  %v3754_v30 = vpack.c.bf16 %v3644_v7, %v3642_v25  ;;  %v3382_v36 = vadd.f32 %v3381_v22, %v9919_v5 }
 0x3b3   : > { %v3383_v28 = vpop.f32.mrf.mxu1 }
 0x3b4   : > { %v3755_v34 = vpack.c.bf16 %v3645_v57, %v3643_v23  ;;  %v3384_v61 = vadd.f32 %v3383_v28, %v9916_v3  ;;  %v3646_v29 = vmax.f32 %v3382_v36, 0.0 }
 0x3b5   : > { %v3385_v6 = vpop.f32.mrf.mxu1 }
 0x3b6   : > { %v3386_v27 = vadd.f32 %v3385_v6, %v9919_v5  ;;  %4118 = vmatprep.mubr.bf16.mxu0 %v3755_v34  ;;  %v3647_v16 = vmax.f32 %v3384_v61, 0.0 }
 0x3b7   : > { %v3387_v31 = vpop.f32.mrf.mxu1  ;;  %4119 = vmatmul.mubr.bf16.gmra.mxu0 %v3754_v30  ;;  %v8551_v30 = vld [vmem:[%s11474_s12 + $0x94] ss:$8 sps:$4 sm:$0xff]  }
 0x3b8   : > { %v3388_v37 = vadd.f32 %v3387_v31, %v9916_v3  ;;  %v3648_v45 = vmax.f32 %v3386_v27, 0.0  ;;  %8229 = vmatprep.subr.bf16.mxu1 %v8551_v30  ;;  %4772 = vmatprep.subr.bf16.mxu0 %v8551_v30 }
 0x3b9   : > { %v3391_v14 = vpop.f32.mrf.mxu1 }
 0x3ba   : > { %v3649_v35 = vmax.f32 %v3388_v37, 0.0  ;;  %v3756_v32 = vpack.c.bf16 %v3648_v45, %v3646_v29  ;;  %v3392_v1 = vadd.f32 %v3391_v14, %v9919_v5  ;;  %v8549_v37 = vld [vmem:[%s11474_s12 + $0x90] ss:$8 sps:$4 sm:$0xff]  }
 0x3bb   : > { %v3393_v33 = vpop.f32.mrf.mxu1  ;;  %8245 = vmatpush2.bf16.msra.mxu1 %v8549_v37  ;;  %4773 = vmatpush2.bf16.msra.mxu0 %v8549_v37 }
 0x3bc   : > { %v3757_v42 = vpack.c.bf16 %v3649_v35, %v3647_v16  ;;  %v3394_v12 = vadd.f32 %v3393_v33, %v9916_v3  ;;  %v3650_v52 = vmax.f32 %v3392_v1, 0.0  ;;  %8230 = vmatprep.subr.bf16.mxu1 %v8554_v40  ;;  %4774 = vmatprep.subr.bf16.mxu0 %v8554_v40  ;;  %v8558_v40 = vld [vmem:[%s11476_s14 + $0x74] ss:$8 sps:$4 sm:$0xff]  }
 0x3bd   : > { %v3395_v43 = vpop.f32.mrf.mxu1 }
 0x3be   : > { %v3396_v46 = vadd.f32 %v3395_v43, %v9919_v5  ;;  %4128 = vmatprep.mubr.bf16.mxu0 %v3757_v42  ;;  %v3651_v49 = vmax.f32 %v3394_v12, 0.0  ;;  %v8552_v42 = vld [vmem:[%s11474_s12 + $0x80] ss:$8 sps:$4 sm:$0xff]  }
 0x3bf   : > { %v3397_v47 = vpop.f32.mrf.mxu1  ;;  %4129 = vmatmul.mubr.bf16.gmra.mxu0 %v3756_v32  ;;  %8246 = vmatpush2.bf16.msra.mxu1 %v8552_v42 }
 0x3c0   : > { %v3398_v48 = vadd.f32 %v3397_v47, %v9916_v3  ;;  %v3652_v50 = vmax.f32 %v3396_v46, 0.0  ;;  %4775 = vmatpush2.bf16.msra.mxu0 %v8552_v42  ;;  %5997 = vmatprep.subr.bf16.mxu1 %v8558_v40 }
 0x3c1   : > { %v3401_v26 = vpop.f32.mrf.mxu1 }
 0x3c2   : > { %v3653_v44 = vmax.f32 %v3398_v48, 0.0  ;;  %v3758_v54 = vpack.c.bf16 %v3652_v50, %v3650_v52  ;;  %v3402_v60 = vadd.f32 %v3401_v26, %v9919_v5 }
 0x3c3   : > { %v3403_v51 = vpop.f32.mrf.mxu1 }
 0x3c4   : > { %v3759_v53 = vpack.c.bf16 %v3653_v44, %v3651_v49  ;;  %v3404_v55 = vadd.f32 %v3403_v51, %v9916_v3  ;;  %v3654_v18 = vmax.f32 %v3402_v60, 0.0 }
 0x3c5   : > { %v3405_v19 = vpop.f32.mrf.mxu1 }
 0x3c6   : > { %v3406_v56 = vadd.f32 %v3405_v19, %v9919_v5  ;;  %4138 = vmatprep.mubr.bf16.mxu0 %v3759_v53  ;;  %v3655_v63 = vmax.f32 %v3404_v55, 0.0 }
 0x3c7   : > { %v3407_v59 = vpop.f32.mrf.mxu1  ;;  %4139 = vmatmul.mubr.bf16.gmra.mxu0 %v3758_v54 }
 0x3c8   : > { %v3408_v62 = vadd.f32 %v3407_v59, %v9916_v3  ;;  %v3656_v4 = vmax.f32 %v3406_v56, 0.0 }
 0x3c9   : > { %v3411_v2 = vpop.f32.mrf.mxu1 }
 0x3ca   : > { %v3657_v8 = vmax.f32 %v3408_v62, 0.0  ;;  %v3760_v15 = vpack.c.bf16 %v3656_v4, %v3654_v18  ;;  %v3412_v38 = vadd.f32 %v3411_v2, %v9919_v5 }
 0x3cb   : > { %v3413_v39 = vpop.f32.mrf.mxu1 }
 0x3cc   : > { %v3761_v11 = vpack.c.bf16 %v3657_v8, %v3655_v63  ;;  %v3414_v58 = vadd.f32 %v3413_v39, %v9916_v3  ;;  %v3658_v34 = vmax.f32 %v3412_v38, 0.0 }
 0x3cd   : > { %v3415_v13 = vpop.f32.mrf.mxu1 }
 0x3ce   : > { %v3416_v17 = vadd.f32 %v3415_v13, %v9919_v5  ;;  %4148 = vmatprep.mubr.bf16.mxu0 %v3761_v11  ;;  %v3659_v7 = vmax.f32 %v3414_v58, 0.0 }
 0x3cf   : > { %v3417_v20 = vpop.f32.mrf.mxu1  ;;  %4149 = vmatmul.mubr.bf16.gmra.mxu0 %v3760_v15 }
 0x3d0   : > { %v3418_v22 = vadd.f32 %v3417_v20, %v9916_v3  ;;  %v3660_v57 = vmax.f32 %v3416_v17, 0.0 }
 0x3d1   : > { %v3421_v23 = vpop.f32.mrf.mxu1 }
 0x3d2   : > { %v3661_v28 = vmax.f32 %v3418_v22, 0.0  ;;  %v3762_v27 = vpack.c.bf16 %v3660_v57, %v3658_v34  ;;  %v3422_v14 = vadd.f32 %v3421_v23, %v9919_v5 }
 0x3d3   : > { %v3423_v25 = vpop.f32.mrf.mxu1 }
 0x3d4   : > { %v3763_v61 = vpack.c.bf16 %v3661_v28, %v3659_v7  ;;  %v3424_v31 = vadd.f32 %v3423_v25, %v9916_v3  ;;  %v3662_v32 = vmax.f32 %v3422_v14, 0.0 }
 0x3d5   : > { %v3425_v6 = vpop.f32.mrf.mxu1 }
 0x3d6   : > { %v3426_v36 = vadd.f32 %v3425_v6, %v9919_v5  ;;  %4158 = vmatprep.mubr.bf16.mxu0 %v3763_v61  ;;  %v3663_v41 = vmax.f32 %v3424_v31, 0.0 }
 0x3d7   : > { %v3427_v16 = vpop.f32.mrf.mxu1  ;;  %4159 = vmatmul.mubr.bf16.gmra.mxu0 %v3762_v27 }
 0x3d8   : > { %v3428_v45 = vadd.f32 %v3427_v16, %v9916_v3  ;;  %v3664_v33 = vmax.f32 %v3426_v36, 0.0 }
 0x3d9   : > { %v3431_v35 = vpop.f32.mrf.mxu1 }
 0x3da   : > { %v3665_v29 = vmax.f32 %v3428_v45, 0.0  ;;  %v3764_v47 = vpack.c.bf16 %v3664_v33, %v3662_v32  ;;  %v3432_v49 = vadd.f32 %v3431_v35, %v9919_v5  ;;  %v10101_v35 = vld [vmem:[%s11473_s11] sm:$0xff] }
 0x3db   : > { %v3433_v43 = vpop.f32.mrf.mxu1  ;;  %v8098_v42 = vcombine.high %v10101_v35, %v10101_v35 }
 0x3dc   : > { %v3765_v12 = vpack.c.bf16 %v3665_v29, %v3663_v41  ;;  %v3434_v1 = vadd.f32 %v3433_v43, %v9916_v3  ;;  %v3666_v54 = vmax.f32 %v3432_v49, 0.0 }
 0x3dd   : > { %v3435_v46 = vpop.f32.mrf.mxu1  ;;  %8099 = vmatprep.subr.msk.bf16.mxu0 %vm1003_vm0, %v8098_v42 }
 0x3de   : > { %v3436_v48 = vadd.f32 %v3435_v46, %v9919_v5  ;;  %4168 = vmatprep.mubr.bf16.mxu0 %v3765_v12  ;;  %v3667_v51 = vmax.f32 %v3434_v1, 0.0 }
 0x3df   : > { %v3437_v26 = vpop.f32.mrf.mxu1  ;;  %4169 = vmatmul.mubr.bf16.gmra.mxu0 %v3764_v47 }
 0x3e0   : > { %v3438_v50 = vadd.f32 %v3437_v26, %v9916_v3  ;;  %v3668_v52 = vmax.f32 %v3436_v48, 0.0 }
 0x3e1   : > { %v3441_v44 = vpop.f32.mrf.mxu1 }
 0x3e2   : > { %v3669_v53 = vmax.f32 %v3438_v50, 0.0  ;;  %v3766_v59 = vpack.c.bf16 %v3668_v52, %v3666_v54  ;;  %v3442_v63 = vadd.f32 %v3441_v44, %v9919_v5 }
 0x3e3   : > { %v3443_v19 = vpop.f32.mrf.mxu1 }
 0x3e4   : > { %v3767_v55 = vpack.c.bf16 %v3669_v53, %v3667_v51  ;;  %v3444_v60 = vadd.f32 %v3443_v19, %v9916_v3  ;;  %v3670_v11 = vmax.f32 %v3442_v63, 0.0 }
 0x3e5   : > { %v3445_v56 = vpop.f32.mrf.mxu1 }
 0x3e6   : > { %v3446_v62 = vadd.f32 %v3445_v56, %v9919_v5  ;;  %4178 = vmatprep.mubr.bf16.mxu0 %v3767_v55  ;;  %v3671_v39 = vmax.f32 %v3444_v60, 0.0 }
 0x3e7   : > { %v3447_v2 = vpop.f32.mrf.mxu1  ;;  %4179 = vmatmul.mubr.bf16.gmra.mxu0 %v3766_v59 }
 0x3e8   : > { %v3448_v4 = vadd.f32 %v3447_v2, %v9916_v3  ;;  %v3672_v9 = vmax.f32 %v3446_v62, 0.0 }
 0x3e9   : > { %v3451_v8 = vpop.f32.mrf.mxu1 }
 0x3ea   : > { %v3673_v10 = vmax.f32 %v3448_v4, 0.0  ;;  %v3768_v58 = vpack.c.bf16 %v3672_v9, %v3670_v11  ;;  %v3452_v22 = vadd.f32 %v3451_v8, %v9919_v5 }
 0x3eb   : > { %v3453_v18 = vpop.f32.mrf.mxu1 }
 0x3ec   : > { %v3769_v13 = vpack.c.bf16 %v3673_v10, %v3671_v39  ;;  %v3454_v17 = vadd.f32 %v3453_v18, %v9916_v3  ;;  %v3674_v61 = vmax.f32 %v3452_v22, 0.0 }
 0x3ed   : > { %v3455_v15 = vpop.f32.mrf.mxu1 }
 0x3ee   : > { %v3456_v20 = vadd.f32 %v3455_v15, %v9919_v5  ;;  %4188 = vmatprep.mubr.bf16.mxu0 %v3769_v13  ;;  %v3675_v57 = vmax.f32 %v3454_v17, 0.0 }
 0x3ef   : > { %v3457_v38 = vpop.f32.mrf.mxu1  ;;  %4189 = vmatmul.mubr.bf16.gmra.mxu0 %v3768_v58 }
 0x3f0   : > { %v3458_v23 = vadd.f32 %v3457_v38, %v9916_v3  ;;  %v3676_v28 = vmax.f32 %v3456_v20, 0.0 }
 0x3f1   : > { %v3461_v7 = vpop.f32.mrf.mxu1 }
 0x3f2   : > { %v3677_v25 = vmax.f32 %v3458_v23, 0.0  ;;  %v3770_v27 = vpack.c.bf16 %v3676_v28, %v3674_v61  ;;  %v3462_v16 = vadd.f32 %v3461_v7, %v9919_v5 }
 0x3f3   : > { %v3463_v34 = vpop.f32.mrf.mxu1 }
 0x3f4   : > { %v3771_v6 = vpack.c.bf16 %v3677_v25, %v3675_v57  ;;  %v3464_v31 = vadd.f32 %v3463_v34, %v9916_v3  ;;  %v3678_v32 = vmax.f32 %v3462_v16, 0.0 }
 0x3f5   : > { %v3465_v30 = vpop.f32.mrf.mxu1 }
 0x3f6   : > { %v3466_v36 = vadd.f32 %v3465_v30, %v9919_v5  ;;  %4198 = vmatprep.mubr.bf16.mxu0 %v3771_v6  ;;  %v3679_v41 = vmax.f32 %v3464_v31, 0.0 }
 0x3f7   : > { %v3467_v37 = vpop.f32.mrf.mxu1  ;;  %4199 = vmatmul.mubr.bf16.gmra.mxu0 %v3770_v27 }
 0x3f8   : > { %v3468_v14 = vadd.f32 %v3467_v37, %v9916_v3  ;;  %v3680_v33 = vmax.f32 %v3466_v36, 0.0 }
 0x3f9   : > { %v3471_v45 = vpop.f32.mrf.mxu1 }
 0x3fa   : > { %v3681_v29 = vmax.f32 %v3468_v14, 0.0  ;;  %v3772_v47 = vpack.c.bf16 %v3680_v33, %v3678_v32  ;;  %v3472_v49 = vadd.f32 %v3471_v45, %v9919_v5 }
 0x3fb   : > { %v3473_v43 = vpop.f32.mrf.mxu1 }
 0x3fc   : > { %v3773_v12 = vpack.c.bf16 %v3681_v29, %v3679_v41  ;;  %v3474_v1 = vadd.f32 %v3473_v43, %v9916_v3  ;;  %v3682_v54 = vmax.f32 %v3472_v49, 0.0 }
 0x3fd   : > { %v3475_v46 = vpop.f32.mrf.mxu1 }
 0x3fe   : > { %v3476_v48 = vadd.f32 %v3475_v46, %v9919_v5  ;;  %4208 = vmatprep.mubr.bf16.mxu0 %v3773_v12  ;;  %v3683_v51 = vmax.f32 %v3474_v1, 0.0 }
 0x3ff   : > { %v3477_v26 = vpop.f32.mrf.mxu1  ;;  %4209 = vmatmul.mubr.bf16.gmra.mxu0 %v3772_v47 }
 0x400   : > { %v3478_v50 = vadd.f32 %v3477_v26, %v9916_v3  ;;  %v3684_v52 = vmax.f32 %v3476_v48, 0.0 }
 0x401   : > { %v3481_v44 = vpop.f32.mrf.mxu1 }
 0x402   : > { %v3685_v53 = vmax.f32 %v3478_v50, 0.0  ;;  %v3774_v59 = vpack.c.bf16 %v3684_v52, %v3682_v54  ;;  %v3482_v63 = vadd.f32 %v3481_v44, %v9919_v5 }
 0x403   : > { %v3483_v19 = vpop.f32.mrf.mxu1 }
 0x404   : > { %v3775_v55 = vpack.c.bf16 %v3685_v53, %v3683_v51  ;;  %v3484_v60 = vadd.f32 %v3483_v19, %v9916_v3  ;;  %v3686_v11 = vmax.f32 %v3482_v63, 0.0 }
 0x405   : > { %v3485_v56 = vpop.f32.mrf.mxu1 }
 0x406   : > { %v3486_v62 = vadd.f32 %v3485_v56, %v9919_v5  ;;  %4218 = vmatprep.mubr.bf16.mxu0 %v3775_v55  ;;  %v3687_v39 = vmax.f32 %v3484_v60, 0.0 }
 0x407   : > { %v3487_v2 = vpop.f32.mrf.mxu1  ;;  %4219 = vmatmul.mubr.bf16.gmra.mxu0 %v3774_v59 }
 0x408   : > { %v3488_v4 = vadd.f32 %v3487_v2, %v9916_v3  ;;  %v3688_v9 = vmax.f32 %v3486_v62, 0.0 }
 0x409   : > { %v3491_v8 = vpop.f32.mrf.mxu1 }
 0x40a   : > { %v3689_v10 = vmax.f32 %v3488_v4, 0.0  ;;  %v3776_v58 = vpack.c.bf16 %v3688_v9, %v3686_v11  ;;  %v3492_v22 = vadd.f32 %v3491_v8, %v9919_v5 }
 0x40b   : > { %v3493_v18 = vpop.f32.mrf.mxu1 }
 0x40c   : > { %v3777_v13 = vpack.c.bf16 %v3689_v10, %v3687_v39  ;;  %v3494_v17 = vadd.f32 %v3493_v18, %v9916_v3  ;;  %v3690_v61 = vmax.f32 %v3492_v22, 0.0 }
 0x40d   : > { %v3495_v15 = vpop.f32.mrf.mxu1 }
 0x40e   : > { %v3496_v20 = vadd.f32 %v3495_v15, %v9919_v5  ;;  %4228 = vmatprep.mubr.bf16.mxu0 %v3777_v13  ;;  %v3691_v57 = vmax.f32 %v3494_v17, 0.0 }
 0x40f   : > { %v3497_v38 = vpop.f32.mrf.mxu1  ;;  %4229 = vmatmul.mubr.bf16.gmra.mxu0 %v3776_v58 }
 0x410   : > { %v3498_v23 = vadd.f32 %v3497_v38, %v9916_v3  ;;  %v3692_v28 = vmax.f32 %v3496_v20, 0.0 }
 0x411   : > { %v3501_v7 = vpop.f32.mrf.mxu1 }
 0x412   : > { %v3693_v25 = vmax.f32 %v3498_v23, 0.0  ;;  %v3778_v27 = vpack.c.bf16 %v3692_v28, %v3690_v61  ;;  %v3502_v16 = vadd.f32 %v3501_v7, %v9919_v5 }
 0x413   : > { %v3503_v34 = vpop.f32.mrf.mxu1 }
 0x414   : > { %v3779_v6 = vpack.c.bf16 %v3693_v25, %v3691_v57  ;;  %v3504_v31 = vadd.f32 %v3503_v34, %v9916_v3  ;;  %v3694_v42 = vmax.f32 %v3502_v16, 0.0 }
 0x415   : > { %v3505_v30 = vpop.f32.mrf.mxu1 }
 0x416   : > { %v3506_v36 = vadd.f32 %v3505_v30, %v9919_v5  ;;  %4238 = vmatprep.mubr.bf16.mxu0 %v3779_v6  ;;  %v3695_v40 = vmax.f32 %v3504_v31, 0.0 }
 0x417   : > { %v3507_v37 = vpop.f32.mrf.mxu1  ;;  %4239 = vmatmul.mubr.bf16.gmra.mxu0 %v3778_v27 }
 0x418   : > { %v3508_v14 = vadd.f32 %v3507_v37, %v9916_v3  ;;  %v3696_v41 = vmax.f32 %v3506_v36, 0.0 }
 0x419   : > { %v3511_v45 = vpop.f32.mrf.mxu1 }
 0x41a   : > { %v3697_v33 = vmax.f32 %v3508_v14, 0.0  ;;  %v3780_v12 = vpack.c.bf16 %v3696_v41, %v3694_v42  ;;  %v3512_v48 = vadd.f32 %v3511_v45, %v9919_v5 }
 0x41b   : > { %v3513_v29 = vpop.f32.mrf.mxu1 }
 0x41c   : > { %v3781_v43 = vpack.c.bf16 %v3697_v33, %v3695_v40  ;;  %v3514_v46 = vadd.f32 %v3513_v29, %v9916_v3  ;;  %v3698_v53 = vmax.f32 %v3512_v48, 0.0 }
 0x41d   : > { %v3515_v32 = vpop.f32.mrf.mxu1 }
 0x41e   : > { %v3516_v47 = vadd.f32 %v3515_v32, %v9919_v5  ;;  %4248 = vmatprep.mubr.bf16.mxu0 %v3781_v43  ;;  %v3699_v50 = vmax.f32 %v3514_v46, 0.0 }
 0x41f   : > { %v3517_v1 = vpop.f32.mrf.mxu1  ;;  %4249 = vmatmul.mubr.bf16.gmra.mxu0 %v3780_v12 }
 0x420   : > { %v3518_v26 = vadd.f32 %v3517_v1, %v9916_v3  ;;  %v3700_v44 = vmax.f32 %v3516_v47, 0.0 }
 0x421   : > { %v3521_v49 = vpop.f32.mrf.mxu1 }
 0x422   : > { %v3701_v51 = vmax.f32 %v3518_v26, 0.0  ;;  %v3782_v55 = vpack.c.bf16 %v3700_v44, %v3698_v53  ;;  %v3522_v62 = vadd.f32 %v3521_v49, %v9919_v5 }
 0x423   : > { %v3523_v52 = vpop.f32.mrf.mxu1 }
 0x424   : > { %v3783_v19 = vpack.c.bf16 %v3701_v51, %v3699_v50  ;;  %v3524_v56 = vadd.f32 %v3523_v52, %v9916_v3  ;;  %v3702_v10 = vmax.f32 %v3522_v62, 0.0 }
 0x425   : > { %v3525_v54 = vpop.f32.mrf.mxu1 }
 0x426   : > { %v3526_v59 = vadd.f32 %v3525_v54, %v9919_v5  ;;  %4258 = vmatprep.mubr.bf16.mxu0 %v3783_v19  ;;  %v3703_v4 = vmax.f32 %v3524_v56, 0.0 }
 0x427   : > { %v3527_v60 = vpop.f32.mrf.mxu1  ;;  %4259 = vmatmul.mubr.bf16.gmra.mxu0 %v3782_v55 }
 0x428   : > { %v3528_v2 = vadd.f32 %v3527_v60, %v9916_v3  ;;  %v3704_v8 = vmax.f32 %v3526_v59, 0.0 }
 0x429   : > { %v3531_v63 = vpop.f32.mrf.mxu1 }
 0x42a   : > { %v3705_v39 = vmax.f32 %v3528_v2, 0.0  ;;  %v3784_v13 = vpack.c.bf16 %v3704_v8, %v3702_v10  ;;  %v3532_v20 = vadd.f32 %v3531_v63, %v9919_v5 }
 0x42b   : > { %v3533_v9 = vpop.f32.mrf.mxu1 }
 0x42c   : > { %v3785_v18 = vpack.c.bf16 %v3705_v39, %v3703_v4  ;;  %v3534_v15 = vadd.f32 %v3533_v9, %v9916_v3  ;;  %v3706_v25 = vmax.f32 %v3532_v20, 0.0 }
 0x42d   : > { %v3535_v11 = vpop.f32.mrf.mxu1 }
 0x42e   : > { %v3536_v58 = vadd.f32 %v3535_v11, %v9919_v5  ;;  %4268 = vmatprep.mubr.bf16.mxu0 %v3785_v18  ;;  %v3707_v23 = vmax.f32 %v3534_v15, 0.0 }
 0x42f   : > { %v3537_v17 = vpop.f32.mrf.mxu1  ;;  %4269 = vmatmul.mubr.bf16.gmra.mxu0 %v3784_v13 }
 0x430   : > { %v3538_v38 = vadd.f32 %v3537_v17, %v9916_v3  ;;  %v3708_v7 = vmax.f32 %v3536_v58, 0.0 }
 0x431   : > { %v3541_v22 = vpop.f32.mrf.mxu1 }
 0x432   : > { %v3709_v57 = vmax.f32 %v3538_v38, 0.0  ;;  %v3786_v6 = vpack.c.bf16 %v3708_v7, %v3706_v25  ;;  %v3542_v36 = vadd.f32 %v3541_v22, %v9919_v5 }
 0x433   : > { %v3543_v28 = vpop.f32.mrf.mxu1 }
 0x434   : > { %v3787_v34 = vpack.c.bf16 %v3709_v57, %v3707_v23  ;;  %v3544_v30 = vadd.f32 %v3543_v28, %v9916_v3  ;;  %v3710_v29 = vmax.f32 %v3542_v36, 0.0 }
 0x435   : > { %v3545_v61 = vpop.f32.mrf.mxu1 }
 0x436   : > { %v3546_v27 = vadd.f32 %v3545_v61, %v9919_v5  ;;  %4278 = vmatprep.mubr.bf16.mxu0 %v3787_v34  ;;  %v3711_v14 = vmax.f32 %v3544_v30, 0.0  ;;  %v3834_v34 = vld [vmem:[%s11472_s10] sm:$0x3] }
 0x437   : > { %v3547_v31 = vpop.f32.mrf.mxu1  ;;  %v10141_v16 = vpop.f32.mrf.mxu0  ;;  %4279 = vmatmul.mubr.bf16.gmra.mxu0 %v3786_v6 }
 0x438   : > { %v3548_v37 = vadd.f32 %v3547_v31, %v9916_v3  ;;  %v3712_v45 = vmax.f32 %v3546_v27, 0.0 }
 0x439   : > { %v3551_v41 = vpop.f32.mrf.mxu1  ;;  %v10143_v33 = vpop.f32.mrf.mxu0 }
 0x43a   : > { %v3713_v40 = vmax.f32 %v3548_v37, 0.0  ;;  %v3788_v12 = vpack.c.bf16 %v3712_v45, %v3710_v29  ;;  %v3552_v50 = vadd.f32 %v3551_v41, %v9919_v5  ;;  %v10184_v41 = vrot.slane %v3834_v34, %v9180_v21 }
 0x43b   : > { %v3553_v42 = vpop.f32.mrf.mxu1  ;;  %v10145_v43 = vpop.f32.mrf.mxu0 }
 0x43c   : > { %v3789_v32 = vpack.c.bf16 %v3713_v40, %v3711_v14  ;;  %v3554_v48 = vadd.f32 %v3553_v42, %v9916_v3  ;;  %v3714_v59 = vmax.f32 %v3552_v50, 0.0  ;;  %v10181_v14 = vrot.slane %v3834_v34, %v9188_v24  ;;  %v8562_v34 = vld [vmem:[%s11476_s14 + $0x64] ss:$8 sps:$4 sm:$0xff]  }
 0x43d   : > { %v3555_v46 = vpop.f32.mrf.mxu1  ;;  %v10147_v47 = vpop.f32.mrf.mxu0 }
 0x43e   : > { %4288 = vmatprep.mubr.bf16.mxu0 %v3789_v32  ;;  %v3556_v1 = vadd.f32 %v3555_v46, %v9919_v5  ;;  %v3715_v54 = vmax.f32 %v3554_v48, 0.0 }
 0x43f   : > { %v3557_v26 = vpop.f32.mrf.mxu1  ;;  %v10151_v49 = vpop.f32.mrf.mxu0  ;;  %4289 = vmatmul.mubr.bf16.gmra.mxu0 %v3788_v12 }
 0x440   : > { %v3558_v44 = vadd.f32 %v3557_v26, %v9916_v3  ;;  %v3716_v53 = vmax.f32 %v3556_v1, 0.0 }
 0x441   : > { %v3561_v51 = vpop.f32.mrf.mxu1  ;;  %v10155_v52 = vpop.f32.mrf.mxu0 }
 0x442   : > { %v3717_v19 = vmax.f32 %v3558_v44, 0.0  ;;  %v3790_v63 = vpack.c.bf16 %v3716_v53, %v3714_v59  ;;  %v3562_v10 = vadd.f32 %v3561_v51, %v9919_v5 }
 0x443   : > { %v3563_v55 = vpop.f32.mrf.mxu1  ;;  %v10157_v56 = vpop.f32.mrf.mxu0 }
 0x444   : > { %v3791_v2 = vpack.c.bf16 %v3717_v19, %v3715_v54  ;;  %v3564_v8 = vadd.f32 %v3563_v55, %v9916_v3  ;;  %v3718_v22 = vmax.f32 %v3562_v10, 0.0 }
 0x445   : > { %v3565_v60 = vpop.f32.mrf.mxu1  ;;  %v10159_v62 = vpop.f32.mrf.mxu0 }
 0x446   : > { %v3566_v4 = vadd.f32 %v3565_v60, %v9919_v5  ;;  %4298 = vmatprep.mubr.bf16.mxu0 %v3791_v2  ;;  %v3719_v17 = vmax.f32 %v3564_v8, 0.0 }
 0x447   : > { %v3567_v39 = vpop.f32.mrf.mxu1  ;;  %v10163_v9 = vpop.f32.mrf.mxu0  ;;  %4299 = vmatmul.mubr.bf16.gmra.mxu0 %v3790_v63 }
 0x448   : > { %v3568_v18 = vadd.f32 %v3567_v39, %v9916_v3  ;;  %v3720_v15 = vmax.f32 %v3566_v4, 0.0 }
 0x449   : > { %v3571_v11 = vpop.f32.mrf.mxu1  ;;  %v10167_v13 = vpop.f32.mrf.mxu0 }
 0x44a   : > { %v3721_v58 = vmax.f32 %v3568_v18, 0.0  ;;  %v3792_v28 = vpack.c.bf16 %v3720_v15, %v3718_v22  ;;  %v3572_v27 = vadd.f32 %v3571_v11, %v9919_v5 }
 0x44b   : > { %v3573_v20 = vpop.f32.mrf.mxu1  ;;  %v10169_v38 = vpop.f32.mrf.mxu0 }
 0x44c   : > { %v3793_v57 = vpack.c.bf16 %v3721_v58, %v3719_v17  ;;  %v3574_v61 = vadd.f32 %v3573_v20, %v9916_v3  ;;  %v3722_v12 = vmax.f32 %v3572_v27, 0.0 }
 0x44d   : > { %v3575_v23 = vpop.f32.mrf.mxu1  ;;  %v10171_v7 = vpop.f32.mrf.mxu0 }
 0x44e   : > { %v3576_v25 = vadd.f32 %v3575_v23, %v9919_v5  ;;  %4308 = vmatprep.mubr.bf16.mxu0 %v3793_v57  ;;  %v3723_v29 = vmax.f32 %v3574_v61, 0.0  ;;  %v8556_v23 = vld [vmem:[%s11476_s14 + $0x70] ss:$8 sps:$4 sm:$0xff]  }
 0x44f   : > { %v3577_v6 = vpop.f32.mrf.mxu1  ;;  %v4070_v30 = vpop.f32.mrf.mxu0  ;;  %4309 = vmatmul.mubr.bf16.gmra.mxu0 %v3792_v28 }
 0x450   : > { %v3578_v31 = vadd.f32 %v3577_v6, %v9916_v3  ;;  %v3724_v45 = vmax.f32 %v3576_v25, 0.0  ;;  %v4071_v51 = vadd.f32 %v4070_v30, %v10181_v14 }
 0x451   : > { %v3581_v36 = vpop.f32.mrf.mxu1  ;;  %v4072_v37 = vpop.f32.mrf.mxu0 }
 0x452   : > { %v3725_v40 = vmax.f32 %v3578_v31, 0.0  ;;  %v4073_v1 = vadd.f32 %v4072_v37, %v10184_v41  ;;  %v3794_v44 = vpack.c.bf16 %v3724_v45, %v3722_v12  ;;  %v3582_v60 = vadd.f32 %v3581_v36, %v9919_v5 }
 0x453   : > { %v3583_v42 = vpop.f32.mrf.mxu1  ;;  %v4074_v32 = vpop.f32.mrf.mxu0  ;;  %v4371_v18 = vmax.f32 %v4071_v51, 0.0 }
 0x454   : > { %v4075_v46 = vadd.f32 %v4074_v32, %v10181_v14  ;;  %v3795_v50 = vpack.c.bf16 %v3725_v40, %v3723_v29  ;;  %v3584_v54 = vadd.f32 %v3583_v42, %v9916_v3  ;;  %v4372_v8 = vmax.f32 %v4073_v1, 0.0  ;;  %v8560_v32 = vld [vmem:[%s11476_s14 + $0x60] ss:$8 sps:$4 sm:$0xff]  }
 0x455   : > { %v3585_v48 = vpop.f32.mrf.mxu1  ;;  %v4076_v26 = vpop.f32.mrf.mxu0  ;;  %v3726_v57 = vmax.f32 %v3582_v60, 0.0 }
 0x456   : > { %v3586_v53 = vadd.f32 %v3585_v48, %v9919_v5  ;;  %v4077_v19 = vadd.f32 %v4076_v26, %v10184_v41  ;;  %4318 = vmatprep.mubr.bf16.mxu0 %v3795_v50  ;;  %v4373_v2 = vmax.f32 %v4075_v46, 0.0  ;;  %v3727_v58 = vmax.f32 %v3584_v54, 0.0  ;;  %v8565_v26 = vld [vmem:[%s11476_s14 + $0x54] ss:$8 sps:$4 sm:$0xff]  }
 0x457   : > { %v3587_v55 = vpop.f32.mrf.mxu1  ;;  %v4080_v59 = vpop.f32.mrf.mxu0  ;;  %4319 = vmatmul.mubr.bf16.gmra.mxu0 %v3794_v44 }
 0x458   : > { %v4374_v63 = vmax.f32 %v4077_v19, 0.0  ;;  %v3588_v4 = vadd.f32 %v3587_v55, %v9916_v3  ;;  %v3728_v11 = vmax.f32 %v3586_v53, 0.0  ;;  %v4493_v28 = vpack.c.bf16 %v4373_v2, %v4371_v18  ;;  %v8568_v18 = vld [vmem:[%s11476_s14 + $0x44] ss:$8 sps:$4 sm:$0xff]  }
 0x459   : > { %v3591_v39 = vpop.f32.mrf.mxu1  ;;  %v4082_v10 = vpop.f32.mrf.mxu0  ;;  %v4081_v36 = vadd.f32 %v4080_v59, %v10181_v14 }
 0x45a   : > { %v3729_v15 = vmax.f32 %v3588_v4, 0.0  ;;  %v4494_v22 = vpack.c.bf16 %v4374_v63, %v4372_v8  ;;  %v4083_v61 = vadd.f32 %v4082_v10, %v10184_v41  ;;  %v3796_v31 = vpack.c.bf16 %v3728_v11, %v3726_v57  ;;  %v8563_v63 = vld [vmem:[%s11476_s14 + $0x50] ss:$8 sps:$4 sm:$0xff]  }
 0x45b   : > { %v3593_v17 = vpop.f32.mrf.mxu1  ;;  %v4084_v20 = vpop.f32.mrf.mxu0  ;;  %v3592_v12 = vadd.f32 %v3591_v39, %v9919_v5  ;;  %v4375_v53 = vmax.f32 %v4081_v36, 0.0 }
 0x45c   : > { %v4085_v25 = vadd.f32 %v4084_v20, %v10181_v14  ;;  %4806 = vmatprep.mubr.bf16.mxu1 %v4494_v22  ;;  %v3797_v27 = vpack.c.bf16 %v3729_v15, %v3727_v58  ;;  %v3594_v40 = vadd.f32 %v3593_v17, %v9916_v3  ;;  %v4376_v50 = vmax.f32 %v4083_v61, 0.0 }
 0x45d   : > { %v3595_v6 = vpop.f32.mrf.mxu1  ;;  %v4086_v30 = vpop.f32.mrf.mxu0  ;;  %4807 = vmatmul.mubr.bf16.vlgmr.msra.gmra.mxu1 %v4493_v28  ;;  %v3730_v4 = vmax.f32 %v3592_v12, 0.0  ;;  %v4047_v28 = vadd.f32 %v10147_v47, %v10184_v41  ;;  %v8571_v47 = vld [vmem:[%s11476_s14 + $0x34] ss:$8 sps:$4 sm:$0xff]  }
 0x45e   : > { %v3596_v37 = vadd.f32 %v3595_v6, %v9919_v5  ;;  %v4087_v45 = vadd.f32 %v4086_v30, %v10184_v41  ;;  %4328 = vmatprep.mubr.bf16.mxu0 %v3797_v27  ;;  %5998 = vmatpush1.bf16.msra.mxu1 %v8556_v23  ;;  %v4377_v46 = vmax.f32 %v4085_v25, 0.0  ;;  %v3731_v55 = vmax.f32 %v3594_v40, 0.0  ;;  %v8566_v6 = vld [vmem:[%s11476_s14 + $0x40] ss:$8 sps:$4 sm:$0xff]  }
 0x45f   : > { %v3597_v29 = vpop.f32.mrf.mxu1  ;;  %v4090_v42 = vpop.f32.mrf.mxu0  ;;  %4329 = vmatmul.mubr.bf16.gmra.mxu0 %v3796_v31  ;;  %5999 = vmatprep.subr.bf16.mxu1 %v8562_v34 }
 0x460   : > { %v4378_v1 = vmax.f32 %v4087_v45, 0.0  ;;  %v3598_v48 = vadd.f32 %v3597_v29, %v9916_v3  ;;  %v3732_v19 = vmax.f32 %v3596_v37, 0.0  ;;  %v4495_v8 = vpack.c.bf16 %v4377_v46, %v4375_v53 }
 0x461   : > { %v3601_v44 = vpop.f32.mrf.mxu1  ;;  %v4092_v51 = vpop.f32.mrf.mxu0  ;;  %v4091_v11 = vadd.f32 %v4090_v42, %v10181_v14  ;;  %v4043_v37 = vadd.f32 %v10143_v33, %v10184_v41  ;;  %v4045_v53 = vadd.f32 %v10145_v43, %v10181_v14  ;;  %v4041_v43 = vadd.f32 %v10141_v16, %v10181_v14 }
 0x462   : > { %v3733_v54 = vmax.f32 %v3598_v48, 0.0  ;;  %v4496_v2 = vpack.c.bf16 %v4378_v1, %v4376_v50  ;;  %6000 = vmatpush1.bf16.msra.mxu1 %v8560_v32  ;;  %v4093_v39 = vadd.f32 %v4092_v51, %v10184_v41  ;;  %v3798_v20 = vpack.c.bf16 %v3732_v19, %v3730_v4  ;;  %v8572_v4 = vld [vmem:[%s11476_s14 + $0x20] ss:$8 sps:$4 sm:$0xff]  }
 0x463   : > { %v3603_v59 = vpop.f32.mrf.mxu1  ;;  %v4094_v60 = vpop.f32.mrf.mxu0  ;;  %6001 = vmatprep.subr.bf16.mxu1 %v8565_v26  ;;  %v3602_v30 = vadd.f32 %v3601_v44, %v9919_v5  ;;  %v4379_v45 = vmax.f32 %v4091_v11, 0.0  ;;  %v8574_v44 = vld [vmem:[%s11476_s14 + $0x24] ss:$8 sps:$4 sm:$0xff]   ;;  %v4360_v51 = vmax.f32 %v4043_v37, 0.0 }
 0x464   : > { %v4095_v10 = vadd.f32 %v4094_v60, %v10181_v14  ;;  %4816 = vmatprep.mubr.bf16.mxu1 %v4496_v2  ;;  %v3799_v17 = vpack.c.bf16 %v3733_v54, %v3731_v55  ;;  %v3604_v22 = vadd.f32 %v3603_v59, %v9916_v3  ;;  %v4380_v27 = vmax.f32 %v4093_v39, 0.0 }
 0x465   : > { %v3605_v15 = vpop.f32.mrf.mxu1  ;;  %v4096_v58 = vpop.f32.mrf.mxu0  ;;  %4817 = vmatmul.mubr.bf16.gmra.mxu1 %v4495_v8  ;;  %v3734_v48 = vmax.f32 %v3602_v30, 0.0  ;;  %v4057_v60 = vadd.f32 %v10159_v62, %v10184_v41  ;;  %v4053_v62 = vadd.f32 %v10155_v52, %v10184_v41 }
 0x466   : > { %v3606_v23 = vadd.f32 %v3605_v15, %v9919_v5  ;;  %v4097_v57 = vadd.f32 %v4096_v58, %v10184_v41  ;;  %v4381_v25 = vmax.f32 %v4095_v10, 0.0  ;;  %4338 = vmatprep.mubr.bf16.mxu0 %v3799_v17  ;;  %6002 = vmatpush1.bf16.msra.mxu1 %v8563_v63  ;;  %v3735_v29 = vmax.f32 %v3604_v22, 0.0 }
 0x467   : > { %v3607_v34 = vpop.f32.mrf.mxu1  ;;  %v4100_v61 = vpop.f32.mrf.mxu0  ;;  %4339 = vmatmul.mubr.bf16.gmra.mxu0 %v3798_v20  ;;  %6003 = vmatprep.subr.bf16.mxu1 %v8568_v18  ;;  %v4362_v5 = vmax.f32 %v4047_v28, 0.0  ;;  %v8577_v18 = vld [vmem:[%s11476_s14 + $0x14] ss:$8 sps:$4 sm:$0xff]   ;;  %v8097_v15 = vcombine.low %v10101_v35, %v10101_v35  ;;  %v4361_v58 = vmax.f32 %v4045_v53, 0.0  ;;  %v4366_v20 = vmax.f32 %v4057_v60, 0.0 }
 0x468   : > { %v4382_v31 = vmax.f32 %v4097_v57, 0.0  ;;  %v3608_v36 = vadd.f32 %v3607_v34, %v9916_v3  ;;  %v3736_v42 = vmax.f32 %v3606_v23, 0.0  ;;  %v4497_v46 = vpack.c.bf16 %v4381_v25, %v4379_v45  ;;  %v8569_v3 = vld [vmem:[%s11476_s14 + $0x30] ss:$8 sps:$4 sm:$0xff]   ;;  %v8580_v35 = vld [vmem:[%s11476_s14 + $0x4] ss:$8 sps:$4 sm:$0xff]  }
 0x469   : > { %v4102_v40 = vpop.f32.mrf.mxu0  ;;  %v4101_v55 = vadd.f32 %v4100_v61, %v10181_v14  ;;  %v4488_v63 = vpack.c.bf16 %v4362_v5, %v4360_v51  ;;  %v8575_v23 = vld [vmem:[%s11476_s14 + $0x10] ss:$8 sps:$4 sm:$0xff]   ;;  %v4359_v57 = vmax.f32 %v4041_v43, 0.0  ;;  %v4364_v34 = vmax.f32 %v4053_v62, 0.0 }
 0x46a   : > { %v3737_v32 = vmax.f32 %v3608_v36, 0.0  ;;  %v4498_v12 = vpack.c.bf16 %v4382_v31, %v4380_v27  ;;  %6004 = vmatpush1.bf16.msra.mxu1 %v8566_v6  ;;  %v4103_v26 = vadd.f32 %v4102_v40, %v10184_v41  ;;  %v3800_v54 = vpack.c.bf16 %v3736_v42, %v3734_v48  ;;  %v8578_v40 = vld [vmem:[%s11476_s14] ss:$8 sps:$4 sm:$0xff]  }
 0x46b   : > { %v4104_v1 = vpop.f32.mrf.mxu0  ;;  %6005 = vmatprep.subr.bf16.mxu1 %v8571_v47  ;;  %v4383_v17 = vmax.f32 %v4101_v55, 0.0  ;;  %v5103_v6 = vsel %vm1003_vm0, %v8097_v15, 0  ;;  %v4487_v30 = vpack.c.bf16 %v4361_v58, %v4359_v57  ;;  %v4055_v27 = vadd.f32 %v10157_v56, %v10181_v14 }
 0x46c   : > { %v4105_v50 = vadd.f32 %v4104_v1, %v10181_v14  ;;  %4826 = vmatprep.mubr.bf16.mxu1 %v4498_v12  ;;  %v3801_v33 = vpack.c.bf16 %v3737_v32, %v3735_v29  ;;  %v4384_v8 = vmax.f32 %v4103_v26, 0.0  ;;  %v4067_v47 = vadd.f32 %v10171_v7, %v10184_v41  ;;  %v8583_v12 = vld [vmem:[%s11476_s14 + $0xf4] ss:$8 sps:$4 sm:$0xff]   ;;  %v8581_v26 = vld [vmem:[%s11476_s14 + $0xf0] ss:$8 sps:$4 sm:$0xff]  }
 0x46d   : > { %v4106_v19 = vpop.f32.mrf.mxu0  ;;  %4827 = vmatmul.mubr.bf16.gmra.mxu1 %v4497_v46  ;;  %v4490_v45 = vpack.c.bf16 %v4366_v20, %v4364_v34  ;;  %v4051_v29 = vadd.f32 %v10151_v49, %v10181_v14  ;;  %v4063_v7 = vadd.f32 %v10167_v13, %v10184_v41  ;;  %v4365_v46 = vmax.f32 %v4055_v27, 0.0  ;;  %v8586_v13 = vld [vmem:[%s11476_s14 + $0xe4] ss:$8 sps:$4 sm:$0xff]   ;;  %v8587_v27 = vld [vmem:[%s11476_s14 + $0xd0] ss:$8 sps:$4 sm:$0xff]  }
 0x46e   : > { %v4107_v59 = vadd.f32 %v4106_v19, %v10184_v41  ;;  %4348 = vmatprep.mubr.bf16.mxu0 %v3801_v33  ;;  %6006 = vmatpush1.bf16.msra.mxu1 %v8569_v3  ;;  %v4385_v39 = vmax.f32 %v4105_v50, 0.0  ;;  %v4370_v48 = vmax.f32 %v4067_v47, 0.0  ;;  %v4065_v55 = vadd.f32 %v10169_v38, %v10181_v14 }
 0x46f   : > { %v4110_v2 = vpop.f32.mrf.mxu0  ;;  %4349 = vmatmul.mubr.bf16.gmra.mxu0 %v3800_v54  ;;  %6007 = vmatprep.subr.bf16.mxu1 %v8574_v44  ;;  %v4363_v50 = vmax.f32 %v4051_v29, 0.0  ;;  %v4368_v53 = vmax.f32 %v4063_v7, 0.0  ;;  %v4061_v43 = vadd.f32 %v10163_v9, %v10181_v14  ;;  %v8669_v7 = vld [vmem:[%s8944_s29] sm:$0xff]  }
 0x470   : > { %v4386_v10 = vmax.f32 %v4107_v59, 0.0  ;;  %4776 = vmatprep.mubr.bf16.mxu0 %v4488_v63  ;;  %v4499_v28 = vpack.c.bf16 %v4385_v39, %v4383_v17  ;;  %v4111_v31 = vadd.f32 %v4110_v2, %v10181_v14 }
 0x471   : > { %v4112_v11 = vpop.f32.mrf.mxu0  ;;  %v4489_v54 = vpack.c.bf16 %v4365_v46, %v4363_v50  ;;  %v4492_v63 = vpack.c.bf16 %v4370_v48, %v4368_v53  ;;  %v4367_v58 = vmax.f32 %v4061_v43, 0.0 }
 0x472   : > { %v4500_v16 = vpack.c.bf16 %v4386_v10, %v4384_v8  ;;  %6008 = vmatpush1.bf16.msra.mxu1 %v8572_v4  ;;  %v4113_v25 = vadd.f32 %v4112_v11, %v10184_v41  ;;  %v4387_v1 = vmax.f32 %v4111_v31, 0.0  ;;  %v8584_v4 = vld [vmem:[%s11476_s14 + $0xe0] ss:$8 sps:$4 sm:$0xff]   ;;  %v8589_v31 = vld [vmem:[%s11476_s14 + $0xd4] ss:$8 sps:$4 sm:$0xff]  }
 0x473   : > { %v4114_v22 = vpop.f32.mrf.mxu0  ;;  %6009 = vmatprep.subr.bf16.mxu1 %v8577_v18  ;;  %v4369_v18 = vmax.f32 %v4065_v55, 0.0 }
 0x474   : > { %v4115_v52 = vadd.f32 %v4114_v22, %v10181_v14  ;;  %4836 = vmatprep.mubr.bf16.mxu1 %v4500_v16  ;;  %v4388_v42 = vmax.f32 %v4113_v25, 0.0 }
 0x475   : > { %v4116_v61 = vpop.f32.mrf.mxu0  ;;  %4837 = vmatmul.mubr.bf16.gmra.mxu1 %v4499_v28  ;;  %v4491_v22 = vpack.c.bf16 %v4369_v18, %v4367_v58 }
 0x476   : > { %v4117_v36 = vadd.f32 %v4116_v61, %v10184_v41  ;;  %6010 = vmatpush1.bf16.msra.mxu1 %v8575_v23  ;;  %v4389_v56 = vmax.f32 %v4115_v52, 0.0 }
 0x477   : > { %v4120_v37 = vpop.f32.mrf.mxu0  ;;  %4777 = vmatmul.mubr.bf16.vlgmr.msra.gmra.mxu0 %v4487_v30  ;;  %6011 = vmatprep.subr.bf16.mxu1 %v8580_v35 }
 0x478   : > { %v4390_v32 = vmax.f32 %v4117_v36, 0.0  ;;  %5123 = vmatpush1.bf16.msra.mxu0 %v5103_v6  ;;  %4786 = vmatprep.mubr.bf16.mxu0 %v4490_v45  ;;  %v4501_v33 = vpack.c.bf16 %v4389_v56, %v4387_v1  ;;  %v4121_v59 = vadd.f32 %v4120_v37, %v10181_v14 }
 0x479   : > { %v4122_v5 = vpop.f32.mrf.mxu0 }
 0x47a   : > { %v4502_v3 = vpack.c.bf16 %v4390_v32, %v4388_v42  ;;  %6012 = vmatpush1.bf16.msra.mxu1 %v8578_v40  ;;  %v4123_v44 = vadd.f32 %v4122_v5, %v10184_v41  ;;  %v4391_v62 = vmax.f32 %v4121_v59, 0.0  ;;  %v8590_v59 = vld [vmem:[%s11476_s14 + $0xc0] ss:$8 sps:$4 sm:$0xff]  }
 0x47b   : > { %v4124_v49 = vpop.f32.mrf.mxu0  ;;  %6013 = vmatprep.subr.bf16.mxu1 %v8583_v12 }
 0x47c   : > { %v4125_v51 = vadd.f32 %v4124_v49, %v10181_v14  ;;  %4846 = vmatprep.mubr.bf16.mxu1 %v4502_v3  ;;  %v4392_v8 = vmax.f32 %v4123_v44, 0.0 }
 0x47d   : > { %v4126_v19 = vpop.f32.mrf.mxu0  ;;  %4847 = vmatmul.mubr.bf16.gmra.mxu1 %v4501_v33 }
 0x47e   : > { %v4127_v60 = vadd.f32 %v4126_v19, %v10184_v41  ;;  %6014 = vmatpush2.bf16.msra.mxu1 %v8581_v26  ;;  %v4393_v39 = vmax.f32 %v4125_v51, 0.0 }
 0x47f   : > { %v4130_v2 = vpop.f32.mrf.mxu0  ;;  %4787 = vmatmul.mubr.bf16.gmra.mxu0 %v4489_v54  ;;  %6015 = vmatprep.subr.bf16.mxu1 %v8586_v13  ;;  %v8670_v54 = vld [vmem:[%s8944_s29 + $0x8] sm:$0xff]  }
 0x480   : > { %v4394_v10 = vmax.f32 %v4127_v60, 0.0  ;;  %4796 = vmatprep.mubr.bf16.mxu0 %v4492_v63  ;;  %v4503_v17 = vpack.c.bf16 %v4393_v39, %v4391_v62  ;;  %v4131_v23 = vadd.f32 %v4130_v2, %v10181_v14  ;;  %v8592_v60 = vld [vmem:[%s11476_s14 + $0xc4] ss:$8 sps:$4 sm:$0xff]  }
 0x481   : > { %v4132_v38 = vpop.f32.mrf.mxu0 }
 0x482   : > { %v4504_v11 = vpack.c.bf16 %v4394_v10, %v4392_v8  ;;  %6016 = vmatpush2.bf16.msra.mxu1 %v8584_v4  ;;  %v4133_v16 = vadd.f32 %v4132_v38, %v10184_v41  ;;  %v4395_v61 = vmax.f32 %v4131_v23, 0.0 }
 0x483   : > { %v4134_v15 = vpop.f32.mrf.mxu0  ;;  %6017 = vmatprep.subr.bf16.mxu1 %v8589_v31 }
 0x484   : > { %v4135_v20 = vadd.f32 %v4134_v15, %v10181_v14  ;;  %4856 = vmatprep.mubr.bf16.mxu1 %v4504_v11  ;;  %v4396_v25 = vmax.f32 %v4133_v16, 0.0 }
 0x485   : > { %v4136_v9 = vpop.f32.mrf.mxu0  ;;  %4857 = vmatmul.mubr.bf16.gmra.mxu1 %v4503_v17  ;;  %v8671_v17 = vld [vmem:[%s8944_s29 + $0x10] sm:$0xff]  }
 0x486   : > { %v4137_v57 = vadd.f32 %v4136_v9, %v10184_v41  ;;  %v4397_v52 = vmax.f32 %v4135_v20, 0.0  ;;  %6018 = vmatpush2.bf16.msra.mxu1 %v8587_v27  ;;  %v8672_v27 = vld [vmem:[%s8944_s29 + $0x18] sm:$0xff]  }
 0x487   : > { %v4140_v28 = vpop.f32.mrf.mxu0  ;;  %4797 = vmatmul.mubr.bf16.gmra.mxu0 %v4491_v22  ;;  %6019 = vmatprep.subr.bf16.mxu1 %v8592_v60 }
 0x488   : > { %v4398_v35 = vmax.f32 %v4137_v57, 0.0  ;;  %5140 = vmatprep.mubr.bf16.mxu0 %v8775_v0  ;;  %v4505_v36 = vpack.c.bf16 %v4397_v52, %v4395_v61  ;;  %v4141_v40 = vadd.f32 %v4140_v28, %v10181_v14 }
 0x489   : > { %v4142_v34 = vpop.f32.mrf.mxu0 }
 0x48a   : > { %v4506_v6 = vpack.c.bf16 %v4398_v35, %v4396_v25  ;;  %v4143_v47 = vadd.f32 %v4142_v34, %v10184_v41  ;;  %v4399_v46 = vmax.f32 %v4141_v40, 0.0  ;;  %6020 = vmatpush2.bf16.msra.mxu1 %v8590_v59 }
 0x48b   : > { %v4144_v30 = vpop.f32.mrf.mxu0 }
 0x48c   : > { %v4145_v37 = vadd.f32 %v4144_v30, %v10181_v14  ;;  %4866 = vmatprep.mubr.bf16.mxu1 %v4506_v6  ;;  %v4400_v56 = vmax.f32 %v4143_v47, 0.0  ;;  %v8595_v47 = vld [vmem:[%s11476_s14 + $0xb4] ss:$8 sps:$4 sm:$0xff]  }
 0x48d   : > { %v4146_v45 = vpop.f32.mrf.mxu0  ;;  %4867 = vmatmul.mubr.bf16.gmra.mxu1 %v4505_v36  ;;  %v8593_v36 = vld [vmem:[%s11476_s14 + $0xb0] ss:$8 sps:$4 sm:$0xff]   ;;  %6021 = vmatprep.subr.bf16.mxu1 %v8595_v47 }
 0x48e   : > { %v4147_v29 = vadd.f32 %v4146_v45, %v10184_v41  ;;  %v4401_v32 = vmax.f32 %v4145_v37, 0.0  ;;  %6022 = vmatpush2.bf16.msra.mxu1 %v8593_v36 }
 0x48f   : > { %v4150_v42 = vpop.f32.mrf.mxu0  ;;  %8100 = vmatmul.mubr.msk.bf16.vlgmr.msra.gmra.mxu0 %vm906_vm1, %v8669_v7 }
 0x490   : > { %v4402_v12 = vmax.f32 %v4147_v29, 0.0  ;;  %5150 = vmatprep.mubr.bf16.mxu0 %v8775_v0  ;;  %v4507_v48 = vpack.c.bf16 %v4401_v32, %v4399_v46  ;;  %v4151_v33 = vadd.f32 %v4150_v42, %v10181_v14 }
 0x491   : > { %v4152_v5 = vpop.f32.mrf.mxu0 }
 0x492   : > { %v4508_v1 = vpack.c.bf16 %v4402_v12, %v4400_v56  ;;  %v4153_v49 = vadd.f32 %v4152_v5, %v10184_v41  ;;  %v4403_v2 = vmax.f32 %v4151_v33, 0.0 }
 0x493   : > { %v4154_v3 = vpop.f32.mrf.mxu0 }
 0x494   : > { %v4155_v26 = vadd.f32 %v4154_v3, %v10181_v14  ;;  %4876 = vmatprep.mubr.bf16.mxu1 %v4508_v1  ;;  %v4404_v13 = vmax.f32 %v4153_v49, 0.0 }
 0x495   : > { %v4156_v50 = vpop.f32.mrf.mxu0  ;;  %4877 = vmatmul.mubr.bf16.gmra.mxu1 %v4507_v48  ;;  %v8673_v48 = vld [vmem:[%s8944_s29 + $0x20] sm:$0xff]  }
 0x496   : > { %v4157_v44 = vadd.f32 %v4156_v50, %v10184_v41  ;;  %v4405_v53 = vmax.f32 %v4155_v26, 0.0  ;;  %v8596_v26 = vld [vmem:[#allocation2 + $0x70] ss:$8 sps:$4 sm:$0xff]   ;;  %v8598_v50 = vld [vmem:[#allocation2 + $0x74] ss:$8 sps:$4 sm:$0xff]  }
 0x497   : > { %v4160_v51 = vpop.f32.mrf.mxu0  ;;  %8101 = vmatmul.mubr.msk.bf16.gmra.mxu0 %vm906_vm1, %v8670_v54  ;;  %6746 = vmatprep.subr.bf16.mxu0 %v8598_v50  ;;  %v8610_v50 = vld [vmem:[#allocation2 + $0x54] ss:$8 sps:$4 sm:$0xff]  }
 0x498   : > { %v4406_v19 = vmax.f32 %v4157_v44, 0.0  ;;  %5160 = vmatprep.mubr.bf16.mxu0 %v8775_v0  ;;  %v4509_v43 = vpack.c.bf16 %v4405_v53, %v4403_v2  ;;  %v4161_v38 = vadd.f32 %v4160_v51, %v10181_v14  ;;  %6747 = vmatpush1.bf16.msra.mxu0 %v8596_v26  ;;  %v8608_v26 = vld [vmem:[#allocation2 + $0x50] ss:$8 sps:$4 sm:$0xff]  }
 0x499   : > { %v4162_v55 = vpop.f32.mrf.mxu0 }
 0x49a   : > { %v4510_v63 = vpack.c.bf16 %v4406_v19, %v4404_v13  ;;  %v4163_v8 = vadd.f32 %v4162_v55, %v10184_v41  ;;  %v4407_v20 = vmax.f32 %v4161_v38, 0.0 }
 0x49b   : > { %v4164_v4 = vpop.f32.mrf.mxu0 }
 0x49c   : > { %v4165_v39 = vadd.f32 %v4164_v4, %v10181_v14  ;;  %4886 = vmatprep.mubr.bf16.mxu1 %v4510_v63  ;;  %v4408_v11 = vmax.f32 %v4163_v8, 0.0 }
 0x49d   : > { %v4166_v10 = vpop.f32.mrf.mxu0  ;;  %4887 = vmatmul.mubr.bf16.gmra.mxu1 %v4509_v43  ;;  %v8674_v43 = vld [vmem:[%s8944_s29 + $0x28] sm:$0xff]  }
 0x49e   : > { %v4167_v18 = vadd.f32 %v4166_v10, %v10184_v41  ;;  %v4409_v15 = vmax.f32 %v4165_v39, 0.0  ;;  %v8599_v39 = vld [vmem:[%s11476_s14 + $0xa0] ss:$8 sps:$4 sm:$0xff]   ;;  %v8601_v10 = vld [vmem:[%s11476_s14 + $0xa4] ss:$8 sps:$4 sm:$0xff]  }
 0x49f   : > { %v4170_v62 = vpop.f32.mrf.mxu0  ;;  %8102 = vmatmul.mubr.msk.bf16.gmra.mxu0 %vm906_vm1, %v8671_v17  ;;  %6023 = vmatprep.subr.bf16.mxu1 %v8601_v10  ;;  %v8611_v10 = vld [vmem:[%s11476_s14 + $0x80] ss:$8 sps:$4 sm:$0xff]  }
 0x4a0   : > { %v4410_v58 = vmax.f32 %v4167_v18, 0.0  ;;  %5170 = vmatprep.mubr.bf16.mxu0 %v8775_v0  ;;  %v4511_v23 = vpack.c.bf16 %v4409_v15, %v4407_v20  ;;  %v4171_v52 = vadd.f32 %v4170_v62, %v10181_v14  ;;  %6024 = vmatpush2.bf16.msra.mxu1 %v8599_v39  ;;  %v8604_v20 = vld [vmem:[#allocation2 + $0x64] ss:$8 sps:$4 sm:$0xff]  }
 0x4a1   : > { %v4172_v16 = vpop.f32.mrf.mxu0  ;;  %6748 = vmatprep.subr.bf16.mxu0 %v8604_v20 }
 0x4a2   : > { %v4512_v9 = vpack.c.bf16 %v4410_v58, %v4408_v11  ;;  %v4173_v57 = vadd.f32 %v4172_v16, %v10184_v41  ;;  %v4411_v37 = vmax.f32 %v4171_v52, 0.0  ;;  %v8602_v16 = vld [vmem:[#allocation2 + $0x60] ss:$8 sps:$4 sm:$0xff]   ;;  %v8675_v52 = vld [vmem:[%s8944_s29 + $0x30] sm:$0xff]  }
 0x4a3   : > { %v4174_v22 = vpop.f32.mrf.mxu0  ;;  %6749 = vmatpush1.bf16.msra.mxu0 %v8602_v16  ;;  %v8678_v16 = vld [vmem:[%s8944_s29 + $0x48] sm:$0xff]  }
 0x4a4   : > { %v4175_v28 = vadd.f32 %v4174_v22, %v10181_v14  ;;  %4896 = vmatprep.mubr.bf16.mxu1 %v4512_v9  ;;  %v4412_v61 = vmax.f32 %v4173_v57, 0.0  ;;  %6750 = vmatprep.subr.bf16.mxu0 %v8610_v50 }
 0x4a5   : > { %v4176_v25 = vpop.f32.mrf.mxu0  ;;  %4897 = vmatmul.mubr.bf16.gmra.mxu1 %v4511_v23 }
 0x4a6   : > { %v4177_v35 = vadd.f32 %v4176_v25, %v10184_v41  ;;  %v4413_v6 = vmax.f32 %v4175_v28, 0.0 }
 0x4a7   : > { %v4180_v34 = vpop.f32.mrf.mxu0  ;;  %8103 = vmatmul.mubr.msk.bf16.gmra.mxu0 %vm906_vm1, %v8672_v27 }
 0x4a8   : > { %v4414_v30 = vmax.f32 %v4177_v35, 0.0  ;;  %5180 = vmatprep.mubr.bf16.mxu0 %v8775_v0  ;;  %v4513_v29 = vpack.c.bf16 %v4413_v6, %v4411_v37  ;;  %v4181_v12 = vadd.f32 %v4180_v34, %v10181_v14  ;;  %v8605_v6 = vld [vmem:[%s11476_s14 + $0x90] ss:$8 sps:$4 sm:$0xff]   ;;  %6751 = vmatpush1.bf16.msra.mxu0 %v8608_v26 }
 0x4a9   : > { %v4182_v31 = vpop.f32.mrf.mxu0 }
 0x4aa   : > { %v4514_v45 = vpack.c.bf16 %v4414_v30, %v4412_v61  ;;  %v4183_v42 = vadd.f32 %v4182_v31, %v10184_v41  ;;  %v4415_v33 = vmax.f32 %v4181_v12, 0.0  ;;  %v8607_v30 = vld [vmem:[%s11476_s14 + $0x94] ss:$8 sps:$4 sm:$0xff]  }
 0x4ab   : > { %v4184_v40 = vpop.f32.mrf.mxu0  ;;  %6025 = vmatprep.subr.bf16.mxu1 %v8607_v30  ;;  %v8676_v12 = vld [vmem:[%s8944_s29 + $0x38] sm:$0xff]  }
 0x4ac   : > { %v4185_v56 = vadd.f32 %v4184_v40, %v10181_v14  ;;  %4906 = vmatprep.mubr.bf16.mxu1 %v4514_v45  ;;  %v4416_v46 = vmax.f32 %v4183_v42, 0.0  ;;  %6026 = vmatpush2.bf16.msra.mxu1 %v8605_v6 }
 0x4ad   : > { %v4186_v32 = vpop.f32.mrf.mxu0  ;;  %4907 = vmatmul.mubr.bf16.gmra.mxu1 %v4513_v29 }
 0x4ae   : > { %v4187_v7 = vadd.f32 %v4186_v32, %v10184_v41  ;;  %v4417_v1 = vmax.f32 %v4185_v56, 0.0 }
 0x4af   : > { %v4190_v5 = vpop.f32.mrf.mxu0  ;;  %8104 = vmatmul.mubr.msk.bf16.gmra.mxu0 %vm906_vm1, %v8673_v48 }
 0x4b0   : > { %v4418_v3 = vmax.f32 %v4187_v7, 0.0  ;;  %5190 = vmatprep.mubr.bf16.mxu0 %v8775_v0  ;;  %v4515_v13 = vpack.c.bf16 %v4417_v1, %v4415_v33  ;;  %v4191_v55 = vadd.f32 %v4190_v5, %v10181_v14 }
 0x4b1   : > { %v4192_v49 = vpop.f32.mrf.mxu0 }
 0x4b2   : > { %v4516_v44 = vpack.c.bf16 %v4418_v3, %v4416_v46  ;;  %v4193_v53 = vadd.f32 %v4192_v49, %v10184_v41  ;;  %v4419_v38 = vmax.f32 %v4191_v55, 0.0  ;;  %v8677_v55 = vld [vmem:[%s8944_s29 + $0x40] sm:$0xff]  }
 0x4b3   : > { %v4194_v51 = vpop.f32.mrf.mxu0 }
 0x4b4   : > { %v4195_v19 = vadd.f32 %v4194_v51, %v10181_v14  ;;  %4916 = vmatprep.mubr.bf16.mxu1 %v4516_v44  ;;  %v4420_v2 = vmax.f32 %v4193_v53, 0.0 }
 0x4b5   : > { %v4196_v54 = vpop.f32.mrf.mxu0  ;;  %4917 = vmatmul.mubr.bf16.gmra.mxu1 %v4515_v13 }
 0x4b6   : > { %v4197_v59 = vadd.f32 %v4196_v54, %v10184_v41  ;;  %v4421_v63 = vmax.f32 %v4195_v19, 0.0 }
 0x4b7   : > { %v4200_v60 = vpop.f32.mrf.mxu0  ;;  %8105 = vmatmul.mubr.msk.bf16.gmra.mxu0 %vm906_vm1, %v8674_v43 }
 0x4b8   : > { %v4422_v4 = vmax.f32 %v4197_v59, 0.0  ;;  %5200 = vmatprep.mubr.bf16.mxu0 %v8775_v0  ;;  %v4517_v11 = vpack.c.bf16 %v4421_v63, %v4419_v38  ;;  %v4201_v9 = vadd.f32 %v4200_v60, %v10181_v14  ;;  %v8613_v38 = vld [vmem:[%s11476_s14 + $0x84] ss:$8 sps:$4 sm:$0xff]  }
 0x4b9   : > { %v4202_v8 = vpop.f32.mrf.mxu0  ;;  %6027 = vmatprep.subr.bf16.mxu1 %v8613_v38  ;;  %v8617_v38 = vld [vmem:[#allocation2 + $0x30] ss:$8 sps:$4 sm:$0xff]  }
 0x4ba   : > { %v4518_v18 = vpack.c.bf16 %v4422_v4, %v4420_v2  ;;  %v4203_v15 = vadd.f32 %v4202_v8, %v10184_v41  ;;  %v4423_v34 = vmax.f32 %v4201_v9, 0.0  ;;  %6028 = vmatpush2.bf16.msra.mxu1 %v8611_v10 }
 0x4bb   : > { %v4204_v62 = vpop.f32.mrf.mxu0  ;;  %7426 = vmatprep.subr.bf16.mxu1 %v8775_v0 }
 0x4bc   : > { %v4205_v58 = vadd.f32 %v4204_v62, %v10181_v14  ;;  %4926 = vmatprep.mubr.bf16.mxu1 %v4518_v18  ;;  %v4424_v57 = vmax.f32 %v4203_v15, 0.0 }
 0x4bd   : > { %v4206_v17 = vpop.f32.mrf.mxu0  ;;  %4927 = vmatmul.mubr.bf16.gmra.mxu1 %v4517_v11 }
 0x4be   : > { %v4207_v22 = vadd.f32 %v4206_v17, %v10184_v41  ;;  %v4425_v28 = vmax.f32 %v4205_v58, 0.0 }
 0x4bf   : > { %v4210_v23 = vpop.f32.mrf.mxu0  ;;  %8106 = vmatmul.mubr.msk.bf16.gmra.mxu0 %vm906_vm1, %v8675_v52 }
 0x4c0   : > { %v4426_v25 = vmax.f32 %v4207_v22, 0.0  ;;  %5210 = vmatprep.mubr.bf16.mxu0 %v8775_v0  ;;  %v4519_v31 = vpack.c.bf16 %v4425_v28, %v4423_v34  ;;  %v4211_v45 = vadd.f32 %v4210_v23, %v10181_v14 }
 0x4c1   : > { %v4212_v35 = vpop.f32.mrf.mxu0 }
 0x4c2   : > { %v4520_v61 = vpack.c.bf16 %v4426_v25, %v4424_v57  ;;  %v4213_v36 = vadd.f32 %v4212_v35, %v10184_v41  ;;  %v4427_v5 = vmax.f32 %v4211_v45, 0.0 }
 0x4c3   : > { %v4214_v27 = vpop.f32.mrf.mxu0 }
 0x4c4   : > { %v4215_v47 = vadd.f32 %v4214_v27, %v10181_v14  ;;  %4936 = vmatprep.mubr.bf16.mxu1 %v4520_v61  ;;  %v4428_v42 = vmax.f32 %v4213_v36, 0.0 }
 0x4c5   : > { %v4216_v37 = vpop.f32.mrf.mxu0  ;;  %4937 = vmatmul.mubr.bf16.gmra.mxu1 %v4519_v31  ;;  %v8679_v31 = vld [vmem:[%s8944_s29 + $0x50] sm:$0xff]  }
 0x4c6   : > { %v4217_v40 = vadd.f32 %v4216_v37, %v10184_v41  ;;  %v4429_v56 = vmax.f32 %v4215_v47, 0.0 }
 0x4c7   : > { %v4220_v29 = vpop.f32.mrf.mxu0  ;;  %8107 = vmatmul.mubr.msk.bf16.gmra.mxu0 %vm906_vm1, %v8676_v12 }
 0x4c8   : > { %v4430_v32 = vmax.f32 %v4217_v40, 0.0  ;;  %5220 = vmatprep.mubr.bf16.mxu0 %v8775_v0  ;;  %v4521_v3 = vpack.c.bf16 %v4429_v56, %v4427_v5  ;;  %v4221_v44 = vadd.f32 %v4220_v29, %v10181_v14  ;;  %v8614_v40 = vld [vmem:[#allocation2 + $0x40] ss:$8 sps:$4 sm:$0xff]   ;;  %v8616_v29 = vld [vmem:[#allocation2 + $0x44] ss:$8 sps:$4 sm:$0xff]  }
 0x4c9   : > { %v4222_v7 = vpop.f32.mrf.mxu0  ;;  %6752 = vmatprep.subr.bf16.mxu0 %v8616_v29 }
 0x4ca   : > { %v4522_v46 = vpack.c.bf16 %v4430_v32, %v4428_v42  ;;  %v4223_v48 = vadd.f32 %v4222_v7, %v10184_v41  ;;  %v4431_v60 = vmax.f32 %v4221_v44, 0.0  ;;  %6753 = vmatpush1.bf16.msra.mxu0 %v8614_v40  ;;  %v8683_v40 = vld [vmem:[%s8944_s29 + $0x70] sm:$0xff]  }
 0x4cb   : > { %v4224_v1 = vpop.f32.mrf.mxu0 }
 0x4cc   : > { %v4225_v49 = vadd.f32 %v4224_v1, %v10181_v14  ;;  %4946 = vmatprep.mubr.bf16.mxu1 %v4522_v46  ;;  %v4432_v53 = vmax.f32 %v4223_v48, 0.0 }
 0x4cd   : > { %v4226_v33 = vpop.f32.mrf.mxu0  ;;  %4947 = vmatmul.mubr.bf16.gmra.mxu1 %v4521_v3 }
 0x4ce   : > { %v4227_v51 = vadd.f32 %v4226_v33, %v10184_v41  ;;  %v4433_v19 = vmax.f32 %v4225_v49, 0.0  ;;  %v8680_v49 = vld [vmem:[%s8944_s29 + $0x58] sm:$0xff]  }
 0x4cf   : > { %v4230_v13 = vpop.f32.mrf.mxu0  ;;  %8108 = vmatmul.mubr.msk.bf16.gmra.mxu0 %vm906_vm1, %v8677_v55 }
 0x4d0   : > { %v4434_v54 = vmax.f32 %v4227_v51, 0.0  ;;  %5230 = vmatprep.mubr.bf16.mxu0 %v8775_v0  ;;  %v4523_v4 = vpack.c.bf16 %v4433_v19, %v4431_v60  ;;  %v4231_v18 = vadd.f32 %v4230_v13, %v10181_v14 }
 0x4d1   : > { %v4232_v59 = vpop.f32.mrf.mxu0 }
 0x4d2   : > { %v4524_v2 = vpack.c.bf16 %v4434_v54, %v4432_v53  ;;  %v4233_v43 = vadd.f32 %v4232_v59, %v10184_v41  ;;  %v4435_v9 = vmax.f32 %v4231_v18, 0.0  ;;  %v8619_v18 = vld [vmem:[#allocation2 + $0x34] ss:$8 sps:$4 sm:$0xff]  }
 0x4d3   : > { %v4234_v63 = vpop.f32.mrf.mxu0  ;;  %6754 = vmatprep.subr.bf16.mxu0 %v8619_v18 }
 0x4d4   : > { %v4235_v8 = vadd.f32 %v4234_v63, %v10181_v14  ;;  %4956 = vmatprep.mubr.bf16.mxu1 %v4524_v2  ;;  %v4436_v15 = vmax.f32 %v4233_v43, 0.0  ;;  %6755 = vmatpush1.bf16.msra.mxu0 %v8617_v38 }
 0x4d5   : > { %v4236_v39 = vpop.f32.mrf.mxu0  ;;  %4957 = vmatmul.mubr.bf16.gmra.mxu1 %v4523_v4  ;;  %v8681_v4 = vld [vmem:[%s8944_s29 + $0x60] sm:$0xff]  }
 0x4d6   : > { %v4237_v62 = vadd.f32 %v4236_v39, %v10184_v41  ;;  %v4437_v58 = vmax.f32 %v4235_v8, 0.0 }
 0x4d7   : > { %v4240_v11 = vpop.f32.mrf.mxu0  ;;  %8109 = vmatmul.mubr.msk.bf16.gmra.mxu0 %vm906_vm1, %v8678_v16 }
 0x4d8   : > { %v4438_v17 = vmax.f32 %v4237_v62, 0.0  ;;  %5240 = vmatprep.mubr.bf16.mxu0 %v8775_v0  ;;  %v4525_v57 = vpack.c.bf16 %v4437_v58, %v4435_v9  ;;  %v4241_v35 = vadd.f32 %v4240_v11, %v10181_v14 }
 0x4d9   : > { %v4242_v20 = vpop.f32.mrf.mxu0 }
 0x4da   : > { %v4526_v22 = vpack.c.bf16 %v4438_v17, %v4436_v15  ;;  %v4243_v28 = vadd.f32 %v4242_v20, %v10184_v41  ;;  %v4439_v47 = vmax.f32 %v4241_v35, 0.0 }
 0x4db   : > { %v4244_v23 = vpop.f32.mrf.mxu0 }
 0x4dc   : > { %v4245_v25 = vadd.f32 %v4244_v23, %v10181_v14  ;;  %4966 = vmatprep.mubr.bf16.mxu1 %v4526_v22  ;;  %v4440_v6 = vmax.f32 %v4243_v28, 0.0 }
 0x4dd   : > { %v4246_v52 = vpop.f32.mrf.mxu0  ;;  %4967 = vmatmul.mubr.bf16.gmra.mxu1 %v4525_v57  ;;  %v8682_v57 = vld [vmem:[%s8944_s29 + $0x68] sm:$0xff]  }
 0x4de   : > { %v4247_v34 = vadd.f32 %v4246_v52, %v10184_v41  ;;  %v4441_v30 = vmax.f32 %v4245_v25, 0.0 }
 0x4df   : > { %v4250_v61 = vpop.f32.mrf.mxu0  ;;  %8110 = vmatmul.mubr.msk.bf16.gmra.mxu0 %vm906_vm1, %v8679_v31 }
 0x4e0   : > { %v4442_v27 = vmax.f32 %v4247_v34, 0.0  ;;  %5250 = vmatprep.mubr.bf16.mxu0 %v8775_v0  ;;  %v4527_v42 = vpack.c.bf16 %v4441_v30, %v4439_v47  ;;  %v4251_v7 = vadd.f32 %v4250_v61, %v10181_v14 }
 0x4e1   : > { %v4252_v36 = vpop.f32.mrf.mxu0 }
 0x4e2   : > { %v4528_v37 = vpack.c.bf16 %v4442_v27, %v4440_v6  ;;  %v4253_v56 = vadd.f32 %v4252_v36, %v10184_v41  ;;  %v4443_v50 = vmax.f32 %v4251_v7, 0.0  ;;  %v8622_v7 = vld [vmem:[#allocation2 + $0x24] ss:$8 sps:$4 sm:$0xff]  }
 0x4e3   : > { %v4254_v45 = vpop.f32.mrf.mxu0  ;;  %6756 = vmatprep.subr.bf16.mxu0 %v8622_v7 }
 0x4e4   : > { %v4255_v32 = vadd.f32 %v4254_v45, %v10181_v14  ;;  %4976 = vmatprep.mubr.bf16.mxu1 %v4528_v37  ;;  %v4444_v1 = vmax.f32 %v4253_v56, 0.0 }
 0x4e5   : > { %v4256_v12 = vpop.f32.mrf.mxu0  ;;  %4977 = vmatmul.mubr.bf16.gmra.mxu1 %v4527_v42 }
 0x4e6   : > { %v4257_v5 = vadd.f32 %v4256_v12, %v10184_v41  ;;  %v4445_v3 = vmax.f32 %v4255_v32, 0.0  ;;  %v8620_v12 = vld [vmem:[#allocation2 + $0x20] ss:$8 sps:$4 sm:$0xff]  }
 0x4e7   : > { %v4260_v46 = vpop.f32.mrf.mxu0  ;;  %8111 = vmatmul.mubr.msk.bf16.gmra.mxu0 %vm906_vm1, %v8680_v49 }
 0x4e8   : > { %v4446_v48 = vmax.f32 %v4257_v5, 0.0  ;;  %5260 = vmatprep.mubr.bf16.mxu0 %v8775_v0  ;;  %v4529_v51 = vpack.c.bf16 %v4445_v3, %v4443_v50  ;;  %v4261_v54 = vadd.f32 %v4260_v46, %v10181_v14  ;;  %6757 = vmatpush1.bf16.msra.mxu0 %v8620_v12  ;;  %v8687_v12 = vld [vmem:[%s8944_s29 + $0x90] sm:$0xff]  }
 0x4e9   : > { %v4262_v26 = vpop.f32.mrf.mxu0 }
 0x4ea   : > { %v4530_v33 = vpack.c.bf16 %v4446_v48, %v4444_v1  ;;  %v4263_v13 = vadd.f32 %v4262_v26, %v10184_v41  ;;  %v4447_v8 = vmax.f32 %v4261_v54, 0.0 }
 0x4eb   : > { %v4264_v44 = vpop.f32.mrf.mxu0 }
 0x4ec   : > { %v4265_v53 = vadd.f32 %v4264_v44, %v10181_v14  ;;  %4986 = vmatprep.mubr.bf16.mxu1 %v4530_v33  ;;  %v4448_v60 = vmax.f32 %v4263_v13, 0.0 }
 0x4ed   : > { %v4266_v19 = vpop.f32.mrf.mxu0  ;;  %4987 = vmatmul.mubr.bf16.gmra.mxu1 %v4529_v51  ;;  %v8684_v51 = vld [vmem:[%s8944_s29 + $0x78] sm:$0xff]  }
 0x4ee   : > { %v4267_v55 = vadd.f32 %v4266_v19, %v10184_v41  ;;  %v4449_v2 = vmax.f32 %v4265_v53, 0.0 }
 0x4ef   : > { %v4270_v59 = vpop.f32.mrf.mxu0  ;;  %8112 = vmatmul.mubr.msk.bf16.gmra.mxu0 %vm906_vm1, %v8681_v4 }
 0x4f0   : > { %v4450_v63 = vmax.f32 %v4267_v55, 0.0  ;;  %5270 = vmatprep.mubr.bf16.mxu0 %v8775_v0  ;;  %v4531_v62 = vpack.c.bf16 %v4449_v2, %v4447_v8  ;;  %v4271_v17 = vadd.f32 %v4270_v59, %v10181_v14 }
 0x4f1   : > { %v4272_v43 = vpop.f32.mrf.mxu0 }
 0x4f2   : > { %v4532_v39 = vpack.c.bf16 %v4450_v63, %v4448_v60  ;;  %v4273_v11 = vadd.f32 %v4272_v43, %v10184_v41  ;;  %v4451_v25 = vmax.f32 %v4271_v17, 0.0 }
 0x4f3   : > { %v4274_v10 = vpop.f32.mrf.mxu0 }
 0x4f4   : > { %v4275_v15 = vadd.f32 %v4274_v10, %v10181_v14  ;;  %4996 = vmatprep.mubr.bf16.mxu1 %v4532_v39  ;;  %v4452_v9 = vmax.f32 %v4273_v11, 0.0  ;;  %v8685_v39 = vld [vmem:[%s8944_s29 + $0x80] sm:$0xff]  }
 0x4f5   : > { %v4276_v58 = vpop.f32.mrf.mxu0  ;;  %4997 = vmatmul.mubr.bf16.gmra.mxu1 %v4531_v62 }
 0x4f6   : > { %v4277_v16 = vadd.f32 %v4276_v58, %v10184_v41  ;;  %v4453_v22 = vmax.f32 %v4275_v15, 0.0  ;;  %v8623_v15 = vld [vmem:[#allocation2 + $0x10] ss:$8 sps:$4 sm:$0xff]   ;;  %v8625_v58 = vld [vmem:[#allocation2 + $0x14] ss:$8 sps:$4 sm:$0xff]  }
 0x4f7   : > { %v4280_v20 = vpop.f32.mrf.mxu0  ;;  %8113 = vmatmul.mubr.msk.bf16.gmra.mxu0 %vm906_vm1, %v8682_v57  ;;  %6758 = vmatprep.subr.bf16.mxu0 %v8625_v58 }
 0x4f8   : > { %v4454_v23 = vmax.f32 %v4277_v16, 0.0  ;;  %5280 = vmatprep.mubr.bf16.mxu0 %v8775_v0  ;;  %v4533_v34 = vpack.c.bf16 %v4453_v22, %v4451_v25  ;;  %v4281_v27 = vadd.f32 %v4280_v20, %v10181_v14  ;;  %6759 = vmatpush1.bf16.msra.mxu0 %v8623_v15 }
 0x4f9   : > { %v4282_v28 = vpop.f32.mrf.mxu0 }
 0x4fa   : > { %v4534_v52 = vpack.c.bf16 %v4454_v23, %v4452_v9  ;;  %v4283_v61 = vadd.f32 %v4282_v28, %v10184_v41  ;;  %v4455_v42 = vmax.f32 %v4281_v27, 0.0 }
 0x4fb   : > { %v4284_v35 = vpop.f32.mrf.mxu0 }
 0x4fc   : > { %v4285_v6 = vadd.f32 %v4284_v35, %v10181_v14  ;;  %5006 = vmatprep.mubr.bf16.mxu1 %v4534_v52  ;;  %v4456_v47 = vmax.f32 %v4283_v61, 0.0  ;;  %v8686_v52 = vld [vmem:[%s8944_s29 + $0x88] sm:$0xff]  }
 0x4fd   : > { %v4286_v30 = vpop.f32.mrf.mxu0  ;;  %5007 = vmatmul.mubr.bf16.gmra.mxu1 %v4533_v34 }
 0x4fe   : > { %v4287_v31 = vadd.f32 %v4286_v30, %v10184_v41  ;;  %v4457_v37 = vmax.f32 %v4285_v6, 0.0 }
 0x4ff   : > { %v4290_v36 = vpop.f32.mrf.mxu0  ;;  %8114 = vmatmul.mubr.msk.bf16.gmra.mxu0 %vm906_vm1, %v8683_v40 }
 0x500   : > { %v4458_v45 = vmax.f32 %v4287_v31, 0.0  ;;  %5290 = vmatprep.mubr.bf16.mxu0 %v8775_v0  ;;  %v4535_v5 = vpack.c.bf16 %v4457_v37, %v4455_v42  ;;  %v4291_v48 = vadd.f32 %v4290_v36, %v10181_v14 }
 0x501   : > { %v4292_v29 = vpop.f32.mrf.mxu0 }
 0x502   : > { %v4536_v56 = vpack.c.bf16 %v4458_v45, %v4456_v47  ;;  %v4293_v46 = vadd.f32 %v4292_v29, %v10184_v41  ;;  %v4459_v13 = vmax.f32 %v4291_v48, 0.0 }
 0x503   : > { %v4294_v32 = vpop.f32.mrf.mxu0 }
 0x504   : > { %v4295_v1 = vadd.f32 %v4294_v32, %v10181_v14  ;;  %5016 = vmatprep.mubr.bf16.mxu1 %v4536_v56  ;;  %v4460_v26 = vmax.f32 %v4293_v46, 0.0 }
 0x505   : > { %v4296_v3 = vpop.f32.mrf.mxu0  ;;  %5017 = vmatmul.mubr.bf16.gmra.mxu1 %v4535_v5 }
 0x506   : > { %v4297_v49 = vadd.f32 %v4296_v3, %v10184_v41  ;;  %v4461_v50 = vmax.f32 %v4295_v1, 0.0 }
 0x507   : > { %v4300_v44 = vpop.f32.mrf.mxu0  ;;  %8115 = vmatmul.mubr.msk.bf16.gmra.mxu0 %vm906_vm1, %v8684_v51 }
 0x508   : > { %v4462_v33 = vmax.f32 %v4297_v49, 0.0  ;;  %5300 = vmatprep.mubr.bf16.mxu0 %v8775_v0  ;;  %v4537_v54 = vpack.c.bf16 %v4461_v50, %v4459_v13  ;;  %v4301_v2 = vadd.f32 %v4300_v44, %v10181_v14  ;;  %v8626_v49 = vld [vmem:[#allocation2] ss:$8 sps:$4 sm:$0xff]  }
 0x509   : > { %v4302_v53 = vpop.f32.mrf.mxu0 }
 0x50a   : > { %v4538_v19 = vpack.c.bf16 %v4462_v33, %v4460_v26  ;;  %v4303_v59 = vadd.f32 %v4302_v53, %v10184_v41  ;;  %v4463_v18 = vmax.f32 %v4301_v2, 0.0  ;;  %v8628_v26 = vld [vmem:[#allocation2 + $0x4] ss:$8 sps:$4 sm:$0xff]  }
 0x50b   : > { %v4304_v55 = vpop.f32.mrf.mxu0  ;;  %6760 = vmatprep.subr.bf16.mxu0 %v8628_v26 }
 0x50c   : > { %5026 = vmatprep.mubr.bf16.mxu1 %v4538_v19  ;;  %v4305_v60 = vadd.f32 %v4304_v55, %v10181_v14  ;;  %v4464_v10 = vmax.f32 %v4303_v59, 0.0  ;;  %6761 = vmatpush1.bf16.msra.mxu0 %v8626_v49 }
 0x50d   : > { %v4306_v63 = vpop.f32.mrf.mxu0  ;;  %5027 = vmatmul.mubr.bf16.gmra.mxu1 %v4537_v54 }
 0x50e   : > { %v4307_v4 = vadd.f32 %v4306_v63, %v10184_v41  ;;  %v4465_v43 = vmax.f32 %v4305_v60, 0.0  ;;  %v8688_v63 = vld [vmem:[%s8944_s29 + $0x98] sm:$0xff]  }
 0x50f   : > { %v4310_v8 = vpop.f32.mrf.mxu0  ;;  %8116 = vmatmul.mubr.msk.bf16.gmra.mxu0 %vm906_vm1, %v8685_v39 }
 0x510   : > { %v4466_v38 = vmax.f32 %v4307_v4, 0.0  ;;  %5310 = vmatprep.mubr.bf16.mxu0 %v8775_v0  ;;  %v4539_v17 = vpack.c.bf16 %v4465_v43, %v4463_v18  ;;  %v4311_v22 = vadd.f32 %v4310_v8, %v10181_v14 }
 0x511   : > { %v4312_v62 = vpop.f32.mrf.mxu0 }
 0x512   : > { %v4540_v11 = vpack.c.bf16 %v4466_v38, %v4464_v10  ;;  %v4313_v20 = vadd.f32 %v4312_v62, %v10184_v41  ;;  %v4467_v61 = vmax.f32 %v4311_v22, 0.0 }
 0x513   : > { %v4314_v16 = vpop.f32.mrf.mxu0 }
 0x514   : > { %v4315_v9 = vadd.f32 %v4314_v16, %v10181_v14  ;;  %5036 = vmatprep.mubr.bf16.mxu1 %v4540_v11  ;;  %v4468_v35 = vmax.f32 %v4313_v20, 0.0 }
 0x515   : > { %v4316_v23 = vpop.f32.mrf.mxu0  ;;  %5037 = vmatmul.mubr.bf16.gmra.mxu1 %v4539_v17 }
 0x516   : > { %v4317_v57 = vadd.f32 %v4316_v23, %v10184_v41  ;;  %v4469_v28 = vmax.f32 %v4315_v9, 0.0 }
 0x517   : > { %v4320_v25 = vpop.f32.mrf.mxu0  ;;  %8117 = vmatmul.mubr.msk.bf16.gmra.mxu0 %vm906_vm1, %v8686_v52 }
 0x518   : > { %v4470_v34 = vmax.f32 %v4317_v57, 0.0  ;;  %5320 = vmatprep.mubr.bf16.mxu0 %v8775_v0  ;;  %v4541_v27 = vpack.c.bf16 %v4469_v28, %v4467_v61  ;;  %v4321_v37 = vadd.f32 %v4320_v25, %v10181_v14  ;;  %v8689_v28 = vld [vmem:[%s8944_s29 + $0xa0] sm:$0xff]  }
 0x519   : > { %v4322_v6 = vpop.f32.mrf.mxu0 }
 0x51a   : > { %v4542_v30 = vpack.c.bf16 %v4470_v34, %v4468_v35  ;;  %v4323_v36 = vadd.f32 %v4322_v6, %v10184_v41  ;;  %v4471_v46 = vmax.f32 %v4321_v37, 0.0 }
 0x51b   : > { %v4324_v31 = vpop.f32.mrf.mxu0 }
 0x51c   : > { %v4325_v47 = vadd.f32 %v4324_v31, %v10181_v14  ;;  %5046 = vmatprep.mubr.bf16.mxu1 %v4542_v30  ;;  %v4472_v7 = vmax.f32 %v4323_v36, 0.0  ;;  %v8629_v30 = vld [vmem:[#allocation2 + $0xf0] ss:$8 sps:$4 sm:$0xff]  }
 0x51d   : > { %v4326_v45 = vpop.f32.mrf.mxu0  ;;  %v10477_v40 = vpop.f32.mrf.mxu1  ;;  %5047 = vmatmul.mubr.bf16.gmra.mxu1 %v4541_v27  ;;  %v8631_v27 = vld [vmem:[#allocation2 + $0xf4] ss:$8 sps:$4 sm:$0xff]  }
 0x51e   : > { %v4327_v29 = vadd.f32 %v4326_v45, %v10184_v41  ;;  %v4473_v42 = vmax.f32 %v4325_v47, 0.0  ;;  %6762 = vmatprep.subr.bf16.mxu0 %v8631_v27 }
 0x51f   : > { %v4330_v56 = vpop.f32.mrf.mxu0  ;;  %v10480_v32 = vpop.f32.mrf.mxu1  ;;  %8118 = vmatmul.mubr.msk.bf16.gmra.mxu0 %vm906_vm1, %v8687_v12 }
 0x520   : > { %v4474_v5 = vmax.f32 %v4327_v29, 0.0  ;;  %5330 = vmatprep.mubr.bf16.mxu0 %v8775_v0  ;;  %v4543_v50 = vpack.c.bf16 %v4473_v42, %v4471_v46  ;;  %v4331_v53 = vadd.f32 %v4330_v56, %v10181_v14  ;;  %6763 = vmatpush2.bf16.msra.mxu0 %v8629_v30 }
 0x521   : > { %v4332_v1 = vpop.f32.mrf.mxu0  ;;  %v10485_v3 = vpop.f32.mrf.mxu1 }
 0x522   : > { %v4544_v48 = vpack.c.bf16 %v4474_v5, %v4472_v7  ;;  %v4333_v51 = vadd.f32 %v4332_v1, %v10184_v41  ;;  %v4475_v8 = vmax.f32 %v4331_v53, 0.0  ;;  %v8690_v1 = vld [vmem:[%s8944_s29 + $0xa8] sm:$0xff]  }
 0x523   : > { %v4334_v33 = vpop.f32.mrf.mxu0  ;;  %v10487_v44 = vpop.f32.mrf.mxu1 }
 0x524   : > { %v4335_v13 = vadd.f32 %v4334_v33, %v10181_v14  ;;  %5056 = vmatprep.mubr.bf16.mxu1 %v4544_v48  ;;  %v4476_v4 = vmax.f32 %v4333_v51, 0.0 }
 0x525   : > { %v4336_v19 = vpop.f32.mrf.mxu0  ;;  %v10492_v54 = vpop.f32.mrf.mxu1  ;;  %5057 = vmatmul.mubr.bf16.gmra.mxu1 %v4543_v50 }
 0x526   : > { %v4337_v55 = vadd.f32 %v4336_v19, %v10184_v41  ;;  %v4477_v59 = vmax.f32 %v4335_v13, 0.0 }
 0x527   : > { %v4340_v60 = vpop.f32.mrf.mxu0  ;;  %v10495_v2 = vpop.f32.mrf.mxu1  ;;  %8119 = vmatmul.mubr.msk.bf16.gmra.mxu0 %vm906_vm1, %v8688_v63 }
 0x528   : > { %v4478_v43 = vmax.f32 %v4337_v55, 0.0  ;;  %5340 = vmatprep.mubr.bf16.mxu0 %v8775_v0  ;;  %v4545_v18 = vpack.c.bf16 %v4477_v59, %v4475_v8  ;;  %v4341_v17 = vadd.f32 %v4340_v60, %v10181_v14  ;;  %v8691_v60 = vld [vmem:[%s8944_s29 + $0xb0] sm:$0xff]   ;;  %v8634_v8 = vld [vmem:[#allocation2 + $0xe4] ss:$8 sps:$4 sm:$0xff]  }
 0x529   : > { %v4342_v39 = vpop.f32.mrf.mxu0  ;;  %v10500_v10 = vpop.f32.mrf.mxu1  ;;  %6764 = vmatprep.subr.bf16.mxu0 %v8634_v8 }
 0x52a   : > { %v4546_v38 = vpack.c.bf16 %v4478_v43, %v4476_v4  ;;  %v4343_v15 = vadd.f32 %v4342_v39, %v10184_v41  ;;  %v4479_v35 = vmax.f32 %v4341_v17, 0.0  ;;  %v8632_v43 = vld [vmem:[#allocation2 + $0xe0] ss:$8 sps:$4 sm:$0xff]   ;;  %v8692_v17 = vld [vmem:[%s8944_s29 + $0xb8] sm:$0xff]  }
 0x52b   : > { %v4344_v62 = vpop.f32.mrf.mxu0  ;;  %v10502_v11 = vpop.f32.mrf.mxu1  ;;  %6765 = vmatpush2.bf16.msra.mxu0 %v8632_v43  ;;  %v8694_v43 = vld [vmem:[%s8944_s29 + $0xc8] sm:$0xff]  }
 0x52c   : > { %v4345_v58 = vadd.f32 %v4344_v62, %v10181_v14  ;;  %5066 = vmatprep.mubr.bf16.mxu1 %v4546_v38  ;;  %v4480_v25 = vmax.f32 %v4343_v15, 0.0 }
 0x52d   : > { %v4346_v16 = vpop.f32.mrf.mxu0  ;;  %v10507_v20 = vpop.f32.mrf.mxu1  ;;  %5067 = vmatmul.mubr.bf16.gmra.mxu1 %v4545_v18 }
 0x52e   : > { %v4347_v9 = vadd.f32 %v4346_v16, %v10184_v41  ;;  %v4481_v22 = vmax.f32 %v4345_v58, 0.0 }
 0x52f   : > { %v4350_v23 = vpop.f32.mrf.mxu0  ;;  %v10510_v57 = vpop.f32.mrf.mxu1  ;;  %8120 = vmatmul.mubr.msk.bf16.gmra.mxu0 %vm906_vm1, %v8689_v28 }
 0x530   : > { %v4482_v52 = vmax.f32 %v4347_v9, 0.0  ;;  %5350 = vmatprep.mubr.bf16.mxu0 %v8775_v0  ;;  %v4547_v31 = vpack.c.bf16 %v4481_v22, %v4479_v35  ;;  %v4351_v29 = vadd.f32 %v4350_v23, %v10181_v14 }
 0x531   : > { %v4352_v34 = vpop.f32.mrf.mxu0  ;;  %v10515_v61 = vpop.f32.mrf.mxu1 }
 0x532   : > { %v4548_v6 = vpack.c.bf16 %v4482_v52, %v4480_v25  ;;  %v4353_v37 = vadd.f32 %v4352_v34, %v10184_v41  ;;  %v8693_v34 = vld [vmem:[%s8944_s29 + $0xc0] sm:$0xff]  }
 0x533   : > { %v4354_v36 = vpop.f32.mrf.mxu0  ;;  %v10517_v47 = vpop.f32.mrf.mxu1 }
 0x534   : > { %v4355_v45 = vadd.f32 %v4354_v36, %v10181_v14  ;;  %5076 = vmatprep.mubr.bf16.mxu1 %v4548_v6  ;;  %v4484_v48 = vmax.f32 %v4353_v37, 0.0  ;;  %v4483_v14 = vmax.f32 %v4351_v29, 0.0  ;;  %v5461_v6 = vld [vmem:[%s11475_s13] sm:$0x3]  ;;  %v8635_v37 = vld [vmem:[#allocation2 + $0xd0] ss:$8 sps:$4 sm:$0xff]  }
 0x535   : > { %v4356_v42 = vpop.f32.mrf.mxu0  ;;  %v10522_v56 = vpop.f32.mrf.mxu1  ;;  %5077 = vmatmul.mubr.bf16.gmra.mxu1 %v4547_v31  ;;  %v10579_v36 = vrot.slane %v5461_v6, %v9180_v21 }
 0x536   : > { %v4357_v12 = vadd.f32 %v4356_v42, %v10184_v41  ;;  %v4485_v7 = vmax.f32 %v4355_v45, 0.0  ;;  %v8637_v45 = vld [vmem:[#allocation2 + $0xd4] ss:$8 sps:$4 sm:$0xff]   ;;  %v10582_v42 = vrot.slane %v5461_v6, %v9188_v24 }
 0x537   : > { %v4778_v5 = vpop.f32.mrf.mxu0  ;;  %v10525_v46 = vpop.f32.mrf.mxu1  ;;  %8121 = vmatmul.mubr.msk.bf16.gmra.mxu0 %vm906_vm1, %v8690_v1  ;;  %6766 = vmatprep.subr.bf16.mxu0 %v8637_v45 }
 0x538   : > { %v4486_v49 = vmax.f32 %v4357_v12, 0.0  ;;  %5360 = vmatprep.mubr.bf16.mxu0 %v8775_v0  ;;  %v4549_v51 = vpack.c.bf16 %v4485_v7, %v4483_v14  ;;  %6767 = vmatpush2.bf16.msra.mxu0 %v8635_v37 }
 0x539   : > { %v4780_v26 = vpop.f32.mrf.mxu0  ;;  %v10530_v50 = vpop.f32.mrf.mxu1 }
 0x53a   : > { %v4550_v33 = vpack.c.bf16 %v4486_v49, %v4484_v48 }
 0x53b   : > { %v4782_v13 = vpop.f32.mrf.mxu0  ;;  %v10532_v41 = vpop.f32.mrf.mxu1 }
 0x53c   : > { %5086 = vmatprep.mubr.bf16.mxu1 %v4550_v33 }
 0x53d   : > { %v4784_v53 = vpop.f32.mrf.mxu0  ;;  %v10534_v19 = vpop.f32.mrf.mxu1  ;;  %5087 = vmatmul.mubr.bf16.gmra.mxu1 %v4549_v51 }
 0x53f   : > { %v10536_v55 = vpop.f32.mrf.mxu0  ;;  %v10538_v59 = vpop.f32.mrf.mxu1  ;;  %8122 = vmatmul.mubr.msk.bf16.gmra.mxu0 %vm906_vm1, %v8691_v60 }
 0x540   : > { %5370 = vmatprep.mubr.bf16.mxu0 %v8775_v0 }
 0x541   : > { %v4790_v63 = vpop.f32.mrf.mxu0  ;;  %v10543_v4 = vpop.f32.mrf.mxu1 }
 0x543   : > { %v4792_v39 = vpop.f32.mrf.mxu0  ;;  %v10545_v38 = vpop.f32.mrf.mxu1 }
 0x545   : > { %v4794_v18 = vpop.f32.mrf.mxu0  ;;  %v10547_v62 = vpop.f32.mrf.mxu1 }
 0x547   : > { %v10549_v15 = vpop.f32.mrf.mxu0  ;;  %v10551_v58 = vpop.f32.mrf.mxu1  ;;  %8123 = vmatmul.mubr.msk.bf16.gmra.mxu0 %vm906_vm1, %v8692_v17 }
 0x548   : > { %5380 = vmatprep.mubr.bf16.mxu0 %v8775_v0 }
 0x549   : > { %v10556_v16 = vpop.f32.mrf.mxu0  ;;  %v10558_v9 = vpop.f32.mrf.mxu1 }
 0x54b   : > { %v10560_v22 = vpop.f32.mrf.mxu0  ;;  %v10562_v23 = vpop.f32.mrf.mxu1 }
 0x54d   : > { %v10564_v28 = vpop.f32.mrf.mxu0  ;;  %v10566_v25 = vpop.f32.mrf.mxu1 }
 0x54f   : > { %v10568_v52 = vpop.f32.mrf.mxu1  ;;  %v5142_v35 = vpop.f32.mrf.mxu0  ;;  %8124 = vmatmul.mubr.msk.bf16.gmra.mxu0 %vm906_vm1, %v8693_v34 }
 0x550   : > { %5390 = vmatprep.mubr.bf16.mxu0 %v8775_v0  ;;  %v5143_v29 = vadd.f32 %v5142_v35, %v4778_v5 }
 0x551   : > { %v10576_v30 = vpop.f32.mrf.mxu1  ;;  %v5144_v27 = vpop.f32.mrf.mxu0 }
 0x552   : > { %v5145_v31 = vadd.f32 %v5144_v27, %v4780_v26  ;;  %v5473_v51 = vadd.f32 %v10582_v42, %v5143_v29 }
 0x553   : > { %v10584_v12 = vpop.f32.mrf.mxu1  ;;  %v5146_v7 = vpop.f32.mrf.mxu0 }
 0x554   : > { %v5147_v1 = vadd.f32 %v5146_v7, %v4782_v13  ;;  %v5474_v14 = vadd.f32 %v10579_v36, %v5145_v31 }
 0x555   : > { %v10586_v48 = vpop.f32.mrf.mxu1  ;;  %v5148_v49 = vpop.f32.mrf.mxu0 }
 0x556   : > { %v5475_v26 = vadd.f32 %v10582_v42, %v5147_v1  ;;  %v5149_v33 = vadd.f32 %v5148_v49, %v4784_v53  ;;  %v5602_v34 = vmax.f32 %v5474_v14, 0.0  ;;  %v5601_v53 = vmax.f32 %v5473_v51, 0.0 }
 0x557   : > { %v10591_v5 = vpop.f32.mrf.mxu1  ;;  %v5152_v60 = vpop.f32.mrf.mxu0  ;;  %8125 = vmatmul.mubr.msk.bf16.gmra.mxu0 %vm906_vm1, %v8694_v43 }
 0x558   : > { %v5476_v13 = vadd.f32 %v10579_v36, %v5149_v33  ;;  %5400 = vmatprep.mubr.bf16.mxu0 %v8775_v0  ;;  %v5603_v8 = vmax.f32 %v5475_v26, 0.0  ;;  %v5153_v31 = vadd.f32 %v5152_v60, %v10536_v55  ;;  %v8695_v60 = vld [vmem:[%s8944_s29 + $0xd0] sm:$0xff]  }
 0x559   : > { %v10597_v17 = vpop.f32.mrf.mxu1  ;;  %v5154_v35 = vpop.f32.mrf.mxu0 }
 0x55a   : > { %v5604_v6 = vmax.f32 %v5476_v13, 0.0  ;;  %v5155_v27 = vadd.f32 %v5154_v35, %v4790_v63  ;;  %v5729_v1 = vpack.c.bf16 %v5603_v8, %v5601_v53  ;;  %v5477_v63 = vadd.f32 %v10582_v42, %v5153_v31  ;;  %v8640_v53 = vld [vmem:[#allocation2 + $0xc4] ss:$8 sps:$4 sm:$0xff]  }
 0x55b   : > { %v10600_v37 = vpop.f32.mrf.mxu1  ;;  %v5156_v45 = vpop.f32.mrf.mxu0  ;;  %6768 = vmatprep.subr.bf16.mxu0 %v8640_v53 }
 0x55c   : > { %v5157_v29 = vadd.f32 %v5156_v45, %v4792_v39  ;;  %v5730_v7 = vpack.c.bf16 %v5604_v6, %v5602_v34  ;;  %v5478_v26 = vadd.f32 %v10579_v36, %v5155_v27  ;;  %v8638_v27 = vld [vmem:[#allocation2 + $0xc0] ss:$8 sps:$4 sm:$0xff]   ;;  %v5605_v31 = vmax.f32 %v5477_v63, 0.0 }
 0x55d   : > { %v10602_v49 = vpop.f32.mrf.mxu1  ;;  %v5158_v33 = vpop.f32.mrf.mxu0  ;;  %6769 = vmatpush2.bf16.msra.mxu0 %v8638_v27 }
 0x55e   : > { %v5479_v43 = vadd.f32 %v10582_v42, %v5157_v29  ;;  %v5159_v14 = vadd.f32 %v5158_v33, %v4794_v18  ;;  %6029 = vmatprep.mubr.bf16.mxu1 %v5730_v7  ;;  %v5606_v34 = vmax.f32 %v5478_v26, 0.0 }
 0x55f   : > { %v10607_v51 = vpop.f32.mrf.mxu1  ;;  %v5162_v55 = vpop.f32.mrf.mxu0  ;;  %8126 = vmatmul.mubr.msk.bf16.gmra.mxu0 %vm906_vm1, %v8695_v60  ;;  %6030 = vmatmul.mubr.bf16.vlgmr.msra.gmra.mxu1 %v5729_v1 }
 0x560   : > { %v5480_v39 = vadd.f32 %v10579_v36, %v5159_v14  ;;  %5410 = vmatprep.mubr.bf16.mxu0 %v8775_v0  ;;  %v5607_v13 = vmax.f32 %v5479_v43, 0.0  ;;  %v5163_v45 = vadd.f32 %v5162_v55, %v10549_v15 }
 0x561   : > { %v10613_v8 = vpop.f32.mrf.mxu1  ;;  %v5164_v35 = vpop.f32.mrf.mxu0 }
 0x562   : > { %v5608_v18 = vmax.f32 %v5480_v39, 0.0  ;;  %v5165_v6 = vadd.f32 %v5164_v35, %v10556_v16  ;;  %v5731_v43 = vpack.c.bf16 %v5607_v13, %v5605_v31  ;;  %v5481_v15 = vadd.f32 %v10582_v42, %v5163_v45 }
 0x563   : > { %v10617_v29 = vpop.f32.mrf.mxu1  ;;  %v5166_v7 = vpop.f32.mrf.mxu0 }
 0x564   : > { %v5167_v1 = vadd.f32 %v5166_v7, %v10560_v22  ;;  %v5732_v33 = vpack.c.bf16 %v5608_v18, %v5606_v34  ;;  %v5482_v16 = vadd.f32 %v10579_v36, %v5165_v6  ;;  %v8696_v22 = vld [vmem:[%s8944_s29 + $0xd8] sm:$0xff]   ;;  %v5609_v53 = vmax.f32 %v5481_v15, 0.0 }
 0x565   : > { %v10620_v14 = vpop.f32.mrf.mxu1  ;;  %v5168_v26 = vpop.f32.mrf.mxu0 }
 0x566   : > { %v5483_v60 = vadd.f32 %v10582_v42, %v5167_v1  ;;  %v5169_v63 = vadd.f32 %v5168_v26, %v10564_v28  ;;  %6039 = vmatprep.mubr.bf16.mxu1 %v5732_v33  ;;  %v5610_v6 = vmax.f32 %v5482_v16, 0.0 }
 0x567   : > { %v10626_v55 = vpop.f32.mrf.mxu1  ;;  %v5172_v39 = vpop.f32.mrf.mxu0  ;;  %8127 = vmatmul.mubr.msk.bf16.gmra.mxu0 %vm906_vm1, %v8696_v22  ;;  %6040 = vmatmul.mubr.bf16.gmra.mxu1 %v5731_v43  ;;  %v8697_v22 = vld [vmem:[%s8944_s29 + $0xe0] sm:$0xff]  }
 0x568   : > { %v5484_v13 = vadd.f32 %v10579_v36, %v5169_v63  ;;  %5420 = vmatprep.mubr.bf16.mxu0 %v8775_v0  ;;  %v5611_v35 = vmax.f32 %v5483_v60, 0.0  ;;  %v5173_v31 = vadd.f32 %v5172_v39, %v10477_v40 }
 0x569   : > { %v10632_v34 = vpop.f32.mrf.mxu1  ;;  %v5174_v18 = vpop.f32.mrf.mxu0 }
 0x56a   : > { %v5612_v28 = vmax.f32 %v5484_v13, 0.0  ;;  %v5175_v27 = vadd.f32 %v5174_v18, %v10480_v32  ;;  %v5733_v43 = vpack.c.bf16 %v5611_v35, %v5609_v53  ;;  %v5485_v15 = vadd.f32 %v10582_v42, %v5173_v31  ;;  %v8643_v53 = vld [vmem:[#allocation2 + $0xb4] ss:$8 sps:$4 sm:$0xff]  }
 0x56b   : > { %v10636_v45 = vpop.f32.mrf.mxu1  ;;  %v5176_v7 = vpop.f32.mrf.mxu0  ;;  %6770 = vmatprep.subr.bf16.mxu0 %v8643_v53 }
 0x56c   : > { %v5177_v1 = vadd.f32 %v5176_v7, %v10485_v3  ;;  %v5734_v33 = vpack.c.bf16 %v5612_v28, %v5610_v6  ;;  %v5486_v63 = vadd.f32 %v10579_v36, %v5175_v27  ;;  %v8641_v27 = vld [vmem:[#allocation2 + $0xb0] ss:$8 sps:$4 sm:$0xff]   ;;  %v5613_v31 = vmax.f32 %v5485_v15, 0.0 }
 0x56d   : > { %v10639_v26 = vpop.f32.mrf.mxu1  ;;  %v5178_v60 = vpop.f32.mrf.mxu0  ;;  %6771 = vmatpush2.bf16.msra.mxu0 %v8641_v27 }
 0x56e   : > { %v5487_v16 = vadd.f32 %v10582_v42, %v5177_v1  ;;  %v5179_v32 = vadd.f32 %v5178_v60, %v10487_v44  ;;  %6049 = vmatprep.mubr.bf16.mxu1 %v5734_v33  ;;  %v5614_v6 = vmax.f32 %v5486_v63, 0.0 }
 0x56f   : > { %v10645_v40 = vpop.f32.mrf.mxu1  ;;  %v5182_v39 = vpop.f32.mrf.mxu0  ;;  %8128 = vmatmul.mubr.msk.bf16.gmra.mxu0 %vm906_vm1, %v8697_v22  ;;  %6050 = vmatmul.mubr.bf16.gmra.mxu1 %v5733_v43 }
 0x570   : > { %v5488_v3 = vadd.f32 %v10579_v36, %v5179_v32  ;;  %5430 = vmatprep.mubr.bf16.mxu0 %v8775_v0  ;;  %v5615_v13 = vmax.f32 %v5487_v16, 0.0  ;;  %v5183_v7 = vadd.f32 %v5182_v39, %v10492_v54 }
 0x571   : > { %v10651_v35 = vpop.f32.mrf.mxu1  ;;  %v5184_v18 = vpop.f32.mrf.mxu0 }
 0x572   : > { %v5616_v44 = vmax.f32 %v5488_v3, 0.0  ;;  %v5185_v28 = vadd.f32 %v5184_v18, %v10495_v2  ;;  %v5735_v16 = vpack.c.bf16 %v5615_v13, %v5613_v31  ;;  %v5489_v54 = vadd.f32 %v10582_v42, %v5183_v7 }
 0x573   : > { %v10655_v1 = vpop.f32.mrf.mxu1  ;;  %v5186_v33 = vpop.f32.mrf.mxu0 }
 0x574   : > { %v5187_v43 = vadd.f32 %v5186_v33, %v10500_v10  ;;  %v5736_v60 = vpack.c.bf16 %v5616_v44, %v5614_v6  ;;  %v5490_v2 = vadd.f32 %v10579_v36, %v5185_v28  ;;  %v8698_v10 = vld [vmem:[%s8944_s29 + $0xe8] sm:$0xff]   ;;  %v5617_v53 = vmax.f32 %v5489_v54, 0.0 }
 0x575   : > { %v10658_v32 = vpop.f32.mrf.mxu1  ;;  %v5188_v63 = vpop.f32.mrf.mxu0 }
 0x576   : > { %v5491_v22 = vadd.f32 %v10582_v42, %v5187_v43  ;;  %v5189_v15 = vadd.f32 %v5188_v63, %v10502_v11  ;;  %6059 = vmatprep.mubr.bf16.mxu1 %v5736_v60  ;;  %v5618_v28 = vmax.f32 %v5490_v2, 0.0 }
 0x577   : > { %v10664_v39 = vpop.f32.mrf.mxu1  ;;  %v5192_v3 = vpop.f32.mrf.mxu0  ;;  %8129 = vmatmul.mubr.msk.bf16.gmra.mxu0 %vm906_vm1, %v8698_v10  ;;  %6060 = vmatmul.mubr.bf16.gmra.mxu1 %v5735_v16  ;;  %v8699_v10 = vld [vmem:[%s8944_s29 + $0xf0] sm:$0xff]  }
 0x578   : > { %v5492_v13 = vadd.f32 %v10579_v36, %v5189_v15  ;;  %5440 = vmatprep.mubr.bf16.mxu0 %v8775_v0  ;;  %v5619_v18 = vmax.f32 %v5491_v22, 0.0  ;;  %v5193_v31 = vadd.f32 %v5192_v3, %v10507_v20 }
 0x579   : > { %v10670_v6 = vpop.f32.mrf.mxu1  ;;  %v5194_v44 = vpop.f32.mrf.mxu0 }
 0x57a   : > { %v5620_v11 = vmax.f32 %v5492_v13, 0.0  ;;  %v5195_v27 = vadd.f32 %v5194_v44, %v10510_v57  ;;  %v5737_v16 = vpack.c.bf16 %v5619_v18, %v5617_v53  ;;  %v5493_v54 = vadd.f32 %v10582_v42, %v5193_v31  ;;  %v8645_v53 = vld [vmem:[#allocation2 + $0xa0] ss:$8 sps:$4 sm:$0xff]   ;;  %v8647_v31 = vld [vmem:[#allocation2 + $0xa4] ss:$8 sps:$4 sm:$0xff]  }
 0x57b   : > { %v10674_v7 = vpop.f32.mrf.mxu1  ;;  %v5196_v33 = vpop.f32.mrf.mxu0  ;;  %6772 = vmatprep.subr.bf16.mxu0 %v8647_v31 }
 0x57c   : > { %v5197_v43 = vadd.f32 %v5196_v33, %v10515_v61  ;;  %v5738_v60 = vpack.c.bf16 %v5620_v11, %v5618_v28  ;;  %v5494_v63 = vadd.f32 %v10579_v36, %v5195_v27  ;;  %v8644_v27 = vld [vmem:[#allocation4 + $0x38] sm:$0xff]   ;;  %v5621_v33 = vmax.f32 %v5493_v54, 0.0  ;;  %6773 = vmatpush2.bf16.msra.mxu0 %v8645_v53 }
 0x57d   : > { %v10678_v22 = vpop.f32.mrf.mxu1  ;;  %v5198_v15 = vpop.f32.mrf.mxu0  ;;  %7427 = vmatpush1.bf16.msra.mxu1 %v8644_v27 }
 0x57e   : > { %v5495_v2 = vadd.f32 %v10582_v42, %v5197_v43  ;;  %v5199_v57 = vadd.f32 %v5198_v15, %v10517_v47  ;;  %6069 = vmatprep.mubr.bf16.mxu1 %v5738_v60  ;;  %v5622_v13 = vmax.f32 %v5494_v63, 0.0  ;;  %7428 = vmatprep.subr.bf16.mxu1 %v8775_v0 }
 0x57f   : > { %v10683_v20 = vpop.f32.mrf.mxu1  ;;  %v5202_v3 = vpop.f32.mrf.mxu0  ;;  %8130 = vmatmul.mubr.msk.bf16.gmra.mxu0 %vm906_vm1, %v8699_v10  ;;  %6070 = vmatmul.mubr.bf16.gmra.mxu1 %v5737_v16 }
 0x580   : > { %v5496_v61 = vadd.f32 %v10579_v36, %v5199_v57  ;;  %5450 = vmatprep.mubr.bf16.mxu0 %v8775_v0  ;;  %v5623_v18 = vmax.f32 %v5495_v2, 0.0  ;;  %v5203_v43 = vadd.f32 %v5202_v3, %v10522_v56 }
 0x581   : > { %v10689_v44 = vpop.f32.mrf.mxu1  ;;  %v5204_v28 = vpop.f32.mrf.mxu0 }
 0x582   : > { %v5624_v47 = vmax.f32 %v5496_v61, 0.0  ;;  %v5205_v11 = vadd.f32 %v5204_v28, %v10525_v46  ;;  %v5739_v2 = vpack.c.bf16 %v5623_v18, %v5621_v33 }
 0x583   : > { %v10693_v60 = vpop.f32.mrf.mxu1  ;;  %v5206_v16 = vpop.f32.mrf.mxu0 }
 0x584   : > { %v5207_v15 = vadd.f32 %v5206_v16, %v10530_v50  ;;  %v5740_v63 = vpack.c.bf16 %v5624_v47, %v5622_v13  ;;  %v5498_v46 = vadd.f32 %v10579_v36, %v5205_v11  ;;  %v5497_v50 = vadd.f32 %v10582_v42, %v5203_v43  ;;  %v8700_v13 = vld [vmem:[%s8944_s29 + $0xf8] sm:$0xff]  }
 0x585   : > { %v10696_v57 = vpop.f32.mrf.mxu1  ;;  %v5208_v10 = vpop.f32.mrf.mxu0 }
 0x586   : > { %v5499_v56 = vadd.f32 %v10582_v42, %v5207_v15  ;;  %v5209_v54 = vadd.f32 %v5208_v10, %v10532_v41  ;;  %6079 = vmatprep.mubr.bf16.mxu1 %v5740_v63  ;;  %v5626_v27 = vmax.f32 %v5498_v46, 0.0  ;;  %v5625_v31 = vmax.f32 %v5497_v50, 0.0 }
 0x587   : > { %v10703_v3 = vpop.f32.mrf.mxu1  ;;  %v5212_v61 = vpop.f32.mrf.mxu0  ;;  %8131 = vmatmul.mubr.msk.bf16.gmra.mxu0 %vm906_vm1, %v8700_v13  ;;  %6080 = vmatmul.mubr.bf16.gmra.mxu1 %v5739_v2 }
 0x588   : > { %v5500_v18 = vadd.f32 %v10579_v36, %v5209_v54  ;;  %v5627_v28 = vmax.f32 %v5499_v56, 0.0  ;;  %v5213_v33 = vadd.f32 %v5212_v61, %v10534_v19 }
 0x589   : > { %v10708_v47 = vpop.f32.mrf.mxu1  ;;  %v5214_v11 = vpop.f32.mrf.mxu0 }
 0x58a   : > { %v5628_v53 = vmax.f32 %v5500_v18, 0.0  ;;  %v5215_v41 = vadd.f32 %v5214_v11, %v10538_v59  ;;  %v5741_v2 = vpack.c.bf16 %v5627_v28, %v5625_v31  ;;  %v5501_v59 = vadd.f32 %v10582_v42, %v5213_v33  ;;  %v8649_v31 = vld [vmem:[#allocation2 + $0x90] ss:$8 sps:$4 sm:$0xff]  }
 0x58b   : > { %v10712_v43 = vpop.f32.mrf.mxu1  ;;  %v5216_v16 = vpop.f32.mrf.mxu0 }
 0x58c   : > { %v5217_v15 = vadd.f32 %v5216_v16, %v10543_v4  ;;  %v5742_v63 = vpack.c.bf16 %v5628_v53, %v5626_v27  ;;  %v5502_v10 = vadd.f32 %v10579_v36, %v5215_v41  ;;  %v8648_v41 = vld [vmem:[#allocation4 + $0x30] sm:$0xff]   ;;  %v5629_v16 = vmax.f32 %v5501_v59, 0.0 }
 0x58d   : > { %v10716_v56 = vpop.f32.mrf.mxu1  ;;  %v5218_v54 = vpop.f32.mrf.mxu0  ;;  %7429 = vmatpush1.bf16.msra.mxu1 %v8648_v41 }
 0x58e   : > { %v5503_v46 = vadd.f32 %v10582_v42, %v5217_v15  ;;  %v5219_v13 = vadd.f32 %v5218_v54, %v10545_v38  ;;  %6089 = vmatprep.mubr.bf16.mxu1 %v5742_v63  ;;  %v5630_v61 = vmax.f32 %v5502_v10, 0.0  ;;  %v8651_v38 = vld [vmem:[#allocation2 + $0x94] ss:$8 sps:$4 sm:$0xff]   ;;  %7430 = vmatprep.subr.bf16.mxu1 %v8775_v0 }
 0x58f   : > { %v10721_v19 = vpop.f32.mrf.mxu1  ;;  %v5222_v50 = vpop.f32.mrf.mxu0  ;;  %6090 = vmatmul.mubr.bf16.gmra.mxu1 %v5741_v2  ;;  %6774 = vmatprep.subr.bf16.mxu0 %v8651_v38 }
 0x590   : > { %v5504_v4 = vadd.f32 %v10579_v36, %v5219_v13  ;;  %v5631_v18 = vmax.f32 %v5503_v46, 0.0  ;;  %v5223_v33 = vadd.f32 %v5222_v50, %v10547_v62  ;;  %6775 = vmatpush2.bf16.msra.mxu0 %v8649_v31 }
 0x591   : > { %v10724_v28 = vpop.f32.mrf.mxu1  ;;  %v5224_v11 = vpop.f32.mrf.mxu0 }
 0x592   : > { %v5632_v27 = vmax.f32 %v5504_v4, 0.0  ;;  %v5225_v53 = vadd.f32 %v5224_v11, %v10551_v58  ;;  %v5743_v10 = vpack.c.bf16 %v5631_v18, %v5629_v16  ;;  %v5505_v50 = vadd.f32 %v10582_v42, %v5223_v33 }
 0x593   : > { %v10728_v15 = vpop.f32.mrf.mxu1  ;;  %v5226_v63 = vpop.f32.mrf.mxu0 }
 0x594   : > { %v5227_v2 = vadd.f32 %v5226_v63, %v10558_v9  ;;  %v5744_v54 = vpack.c.bf16 %v5632_v27, %v5630_v61  ;;  %v5506_v58 = vadd.f32 %v10579_v36, %v5225_v53  ;;  %v5633_v38 = vmax.f32 %v5505_v50, 0.0 }
 0x595   : > { %v10731_v46 = vpop.f32.mrf.mxu1  ;;  %v5228_v13 = vpop.f32.mrf.mxu0 }
 0x596   : > { %v5507_v59 = vadd.f32 %v10582_v42, %v5227_v2  ;;  %v5229_v62 = vadd.f32 %v5228_v13, %v10562_v23  ;;  %6099 = vmatprep.mubr.bf16.mxu1 %v5744_v54  ;;  %v5634_v41 = vmax.f32 %v5506_v58, 0.0 }
 0x597   : > { %v10738_v9 = vpop.f32.mrf.mxu1  ;;  %v5232_v4 = vpop.f32.mrf.mxu0  ;;  %6100 = vmatmul.mubr.bf16.gmra.mxu1 %v5743_v10 }
 0x598   : > { %v5508_v61 = vadd.f32 %v10579_v36, %v5229_v62  ;;  %v5635_v18 = vmax.f32 %v5507_v59, 0.0  ;;  %v5233_v23 = vadd.f32 %v5232_v4, %v10566_v25 }
 0x599   : > { %v10741_v11 = vpop.f32.mrf.mxu1  ;;  %v5234_v27 = vpop.f32.mrf.mxu0 }
 0x59a   : > { %v5636_v31 = vmax.f32 %v5508_v61, 0.0  ;;  %v5235_v53 = vadd.f32 %v5234_v27, %v10568_v52  ;;  %v5745_v54 = vpack.c.bf16 %v5635_v18, %v5633_v38  ;;  %v5509_v52 = vadd.f32 %v10582_v42, %v5233_v23  ;;  %v8653_v38 = vld [vmem:[#allocation2 + $0x80] ss:$8 sps:$4 sm:$0xff]  }
 0x59b   : > { %v10745_v16 = vpop.f32.mrf.mxu1  ;;  %v5236_v33 = vpop.f32.mrf.mxu0 }
 0x59c   : > { %v5237_v63 = vadd.f32 %v5236_v33, %v10576_v30  ;;  %v5746_v2 = vpack.c.bf16 %v5636_v31, %v5634_v41  ;;  %v5510_v10 = vadd.f32 %v10579_v36, %v5235_v53  ;;  %v8652_v53 = vld [vmem:[#allocation4 + $0x28] sm:$0xff]   ;;  %v5637_v33 = vmax.f32 %v5509_v52, 0.0 }
 0x59d   : > { %v10749_v13 = vpop.f32.mrf.mxu1  ;;  %v5238_v59 = vpop.f32.mrf.mxu0  ;;  %7431 = vmatpush1.bf16.msra.mxu1 %v8652_v53 }
 0x59e   : > { %v5511_v58 = vadd.f32 %v10582_v42, %v5237_v63  ;;  %v5239_v62 = vadd.f32 %v5238_v59, %v10584_v12  ;;  %6109 = vmatprep.mubr.bf16.mxu1 %v5746_v2  ;;  %v5638_v4 = vmax.f32 %v5510_v10, 0.0  ;;  %v8655_v12 = vld [vmem:[#allocation2 + $0x84] ss:$8 sps:$4 sm:$0xff]   ;;  %7432 = vmatprep.subr.bf16.mxu1 %v8775_v0 }
 0x59f   : > { %v10754_v25 = vpop.f32.mrf.mxu1  ;;  %v5242_v50 = vpop.f32.mrf.mxu0  ;;  %6110 = vmatmul.mubr.bf16.gmra.mxu1 %v5745_v54  ;;  %6776 = vmatprep.subr.bf16.mxu0 %v8655_v12 }
 0x5a0   : > { %v5512_v30 = vadd.f32 %v10579_v36, %v5239_v62  ;;  %v5639_v61 = vmax.f32 %v5511_v58, 0.0  ;;  %v5243_v23 = vadd.f32 %v5242_v50, %v10586_v48  ;;  %6777 = vmatpush2.bf16.msra.mxu0 %v8653_v38 }
 0x5a1   : > { %v10757_v18 = vpop.f32.mrf.mxu1  ;;  %v5244_v27 = vpop.f32.mrf.mxu0 }
 0x5a2   : > { %v5640_v41 = vmax.f32 %v5512_v30, 0.0  ;;  %v5245_v31 = vadd.f32 %v5244_v27, %v10591_v5  ;;  %v5747_v10 = vpack.c.bf16 %v5639_v61, %v5637_v33  ;;  %v5513_v50 = vadd.f32 %v10582_v42, %v5243_v23 }
 0x5a3   : > { %v10761_v63 = vpop.f32.mrf.mxu1  ;;  %v5246_v2 = vpop.f32.mrf.mxu0 }
 0x5a4   : > { %v5247_v54 = vadd.f32 %v5246_v2, %v10597_v17  ;;  %v5748_v59 = vpack.c.bf16 %v5640_v41, %v5638_v4  ;;  %v5514_v5 = vadd.f32 %v10579_v36, %v5245_v31  ;;  %v5641_v12 = vmax.f32 %v5513_v50, 0.0 }
 0x5a5   : > { %v10764_v58 = vpop.f32.mrf.mxu1  ;;  %v5248_v62 = vpop.f32.mrf.mxu0 }
 0x5a6   : > { %v5515_v52 = vadd.f32 %v10582_v42, %v5247_v54  ;;  %v5249_v48 = vadd.f32 %v5248_v62, %v10600_v37  ;;  %6119 = vmatprep.mubr.bf16.mxu1 %v5748_v59  ;;  %v5642_v53 = vmax.f32 %v5514_v5, 0.0 }
 0x5a7   : > { %v10771_v17 = vpop.f32.mrf.mxu1  ;;  %v5252_v30 = vpop.f32.mrf.mxu0  ;;  %6120 = vmatmul.mubr.bf16.gmra.mxu1 %v5747_v10 }
 0x5a8   : > { %v5516_v4 = vadd.f32 %v10579_v36, %v5249_v48  ;;  %v5643_v61 = vmax.f32 %v5515_v52, 0.0  ;;  %v5253_v37 = vadd.f32 %v5252_v30, %v10602_v49 }
 0x5a9   : > { %v10774_v27 = vpop.f32.mrf.mxu1  ;;  %v5254_v41 = vpop.f32.mrf.mxu0 }
 0x5aa   : > { %v5644_v38 = vmax.f32 %v5516_v4, 0.0  ;;  %v5255_v31 = vadd.f32 %v5254_v41, %v10607_v51  ;;  %v5749_v59 = vpack.c.bf16 %v5643_v61, %v5641_v12  ;;  %v5517_v51 = vadd.f32 %v10582_v42, %v5253_v37 }
 0x5ab   : > { %v10778_v33 = vpop.f32.mrf.mxu1  ;;  %v5256_v23 = vpop.f32.mrf.mxu0 }
 0x5ac   : > { %v5257_v2 = vadd.f32 %v5256_v23, %v10613_v8  ;;  %v5750_v54 = vpack.c.bf16 %v5644_v38, %v5642_v53  ;;  %v5518_v52 = vadd.f32 %v10579_v36, %v5255_v31  ;;  %v8656_v31 = vld [vmem:[#allocation4 + $0x20] sm:$0xff]   ;;  %v5645_v12 = vmax.f32 %v5517_v51, 0.0 }
 0x5ad   : > { %v10781_v10 = vpop.f32.mrf.mxu1  ;;  %v5258_v62 = vpop.f32.mrf.mxu0  ;;  %7433 = vmatpush1.bf16.msra.mxu1 %v8656_v31 }
 0x5ae   : > { %v5519_v5 = vadd.f32 %v10582_v42, %v5257_v2  ;;  %v5259_v48 = vadd.f32 %v5258_v62, %v10617_v29  ;;  %6129 = vmatprep.mubr.bf16.mxu1 %v5750_v54  ;;  %v5646_v41 = vmax.f32 %v5518_v52, 0.0  ;;  %7434 = vmatprep.subr.bf16.mxu1 %v8775_v0 }
 0x5af   : > { %v10787_v49 = vpop.f32.mrf.mxu1  ;;  %v5262_v50 = vpop.f32.mrf.mxu0  ;;  %6130 = vmatmul.mubr.bf16.gmra.mxu1 %v5749_v59 }
 0x5b0   : > { %v5520_v8 = vadd.f32 %v10579_v36, %v5259_v48  ;;  %v5647_v30 = vmax.f32 %v5519_v5, 0.0  ;;  %v5263_v29 = vadd.f32 %v5262_v50, %v10620_v14 }
 0x5b1   : > { %v10790_v4 = vpop.f32.mrf.mxu1  ;;  %v5264_v61 = vpop.f32.mrf.mxu0 }
 0x5b2   : > { %v5648_v53 = vmax.f32 %v5520_v8, 0.0  ;;  %v5265_v38 = vadd.f32 %v5264_v61, %v10626_v55  ;;  %v5751_v59 = vpack.c.bf16 %v5647_v30, %v5645_v12  ;;  %v5521_v14 = vadd.f32 %v10582_v42, %v5263_v29 }
 0x5b3   : > { %v10794_v23 = vpop.f32.mrf.mxu1  ;;  %v5266_v37 = vpop.f32.mrf.mxu0 }
 0x5b4   : > { %v5267_v2 = vadd.f32 %v5266_v37, %v10632_v34  ;;  %v5752_v54 = vpack.c.bf16 %v5648_v53, %v5646_v41  ;;  %v5522_v52 = vadd.f32 %v10579_v36, %v5265_v38  ;;  %v5649_v31 = vmax.f32 %v5521_v14, 0.0 }
 0x5b5   : > { %v10797_v62 = vpop.f32.mrf.mxu1  ;;  %v5268_v5 = vpop.f32.mrf.mxu0 }
 0x5b6   : > { %v5523_v55 = vadd.f32 %v10582_v42, %v5267_v2  ;;  %v5269_v48 = vadd.f32 %v5268_v5, %v10636_v45  ;;  %6139 = vmatprep.mubr.bf16.mxu1 %v5752_v54  ;;  %v5650_v41 = vmax.f32 %v5522_v52, 0.0 }
 0x5b7   : > { %v10804_v51 = vpop.f32.mrf.mxu1  ;;  %v5272_v34 = vpop.f32.mrf.mxu0  ;;  %6140 = vmatmul.mubr.bf16.gmra.mxu1 %v5751_v59 }
 0x5b8   : > { %v5524_v50 = vadd.f32 %v10579_v36, %v5269_v48  ;;  %v5651_v8 = vmax.f32 %v5523_v55, 0.0  ;;  %v5273_v45 = vadd.f32 %v5272_v34, %v10639_v26 }
 0x5b9   : > { %v10807_v30 = vpop.f32.mrf.mxu1  ;;  %v5274_v61 = vpop.f32.mrf.mxu0 }
 0x5ba   : > { %v5652_v53 = vmax.f32 %v5524_v50, 0.0  ;;  %v5275_v38 = vadd.f32 %v5274_v61, %v10645_v40  ;;  %v5753_v54 = vpack.c.bf16 %v5651_v8, %v5649_v31  ;;  %v5525_v40 = vadd.f32 %v10582_v42, %v5273_v45 }
 0x5bb   : > { %v10811_v12 = vpop.f32.mrf.mxu1  ;;  %v5276_v29 = vpop.f32.mrf.mxu0 }
 0x5bc   : > { %v5277_v37 = vadd.f32 %v5276_v29, %v10651_v35  ;;  %v5754_v2 = vpack.c.bf16 %v5652_v53, %v5650_v41  ;;  %v5526_v55 = vadd.f32 %v10579_v36, %v5275_v38  ;;  %v8657_v38 = vld [vmem:[#allocation4 + $0x18] sm:$0xff]   ;;  %v5653_v31 = vmax.f32 %v5525_v40, 0.0 }
 0x5bd   : > { %v10814_v59 = vpop.f32.mrf.mxu1  ;;  %v5278_v5 = vpop.f32.mrf.mxu0  ;;  %7435 = vmatpush1.bf16.msra.mxu1 %v8657_v38 }
 0x5be   : > { %v5527_v52 = vadd.f32 %v10582_v42, %v5277_v37  ;;  %v5279_v48 = vadd.f32 %v5278_v5, %v10655_v1  ;;  %6149 = vmatprep.mubr.bf16.mxu1 %v5754_v2  ;;  %v5654_v61 = vmax.f32 %v5526_v55, 0.0  ;;  %7436 = vmatprep.subr.bf16.mxu1 %v8775_v0 }
 0x5bf   : > { %v10820_v26 = vpop.f32.mrf.mxu1  ;;  %v5282_v14 = vpop.f32.mrf.mxu0  ;;  %6150 = vmatmul.mubr.bf16.gmra.mxu1 %v5753_v54 }
 0x5c0   : > { %v5528_v35 = vadd.f32 %v10579_v36, %v5279_v48  ;;  %v5655_v34 = vmax.f32 %v5527_v52, 0.0  ;;  %v5283_v1 = vadd.f32 %v5282_v14, %v10658_v32 }
 0x5c1   : > { %v10823_v50 = vpop.f32.mrf.mxu1  ;;  %v5284_v8 = vpop.f32.mrf.mxu0 }
 0x5c2   : > { %v5656_v41 = vmax.f32 %v5528_v35, 0.0  ;;  %v5285_v53 = vadd.f32 %v5284_v8, %v10664_v39  ;;  %v5755_v54 = vpack.c.bf16 %v5655_v34, %v5653_v31  ;;  %v5529_v32 = vadd.f32 %v10582_v42, %v5283_v1 }
 0x5c3   : > { %v10827_v29 = vpop.f32.mrf.mxu1  ;;  %v5286_v45 = vpop.f32.mrf.mxu0 }
 0x5c4   : > { %v5287_v37 = vadd.f32 %v5286_v45, %v10670_v6  ;;  %v5756_v2 = vpack.c.bf16 %v5656_v41, %v5654_v61  ;;  %v5530_v55 = vadd.f32 %v10579_v36, %v5285_v53  ;;  %v5657_v38 = vmax.f32 %v5529_v32, 0.0 }
 0x5c5   : > { %v10830_v5 = vpop.f32.mrf.mxu1  ;;  %v5288_v52 = vpop.f32.mrf.mxu0 }
 0x5c6   : > { %v5531_v39 = vadd.f32 %v10582_v42, %v5287_v37  ;;  %v5289_v48 = vadd.f32 %v5288_v52, %v10674_v7  ;;  %6159 = vmatprep.mubr.bf16.mxu1 %v5756_v2  ;;  %v5658_v61 = vmax.f32 %v5530_v55, 0.0 }
 0x5c7   : > { %v10837_v40 = vpop.f32.mrf.mxu1  ;;  %v5292_v6 = vpop.f32.mrf.mxu0  ;;  %6160 = vmatmul.mubr.bf16.gmra.mxu1 %v5755_v54 }
 0x5c8   : > { %v5532_v14 = vadd.f32 %v10579_v36, %v5289_v48  ;;  %v5659_v35 = vmax.f32 %v5531_v39, 0.0  ;;  %v5293_v7 = vadd.f32 %v5292_v6, %v10678_v22 }
 0x5c9   : > { %v10840_v34 = vpop.f32.mrf.mxu1  ;;  %v5294_v8 = vpop.f32.mrf.mxu0 }
 0x5ca   : > { %v5660_v41 = vmax.f32 %v5532_v14, 0.0  ;;  %v5295_v53 = vadd.f32 %v5294_v8, %v10683_v20  ;;  %v5757_v2 = vpack.c.bf16 %v5659_v35, %v5657_v38  ;;  %v5533_v20 = vadd.f32 %v10582_v42, %v5293_v7 }
 0x5cb   : > { %v10844_v31 = vpop.f32.mrf.mxu1  ;;  %v5296_v1 = vpop.f32.mrf.mxu0 }
 0x5cc   : > { %v5297_v45 = vadd.f32 %v5296_v1, %v10689_v44  ;;  %v5758_v37 = vpack.c.bf16 %v5660_v41, %v5658_v61  ;;  %v5534_v39 = vadd.f32 %v10579_v36, %v5295_v53  ;;  %v8658_v53 = vld [vmem:[#allocation4 + $0x10] sm:$0xff]   ;;  %v5661_v38 = vmax.f32 %v5533_v20, 0.0 }
 0x5cd   : > { %v10847_v54 = vpop.f32.mrf.mxu1  ;;  %v5298_v52 = vpop.f32.mrf.mxu0  ;;  %7437 = vmatpush1.bf16.msra.mxu1 %v8658_v53 }
 0x5ce   : > { %v5535_v55 = vadd.f32 %v10582_v42, %v5297_v45  ;;  %v5299_v48 = vadd.f32 %v5298_v52, %v10693_v60  ;;  %6169 = vmatprep.mubr.bf16.mxu1 %v5758_v37  ;;  %v5662_v8 = vmax.f32 %v5534_v39, 0.0  ;;  %7438 = vmatprep.subr.bf16.mxu1 %v8775_v0 }
 0x5cf   : > { %v10853_v22 = vpop.f32.mrf.mxu1  ;;  %v5302_v32 = vpop.f32.mrf.mxu0  ;;  %6170 = vmatmul.mubr.bf16.gmra.mxu1 %v5757_v2 }
 0x5d0   : > { %v5536_v44 = vadd.f32 %v10579_v36, %v5299_v48  ;;  %v5663_v6 = vmax.f32 %v5535_v55, 0.0  ;;  %v5303_v60 = vadd.f32 %v5302_v32, %v10696_v57 }
 0x5d1   : > { %v10856_v14 = vpop.f32.mrf.mxu1  ;;  %v5304_v35 = vpop.f32.mrf.mxu0 }
 0x5d2   : > { %v5664_v61 = vmax.f32 %v5536_v44, 0.0  ;;  %v5305_v41 = vadd.f32 %v5304_v35, %v10703_v3  ;;  %v5759_v2 = vpack.c.bf16 %v5663_v6, %v5661_v38  ;;  %v5537_v57 = vadd.f32 %v10582_v42, %v5303_v60 }
 0x5d3   : > { %v10860_v1 = vpop.f32.mrf.mxu1  ;;  %v5306_v7 = vpop.f32.mrf.mxu0 }
 0x5d4   : > { %v5307_v45 = vadd.f32 %v5306_v7, %v10708_v47  ;;  %v5760_v37 = vpack.c.bf16 %v5664_v61, %v5662_v8  ;;  %v5538_v39 = vadd.f32 %v10579_v36, %v5305_v41  ;;  %v5665_v53 = vmax.f32 %v5537_v57, 0.0 }
 0x5d5   : > { %v10863_v52 = vpop.f32.mrf.mxu1  ;;  %v5308_v55 = vpop.f32.mrf.mxu0 }
 0x5d6   : > { %v5539_v3 = vadd.f32 %v10582_v42, %v5307_v45  ;;  %v5309_v48 = vadd.f32 %v5308_v55, %v10712_v43  ;;  %6179 = vmatprep.mubr.bf16.mxu1 %v5760_v37  ;;  %v5666_v8 = vmax.f32 %v5538_v39, 0.0 }
 0x5d7   : > { %v10870_v20 = vpop.f32.mrf.mxu1  ;;  %v5312_v47 = vpop.f32.mrf.mxu0  ;;  %6180 = vmatmul.mubr.bf16.gmra.mxu1 %v5759_v2 }
 0x5d8   : > { %v5540_v32 = vadd.f32 %v10579_v36, %v5309_v48  ;;  %v5667_v44 = vmax.f32 %v5539_v3, 0.0  ;;  %v5313_v43 = vadd.f32 %v5312_v47, %v10716_v56  ;;  %v8659_v47 = vld [vmem:[#allocation4 + $0x8] sm:$0xff]  }
 0x5d9   : > { %v10873_v6 = vpop.f32.mrf.mxu1  ;;  %v5314_v35 = vpop.f32.mrf.mxu0  ;;  %7439 = vmatpush1.bf16.msra.mxu1 %v8659_v47 }
 0x5da   : > { %v5668_v61 = vmax.f32 %v5540_v32, 0.0  ;;  %v5315_v41 = vadd.f32 %v5314_v35, %v10721_v19  ;;  %v5761_v37 = vpack.c.bf16 %v5667_v44, %v5665_v53  ;;  %v5541_v19 = vadd.f32 %v10582_v42, %v5313_v43  ;;  %7440 = vmatprep.subr.bf16.mxu1 %v8775_v0 }
 0x5db   : > { %v10877_v38 = vpop.f32.mrf.mxu1  ;;  %v5316_v60 = vpop.f32.mrf.mxu0 }
 0x5dc   : > { %v5317_v7 = vadd.f32 %v5316_v60, %v10724_v28  ;;  %v5762_v45 = vpack.c.bf16 %v5668_v61, %v5666_v8  ;;  %v5542_v3 = vadd.f32 %v10579_v36, %v5315_v41 }
 0x5dd   : > { %v10880_v2 = vpop.f32.mrf.mxu1  ;;  %v5318_v55 = vpop.f32.mrf.mxu0 }
 0x5de   : > { %v5543_v39 = vadd.f32 %v10582_v42, %v5317_v7  ;;  %v5319_v48 = vadd.f32 %v5318_v55, %v10728_v15  ;;  %6189 = vmatprep.mubr.bf16.mxu1 %v5762_v45  ;;  %v5670_v8 = vmax.f32 %v5542_v3, 0.0  ;;  %v5669_v15 = vmax.f32 %v5541_v19, 0.0 }
 0x5df   : > { %v10886_v56 = vpop.f32.mrf.mxu1  ;;  %v5322_v57 = vpop.f32.mrf.mxu0  ;;  %6190 = vmatmul.mubr.bf16.gmra.mxu1 %v5761_v37 }
 0x5e0   : > { %v5544_v28 = vadd.f32 %v10579_v36, %v5319_v48  ;;  %v5671_v32 = vmax.f32 %v5543_v39, 0.0  ;;  %v5323_v53 = vadd.f32 %v5322_v57, %v10731_v46 }
 0x5e1   : > { %v10889_v44 = vpop.f32.mrf.mxu1  ;;  %v5324_v35 = vpop.f32.mrf.mxu0 }
 0x5e2   : > { %v5672_v61 = vmax.f32 %v5544_v28, 0.0  ;;  %v5325_v41 = vadd.f32 %v5324_v35, %v10738_v9  ;;  %v5763_v37 = vpack.c.bf16 %v5671_v32, %v5669_v15  ;;  %v5545_v46 = vadd.f32 %v10582_v42, %v5323_v53 }
 0x5e3   : > { %v10893_v43 = vpop.f32.mrf.mxu1  ;;  %v5326_v60 = vpop.f32.mrf.mxu0 }
 0x5e4   : > { %v5327_v7 = vadd.f32 %v5326_v60, %v10741_v11  ;;  %v5764_v45 = vpack.c.bf16 %v5672_v61, %v5670_v8  ;;  %v5546_v3 = vadd.f32 %v10579_v36, %v5325_v41  ;;  %v5673_v41 = vmax.f32 %v5545_v46, 0.0  ;;  %v8660_v46 = vld [vmem:[#allocation4] sm:$0xff]  }
 0x5e5   : > { %v10897_v55 = vpop.f32.mrf.mxu1  ;;  %v5328_v39 = vpop.f32.mrf.mxu0  ;;  %7441 = vmatpush1.bf16.msra.mxu1 %v8660_v46 }
 0x5e6   : > { %v5547_v9 = vadd.f32 %v10582_v42, %v5327_v7  ;;  %v5329_v48 = vadd.f32 %v5328_v39, %v10745_v16  ;;  %6199 = vmatprep.mubr.bf16.mxu1 %v5764_v45  ;;  %v5674_v35 = vmax.f32 %v5546_v3, 0.0  ;;  %7442 = vmatprep.subr.bf16.mxu1 %v8775_v0 }
 0x5e7   : > { %v10903_v19 = vpop.f32.mrf.mxu1  ;;  %v5332_v57 = vpop.f32.mrf.mxu0  ;;  %6200 = vmatmul.mubr.bf16.gmra.mxu1 %v5763_v37 }
 0x5e8   : > { %v5548_v11 = vadd.f32 %v10579_v36, %v5329_v48  ;;  %v5675_v28 = vmax.f32 %v5547_v9, 0.0  ;;  %v5333_v16 = vadd.f32 %v5332_v57, %v10749_v13 }
 0x5e9   : > { %v10906_v47 = vpop.f32.mrf.mxu1  ;;  %v5334_v32 = vpop.f32.mrf.mxu0 }
 0x5ea   : > { %v5676_v8 = vmax.f32 %v5548_v11, 0.0  ;;  %v5335_v61 = vadd.f32 %v5334_v32, %v10754_v25  ;;  %v5765_v7 = vpack.c.bf16 %v5675_v28, %v5673_v41  ;;  %v5549_v25 = vadd.f32 %v10582_v42, %v5333_v16 }
 0x5eb   : > { %v5336_v15 = vpop.f32.mrf.mxu0  ;;  %v10911_v45 = vpop.f32.mrf.mxu1 }
 0x5ec   : > { %v5337_v53 = vadd.f32 %v5336_v15, %v10757_v18  ;;  %v5766_v60 = vpack.c.bf16 %v5676_v8, %v5674_v35  ;;  %v5550_v39 = vadd.f32 %v10579_v36, %v5335_v61  ;;  %v5677_v8 = vmax.f32 %v5549_v25, 0.0 }
 0x5ed   : > { %v5338_v37 = vpop.f32.mrf.mxu0  ;;  %v10918_v57 = vpop.f32.mrf.mxu1 }
 0x5ee   : > { %v5551_v9 = vadd.f32 %v10582_v42, %v5337_v53  ;;  %v5339_v3 = vadd.f32 %v5338_v37, %v10761_v63  ;;  %6209 = vmatprep.mubr.bf16.mxu1 %v5766_v60  ;;  %v5678_v28 = vmax.f32 %v5550_v39, 0.0 }
 0x5ef   : > { %v5342_v48 = vpop.f32.mrf.mxu0  ;;  %6210 = vmatmul.mubr.bf16.gmra.mxu1 %v5765_v7  ;;  %v10924_v53 = vpop.f32.mrf.mxu1 }
 0x5f0   : > { %v5552_v13 = vadd.f32 %v10579_v36, %v5339_v3  ;;  %v5679_v18 = vmax.f32 %v5551_v9, 0.0  ;;  %v5343_v63 = vadd.f32 %v5342_v48, %v10764_v58 }
 0x5f1   : > { %v5344_v11 = vpop.f32.mrf.mxu0  ;;  %v10931_v3 = vpop.f32.mrf.mxu1 }
 0x5f2   : > { %v5680_v32 = vmax.f32 %v5552_v13, 0.0  ;;  %v5345_v35 = vadd.f32 %v5344_v11, %v10771_v17  ;;  %v5767_v15 = vpack.c.bf16 %v5679_v18, %v5677_v8  ;;  %v5553_v39 = vadd.f32 %v10582_v42, %v5343_v63 }
 0x5f3   : > { %v5346_v61 = vpop.f32.mrf.mxu0 }
 0x5f4   : > { %v5347_v41 = vadd.f32 %v5346_v61, %v10774_v27  ;;  %v5768_v16 = vpack.c.bf16 %v5680_v32, %v5678_v28  ;;  %v5554_v7 = vadd.f32 %v10579_v36, %v5345_v35  ;;  %v5681_v18 = vmax.f32 %v5553_v39, 0.0  ;;  %v10936_v35 = vpop.f32.mrf.mxu1 }
 0x5f5   : > { %v5348_v60 = vpop.f32.mrf.mxu0 }
 0x5f6   : > { %v5555_v37 = vadd.f32 %v10582_v42, %v5347_v41  ;;  %v5349_v17 = vadd.f32 %v5348_v60, %v10778_v33  ;;  %6219 = vmatprep.mubr.bf16.mxu1 %v5768_v16  ;;  %v5682_v48 = vmax.f32 %v5554_v7, 0.0  ;;  %v8661_v60 = vld [vmem:[#allocation4 + $0x78] sm:$0xff]  }
 0x5f7   : > { %v5352_v58 = vpop.f32.mrf.mxu0  ;;  %6220 = vmatmul.mubr.bf16.gmra.mxu1 %v5767_v15 }
 0x5f8   : > { %v5556_v9 = vadd.f32 %v10579_v36, %v5349_v17  ;;  %v5683_v27 = vmax.f32 %v5555_v37, 0.0  ;;  %v5353_v11 = vadd.f32 %v5352_v58, %v10781_v10  ;;  %7443 = vmatpush2.bf16.msra.mxu1 %v8661_v60 }
 0x5f9   : > { %v5354_v25 = vpop.f32.mrf.mxu0  ;;  %7444 = vmatprep.subr.bf16.mxu1 %v8775_v0 }
 0x5fa   : > { %v5684_v13 = vmax.f32 %v5556_v9, 0.0  ;;  %v5355_v46 = vadd.f32 %v5354_v25, %v10787_v49  ;;  %v5769_v8 = vpack.c.bf16 %v5683_v27, %v5681_v18  ;;  %v5557_v49 = vadd.f32 %v10582_v42, %v5353_v11 }
 0x5fb   : > { %v5356_v28 = vpop.f32.mrf.mxu0 }
 0x5fc   : > { %v5357_v33 = vadd.f32 %v5356_v28, %v10790_v4  ;;  %v5770_v32 = vpack.c.bf16 %v5684_v13, %v5682_v48  ;;  %v5558_v61 = vadd.f32 %v10579_v36, %v5355_v46  ;;  %v10943_v4 = vpop.f32.mrf.mxu1  ;;  %v5685_v9 = vmax.f32 %v5557_v49, 0.0 }
 0x5fd   : > { %v5358_v63 = vpop.f32.mrf.mxu0 }
 0x5fe   : > { %v5559_v41 = vadd.f32 %v10582_v42, %v5357_v33  ;;  %v5359_v16 = vadd.f32 %v5358_v63, %v10794_v23  ;;  %6229 = vmatprep.mubr.bf16.mxu1 %v5770_v32  ;;  %v5686_v17 = vmax.f32 %v5558_v61, 0.0  ;;  %v10949_v13 = vpop.f32.mrf.mxu1 }
 0x5ff   : > { %v5362_v15 = vpop.f32.mrf.mxu0  ;;  %6230 = vmatmul.mubr.bf16.gmra.mxu1 %v5769_v8 }
 0x600   : > { %v5560_v10 = vadd.f32 %v10579_v36, %v5359_v16  ;;  %v5687_v7 = vmax.f32 %v5559_v41, 0.0  ;;  %v5363_v23 = vadd.f32 %v5362_v15, %v10797_v62  ;;  %v10956_v8 = vpop.f32.mrf.mxu1 }
 0x601   : > { %v5364_v37 = vpop.f32.mrf.mxu0 }
 0x602   : > { %v5688_v39 = vmax.f32 %v5560_v10, 0.0  ;;  %v5365_v58 = vadd.f32 %v5364_v37, %v10804_v51  ;;  %v5771_v46 = vpack.c.bf16 %v5687_v7, %v5685_v9  ;;  %v5561_v33 = vadd.f32 %v10582_v42, %v5363_v23  ;;  %v10961_v7 = vpop.f32.mrf.mxu1 }
 0x603   : > { %v5366_v27 = vpop.f32.mrf.mxu0 }
 0x604   : > { %v5367_v25 = vadd.f32 %v5366_v27, %v10807_v30  ;;  %v5772_v48 = vpack.c.bf16 %v5688_v39, %v5686_v17  ;;  %v5562_v11 = vadd.f32 %v10579_v36, %v5365_v58  ;;  %v5689_v49 = vmax.f32 %v5561_v33, 0.0  ;;  %v8662_v27 = vld [vmem:[#allocation4 + $0x70] sm:$0xff]  }
 0x605   : > { %v5368_v18 = vpop.f32.mrf.mxu0  ;;  %7445 = vmatpush2.bf16.msra.mxu1 %v8662_v27 }
 0x606   : > { %v5563_v28 = vadd.f32 %v10582_v42, %v5367_v25  ;;  %v5369_v51 = vadd.f32 %v5368_v18, %v10811_v12  ;;  %6239 = vmatprep.mubr.bf16.mxu1 %v5772_v48  ;;  %v5690_v61 = vmax.f32 %v5562_v11, 0.0  ;;  %7446 = vmatprep.subr.bf16.mxu1 %v8775_v0 }
 0x607   : > { %v5372_v62 = vpop.f32.mrf.mxu0  ;;  %6240 = vmatmul.mubr.bf16.gmra.mxu1 %v5771_v46 }
 0x608   : > { %v5564_v32 = vadd.f32 %v10579_v36, %v5369_v51  ;;  %v5691_v30 = vmax.f32 %v5563_v28, 0.0  ;;  %v5373_v15 = vadd.f32 %v5372_v62, %v10814_v59 }
 0x609   : > { %v5374_v63 = vpop.f32.mrf.mxu0 }
 0x60a   : > { %v5692_v41 = vmax.f32 %v5564_v32, 0.0  ;;  %v5375_v16 = vadd.f32 %v5374_v63, %v10820_v26  ;;  %v5773_v37 = vpack.c.bf16 %v5691_v30, %v5689_v49  ;;  %v5565_v26 = vadd.f32 %v10582_v42, %v5373_v15 }
 0x60b   : > { %v5376_v10 = vpop.f32.mrf.mxu0 }
 0x60c   : > { %v5377_v12 = vadd.f32 %v5376_v10, %v10823_v50  ;;  %v5774_v60 = vpack.c.bf16 %v5692_v41, %v5690_v61  ;;  %v5566_v39 = vadd.f32 %v10579_v36, %v5375_v16  ;;  %v10968_v50 = vpop.f32.mrf.mxu1  ;;  %v5693_v28 = vmax.f32 %v5565_v26, 0.0 }
 0x60d   : > { %v5378_v17 = vpop.f32.mrf.mxu0 }
 0x60e   : > { %v5567_v58 = vadd.f32 %v10582_v42, %v5377_v12  ;;  %v5379_v9 = vadd.f32 %v5378_v17, %v10827_v29  ;;  %6249 = vmatprep.mubr.bf16.mxu1 %v5774_v60  ;;  %v5694_v46 = vmax.f32 %v5566_v39, 0.0  ;;  %v10974_v32 = vpop.f32.mrf.mxu1 }
 0x60f   : > { %v5382_v23 = vpop.f32.mrf.mxu0  ;;  %6250 = vmatmul.mubr.bf16.gmra.mxu1 %v5773_v37 }
 0x610   : > { %v5568_v59 = vadd.f32 %v10579_v36, %v5379_v9  ;;  %v5695_v25 = vmax.f32 %v5567_v58, 0.0  ;;  %v5383_v29 = vadd.f32 %v5382_v23, %v10830_v5  ;;  %v10981_v15 = vpop.f32.mrf.mxu1 }
 0x611   : > { %v5384_v48 = vpop.f32.mrf.mxu0 }
 0x612   : > { %v5696_v18 = vmax.f32 %v5568_v59, 0.0  ;;  %v5385_v11 = vadd.f32 %v5384_v48, %v10837_v40  ;;  %v5775_v30 = vpack.c.bf16 %v5695_v25, %v5693_v28  ;;  %v5569_v16 = vadd.f32 %v10582_v42, %v5383_v29  ;;  %v10986_v26 = vpop.f32.mrf.mxu1 }
 0x613   : > { %v5386_v51 = vpop.f32.mrf.mxu0 }
 0x614   : > { %v5387_v33 = vadd.f32 %v5386_v51, %v10840_v34  ;;  %v5776_v62 = vpack.c.bf16 %v5696_v18, %v5694_v46  ;;  %v5570_v61 = vadd.f32 %v10579_v36, %v5385_v11  ;;  %v5697_v17 = vmax.f32 %v5569_v16, 0.0  ;;  %v8663_v11 = vld [vmem:[#allocation4 + $0x68] sm:$0xff]  }
 0x615   : > { %v5388_v63 = vpop.f32.mrf.mxu0  ;;  %7447 = vmatpush2.bf16.msra.mxu1 %v8663_v11 }
 0x616   : > { %v5571_v41 = vadd.f32 %v10582_v42, %v5387_v33  ;;  %v5389_v40 = vadd.f32 %v5388_v63, %v10844_v31  ;;  %6259 = vmatprep.mubr.bf16.mxu1 %v5776_v62  ;;  %v5698_v12 = vmax.f32 %v5570_v61, 0.0  ;;  %7448 = vmatprep.subr.bf16.mxu1 %v8775_v0 }
 0x617   : > { %v5392_v5 = vpop.f32.mrf.mxu0  ;;  %6260 = vmatmul.mubr.bf16.gmra.mxu1 %v5775_v30 }
 0x618   : > { %v5572_v49 = vadd.f32 %v10579_v36, %v5389_v40  ;;  %v5699_v34 = vmax.f32 %v5571_v41, 0.0  ;;  %v5393_v39 = vadd.f32 %v5392_v5, %v10847_v54  ;;  %v5825_v54 = vld [vmem:[%s11477_s15] sm:$0x3] }
 0x619   : > { %v5394_v10 = vpop.f32.mrf.mxu0  ;;  %v10997_v51 = vrot.slane %v5825_v54, %v9180_v21  ;;  %v11000_v30 = vrot.slane %v5825_v54, %v9188_v24 }
 0x61a   : > { %v5700_v60 = vmax.f32 %v5572_v49, 0.0  ;;  %v5395_v37 = vadd.f32 %v5394_v10, %v10853_v22  ;;  %v5777_v23 = vpack.c.bf16 %v5699_v34, %v5697_v17  ;;  %v5573_v22 = vadd.f32 %v10582_v42, %v5393_v39 }
 0x61b   : > { %v5396_v58 = vpop.f32.mrf.mxu0 }
 0x61c   : > { %v5397_v31 = vadd.f32 %v5396_v58, %v10856_v14  ;;  %v5778_v9 = vpack.c.bf16 %v5700_v60, %v5698_v12  ;;  %v5574_v27 = vadd.f32 %v10579_v36, %v5395_v37  ;;  %v5701_v63 = vmax.f32 %v5573_v22, 0.0 }
 0x61d   : > { %v5398_v59 = vpop.f32.mrf.mxu0 }
 0x61e   : > { %v5575_v25 = vadd.f32 %v10582_v42, %v5397_v31  ;;  %v5399_v48 = vadd.f32 %v5398_v59, %v10860_v1  ;;  %6269 = vmatprep.mubr.bf16.mxu1 %v5778_v9  ;;  %v5702_v1 = vmax.f32 %v5574_v27, 0.0 }
 0x61f   : > { %v5402_v46 = vpop.f32.mrf.mxu0  ;;  %v6031_v14 = vpop.f32.mrf.mxu1  ;;  %6270 = vmatmul.mubr.bf16.gmra.mxu1 %v5777_v23 }
 0x620   : > { %v5576_v18 = vadd.f32 %v10579_v36, %v5399_v48  ;;  %v5703_v28 = vmax.f32 %v5575_v25, 0.0  ;;  %v5403_v16 = vadd.f32 %v5402_v46, %v10863_v52  ;;  %v6032_v17 = vadd.f32 %v6031_v14, %v11000_v30 }
 0x621   : > { %v5404_v29 = vpop.f32.mrf.mxu0  ;;  %v6033_v33 = vpop.f32.mrf.mxu1 }
 0x622   : > { %v5704_v62 = vmax.f32 %v5576_v18, 0.0  ;;  %v5405_v61 = vadd.f32 %v5404_v29, %v10870_v20  ;;  %v5779_v10 = vpack.c.bf16 %v5703_v28, %v5701_v63  ;;  %v6034_v12 = vadd.f32 %v6033_v33, %v10997_v51 }
 0x623   : > { %v5406_v41 = vpop.f32.mrf.mxu0  ;;  %v6035_v40 = vpop.f32.mrf.mxu1  ;;  %v5577_v9 = vadd.f32 %v10582_v42, %v5403_v16  ;;  %v6350_v46 = vmax.f32 %v6032_v17, 0.0 }
 0x624   : > { %v5407_v5 = vadd.f32 %v5406_v41, %v10873_v6  ;;  %v6036_v49 = vadd.f32 %v6035_v40, %v11000_v30  ;;  %v5780_v34 = vpack.c.bf16 %v5704_v62, %v5702_v1  ;;  %v5578_v52 = vadd.f32 %v10579_v36, %v5405_v61 }
 0x625   : > { %v5408_v60 = vpop.f32.mrf.mxu0  ;;  %v6037_v37 = vpop.f32.mrf.mxu1  ;;  %v6351_v25 = vmax.f32 %v6034_v12, 0.0  ;;  %v5705_v1 = vmax.f32 %v5577_v9, 0.0 }
 0x626   : > { %v5579_v20 = vadd.f32 %v10582_v42, %v5407_v5  ;;  %v5409_v39 = vadd.f32 %v5408_v60, %v10877_v38  ;;  %v6038_v58 = vadd.f32 %v6037_v37, %v10997_v51  ;;  %6279 = vmatprep.mubr.bf16.mxu1 %v5780_v34  ;;  %v6352_v23 = vmax.f32 %v6036_v49, 0.0 }
 0x627   : > { %v5412_v6 = vpop.f32.mrf.mxu0  ;;  %v6041_v31 = vpop.f32.mrf.mxu1  ;;  %6280 = vmatmul.mubr.bf16.gmra.mxu1 %v5779_v10  ;;  %v5706_v14 = vmax.f32 %v5578_v52, 0.0 }
 0x628   : > { %v5580_v59 = vadd.f32 %v10579_v36, %v5409_v39  ;;  %v6353_v27 = vmax.f32 %v6038_v58, 0.0  ;;  %v5707_v54 = vmax.f32 %v5579_v20, 0.0  ;;  %v5413_v18 = vadd.f32 %v5412_v6, %v10880_v2  ;;  %v8664_v39 = vld [vmem:[#allocation4 + $0x60] sm:$0xff]  }
 0x629   : > { %v5414_v48 = vpop.f32.mrf.mxu0  ;;  %v6043_v22 = vpop.f32.mrf.mxu1  ;;  %v6478_v62 = vpack.c.bf16 %v6352_v23, %v6350_v46  ;;  %v6042_v2 = vadd.f32 %v6041_v31, %v11000_v30  ;;  %7449 = vmatpush2.bf16.msra.mxu1 %v8664_v39 }
 0x62a   : > { %v5708_v38 = vmax.f32 %v5580_v59, 0.0  ;;  %v5415_v11 = vadd.f32 %v5414_v48, %v10886_v56  ;;  %v6479_v33 = vpack.c.bf16 %v6353_v27, %v6351_v25  ;;  %v6044_v41 = vadd.f32 %v6043_v22, %v10997_v51  ;;  %7450 = vmatprep.subr.bf16.mxu1 %v8775_v0 }
 0x62b   : > { %v5416_v28 = vpop.f32.mrf.mxu0  ;;  %v6045_v29 = vpop.f32.mrf.mxu1  ;;  %v5781_v49 = vpack.c.bf16 %v5707_v54, %v5705_v1  ;;  %v5581_v10 = vadd.f32 %v10582_v42, %v5413_v18 }
 0x62c   : > { %v5417_v63 = vadd.f32 %v5416_v28, %v10889_v44  ;;  %v6046_v61 = vadd.f32 %v6045_v29, %v11000_v30  ;;  %6778 = vmatprep.mubr.bf16.mxu0 %v6479_v33  ;;  %v5782_v5 = vpack.c.bf16 %v5708_v38, %v5706_v14  ;;  %v5582_v44 = vadd.f32 %v10579_v36, %v5415_v11 }
 0x62d   : > { %v5418_v40 = vpop.f32.mrf.mxu0  ;;  %v6047_v16 = vpop.f32.mrf.mxu1  ;;  %6779 = vmatmul.mubr.bf16.vlgmr.msra.gmra.mxu0 %v6478_v62  ;;  %v6355_v58 = vmax.f32 %v6044_v41, 0.0  ;;  %v5709_v59 = vmax.f32 %v5581_v10, 0.0 }
 0x62e   : > { %v5583_v56 = vadd.f32 %v10582_v42, %v5417_v63  ;;  %v5419_v34 = vadd.f32 %v5418_v40, %v10893_v43  ;;  %v6048_v12 = vadd.f32 %v6047_v16, %v10997_v51  ;;  %6289 = vmatprep.mubr.bf16.mxu1 %v5782_v5  ;;  %v6356_v17 = vmax.f32 %v6046_v61, 0.0 }
 0x62f   : > { %v5422_v60 = vpop.f32.mrf.mxu0  ;;  %v6051_v37 = vpop.f32.mrf.mxu1  ;;  %6290 = vmatmul.mubr.bf16.gmra.mxu1 %v5781_v49  ;;  %v6354_v43 = vmax.f32 %v6042_v2, 0.0  ;;  %v5710_v27 = vmax.f32 %v5582_v44, 0.0 }
 0x630   : > { %v5584_v20 = vadd.f32 %v10579_v36, %v5419_v34  ;;  %v6357_v52 = vmax.f32 %v6048_v12, 0.0  ;;  %v5711_v9 = vmax.f32 %v5583_v56, 0.0  ;;  %v5423_v38 = vadd.f32 %v5422_v60, %v10897_v55 }
 0x631   : > { %v5424_v6 = vpop.f32.mrf.mxu0  ;;  %v6053_v31 = vpop.f32.mrf.mxu1  ;;  %v6480_v54 = vpack.c.bf16 %v6356_v17, %v6354_v43 }
 0x632   : > { %v5712_v23 = vmax.f32 %v5584_v20, 0.0  ;;  %v5425_v25 = vadd.f32 %v5424_v6, %v10903_v19  ;;  %v6481_v46 = vpack.c.bf16 %v6357_v52, %v6355_v58  ;;  %v6054_v11 = vadd.f32 %v6053_v31, %v10997_v51 }
 0x633   : > { %v5426_v48 = vpop.f32.mrf.mxu0  ;;  %v6055_v22 = vpop.f32.mrf.mxu1  ;;  %v5783_v1 = vpack.c.bf16 %v5711_v9, %v5709_v59  ;;  %v6052_v19 = vadd.f32 %v6051_v37, %v11000_v30  ;;  %v5585_v40 = vadd.f32 %v10582_v42, %v5423_v38 }
 0x634   : > { %v5427_v14 = vadd.f32 %v5426_v48, %v10906_v47  ;;  %v6056_v18 = vadd.f32 %v6055_v22, %v11000_v30  ;;  %6788 = vmatprep.mubr.bf16.mxu0 %v6481_v46  ;;  %v5784_v33 = vpack.c.bf16 %v5712_v23, %v5710_v27  ;;  %v5586_v55 = vadd.f32 %v10579_v36, %v5425_v25 }
 0x635   : > { %v5428_v28 = vpop.f32.mrf.mxu0  ;;  %v6057_v29 = vpop.f32.mrf.mxu1  ;;  %6789 = vmatmul.mubr.bf16.gmra.mxu0 %v6480_v54  ;;  %v6359_v49 = vmax.f32 %v6054_v11, 0.0  ;;  %v6358_v10 = vmax.f32 %v6052_v19, 0.0  ;;  %v5713_v58 = vmax.f32 %v5585_v40, 0.0 }
 0x636   : > { %v5587_v62 = vadd.f32 %v10582_v42, %v5427_v14  ;;  %v5429_v63 = vadd.f32 %v5428_v28, %v10911_v45  ;;  %v6058_v47 = vadd.f32 %v6057_v29, %v10997_v51  ;;  %6299 = vmatprep.mubr.bf16.mxu1 %v5784_v33  ;;  %v6360_v16 = vmax.f32 %v6056_v18, 0.0  ;;  %v8665_v18 = vld [vmem:[#allocation4 + $0x58] sm:$0xff]  }
 0x637   : > { %v5432_v61 = vpop.f32.mrf.mxu0  ;;  %v6061_v41 = vpop.f32.mrf.mxu1  ;;  %6300 = vmatmul.mubr.bf16.gmra.mxu1 %v5783_v1  ;;  %v5714_v12 = vmax.f32 %v5586_v55, 0.0 }
 0x638   : > { %v5588_v5 = vadd.f32 %v10579_v36, %v5429_v63  ;;  %v6361_v2 = vmax.f32 %v6058_v47, 0.0  ;;  %v5715_v45 = vmax.f32 %v5587_v62, 0.0  ;;  %v5433_v60 = vadd.f32 %v5432_v61, %v10918_v57  ;;  %7451 = vmatpush2.bf16.msra.mxu1 %v8665_v18 }
 0x639   : > { %v5434_v56 = vpop.f32.mrf.mxu0  ;;  %v6063_v34 = vpop.f32.mrf.mxu1  ;;  %v6482_v52 = vpack.c.bf16 %v6360_v16, %v6358_v10  ;;  %v6062_v57 = vadd.f32 %v6061_v41, %v11000_v30  ;;  %7452 = vmatprep.subr.bf16.mxu1 %v8775_v0 }
 0x63a   : > { %v5716_v44 = vmax.f32 %v5588_v5, 0.0  ;;  %v5435_v37 = vadd.f32 %v5434_v56, %v10924_v53  ;;  %v6483_v39 = vpack.c.bf16 %v6361_v2, %v6359_v49  ;;  %v6064_v43 = vadd.f32 %v6063_v34, %v10997_v51 }
 0x63b   : > { %v5436_v17 = vpop.f32.mrf.mxu0  ;;  %v6065_v20 = vpop.f32.mrf.mxu1  ;;  %v5785_v27 = vpack.c.bf16 %v5715_v45, %v5713_v58  ;;  %v5589_v48 = vadd.f32 %v10582_v42, %v5433_v60 }
 0x63c   : > { %v5437_v6 = vadd.f32 %v5436_v17, %v10931_v3  ;;  %v6066_v31 = vadd.f32 %v6065_v20, %v11000_v30  ;;  %6798 = vmatprep.mubr.bf16.mxu0 %v6483_v39  ;;  %v5786_v59 = vpack.c.bf16 %v5716_v44, %v5714_v12  ;;  %v5590_v3 = vadd.f32 %v10579_v36, %v5435_v37 }
 0x63d   : > { %v5438_v9 = vpop.f32.mrf.mxu0  ;;  %v6067_v23 = vpop.f32.mrf.mxu1  ;;  %6799 = vmatmul.mubr.bf16.gmra.mxu0 %v6482_v52  ;;  %v6363_v11 = vmax.f32 %v6064_v43, 0.0  ;;  %v5717_v62 = vmax.f32 %v5589_v48, 0.0 }
 0x63e   : > { %v5591_v53 = vadd.f32 %v10582_v42, %v5437_v6  ;;  %v5439_v25 = vadd.f32 %v5438_v9, %v10936_v35  ;;  %v6068_v22 = vadd.f32 %v6067_v23, %v10997_v51  ;;  %6309 = vmatprep.mubr.bf16.mxu1 %v5786_v59  ;;  %v6364_v38 = vmax.f32 %v6066_v31, 0.0 }
 0x63f   : > { %v5442_v46 = vpop.f32.mrf.mxu0  ;;  %v6071_v54 = vpop.f32.mrf.mxu1  ;;  %6310 = vmatmul.mubr.bf16.gmra.mxu1 %v5785_v27  ;;  %v6362_v35 = vmax.f32 %v6062_v57, 0.0  ;;  %v5718_v63 = vmax.f32 %v5590_v3, 0.0 }
 0x640   : > { %v5592_v14 = vadd.f32 %v10579_v36, %v5439_v25  ;;  %v6365_v28 = vmax.f32 %v6068_v22, 0.0  ;;  %v5719_v1 = vmax.f32 %v5591_v53, 0.0  ;;  %v5443_v16 = vadd.f32 %v5442_v46, %v10943_v4 }
 0x641   : > { %v5444_v29 = vpop.f32.mrf.mxu0  ;;  %v6073_v33 = vpop.f32.mrf.mxu1  ;;  %v6484_v40 = vpack.c.bf16 %v6364_v38, %v6362_v35 }
 0x642   : > { %v5720_v19 = vmax.f32 %v5592_v14, 0.0  ;;  %v5445_v55 = vadd.f32 %v5444_v29, %v10949_v13  ;;  %v6485_v41 = vpack.c.bf16 %v6365_v28, %v6363_v11  ;;  %v6074_v2 = vadd.f32 %v6073_v33, %v10997_v51 }
 0x643   : > { %v5446_v47 = vpop.f32.mrf.mxu0  ;;  %v6075_v61 = vpop.f32.mrf.mxu1  ;;  %v5787_v45 = vpack.c.bf16 %v5719_v1, %v5717_v62  ;;  %v6072_v13 = vadd.f32 %v6071_v54, %v11000_v30  ;;  %v5593_v17 = vadd.f32 %v10582_v42, %v5443_v16  ;;  %v8666_v62 = vld [vmem:[#allocation4 + $0x50] sm:$0xff]  }
 0x644   : > { %v5447_v5 = vadd.f32 %v5446_v47, %v10956_v8  ;;  %v6076_v49 = vadd.f32 %v6075_v61, %v11000_v30  ;;  %6808 = vmatprep.mubr.bf16.mxu0 %v6485_v41  ;;  %v5788_v10 = vpack.c.bf16 %v5720_v19, %v5718_v63  ;;  %v5594_v4 = vadd.f32 %v10579_v36, %v5445_v55 }
 0x645   : > { %v5448_v56 = vpop.f32.mrf.mxu0  ;;  %v6077_v34 = vpop.f32.mrf.mxu1  ;;  %6809 = vmatmul.mubr.bf16.gmra.mxu0 %v6484_v40  ;;  %v6367_v58 = vmax.f32 %v6074_v2, 0.0  ;;  %v6366_v43 = vmax.f32 %v6072_v13, 0.0  ;;  %v5721_v48 = vmax.f32 %v5593_v17, 0.0  ;;  %7453 = vmatpush2.bf16.msra.mxu1 %v8666_v62 }
 0x646   : > { %v5595_v44 = vadd.f32 %v10582_v42, %v5447_v5  ;;  %v5449_v12 = vadd.f32 %v5448_v56, %v10961_v7  ;;  %v6078_v8 = vadd.f32 %v6077_v34, %v10997_v51  ;;  %6319 = vmatprep.mubr.bf16.mxu1 %v5788_v10  ;;  %v6368_v20 = vmax.f32 %v6076_v49, 0.0  ;;  %7454 = vmatprep.subr.bf16.mxu1 %v8775_v0 }
 0x647   : > { %v5452_v60 = vpop.f32.mrf.mxu0  ;;  %v6081_v37 = vpop.f32.mrf.mxu1  ;;  %6320 = vmatmul.mubr.bf16.gmra.mxu1 %v5787_v45  ;;  %v5722_v59 = vmax.f32 %v5594_v4, 0.0 }
 0x648   : > { %v5596_v39 = vadd.f32 %v10579_v36, %v5449_v12  ;;  %v6369_v52 = vmax.f32 %v6078_v8, 0.0  ;;  %v5723_v7 = vmax.f32 %v5595_v44, 0.0  ;;  %v5453_v27 = vadd.f32 %v5452_v60, %v10968_v50 }
 0x649   : > { %v5454_v6 = vpop.f32.mrf.mxu0  ;;  %v6083_v31 = vpop.f32.mrf.mxu1  ;;  %v6486_v3 = vpack.c.bf16 %v6368_v20, %v6366_v43  ;;  %v6082_v54 = vadd.f32 %v6081_v37, %v11000_v30 }
 0x64a   : > { %v5724_v9 = vmax.f32 %v5596_v39, 0.0  ;;  %v5455_v23 = vadd.f32 %v5454_v6, %v10974_v32  ;;  %v6487_v25 = vpack.c.bf16 %v6369_v52, %v6367_v58  ;;  %v6084_v38 = vadd.f32 %v6083_v31, %v10997_v51 }
 0x64b   : > { %v5456_v57 = vpop.f32.mrf.mxu0  ;;  %v6085_v53 = vpop.f32.mrf.mxu1  ;;  %v5789_v11 = vpack.c.bf16 %v5723_v7, %v5721_v48  ;;  %v6370_v61 = vmax.f32 %v6082_v54, 0.0 }
 0x64c   : > { %v5457_v22 = vadd.f32 %v5456_v57, %v10981_v15  ;;  %v6086_v46 = vadd.f32 %v6085_v53, %v11000_v30  ;;  %6818 = vmatprep.mubr.bf16.mxu0 %v6487_v25  ;;  %v5790_v32 = vpack.c.bf16 %v5724_v9, %v5722_v59  ;;  %v5598_v50 = vadd.f32 %v10579_v36, %v5455_v23 }
 0x64d   : > { %v5458_v14 = vpop.f32.mrf.mxu0  ;;  %v6087_v18 = vpop.f32.mrf.mxu1  ;;  %6819 = vmatmul.mubr.bf16.gmra.mxu0 %v6486_v3  ;;  %v5597_v15 = vadd.f32 %v10582_v42, %v5453_v27  ;;  %v6371_v63 = vmax.f32 %v6084_v38, 0.0  ;;  %v8667_v27 = vld [vmem:[#allocation4 + $0x48] sm:$0xff]  }
 0x64e   : > { %v5599_v28 = vadd.f32 %v10582_v42, %v5457_v22  ;;  %v5459_v29 = vadd.f32 %v5458_v14, %v10986_v26  ;;  %v6088_v33 = vadd.f32 %v6087_v18, %v10997_v51  ;;  %6329 = vmatprep.mubr.bf16.mxu1 %v5790_v32  ;;  %v6372_v1 = vmax.f32 %v6086_v46, 0.0  ;;  %7455 = vmatpush2.bf16.msra.mxu1 %v8667_v27 }
 0x64f   : > { %v6091_v35 = vpop.f32.mrf.mxu1  ;;  %6330 = vmatmul.mubr.bf16.gmra.mxu1 %v5789_v11  ;;  %v5726_v41 = vmax.f32 %v5598_v50, 0.0  ;;  %v5725_v26 = vmax.f32 %v5597_v15, 0.0  ;;  %7456 = vmatprep.subr.bf16.mxu1 %v8775_v0 }
 0x650   : > { %v5600_v19 = vadd.f32 %v10579_v36, %v5459_v29  ;;  %v6373_v55 = vmax.f32 %v6088_v33, 0.0  ;;  %v5727_v40 = vmax.f32 %v5599_v28, 0.0  ;;  %v6488_v49 = vpack.c.bf16 %v6372_v1, %v6370_v61 }
 0x651   : > { %v6093_v47 = vpop.f32.mrf.mxu1  ;;  %v6092_v45 = vadd.f32 %v6091_v35, %v11000_v30 }
 0x652   : > { %v5728_v16 = vmax.f32 %v5600_v19, 0.0  ;;  %v6489_v42 = vpack.c.bf16 %v6373_v55, %v6371_v63  ;;  %v6094_v2 = vadd.f32 %v6093_v47, %v10997_v51  ;;  %v5791_v10 = vpack.c.bf16 %v5727_v40, %v5725_v26  ;;  %v8668_v40 = vld [vmem:[#allocation4 + $0x40] sm:$0xff]  }
 0x653   : > { %v6095_v5 = vpop.f32.mrf.mxu1  ;;  %v6374_v37 = vmax.f32 %v6092_v45, 0.0  ;;  %7457 = vmatpush2.bf16.msra.mxu1 %v8668_v40 }
 0x654   : > { %v6096_v36 = vadd.f32 %v6095_v5, %v11000_v30  ;;  %v5792_v56 = vpack.c.bf16 %v5728_v16, %v5726_v41  ;;  %6828 = vmatprep.mubr.bf16.mxu0 %v6489_v42  ;;  %v6375_v12 = vmax.f32 %v6094_v2, 0.0 }
 0x655   : > { %v6097_v34 = vpop.f32.mrf.mxu1  ;;  %6829 = vmatmul.mubr.bf16.gmra.mxu0 %v6488_v49 }
 0x656   : > { %v6098_v13 = vadd.f32 %v6097_v34, %v10997_v51  ;;  %6339 = vmatprep.mubr.bf16.mxu1 %v5792_v56  ;;  %v6376_v4 = vmax.f32 %v6096_v36, 0.0 }
 0x657   : > { %v6101_v44 = vpop.f32.mrf.mxu1  ;;  %6340 = vmatmul.mubr.bf16.gmra.mxu1 %v5791_v10 }
 0x658   : > { %v6377_v8 = vmax.f32 %v6098_v13, 0.0  ;;  %v6490_v39 = vpack.c.bf16 %v6376_v4, %v6374_v37  ;;  %v6102_v31 = vadd.f32 %v6101_v44, %v11000_v30 }
 0x659   : > { %v6103_v60 = vpop.f32.mrf.mxu1 }
 0x65a   : > { %v6491_v17 = vpack.c.bf16 %v6377_v8, %v6375_v12  ;;  %v6104_v58 = vadd.f32 %v6103_v60, %v10997_v51  ;;  %v6378_v53 = vmax.f32 %v6102_v31, 0.0 }
 0x65b   : > { %v6105_v20 = vpop.f32.mrf.mxu1 }
 0x65c   : > { %v6106_v52 = vadd.f32 %v6105_v20, %v11000_v30  ;;  %6838 = vmatprep.mubr.bf16.mxu0 %v6491_v17  ;;  %v6379_v9 = vmax.f32 %v6104_v58, 0.0 }
 0x65d   : > { %v6107_v6 = vpop.f32.mrf.mxu1  ;;  %6839 = vmatmul.mubr.bf16.gmra.mxu0 %v6490_v39 }
 0x65e   : > { %v6108_v43 = vadd.f32 %v6107_v6, %v10997_v51  ;;  %v6380_v23 = vmax.f32 %v6106_v52, 0.0 }
 0x65f   : > { %v6111_v7 = vpop.f32.mrf.mxu1 }
 0x660   : > { %v6381_v59 = vmax.f32 %v6108_v43, 0.0  ;;  %v6492_v3 = vpack.c.bf16 %v6380_v23, %v6378_v53  ;;  %v6112_v38 = vadd.f32 %v6111_v7, %v11000_v30 }
 0x661   : > { %v6113_v57 = vpop.f32.mrf.mxu1 }
 0x662   : > { %v6493_v25 = vpack.c.bf16 %v6381_v59, %v6379_v9  ;;  %v6114_v22 = vadd.f32 %v6113_v57, %v10997_v51  ;;  %v6382_v29 = vmax.f32 %v6112_v38, 0.0 }
 0x663   : > { %v6115_v48 = vpop.f32.mrf.mxu1 }
 0x664   : > { %v6116_v46 = vadd.f32 %v6115_v48, %v11000_v30  ;;  %6848 = vmatprep.mubr.bf16.mxu0 %v6493_v25  ;;  %v6383_v32 = vmax.f32 %v6114_v22, 0.0 }
 0x665   : > { %v6117_v54 = vpop.f32.mrf.mxu1  ;;  %6849 = vmatmul.mubr.bf16.gmra.mxu0 %v6492_v3 }
 0x666   : > { %v6118_v14 = vadd.f32 %v6117_v54, %v10997_v51  ;;  %v6384_v11 = vmax.f32 %v6116_v46, 0.0 }
 0x667   : > { %v6121_v18 = vpop.f32.mrf.mxu1 }
 0x668   : > { %v6385_v50 = vmax.f32 %v6118_v14, 0.0  ;;  %v6494_v33 = vpack.c.bf16 %v6384_v11, %v6382_v29  ;;  %v6122_v62 = vadd.f32 %v6121_v18, %v11000_v30 }
 0x669   : > { %v6123_v28 = vpop.f32.mrf.mxu1 }
 0x66a   : > { %v6495_v15 = vpack.c.bf16 %v6385_v50, %v6383_v32  ;;  %v6124_v35 = vadd.f32 %v6123_v28, %v10997_v51  ;;  %v6386_v26 = vmax.f32 %v6122_v62, 0.0 }
 0x66b   : > { %v6125_v0 = vpop.f32.mrf.mxu1 }
 0x66c   : > { %v6126_v1 = vadd.f32 %v6125_v0, %v11000_v30  ;;  %6858 = vmatprep.mubr.bf16.mxu0 %v6495_v15  ;;  %v6387_v47 = vmax.f32 %v6124_v35, 0.0 }
 0x66d   : > { %v6127_v19 = vpop.f32.mrf.mxu1  ;;  %6859 = vmatmul.mubr.bf16.gmra.mxu0 %v6494_v33 }
 0x66e   : > { %v6128_v63 = vadd.f32 %v6127_v19, %v10997_v51  ;;  %v6388_v61 = vmax.f32 %v6126_v1, 0.0 }
 0x66f   : > { %v6131_v55 = vpop.f32.mrf.mxu1 }
 0x670   : > { %v6389_v41 = vmax.f32 %v6128_v63, 0.0  ;;  %v6496_v49 = vpack.c.bf16 %v6388_v61, %v6386_v26  ;;  %v6132_v34 = vadd.f32 %v6131_v55, %v11000_v30 }
 0x671   : > { %v6133_v16 = vpop.f32.mrf.mxu1 }
 0x672   : > { %v6497_v5 = vpack.c.bf16 %v6389_v41, %v6387_v47  ;;  %v6134_v2 = vadd.f32 %v6133_v16, %v10997_v51  ;;  %v6390_v8 = vmax.f32 %v6132_v34, 0.0 }
 0x673   : > { %v6135_v42 = vpop.f32.mrf.mxu1 }
 0x674   : > { %v6136_v36 = vadd.f32 %v6135_v42, %v11000_v30  ;;  %6868 = vmatprep.mubr.bf16.mxu0 %v6497_v5  ;;  %v6391_v13 = vmax.f32 %v6134_v2, 0.0 }
 0x675   : > { %v6137_v56 = vpop.f32.mrf.mxu1  ;;  %6869 = vmatmul.mubr.bf16.gmra.mxu0 %v6496_v49 }
 0x676   : > { %v6138_v10 = vadd.f32 %v6137_v56, %v10997_v51  ;;  %v6392_v44 = vmax.f32 %v6136_v36, 0.0 }
 0x677   : > { %v6141_v45 = vpop.f32.mrf.mxu1 }
 0x678   : > { %v6393_v12 = vmax.f32 %v6138_v10, 0.0  ;;  %v6498_v17 = vpack.c.bf16 %v6392_v44, %v6390_v8  ;;  %v6142_v52 = vadd.f32 %v6141_v45, %v11000_v30 }
 0x679   : > { %v6143_v4 = vpop.f32.mrf.mxu1 }
 0x67a   : > { %v6499_v60 = vpack.c.bf16 %v6393_v12, %v6391_v13  ;;  %v6144_v20 = vadd.f32 %v6143_v4, %v10997_v51  ;;  %v6394_v59 = vmax.f32 %v6142_v52, 0.0 }
 0x67b   : > { %v6145_v37 = vpop.f32.mrf.mxu1 }
 0x67c   : > { %v6146_v39 = vadd.f32 %v6145_v37, %v11000_v30  ;;  %6878 = vmatprep.mubr.bf16.mxu0 %v6499_v60  ;;  %v6395_v43 = vmax.f32 %v6144_v20, 0.0 }
 0x67d   : > { %v6147_v58 = vpop.f32.mrf.mxu1  ;;  %6879 = vmatmul.mubr.bf16.gmra.mxu0 %v6498_v17 }
 0x67e   : > { %v6148_v6 = vadd.f32 %v6147_v58, %v10997_v51  ;;  %v6396_v7 = vmax.f32 %v6146_v39, 0.0 }
 0x67f   : > { %v6151_v31 = vpop.f32.mrf.mxu1 }
 0x680   : > { %v6397_v9 = vmax.f32 %v6148_v6, 0.0  ;;  %v6500_v53 = vpack.c.bf16 %v6396_v7, %v6394_v59  ;;  %v6152_v22 = vadd.f32 %v6151_v31, %v11000_v30 }
 0x681   : > { %v6153_v23 = vpop.f32.mrf.mxu1 }
 0x682   : > { %v6501_v27 = vpack.c.bf16 %v6397_v9, %v6395_v43  ;;  %v6154_v25 = vadd.f32 %v6153_v23, %v10997_v51  ;;  %v6398_v11 = vmax.f32 %v6152_v22, 0.0 }
 0x683   : > { %v6155_v57 = vpop.f32.mrf.mxu1 }
 0x684   : > { %v6156_v48 = vadd.f32 %v6155_v57, %v11000_v30  ;;  %6888 = vmatprep.mubr.bf16.mxu0 %v6501_v27  ;;  %v6399_v38 = vmax.f32 %v6154_v25, 0.0 }
 0x685   : > { %v6157_v3 = vpop.f32.mrf.mxu1  ;;  %6889 = vmatmul.mubr.bf16.gmra.mxu0 %v6500_v53 }
 0x686   : > { %v6158_v46 = vadd.f32 %v6157_v3, %v10997_v51  ;;  %v6400_v14 = vmax.f32 %v6156_v48, 0.0 }
 0x687   : > { %v6161_v54 = vpop.f32.mrf.mxu1 }
 0x688   : > { %v6401_v18 = vmax.f32 %v6158_v46, 0.0  ;;  %v6502_v29 = vpack.c.bf16 %v6400_v14, %v6398_v11  ;;  %v6162_v35 = vadd.f32 %v6161_v54, %v11000_v30 }
 0x689   : > { %v6163_v32 = vpop.f32.mrf.mxu1 }
 0x68a   : > { %v6503_v50 = vpack.c.bf16 %v6401_v18, %v6399_v38  ;;  %v6164_v15 = vadd.f32 %v6163_v32, %v10997_v51  ;;  %v6402_v61 = vmax.f32 %v6162_v35, 0.0 }
 0x68b   : > { %v6165_v28 = vpop.f32.mrf.mxu1 }
 0x68c   : > { %v6166_v0 = vadd.f32 %v6165_v28, %v11000_v30  ;;  %6898 = vmatprep.mubr.bf16.mxu0 %v6503_v50  ;;  %v6403_v62 = vmax.f32 %v6164_v15, 0.0 }
 0x68d   : > { %v6167_v33 = vpop.f32.mrf.mxu1  ;;  %6899 = vmatmul.mubr.bf16.gmra.mxu0 %v6502_v29 }
 0x68e   : > { %v6168_v1 = vadd.f32 %v6167_v33, %v10997_v51  ;;  %v6404_v63 = vmax.f32 %v6166_v0, 0.0 }
 0x68f   : > { %v6171_v19 = vpop.f32.mrf.mxu1 }
 0x690   : > { %v6405_v55 = vmax.f32 %v6168_v1, 0.0  ;;  %v6504_v16 = vpack.c.bf16 %v6404_v63, %v6402_v61  ;;  %v6172_v49 = vadd.f32 %v6171_v19, %v11000_v30 }
 0x691   : > { %v6173_v47 = vpop.f32.mrf.mxu1 }
 0x692   : > { %v6505_v41 = vpack.c.bf16 %v6405_v55, %v6403_v62  ;;  %v6174_v26 = vadd.f32 %v6173_v47, %v10997_v51  ;;  %v6406_v13 = vmax.f32 %v6172_v49, 0.0 }
 0x693   : > { %v6175_v40 = vpop.f32.mrf.mxu1 }
 0x694   : > { %v6176_v5 = vadd.f32 %v6175_v40, %v11000_v30  ;;  %6908 = vmatprep.mubr.bf16.mxu0 %v6505_v41  ;;  %v6407_v56 = vmax.f32 %v6174_v26, 0.0 }
 0x695   : > { %v6177_v42 = vpop.f32.mrf.mxu1  ;;  %6909 = vmatmul.mubr.bf16.gmra.mxu0 %v6504_v16 }
 0x696   : > { %v6178_v2 = vadd.f32 %v6177_v42, %v10997_v51  ;;  %v6408_v34 = vmax.f32 %v6176_v5, 0.0 }
 0x697   : > { %v6181_v36 = vpop.f32.mrf.mxu1 }
 0x698   : > { %v6409_v10 = vmax.f32 %v6178_v2, 0.0  ;;  %v6506_v4 = vpack.c.bf16 %v6408_v34, %v6406_v13  ;;  %v6182_v17 = vadd.f32 %v6181_v36, %v11000_v30 }
 0x699   : > { %v6183_v45 = vpop.f32.mrf.mxu1 }
 0x69a   : > { %v6507_v44 = vpack.c.bf16 %v6409_v10, %v6407_v56  ;;  %v6184_v8 = vadd.f32 %v6183_v45, %v10997_v51  ;;  %v6410_v43 = vmax.f32 %v6182_v17, 0.0 }
 0x69b   : > { %v6185_v12 = vpop.f32.mrf.mxu1 }
 0x69c   : > { %v6186_v60 = vadd.f32 %v6185_v12, %v11000_v30  ;;  %6918 = vmatprep.mubr.bf16.mxu0 %v6507_v44  ;;  %v6411_v58 = vmax.f32 %v6184_v8, 0.0 }
 0x69d   : > { %v6187_v37 = vpop.f32.mrf.mxu1  ;;  %6919 = vmatmul.mubr.bf16.gmra.mxu0 %v6506_v4 }
 0x69e   : > { %v6188_v20 = vadd.f32 %v6187_v37, %v10997_v51  ;;  %v6412_v52 = vmax.f32 %v6186_v60, 0.0 }
 0x69f   : > { %v6191_v39 = vpop.f32.mrf.mxu1 }
 0x6a0   : > { %v6413_v6 = vmax.f32 %v6188_v20, 0.0  ;;  %v6508_v23 = vpack.c.bf16 %v6412_v52, %v6410_v43  ;;  %v6192_v53 = vadd.f32 %v6191_v39, %v11000_v30 }
 0x6a1   : > { %v6193_v31 = vpop.f32.mrf.mxu1 }
 0x6a2   : > { %v6509_v7 = vpack.c.bf16 %v6413_v6, %v6411_v58  ;;  %v6194_v59 = vadd.f32 %v6193_v31, %v10997_v51  ;;  %v6414_v38 = vmax.f32 %v6192_v53, 0.0 }
 0x6a3   : > { %v6195_v9 = vpop.f32.mrf.mxu1 }
 0x6a4   : > { %v6196_v27 = vadd.f32 %v6195_v9, %v11000_v30  ;;  %6928 = vmatprep.mubr.bf16.mxu0 %v6509_v7  ;;  %v6415_v3 = vmax.f32 %v6194_v59, 0.0 }
 0x6a5   : > { %v6197_v57 = vpop.f32.mrf.mxu1  ;;  %6929 = vmatmul.mubr.bf16.gmra.mxu0 %v6508_v23 }
 0x6a6   : > { %v6198_v25 = vadd.f32 %v6197_v57, %v10997_v51  ;;  %v6416_v22 = vmax.f32 %v6196_v27, 0.0 }
 0x6a7   : > { %v6201_v48 = vpop.f32.mrf.mxu1 }
 0x6a8   : > { %v6417_v46 = vmax.f32 %v6198_v25, 0.0  ;;  %v6510_v32 = vpack.c.bf16 %v6416_v22, %v6414_v38  ;;  %v6202_v29 = vadd.f32 %v6201_v48, %v11000_v30 }
 0x6a9   : > { %v6203_v54 = vpop.f32.mrf.mxu1 }
 0x6aa   : > { %v6511_v14 = vpack.c.bf16 %v6417_v46, %v6415_v3  ;;  %v6204_v11 = vadd.f32 %v6203_v54, %v10997_v51  ;;  %v6418_v62 = vmax.f32 %v6202_v29, 0.0 }
 0x6ab   : > { %v6205_v18 = vpop.f32.mrf.mxu1 }
 0x6ac   : > { %v6206_v50 = vadd.f32 %v6205_v18, %v11000_v30  ;;  %6938 = vmatprep.mubr.bf16.mxu0 %v6511_v14  ;;  %v6419_v33 = vmax.f32 %v6204_v11, 0.0 }
 0x6ad   : > { %v6207_v28 = vpop.f32.mrf.mxu1  ;;  %6939 = vmatmul.mubr.bf16.gmra.mxu0 %v6510_v32 }
 0x6ae   : > { %v6208_v15 = vadd.f32 %v6207_v28, %v10997_v51  ;;  %v6420_v35 = vmax.f32 %v6206_v50, 0.0 }
 0x6af   : > { %v6211_v0 = vpop.f32.mrf.mxu1 }
 0x6b0   : > { %v6421_v1 = vmax.f32 %v6208_v15, 0.0  ;;  %v6512_v47 = vpack.c.bf16 %v6420_v35, %v6418_v62  ;;  %v6212_v16 = vadd.f32 %v6211_v0, %v11000_v30 }
 0x6b1   : > { %v6213_v19 = vpop.f32.mrf.mxu1 }
 0x6b2   : > { %v6513_v63 = vpack.c.bf16 %v6421_v1, %v6419_v33  ;;  %v6214_v61 = vadd.f32 %v6213_v19, %v10997_v51  ;;  %v6422_v56 = vmax.f32 %v6212_v16, 0.0 }
 0x6b3   : > { %v6215_v55 = vpop.f32.mrf.mxu1 }
 0x6b4   : > { %v6216_v41 = vadd.f32 %v6215_v55, %v11000_v30  ;;  %6948 = vmatprep.mubr.bf16.mxu0 %v6513_v63  ;;  %v6423_v42 = vmax.f32 %v6214_v61, 0.0 }
 0x6b5   : > { %v6217_v40 = vpop.f32.mrf.mxu1  ;;  %6949 = vmatmul.mubr.bf16.gmra.mxu0 %v6512_v47 }
 0x6b6   : > { %v6218_v26 = vadd.f32 %v6217_v40, %v10997_v51  ;;  %v6424_v49 = vmax.f32 %v6216_v41, 0.0 }
 0x6b7   : > { %v6221_v5 = vpop.f32.mrf.mxu1 }
 0x6b8   : > { %v6425_v2 = vmax.f32 %v6218_v26, 0.0  ;;  %v6514_v45 = vpack.c.bf16 %v6424_v49, %v6422_v56  ;;  %v6222_v4 = vadd.f32 %v6221_v5, %v11000_v30 }
 0x6b9   : > { %v6223_v36 = vpop.f32.mrf.mxu1 }
 0x6ba   : > { %v6515_v34 = vpack.c.bf16 %v6425_v2, %v6423_v42  ;;  %v6224_v13 = vadd.f32 %v6223_v36, %v10997_v51  ;;  %v6426_v58 = vmax.f32 %v6222_v4, 0.0 }
 0x6bb   : > { %v6225_v10 = vpop.f32.mrf.mxu1 }
 0x6bc   : > { %v6226_v44 = vadd.f32 %v6225_v10, %v11000_v30  ;;  %6958 = vmatprep.mubr.bf16.mxu0 %v6515_v34  ;;  %v6427_v37 = vmax.f32 %v6224_v13, 0.0 }
 0x6bd   : > { %v6227_v12 = vpop.f32.mrf.mxu1  ;;  %6959 = vmatmul.mubr.bf16.gmra.mxu0 %v6514_v45 }
 0x6be   : > { %v6228_v8 = vadd.f32 %v6227_v12, %v10997_v51  ;;  %v6428_v17 = vmax.f32 %v6226_v44, 0.0 }
 0x6bf   : > { %v6231_v60 = vpop.f32.mrf.mxu1 }
 0x6c0   : > { %v6429_v20 = vmax.f32 %v6228_v8, 0.0  ;;  %v6516_v31 = vpack.c.bf16 %v6428_v17, %v6426_v58  ;;  %v6232_v23 = vadd.f32 %v6231_v60, %v11000_v30 }
 0x6c1   : > { %v6233_v39 = vpop.f32.mrf.mxu1 }
 0x6c2   : > { %v6517_v52 = vpack.c.bf16 %v6429_v20, %v6427_v37  ;;  %v6234_v43 = vadd.f32 %v6233_v39, %v10997_v51  ;;  %v6430_v3 = vmax.f32 %v6232_v23, 0.0 }
 0x6c3   : > { %v6235_v6 = vpop.f32.mrf.mxu1 }
 0x6c4   : > { %v6236_v7 = vadd.f32 %v6235_v6, %v11000_v30  ;;  %6968 = vmatprep.mubr.bf16.mxu0 %v6517_v52  ;;  %v6431_v57 = vmax.f32 %v6234_v43, 0.0 }
 0x6c5   : > { %v6237_v9 = vpop.f32.mrf.mxu1  ;;  %6969 = vmatmul.mubr.bf16.gmra.mxu0 %v6516_v31 }
 0x6c6   : > { %v6238_v59 = vadd.f32 %v6237_v9, %v10997_v51  ;;  %v6432_v53 = vmax.f32 %v6236_v7, 0.0 }
 0x6c7   : > { %v6241_v27 = vpop.f32.mrf.mxu1 }
 0x6c8   : > { %v6433_v25 = vmax.f32 %v6238_v59, 0.0  ;;  %v6518_v54 = vpack.c.bf16 %v6432_v53, %v6430_v3  ;;  %v6242_v32 = vadd.f32 %v6241_v27, %v11000_v30 }
 0x6c9   : > { %v6243_v48 = vpop.f32.mrf.mxu1 }
 0x6ca   : > { %v6519_v22 = vpack.c.bf16 %v6433_v25, %v6431_v57  ;;  %v6244_v38 = vadd.f32 %v6243_v48, %v10997_v51  ;;  %v6434_v33 = vmax.f32 %v6242_v32, 0.0 }
 0x6cb   : > { %v6245_v46 = vpop.f32.mrf.mxu1 }
 0x6cc   : > { %v6246_v14 = vadd.f32 %v6245_v46, %v11000_v30  ;;  %6978 = vmatprep.mubr.bf16.mxu0 %v6519_v22  ;;  %v6435_v28 = vmax.f32 %v6244_v38, 0.0 }
 0x6cd   : > { %v6247_v18 = vpop.f32.mrf.mxu1  ;;  %6979 = vmatmul.mubr.bf16.gmra.mxu0 %v6518_v54 }
 0x6ce   : > { %v6248_v11 = vadd.f32 %v6247_v18, %v10997_v51  ;;  %v6436_v29 = vmax.f32 %v6246_v14, 0.0  ;;  %v6574_v14 = vld [vmem:[%s11479_s17] sm:$0x3] }
 0x6cf   : > { %v6251_v50 = vpop.f32.mrf.mxu1 }
 0x6d0   : > { %v6437_v15 = vmax.f32 %v6248_v11, 0.0  ;;  %v6520_v19 = vpack.c.bf16 %v6436_v29, %v6434_v33  ;;  %v6252_v47 = vadd.f32 %v6251_v50, %v11000_v30  ;;  %v11163_v29 = vrot.slane %v6574_v14, %v9180_v21 }
 0x6d1   : > { %v6253_v0 = vpop.f32.mrf.mxu1 }
 0x6d2   : > { %v6521_v35 = vpack.c.bf16 %v6437_v15, %v6435_v28  ;;  %v6254_v62 = vadd.f32 %v6253_v0, %v10997_v51  ;;  %v6438_v42 = vmax.f32 %v6252_v47, 0.0  ;;  %v11166_v0 = vrot.slane %v6574_v14, %v9188_v24 }
 0x6d3   : > { %v6255_v1 = vpop.f32.mrf.mxu1 }
 0x6d4   : > { %v6256_v63 = vadd.f32 %v6255_v1, %v11000_v30  ;;  %6988 = vmatprep.mubr.bf16.mxu0 %v6521_v35  ;;  %v6439_v40 = vmax.f32 %v6254_v62, 0.0 }
 0x6d5   : > { %v6257_v55 = vpop.f32.mrf.mxu1  ;;  %6989 = vmatmul.mubr.bf16.gmra.mxu0 %v6520_v19 }
 0x6d6   : > { %v6258_v61 = vadd.f32 %v6257_v55, %v10997_v51  ;;  %v6440_v16 = vmax.f32 %v6256_v63, 0.0 }
 0x6d7   : > { %v6261_v41 = vpop.f32.mrf.mxu1 }
 0x6d8   : > { %v6441_v26 = vmax.f32 %v6258_v61, 0.0  ;;  %v6522_v36 = vpack.c.bf16 %v6440_v16, %v6438_v42  ;;  %v6262_v45 = vadd.f32 %v6261_v41, %v11000_v30 }
 0x6d9   : > { %v6263_v5 = vpop.f32.mrf.mxu1 }
 0x6da   : > { %v6523_v49 = vpack.c.bf16 %v6441_v26, %v6439_v40  ;;  %v6264_v56 = vadd.f32 %v6263_v5, %v10997_v51  ;;  %v6442_v37 = vmax.f32 %v6262_v45, 0.0 }
 0x6db   : > { %v6265_v2 = vpop.f32.mrf.mxu1 }
 0x6dc   : > { %v6266_v34 = vadd.f32 %v6265_v2, %v11000_v30  ;;  %6998 = vmatprep.mubr.bf16.mxu0 %v6523_v49  ;;  %v6443_v12 = vmax.f32 %v6264_v56, 0.0 }
 0x6dd   : > { %v6267_v10 = vpop.f32.mrf.mxu1  ;;  %6999 = vmatmul.mubr.bf16.gmra.mxu0 %v6522_v36 }
 0x6de   : > { %v6268_v13 = vadd.f32 %v6267_v10, %v10997_v51  ;;  %v6444_v4 = vmax.f32 %v6266_v34, 0.0 }
 0x6df   : > { %v6271_v44 = vpop.f32.mrf.mxu1 }
 0x6e0   : > { %v6445_v8 = vmax.f32 %v6268_v13, 0.0  ;;  %v6524_v39 = vpack.c.bf16 %v6444_v4, %v6442_v37  ;;  %v6272_v31 = vadd.f32 %v6271_v44, %v11000_v30 }
 0x6e1   : > { %v6273_v60 = vpop.f32.mrf.mxu1 }
 0x6e2   : > { %v6525_v17 = vpack.c.bf16 %v6445_v8, %v6443_v12  ;;  %v6274_v58 = vadd.f32 %v6273_v60, %v10997_v51  ;;  %v6446_v57 = vmax.f32 %v6272_v31, 0.0 }
 0x6e3   : > { %v6275_v20 = vpop.f32.mrf.mxu1 }
 0x6e4   : > { %v6276_v52 = vadd.f32 %v6275_v20, %v11000_v30  ;;  %7008 = vmatprep.mubr.bf16.mxu0 %v6525_v17  ;;  %v6447_v9 = vmax.f32 %v6274_v58, 0.0 }
 0x6e5   : > { %v6277_v6 = vpop.f32.mrf.mxu1  ;;  %7009 = vmatmul.mubr.bf16.gmra.mxu0 %v6524_v39 }
 0x6e6   : > { %v6278_v43 = vadd.f32 %v6277_v6, %v10997_v51  ;;  %v6448_v23 = vmax.f32 %v6276_v52, 0.0 }
 0x6e7   : > { %v6281_v7 = vpop.f32.mrf.mxu1 }
 0x6e8   : > { %v6449_v59 = vmax.f32 %v6278_v43, 0.0  ;;  %v6526_v48 = vpack.c.bf16 %v6448_v23, %v6446_v57  ;;  %v6282_v54 = vadd.f32 %v6281_v7, %v11000_v30 }
 0x6e9   : > { %v6283_v27 = vpop.f32.mrf.mxu1 }
 0x6ea   : > { %v6527_v53 = vpack.c.bf16 %v6449_v59, %v6447_v9  ;;  %v6284_v3 = vadd.f32 %v6283_v27, %v10997_v51  ;;  %v6450_v33 = vmax.f32 %v6282_v54, 0.0 }
 0x6eb   : > { %v6285_v25 = vpop.f32.mrf.mxu1 }
 0x6ec   : > { %v6286_v22 = vadd.f32 %v6285_v25, %v11000_v30  ;;  %7018 = vmatprep.mubr.bf16.mxu0 %v6527_v53  ;;  %v6451_v32 = vmax.f32 %v6284_v3, 0.0 }
 0x6ed   : > { %v6287_v46 = vpop.f32.mrf.mxu1  ;;  %v6780_v18 = vpop.f32.mrf.mxu0  ;;  %7019 = vmatmul.mubr.bf16.gmra.mxu0 %v6526_v48 }
 0x6ee   : > { %v6288_v38 = vadd.f32 %v6287_v46, %v10997_v51  ;;  %v6452_v11 = vmax.f32 %v6286_v22, 0.0  ;;  %v6781_v41 = vadd.f32 %v6780_v18, %v11166_v0 }
 0x6ef   : > { %v6291_v28 = vpop.f32.mrf.mxu1  ;;  %v6782_v15 = vpop.f32.mrf.mxu0 }
 0x6f0   : > { %v6453_v50 = vmax.f32 %v6288_v38, 0.0  ;;  %v6528_v63 = vpack.c.bf16 %v6452_v11, %v6450_v33  ;;  %v6783_v55 = vadd.f32 %v6782_v15, %v11163_v29  ;;  %v6292_v5 = vadd.f32 %v6291_v28, %v11000_v30 }
 0x6f1   : > { %v6293_v35 = vpop.f32.mrf.mxu1  ;;  %v6784_v1 = vpop.f32.mrf.mxu0  ;;  %v7099_v10 = vmax.f32 %v6781_v41, 0.0 }
 0x6f2   : > { %v6529_v19 = vpack.c.bf16 %v6453_v50, %v6451_v32  ;;  %v6785_v62 = vadd.f32 %v6784_v1, %v11166_v0  ;;  %v6294_v24 = vadd.f32 %v6293_v35, %v10997_v51  ;;  %v7100_v36 = vmax.f32 %v6783_v55, 0.0 }
 0x6f3   : > { %v6295_v47 = vpop.f32.mrf.mxu1  ;;  %v6786_v61 = vpop.f32.mrf.mxu0  ;;  %v6454_v60 = vmax.f32 %v6292_v5, 0.0 }
 0x6f4   : > { %7028 = vmatprep.mubr.bf16.mxu0 %v6529_v19  ;;  %v6296_v21 = vadd.f32 %v6295_v47, %v11000_v30  ;;  %v6787_v40 = vadd.f32 %v6786_v61, %v11163_v29  ;;  %v7101_v42 = vmax.f32 %v6785_v62, 0.0  ;;  %v6455_v44 = vmax.f32 %v6294_v24, 0.0 }
 0x6f5   : > { %v6297_v16 = vpop.f32.mrf.mxu1  ;;  %v6790_v26 = vpop.f32.mrf.mxu0  ;;  %7029 = vmatmul.mubr.bf16.gmra.mxu0 %v6528_v63 }
 0x6f6   : > { %v7102_v49 = vmax.f32 %v6787_v40, 0.0  ;;  %v6298_v2 = vadd.f32 %v6297_v16, %v10997_v51  ;;  %v6456_v45 = vmax.f32 %v6296_v21, 0.0  ;;  %v7227_v37 = vpack.c.bf16 %v7101_v42, %v7099_v10 }
 0x6f7   : > { %v6301_v56 = vpop.f32.mrf.mxu1  ;;  %v6792_v34 = vpop.f32.mrf.mxu0  ;;  %v6791_v31 = vadd.f32 %v6790_v26, %v11166_v0 }
 0x6f8   : > { %v6457_v13 = vmax.f32 %v6298_v2, 0.0  ;;  %v7228_v8 = vpack.c.bf16 %v7102_v49, %v7100_v36  ;;  %v6793_v20 = vadd.f32 %v6792_v34, %v11163_v29  ;;  %v6530_v6 = vpack.c.bf16 %v6456_v45, %v6454_v60 }
 0x6f9   : > { %v6303_v12 = vpop.f32.mrf.mxu1  ;;  %v6794_v4 = vpop.f32.mrf.mxu0  ;;  %v6302_v27 = vadd.f32 %v6301_v56, %v11000_v30  ;;  %v7103_v46 = vmax.f32 %v6791_v31, 0.0 }
 0x6fa   : > { %v6795_v17 = vadd.f32 %v6794_v4, %v11166_v0  ;;  %7458 = vmatprep.mubr.bf16.mxu1 %v7228_v8  ;;  %v6531_v52 = vpack.c.bf16 %v6457_v13, %v6455_v44  ;;  %v6304_v9 = vadd.f32 %v6303_v12, %v10997_v51  ;;  %v7104_v48 = vmax.f32 %v6793_v20, 0.0 }
 0x6fb   : > { %v6305_v39 = vpop.f32.mrf.mxu1  ;;  %v6796_v58 = vpop.f32.mrf.mxu0  ;;  %7459 = vmatmul.mubr.bf16.vlgmr.msra.gmra.mxu1 %v7227_v37  ;;  %v6458_v50 = vmax.f32 %v6302_v27, 0.0 }
 0x6fc   : > { %v6306_v43 = vadd.f32 %v6305_v39, %v11000_v30  ;;  %v6797_v7 = vadd.f32 %v6796_v58, %v11163_v29  ;;  %7038 = vmatprep.mubr.bf16.mxu0 %v6531_v52  ;;  %v7105_v57 = vmax.f32 %v6795_v17, 0.0  ;;  %v6459_v14 = vmax.f32 %v6304_v9, 0.0 }
 0x6fd   : > { %v6307_v23 = vpop.f32.mrf.mxu1  ;;  %v6800_v59 = vpop.f32.mrf.mxu0  ;;  %7039 = vmatmul.mubr.bf16.gmra.mxu0 %v6530_v6 }
 0x6fe   : > { %v7106_v53 = vmax.f32 %v6797_v7, 0.0  ;;  %v6308_v25 = vadd.f32 %v6307_v23, %v10997_v51  ;;  %v6460_v54 = vmax.f32 %v6306_v43, 0.0  ;;  %v7229_v28 = vpack.c.bf16 %v7105_v57, %v7103_v46 }
 0x6ff   : > { %v6311_v3 = vpop.f32.mrf.mxu1  ;;  %v6802_v22 = vpop.f32.mrf.mxu0  ;;  %v6801_v63 = vadd.f32 %v6800_v59, %v11166_v0 }
 0x700   : > { %v6461_v38 = vmax.f32 %v6308_v25, 0.0  ;;  %v7230_v11 = vpack.c.bf16 %v7106_v53, %v7104_v48  ;;  %v6803_v33 = vadd.f32 %v6802_v22, %v11163_v29  ;;  %v6532_v62 = vpack.c.bf16 %v6460_v54, %v6458_v50 }
 0x701   : > { %v6313_v18 = vpop.f32.mrf.mxu1  ;;  %v6804_v32 = vpop.f32.mrf.mxu0  ;;  %v6312_v40 = vadd.f32 %v6311_v3, %v11000_v30  ;;  %v7107_v2 = vmax.f32 %v6801_v63, 0.0 }
 0x702   : > { %v6805_v15 = vadd.f32 %v6804_v32, %v11166_v0  ;;  %7466 = vmatprep.mubr.bf16.mxu1 %v7230_v11  ;;  %v6533_v19 = vpack.c.bf16 %v6461_v38, %v6459_v14  ;;  %v6314_v61 = vadd.f32 %v6313_v18, %v10997_v51  ;;  %v7108_v5 = vmax.f32 %v6803_v33, 0.0 }
 0x703   : > { %v6315_v35 = vpop.f32.mrf.mxu1  ;;  %v6806_v1 = vpop.f32.mrf.mxu0  ;;  %7467 = vmatmul.mubr.bf16.gmra.mxu1 %v7229_v28  ;;  %v6462_v44 = vmax.f32 %v6312_v40, 0.0 }
 0x704   : > { %v6316_v55 = vadd.f32 %v6315_v35, %v11000_v30  ;;  %v6807_v47 = vadd.f32 %v6806_v1, %v11163_v29  ;;  %7048 = vmatprep.mubr.bf16.mxu0 %v6533_v19  ;;  %v7109_v24 = vmax.f32 %v6805_v15, 0.0  ;;  %v6463_v34 = vmax.f32 %v6314_v61, 0.0 }
 0x705   : > { %v6317_v41 = vpop.f32.mrf.mxu1  ;;  %v6810_v21 = vpop.f32.mrf.mxu0  ;;  %7049 = vmatmul.mubr.bf16.gmra.mxu0 %v6532_v62 }
 0x706   : > { %v7110_v16 = vmax.f32 %v6807_v47, 0.0  ;;  %v6318_v26 = vadd.f32 %v6317_v41, %v10997_v51  ;;  %v6464_v36 = vmax.f32 %v6316_v55, 0.0  ;;  %v7231_v12 = vpack.c.bf16 %v7109_v24, %v7107_v2 }
 0x707   : > { %v6321_v42 = vpop.f32.mrf.mxu1  ;;  %v6812_v49 = vpop.f32.mrf.mxu0  ;;  %v6811_v39 = vadd.f32 %v6810_v21, %v11166_v0 }
 0x708   : > { %v6465_v56 = vmax.f32 %v6318_v26, 0.0  ;;  %v7232_v13 = vpack.c.bf16 %v7110_v16, %v7108_v5  ;;  %v6813_v8 = vadd.f32 %v6812_v49, %v11163_v29  ;;  %v6534_v20 = vpack.c.bf16 %v6464_v36, %v6462_v44 }
 0x709   : > { %v6323_v10 = vpop.f32.mrf.mxu1  ;;  %v6814_v45 = vpop.f32.mrf.mxu0  ;;  %v6322_v7 = vadd.f32 %v6321_v42, %v11000_v30  ;;  %v7111_v25 = vmax.f32 %v6811_v39, 0.0 }
 0x70a   : > { %v6815_v4 = vadd.f32 %v6814_v45, %v11166_v0  ;;  %7474 = vmatprep.mubr.bf16.mxu1 %v7232_v13  ;;  %v6535_v17 = vpack.c.bf16 %v6465_v56, %v6463_v34  ;;  %v6324_v6 = vadd.f32 %v6323_v10, %v10997_v51  ;;  %v7112_v27 = vmax.f32 %v6813_v8, 0.0 }
 0x70b   : > { %v6325_v60 = vpop.f32.mrf.mxu1  ;;  %v6816_v37 = vpop.f32.mrf.mxu0  ;;  %7475 = vmatmul.mubr.bf16.gmra.mxu1 %v7231_v12  ;;  %v6466_v14 = vmax.f32 %v6322_v7, 0.0 }
 0x70c   : > { %v6326_v58 = vadd.f32 %v6325_v60, %v11000_v30  ;;  %v6817_v52 = vadd.f32 %v6816_v37, %v11163_v29  ;;  %7058 = vmatprep.mubr.bf16.mxu0 %v6535_v17  ;;  %v7113_v9 = vmax.f32 %v6815_v4, 0.0  ;;  %v6467_v22 = vmax.f32 %v6324_v6, 0.0 }
 0x70d   : > { %v6327_v31 = vpop.f32.mrf.mxu1  ;;  %v6820_v43 = vpop.f32.mrf.mxu0  ;;  %7059 = vmatmul.mubr.bf16.gmra.mxu0 %v6534_v20 }
 0x70e   : > { %v7114_v23 = vmax.f32 %v6817_v52, 0.0  ;;  %v6328_v59 = vadd.f32 %v6327_v31, %v10997_v51  ;;  %v6468_v48 = vmax.f32 %v6326_v58, 0.0  ;;  %v7233_v18 = vpack.c.bf16 %v7113_v9, %v7111_v25 }
 0x70f   : > { %v6331_v57 = vpop.f32.mrf.mxu1  ;;  %v6822_v53 = vpop.f32.mrf.mxu0  ;;  %v6821_v50 = vadd.f32 %v6820_v43, %v11166_v0 }
 0x710   : > { %v6469_v3 = vmax.f32 %v6328_v59, 0.0  ;;  %v7234_v38 = vpack.c.bf16 %v7114_v23, %v7112_v27  ;;  %v6823_v32 = vadd.f32 %v6822_v53, %v11163_v29  ;;  %v6536_v35 = vpack.c.bf16 %v6468_v48, %v6466_v14 }
 0x711   : > { %v6333_v46 = vpop.f32.mrf.mxu1  ;;  %v6824_v54 = vpop.f32.mrf.mxu0  ;;  %v6332_v63 = vadd.f32 %v6331_v57, %v11000_v30  ;;  %v7115_v5 = vmax.f32 %v6821_v50, 0.0 }
 0x712   : > { %v6825_v11 = vadd.f32 %v6824_v54, %v11166_v0  ;;  %7482 = vmatprep.mubr.bf16.mxu1 %v7234_v38  ;;  %v6537_v33 = vpack.c.bf16 %v6469_v3, %v6467_v22  ;;  %v6334_v1 = vadd.f32 %v6333_v46, %v10997_v51  ;;  %v7116_v61 = vmax.f32 %v6823_v32, 0.0 }
 0x713   : > { %v6335_v28 = vpop.f32.mrf.mxu1  ;;  %v6826_v15 = vpop.f32.mrf.mxu0  ;;  %7483 = vmatmul.mubr.bf16.gmra.mxu1 %v7233_v18  ;;  %v6470_v36 = vmax.f32 %v6332_v63, 0.0 }
 0x714   : > { %v6336_v19 = vadd.f32 %v6335_v28, %v11000_v30  ;;  %v6827_v62 = vadd.f32 %v6826_v15, %v11163_v29  ;;  %7068 = vmatprep.mubr.bf16.mxu0 %v6537_v33  ;;  %v7117_v41 = vmax.f32 %v6825_v11, 0.0  ;;  %v6471_v42 = vmax.f32 %v6334_v1, 0.0 }
 0x715   : > { %v6337_v55 = vpop.f32.mrf.mxu1  ;;  %v6830_v47 = vpop.f32.mrf.mxu0  ;;  %7069 = vmatmul.mubr.bf16.gmra.mxu0 %v6536_v35 }
 0x716   : > { %v7118_v21 = vmax.f32 %v6827_v62, 0.0  ;;  %v6338_v40 = vadd.f32 %v6337_v55, %v10997_v51  ;;  %v6472_v24 = vmax.f32 %v6336_v19, 0.0  ;;  %v7235_v10 = vpack.c.bf16 %v7117_v41, %v7115_v5 }
 0x717   : > { %v6341_v16 = vpop.f32.mrf.mxu1  ;;  %v6832_v26 = vpop.f32.mrf.mxu0  ;;  %v6831_v4 = vadd.f32 %v6830_v47, %v11166_v0 }
 0x718   : > { %v7236_v49 = vpack.c.bf16 %v7118_v21, %v7116_v61  ;;  %v6473_v2 = vmax.f32 %v6338_v40, 0.0  ;;  %v6833_v45 = vadd.f32 %v6832_v26, %v11163_v29  ;;  %v6538_v12 = vpack.c.bf16 %v6472_v24, %v6470_v36 }
 0x719   : > { %v6343_v56 = vpop.f32.mrf.mxu1  ;;  %v6834_v34 = vpop.f32.mrf.mxu0  ;;  %v6342_v39 = vadd.f32 %v6341_v16, %v11000_v30  ;;  %v7119_v9 = vmax.f32 %v6831_v4, 0.0 }
 0x71a   : > { %v6835_v13 = vadd.f32 %v6834_v34, %v11166_v0  ;;  %7490 = vmatprep.mubr.bf16.mxu1 %v7236_v49  ;;  %v6539_v44 = vpack.c.bf16 %v6473_v2, %v6471_v42  ;;  %v6344_v37 = vadd.f32 %v6343_v56, %v10997_v51  ;;  %v7120_v6 = vmax.f32 %v6833_v45, 0.0 }
 0x71b   : > { %v6345_v8 = vpop.f32.mrf.mxu1  ;;  %v6836_v60 = vpop.f32.mrf.mxu0  ;;  %7491 = vmatmul.mubr.bf16.gmra.mxu1 %v7235_v10  ;;  %v6474_v25 = vmax.f32 %v6342_v39, 0.0 }
 0x71c   : > { %v6346_v17 = vadd.f32 %v6345_v8, %v11000_v30  ;;  %v6837_v20 = vadd.f32 %v6836_v60, %v11163_v29  ;;  %7078 = vmatprep.mubr.bf16.mxu0 %v6539_v44  ;;  %v7121_v31 = vmax.f32 %v6835_v13, 0.0  ;;  %v6475_v59 = vmax.f32 %v6344_v37, 0.0 }
 0x71d   : > { %v6347_v58 = vpop.f32.mrf.mxu1  ;;  %v6840_v52 = vpop.f32.mrf.mxu0  ;;  %7079 = vmatmul.mubr.bf16.gmra.mxu0 %v6538_v12 }
 0x71e   : > { %v7122_v43 = vmax.f32 %v6837_v20, 0.0  ;;  %v6348_v7 = vadd.f32 %v6347_v58, %v10997_v51  ;;  %v6476_v27 = vmax.f32 %v6346_v17, 0.0  ;;  %v7237_v3 = vpack.c.bf16 %v7121_v31, %v7119_v9 }
 0x71f   : > { %v6842_v23 = vpop.f32.mrf.mxu0  ;;  %v6841_v51 = vadd.f32 %v6840_v52, %v11166_v0 }
 0x720   : > { %v7238_v57 = vpack.c.bf16 %v7122_v43, %v7120_v6  ;;  %v6477_v53 = vmax.f32 %v6348_v7, 0.0  ;;  %v6843_v22 = vadd.f32 %v6842_v23, %v11163_v29  ;;  %v6540_v38 = vpack.c.bf16 %v6476_v27, %v6474_v25 }
 0x721   : > { %v6844_v48 = vpop.f32.mrf.mxu0  ;;  %v7123_v15 = vmax.f32 %v6841_v51, 0.0 }
 0x722   : > { %v6845_v30 = vadd.f32 %v6844_v48, %v11166_v0  ;;  %7498 = vmatprep.mubr.bf16.mxu1 %v7238_v57  ;;  %v6541_v46 = vpack.c.bf16 %v6477_v53, %v6475_v59  ;;  %v7124_v32 = vmax.f32 %v6843_v22, 0.0 }
 0x723   : > { %v6846_v54 = vpop.f32.mrf.mxu0  ;;  %7499 = vmatmul.mubr.bf16.gmra.mxu1 %v7237_v3 }
 0x724   : > { %v6847_v14 = vadd.f32 %v6846_v54, %v11163_v29  ;;  %7088 = vmatprep.mubr.bf16.mxu0 %v6541_v46  ;;  %v7125_v11 = vmax.f32 %v6845_v30, 0.0 }
 0x725   : > { %v6850_v18 = vpop.f32.mrf.mxu0  ;;  %7089 = vmatmul.mubr.bf16.gmra.mxu0 %v6540_v38 }
 0x726   : > { %v7126_v50 = vmax.f32 %v6847_v14, 0.0  ;;  %v7239_v1 = vpack.c.bf16 %v7125_v11, %v7123_v15  ;;  %v6851_v55 = vadd.f32 %v6850_v18, %v11166_v0 }
 0x727   : > { %v6852_v28 = vpop.f32.mrf.mxu0 }
 0x728   : > { %v7240_v33 = vpack.c.bf16 %v7126_v50, %v7124_v32  ;;  %v6853_v19 = vadd.f32 %v6852_v28, %v11163_v29  ;;  %v7127_v16 = vmax.f32 %v6851_v55, 0.0 }
 0x729   : > { %v6854_v35 = vpop.f32.mrf.mxu0 }
 0x72a   : > { %v6855_v62 = vadd.f32 %v6854_v35, %v11166_v0  ;;  %7506 = vmatprep.mubr.bf16.mxu1 %v7240_v33  ;;  %v7128_v41 = vmax.f32 %v6853_v19, 0.0 }
 0x72b   : > { %v6856_v63 = vpop.f32.mrf.mxu0  ;;  %7507 = vmatmul.mubr.bf16.gmra.mxu1 %v7239_v1 }
 0x72c   : > { %v6857_v47 = vadd.f32 %v6856_v63, %v11163_v29  ;;  %v7129_v21 = vmax.f32 %v6855_v62, 0.0 }
 0x72d   : > { %v6860_v61 = vpop.f32.mrf.mxu0 }
 0x72e   : > { %v7130_v40 = vmax.f32 %v6857_v47, 0.0  ;;  %v7241_v42 = vpack.c.bf16 %v7129_v21, %v7127_v16  ;;  %v6861_v56 = vadd.f32 %v6860_v61, %v11166_v0 }
 0x72f   : > { %v6862_v24 = vpop.f32.mrf.mxu0 }
 0x730   : > { %v7242_v26 = vpack.c.bf16 %v7130_v40, %v7128_v41  ;;  %v6863_v49 = vadd.f32 %v6862_v24, %v11163_v29  ;;  %v7131_v4 = vmax.f32 %v6861_v56, 0.0 }
 0x731   : > { %v6864_v5 = vpop.f32.mrf.mxu0 }
 0x732   : > { %v6865_v2 = vadd.f32 %v6864_v5, %v11166_v0  ;;  %7514 = vmatprep.mubr.bf16.mxu1 %v7242_v26  ;;  %v7132_v45 = vmax.f32 %v6863_v49, 0.0 }
 0x733   : > { %v6866_v36 = vpop.f32.mrf.mxu0  ;;  %7515 = vmatmul.mubr.bf16.gmra.mxu1 %v7241_v42 }
 0x734   : > { %v6867_v34 = vadd.f32 %v6866_v36, %v11163_v29  ;;  %v7133_v13 = vmax.f32 %v6865_v2, 0.0 }
 0x735   : > { %v6870_v10 = vpop.f32.mrf.mxu0 }
 0x736   : > { %v7134_v44 = vmax.f32 %v6867_v34, 0.0  ;;  %v7243_v37 = vpack.c.bf16 %v7133_v13, %v7131_v4  ;;  %v6871_v58 = vadd.f32 %v6870_v10, %v11166_v0 }
 0x737   : > { %v6872_v12 = vpop.f32.mrf.mxu0 }
 0x738   : > { %v7244_v8 = vpack.c.bf16 %v7134_v44, %v7132_v45  ;;  %v6873_v17 = vadd.f32 %v6872_v12, %v11163_v29  ;;  %v7135_v23 = vmax.f32 %v6871_v58, 0.0 }
 0x739   : > { %v6874_v60 = vpop.f32.mrf.mxu0 }
 0x73a   : > { %v6875_v20 = vadd.f32 %v6874_v60, %v11166_v0  ;;  %7522 = vmatprep.mubr.bf16.mxu1 %v7244_v8  ;;  %v7136_v31 = vmax.f32 %v6873_v17, 0.0 }
 0x73b   : > { %v6876_v39 = vpop.f32.mrf.mxu0  ;;  %7523 = vmatmul.mubr.bf16.gmra.mxu1 %v7243_v37 }
 0x73c   : > { %v6877_v52 = vadd.f32 %v6876_v39, %v11163_v29  ;;  %v7137_v43 = vmax.f32 %v6875_v20, 0.0 }
 0x73d   : > { %v6880_v6 = vpop.f32.mrf.mxu0 }
 0x73e   : > { %v7138_v7 = vmax.f32 %v6877_v52, 0.0  ;;  %v7245_v57 = vpack.c.bf16 %v7137_v43, %v7135_v23  ;;  %v6881_v3 = vadd.f32 %v6880_v6, %v11166_v0 }
 0x73f   : > { %v6882_v9 = vpop.f32.mrf.mxu0 }
 0x740   : > { %v7246_v59 = vpack.c.bf16 %v7138_v7, %v7136_v31  ;;  %v6883_v53 = vadd.f32 %v6882_v9, %v11163_v29  ;;  %v7139_v14 = vmax.f32 %v6881_v3, 0.0 }
 0x741   : > { %v6884_v27 = vpop.f32.mrf.mxu0 }
 0x742   : > { %v6885_v25 = vadd.f32 %v6884_v27, %v11166_v0  ;;  %7530 = vmatprep.mubr.bf16.mxu1 %v7246_v59  ;;  %v7140_v46 = vmax.f32 %v6883_v53, 0.0 }
 0x743   : > { %v6886_v48 = vpop.f32.mrf.mxu0  ;;  %7531 = vmatmul.mubr.bf16.gmra.mxu1 %v7245_v57 }
 0x744   : > { %v6887_v22 = vadd.f32 %v6886_v48, %v11163_v29  ;;  %v7141_v54 = vmax.f32 %v6885_v25, 0.0 }
 0x745   : > { %v6890_v30 = vpop.f32.mrf.mxu0 }
 0x746   : > { %v7142_v38 = vmax.f32 %v6887_v22, 0.0  ;;  %v7247_v11 = vpack.c.bf16 %v7141_v54, %v7139_v14  ;;  %v6891_v33 = vadd.f32 %v6890_v30, %v11166_v0 }
 0x747   : > { %v6892_v51 = vpop.f32.mrf.mxu0 }
 0x748   : > { %v7248_v18 = vpack.c.bf16 %v7142_v38, %v7140_v46  ;;  %v6893_v50 = vadd.f32 %v6892_v51, %v11163_v29  ;;  %v7143_v47 = vmax.f32 %v6891_v33, 0.0 }
 0x749   : > { %v6894_v32 = vpop.f32.mrf.mxu0 }
 0x74a   : > { %v6895_v28 = vadd.f32 %v6894_v32, %v11166_v0  ;;  %7538 = vmatprep.mubr.bf16.mxu1 %v7248_v18  ;;  %v7144_v19 = vmax.f32 %v6893_v50, 0.0 }
 0x74b   : > { %v6896_v15 = vpop.f32.mrf.mxu0  ;;  %7539 = vmatmul.mubr.bf16.gmra.mxu1 %v7247_v11 }
 0x74c   : > { %v6897_v35 = vadd.f32 %v6896_v15, %v11163_v29  ;;  %v7145_v62 = vmax.f32 %v6895_v28, 0.0 }
 0x74d   : > { %v6900_v1 = vpop.f32.mrf.mxu0 }
 0x74e   : > { %v7146_v63 = vmax.f32 %v6897_v35, 0.0  ;;  %v7249_v21 = vpack.c.bf16 %v7145_v62, %v7143_v47  ;;  %v6901_v26 = vadd.f32 %v6900_v1, %v11166_v0 }
 0x74f   : > { %v6902_v55 = vpop.f32.mrf.mxu0 }
 0x750   : > { %v7250_v61 = vpack.c.bf16 %v7146_v63, %v7144_v19  ;;  %v6903_v40 = vadd.f32 %v6902_v55, %v11163_v29  ;;  %v7147_v34 = vmax.f32 %v6901_v26, 0.0 }
 0x751   : > { %v6904_v41 = vpop.f32.mrf.mxu0 }
 0x752   : > { %v6905_v24 = vadd.f32 %v6904_v41, %v11166_v0  ;;  %7546 = vmatprep.mubr.bf16.mxu1 %v7250_v61  ;;  %v7148_v49 = vmax.f32 %v6903_v40, 0.0 }
 0x753   : > { %v6906_v16 = vpop.f32.mrf.mxu0  ;;  %7547 = vmatmul.mubr.bf16.gmra.mxu1 %v7249_v21 }
 0x754   : > { %v6907_v5 = vadd.f32 %v6906_v16, %v11163_v29  ;;  %v7149_v2 = vmax.f32 %v6905_v24, 0.0 }
 0x755   : > { %v6910_v42 = vpop.f32.mrf.mxu0 }
 0x756   : > { %v7150_v36 = vmax.f32 %v6907_v5, 0.0  ;;  %v7251_v13 = vpack.c.bf16 %v7149_v2, %v7147_v34  ;;  %v6911_v8 = vadd.f32 %v6910_v42, %v11166_v0 }
 0x757   : > { %v6912_v56 = vpop.f32.mrf.mxu0 }
 0x758   : > { %v7252_v10 = vpack.c.bf16 %v7150_v36, %v7148_v49  ;;  %v6913_v44 = vadd.f32 %v6912_v56, %v11163_v29  ;;  %v7151_v52 = vmax.f32 %v6911_v8, 0.0 }
 0x759   : > { %v6914_v45 = vpop.f32.mrf.mxu0 }
 0x75a   : > { %v6915_v12 = vadd.f32 %v6914_v45, %v11166_v0  ;;  %7554 = vmatprep.mubr.bf16.mxu1 %v7252_v10  ;;  %v7152_v17 = vmax.f32 %v6913_v44, 0.0 }
 0x75b   : > { %v6916_v4 = vpop.f32.mrf.mxu0  ;;  %7555 = vmatmul.mubr.bf16.gmra.mxu1 %v7251_v13 }
 0x75c   : > { %v6917_v60 = vadd.f32 %v6916_v4, %v11163_v29  ;;  %v7153_v20 = vmax.f32 %v6915_v12, 0.0 }
 0x75d   : > { %v6920_v37 = vpop.f32.mrf.mxu0 }
 0x75e   : > { %v7154_v39 = vmax.f32 %v6917_v60, 0.0  ;;  %v7253_v43 = vpack.c.bf16 %v7153_v20, %v7151_v52  ;;  %v6921_v59 = vadd.f32 %v6920_v37, %v11166_v0 }
 0x75f   : > { %v6922_v58 = vpop.f32.mrf.mxu0 }
 0x760   : > { %v7254_v6 = vpack.c.bf16 %v7154_v39, %v7152_v17  ;;  %v6923_v7 = vadd.f32 %v6922_v58, %v11163_v29  ;;  %v7155_v22 = vmax.f32 %v6921_v59, 0.0 }
 0x761   : > { %v6924_v31 = vpop.f32.mrf.mxu0 }
 0x762   : > { %v6925_v9 = vadd.f32 %v6924_v31, %v11166_v0  ;;  %7562 = vmatprep.mubr.bf16.mxu1 %v7254_v6  ;;  %v7156_v53 = vmax.f32 %v6923_v7, 0.0 }
 0x763   : > { %v6926_v23 = vpop.f32.mrf.mxu0  ;;  %7563 = vmatmul.mubr.bf16.gmra.mxu1 %v7253_v43 }
 0x764   : > { %v6927_v27 = vadd.f32 %v6926_v23, %v11163_v29  ;;  %v7157_v25 = vmax.f32 %v6925_v9, 0.0 }
 0x765   : > { %v6930_v57 = vpop.f32.mrf.mxu0 }
 0x766   : > { %v7158_v48 = vmax.f32 %v6927_v27, 0.0  ;;  %v7255_v54 = vpack.c.bf16 %v7157_v25, %v7155_v22  ;;  %v6931_v18 = vadd.f32 %v6930_v57, %v11166_v0 }
 0x767   : > { %v6932_v3 = vpop.f32.mrf.mxu0 }
 0x768   : > { %v7256_v30 = vpack.c.bf16 %v7158_v48, %v7156_v53  ;;  %v6933_v38 = vadd.f32 %v6932_v3, %v11163_v29  ;;  %v7159_v35 = vmax.f32 %v6931_v18, 0.0 }
 0x769   : > { %v6934_v46 = vpop.f32.mrf.mxu0 }
 0x76a   : > { %v6935_v51 = vadd.f32 %v6934_v46, %v11166_v0  ;;  %7570 = vmatprep.mubr.bf16.mxu1 %v7256_v30  ;;  %v7160_v50 = vmax.f32 %v6933_v38, 0.0 }
 0x76b   : > { %v6936_v14 = vpop.f32.mrf.mxu0  ;;  %7571 = vmatmul.mubr.bf16.gmra.mxu1 %v7255_v54 }
 0x76c   : > { %v6937_v32 = vadd.f32 %v6936_v14, %v11163_v29  ;;  %v7161_v28 = vmax.f32 %v6935_v51, 0.0 }
 0x76d   : > { %v6940_v11 = vpop.f32.mrf.mxu0 }
 0x76e   : > { %v7162_v15 = vmax.f32 %v6937_v32, 0.0  ;;  %v7257_v62 = vpack.c.bf16 %v7161_v28, %v7159_v35  ;;  %v6941_v61 = vadd.f32 %v6940_v11, %v11166_v0 }
 0x76f   : > { %v6942_v33 = vpop.f32.mrf.mxu0 }
 0x770   : > { %v7258_v1 = vpack.c.bf16 %v7162_v15, %v7160_v50  ;;  %v6943_v63 = vadd.f32 %v6942_v33, %v11163_v29  ;;  %v7163_v5 = vmax.f32 %v6941_v61, 0.0 }
 0x771   : > { %v6944_v19 = vpop.f32.mrf.mxu0 }
 0x772   : > { %v6945_v55 = vadd.f32 %v6944_v19, %v11166_v0  ;;  %7578 = vmatprep.mubr.bf16.mxu1 %v7258_v1  ;;  %v7164_v40 = vmax.f32 %v6943_v63, 0.0 }
 0x773   : > { %v6946_v47 = vpop.f32.mrf.mxu0  ;;  %7579 = vmatmul.mubr.bf16.gmra.mxu1 %v7257_v62 }
 0x774   : > { %v6947_v41 = vadd.f32 %v6946_v47, %v11163_v29  ;;  %v7165_v24 = vmax.f32 %v6945_v55, 0.0 }
 0x775   : > { %v6950_v21 = vpop.f32.mrf.mxu0 }
 0x776   : > { %v7166_v16 = vmax.f32 %v6947_v41, 0.0  ;;  %v7259_v2 = vpack.c.bf16 %v7165_v24, %v7163_v5  ;;  %v6951_v10 = vadd.f32 %v6950_v21, %v11166_v0 }
 0x777   : > { %v6952_v26 = vpop.f32.mrf.mxu0 }
 0x778   : > { %v7260_v42 = vpack.c.bf16 %v7166_v16, %v7164_v40  ;;  %v6953_v36 = vadd.f32 %v6952_v26, %v11163_v29  ;;  %v7167_v60 = vmax.f32 %v6951_v10, 0.0 }
 0x779   : > { %v6954_v49 = vpop.f32.mrf.mxu0 }
 0x77a   : > { %v6955_v56 = vadd.f32 %v6954_v49, %v11166_v0  ;;  %7586 = vmatprep.mubr.bf16.mxu1 %v7260_v42  ;;  %v7168_v44 = vmax.f32 %v6953_v36, 0.0 }
 0x77b   : > { %v6956_v34 = vpop.f32.mrf.mxu0  ;;  %7587 = vmatmul.mubr.bf16.gmra.mxu1 %v7259_v2 }
 0x77c   : > { %v6957_v45 = vadd.f32 %v6956_v34, %v11163_v29  ;;  %v7169_v12 = vmax.f32 %v6955_v56, 0.0 }
 0x77d   : > { %v6960_v13 = vpop.f32.mrf.mxu0 }
 0x77e   : > { %v7170_v4 = vmax.f32 %v6957_v45, 0.0  ;;  %v7261_v20 = vpack.c.bf16 %v7169_v12, %v7167_v60  ;;  %v6961_v6 = vadd.f32 %v6960_v13, %v11166_v0 }
 0x77f   : > { %v6962_v8 = vpop.f32.mrf.mxu0 }
 0x780   : > { %v7262_v37 = vpack.c.bf16 %v7170_v4, %v7168_v44  ;;  %v6963_v39 = vadd.f32 %v6962_v8, %v11163_v29  ;;  %v7171_v27 = vmax.f32 %v6961_v6, 0.0 }
 0x781   : > { %v6964_v17 = vpop.f32.mrf.mxu0 }
 0x782   : > { %v6965_v58 = vadd.f32 %v6964_v17, %v11166_v0  ;;  %7594 = vmatprep.mubr.bf16.mxu1 %v7262_v37  ;;  %v7172_v7 = vmax.f32 %v6963_v39, 0.0 }
 0x783   : > { %v6966_v52 = vpop.f32.mrf.mxu0  ;;  %7595 = vmatmul.mubr.bf16.gmra.mxu1 %v7261_v20 }
 0x784   : > { %v6967_v31 = vadd.f32 %v6966_v52, %v11163_v29  ;;  %v7173_v9 = vmax.f32 %v6965_v58, 0.0 }
 0x785   : > { %v6970_v43 = vpop.f32.mrf.mxu0 }
 0x786   : > { %v7174_v23 = vmax.f32 %v6967_v31, 0.0  ;;  %v7263_v25 = vpack.c.bf16 %v7173_v9, %v7171_v27  ;;  %v6971_v30 = vadd.f32 %v6970_v43, %v11166_v0 }
 0x787   : > { %v6972_v59 = vpop.f32.mrf.mxu0 }
 0x788   : > { %v7264_v57 = vpack.c.bf16 %v7174_v23, %v7172_v7  ;;  %v6973_v48 = vadd.f32 %v6972_v59, %v11163_v29  ;;  %v7175_v32 = vmax.f32 %v6971_v30, 0.0 }
 0x789   : > { %v6974_v53 = vpop.f32.mrf.mxu0 }
 0x78a   : > { %v6975_v3 = vadd.f32 %v6974_v53, %v11166_v0  ;;  %7602 = vmatprep.mubr.bf16.mxu1 %v7264_v57  ;;  %v7176_v38 = vmax.f32 %v6973_v48, 0.0 }
 0x78b   : > { %v6976_v22 = vpop.f32.mrf.mxu0  ;;  %7603 = vmatmul.mubr.bf16.gmra.mxu1 %v7263_v25 }
 0x78c   : > { %v6977_v46 = vadd.f32 %v6976_v22, %v11163_v29  ;;  %v7177_v51 = vmax.f32 %v6975_v3, 0.0 }
 0x78d   : > { %v6980_v54 = vpop.f32.mrf.mxu0 }
 0x78e   : > { %v7178_v14 = vmax.f32 %v6977_v46, 0.0  ;;  %v7265_v28 = vpack.c.bf16 %v7177_v51, %v7175_v32  ;;  %v6981_v1 = vadd.f32 %v6980_v54, %v11166_v0 }
 0x78f   : > { %v6982_v18 = vpop.f32.mrf.mxu0 }
 0x790   : > { %v7266_v11 = vpack.c.bf16 %v7178_v14, %v7176_v38  ;;  %v6983_v15 = vadd.f32 %v6982_v18, %v11163_v29  ;;  %v7179_v41 = vmax.f32 %v6981_v1, 0.0 }
 0x791   : > { %v6984_v50 = vpop.f32.mrf.mxu0 }
 0x792   : > { %v6985_v33 = vadd.f32 %v6984_v50, %v11166_v0  ;;  %7610 = vmatprep.mubr.bf16.mxu1 %v7266_v11  ;;  %v7180_v63 = vmax.f32 %v6983_v15, 0.0 }
 0x793   : > { %v6986_v35 = vpop.f32.mrf.mxu0  ;;  %7611 = vmatmul.mubr.bf16.gmra.mxu1 %v7265_v28 }
 0x794   : > { %v6987_v19 = vadd.f32 %v6986_v35, %v11163_v29  ;;  %v7181_v55 = vmax.f32 %v6985_v33, 0.0 }
 0x795   : > { %v6990_v62 = vpop.f32.mrf.mxu0 }
 0x796   : > { %v7182_v47 = vmax.f32 %v6987_v19, 0.0  ;;  %v7267_v24 = vpack.c.bf16 %v7181_v55, %v7179_v41  ;;  %v6991_v42 = vadd.f32 %v6990_v62, %v11166_v0  ;;  %v11298_v41 = vld [vmem:[%s11481_s19] ss:$0 sm:$0xff] }
 0x797   : > { %v6992_v61 = vpop.f32.mrf.mxu0 }
 0x798   : > { %v7268_v21 = vpack.c.bf16 %v7182_v47, %v7180_v63  ;;  %v6993_v16 = vadd.f32 %v6992_v61, %v11163_v29  ;;  %v7183_v45 = vmax.f32 %v6991_v42, 0.0 }
 0x799   : > { %v6994_v40 = vpop.f32.mrf.mxu0 }
 0x79a   : > { %v6995_v26 = vadd.f32 %v6994_v40, %v11166_v0  ;;  %7618 = vmatprep.mubr.bf16.mxu1 %v7268_v21  ;;  %v7184_v36 = vmax.f32 %v6993_v16, 0.0 }
 0x79b   : > { %v6996_v5 = vpop.f32.mrf.mxu0  ;;  %7619 = vmatmul.mubr.bf16.gmra.mxu1 %v7267_v24 }
 0x79c   : > { %v6997_v49 = vadd.f32 %v6996_v5, %v11163_v29  ;;  %v7185_v56 = vmax.f32 %v6995_v26, 0.0 }
 0x79d   : > { %v7000_v2 = vpop.f32.mrf.mxu0 }
 0x79e   : > { %v7186_v34 = vmax.f32 %v6997_v49, 0.0  ;;  %v7269_v12 = vpack.c.bf16 %v7185_v56, %v7183_v45  ;;  %v7001_v37 = vadd.f32 %v7000_v2, %v11166_v0 }
 0x79f   : > { %v7002_v10 = vpop.f32.mrf.mxu0 }
 0x7a0   : > { %v7270_v13 = vpack.c.bf16 %v7186_v34, %v7184_v36  ;;  %v7003_v4 = vadd.f32 %v7002_v10, %v11163_v29  ;;  %v7187_v31 = vmax.f32 %v7001_v37, 0.0 }
 0x7a1   : > { %v7004_v44 = vpop.f32.mrf.mxu0 }
 0x7a2   : > { %v7005_v8 = vadd.f32 %v7004_v44, %v11166_v0  ;;  %7626 = vmatprep.mubr.bf16.mxu1 %v7270_v13  ;;  %v7188_v39 = vmax.f32 %v7003_v4, 0.0 }
 0x7a3   : > { %v7006_v60 = vpop.f32.mrf.mxu0  ;;  %7627 = vmatmul.mubr.bf16.gmra.mxu1 %v7269_v12 }
 0x7a4   : > { %v7007_v17 = vadd.f32 %v7006_v60, %v11163_v29  ;;  %v7189_v58 = vmax.f32 %v7005_v8, 0.0 }
 0x7a5   : > { %v7010_v20 = vpop.f32.mrf.mxu0 }
 0x7a6   : > { %v7190_v52 = vmax.f32 %v7007_v17, 0.0  ;;  %v7271_v9 = vpack.c.bf16 %v7189_v58, %v7187_v31  ;;  %v7011_v57 = vadd.f32 %v7010_v20, %v11166_v0 }
 0x7a7   : > { %v7012_v6 = vpop.f32.mrf.mxu0 }
 0x7a8   : > { %v7272_v43 = vpack.c.bf16 %v7190_v52, %v7188_v39  ;;  %v7013_v23 = vadd.f32 %v7012_v6, %v11163_v29  ;;  %v7191_v46 = vmax.f32 %v7011_v57, 0.0 }
 0x7a9   : > { %v7014_v7 = vpop.f32.mrf.mxu0 }
 0x7aa   : > { %v7015_v59 = vadd.f32 %v7014_v7, %v11166_v0  ;;  %7634 = vmatprep.mubr.bf16.mxu1 %v7272_v43  ;;  %v7192_v48 = vmax.f32 %v7013_v23, 0.0 }
 0x7ab   : > { %v7016_v27 = vpop.f32.mrf.mxu0  ;;  %7635 = vmatmul.mubr.bf16.gmra.mxu1 %v7271_v9 }
 0x7ac   : > { %v7017_v53 = vadd.f32 %v7016_v27, %v11163_v29  ;;  %v7193_v3 = vmax.f32 %v7015_v59, 0.0 }
 0x7ad   : > { %v7020_v25 = vpop.f32.mrf.mxu0 }
 0x7ae   : > { %v7194_v22 = vmax.f32 %v7017_v53, 0.0  ;;  %v7273_v51 = vpack.c.bf16 %v7193_v3, %v7191_v46  ;;  %v7021_v11 = vadd.f32 %v7020_v25, %v11166_v0 }
 0x7af   : > { %v7022_v30 = vpop.f32.mrf.mxu0 }
 0x7b0   : > { %v7274_v54 = vpack.c.bf16 %v7194_v22, %v7192_v48  ;;  %v7023_v14 = vadd.f32 %v7022_v30, %v11163_v29  ;;  %v7195_v19 = vmax.f32 %v7021_v11, 0.0 }
 0x7b1   : > { %v7024_v38 = vpop.f32.mrf.mxu0 }
 0x7b2   : > { %v7025_v18 = vadd.f32 %v7024_v38, %v11166_v0  ;;  %7642 = vmatprep.mubr.bf16.mxu1 %v7274_v54  ;;  %v7196_v15 = vmax.f32 %v7023_v14, 0.0 }
 0x7b3   : > { %v7026_v32 = vpop.f32.mrf.mxu0  ;;  %7643 = vmatmul.mubr.bf16.gmra.mxu1 %v7273_v51 }
 0x7b4   : > { %v7027_v50 = vadd.f32 %v7026_v32, %v11163_v29  ;;  %v7197_v33 = vmax.f32 %v7025_v18, 0.0 }
 0x7b5   : > { %v7030_v28 = vpop.f32.mrf.mxu0 }
 0x7b6   : > { %v7198_v35 = vmax.f32 %v7027_v50, 0.0  ;;  %v7275_v55 = vpack.c.bf16 %v7197_v33, %v7195_v19  ;;  %v7031_v40 = vadd.f32 %v7030_v28, %v11166_v0 }
 0x7b7   : > { %v7032_v1 = vpop.f32.mrf.mxu0 }
 0x7b8   : > { %v7276_v62 = vpack.c.bf16 %v7198_v35, %v7196_v15  ;;  %v7033_v47 = vadd.f32 %v7032_v1, %v11163_v29  ;;  %v7199_v56 = vmax.f32 %v7031_v40, 0.0 }
 0x7b9   : > { %v7034_v63 = vpop.f32.mrf.mxu0 }
 0x7ba   : > { %v7035_v61 = vadd.f32 %v7034_v63, %v11166_v0  ;;  %7650 = vmatprep.mubr.bf16.mxu1 %v7276_v62  ;;  %v7200_v5 = vmax.f32 %v7033_v47, 0.0 }
 0x7bb   : > { %v7036_v21 = vpop.f32.mrf.mxu0  ;;  %v7460_v16 = vpop.f32.mrf.mxu1  ;;  %7651 = vmatmul.mubr.bf16.gmra.mxu1 %v7275_v55 }
 0x7bc   : > { %v7037_v24 = vadd.f32 %v7036_v21, %v11163_v29  ;;  %v7461_v26 = vadd.f32 %v11298_v41, %v7460_v16  ;;  %v7201_v42 = vmax.f32 %v7035_v61, 0.0 }
 0x7bd   : > { %v7040_v2 = vpop.f32.mrf.mxu0  ;;  %v7462_v36 = vpop.f32.mrf.mxu1 }
 0x7be   : > { %v7202_v49 = vmax.f32 %v7037_v24, 0.0  ;;  %7715 = vst [vmem:[%s11305_s27] sm:$0xff] %v7461_v26  ;;  %v7277_v44 = vpack.c.bf16 %v7201_v42, %v7199_v56  ;;  %v7041_v37 = vadd.f32 %v7040_v2, %v11166_v0 }
 0x7bf   : > { %v7042_v10 = vpop.f32.mrf.mxu0  ;;  %v7463_v45 = vpop.f32.mrf.mxu1 }
 0x7c0   : > { %v7278_v34 = vpack.c.bf16 %v7202_v49, %v7200_v5  ;;  %v7464_v13 = vadd.f32 %v11298_v41, %v7463_v45  ;;  %v7043_v8 = vadd.f32 %v7042_v10, %v11163_v29  ;;  %v7203_v9 = vmax.f32 %v7041_v37, 0.0 }
 0x7c1   : > { %v7044_v12 = vpop.f32.mrf.mxu0  ;;  %v7465_v4 = vpop.f32.mrf.mxu1 }
 0x7c2   : > { %7658 = vmatprep.mubr.bf16.mxu1 %v7278_v34  ;;  %7716 = vst [vmem:[%s11305_s27 + $0x8] sm:$0xff] %v7464_v13  ;;  %v7045_v60 = vadd.f32 %v7044_v12, %v11166_v0  ;;  %v7204_v43 = vmax.f32 %v7043_v8, 0.0 }
 0x7c3   : > { %v7046_v17 = vpop.f32.mrf.mxu0  ;;  %v7468_v20 = vpop.f32.mrf.mxu1  ;;  %7659 = vmatmul.mubr.bf16.gmra.mxu1 %v7277_v44 }
 0x7c4   : > { %v7047_v39 = vadd.f32 %v7046_v17, %v11163_v29  ;;  %v7469_v58 = vadd.f32 %v11298_v41, %v7468_v20  ;;  %v7205_v52 = vmax.f32 %v7045_v60, 0.0 }
 0x7c5   : > { %v7050_v6 = vpop.f32.mrf.mxu0  ;;  %v7470_v31 = vpop.f32.mrf.mxu1 }
 0x7c6   : > { %v7206_v7 = vmax.f32 %v7047_v39, 0.0  ;;  %7717 = vst [vmem:[%s11305_s27 + $0x10] sm:$0xff] %v7469_v58  ;;  %v7279_v53 = vpack.c.bf16 %v7205_v52, %v7203_v9  ;;  %v7051_v30 = vadd.f32 %v7050_v6, %v11166_v0 }
 0x7c7   : > { %v7052_v23 = vpop.f32.mrf.mxu0  ;;  %v7471_v59 = vpop.f32.mrf.mxu1 }
 0x7c8   : > { %v7280_v27 = vpack.c.bf16 %v7206_v7, %v7204_v43  ;;  %v7472_v57 = vadd.f32 %v11298_v41, %v7471_v59  ;;  %v7053_v3 = vadd.f32 %v7052_v23, %v11163_v29  ;;  %v7207_v28 = vmax.f32 %v7051_v30, 0.0 }
 0x7c9   : > { %v7054_v25 = vpop.f32.mrf.mxu0  ;;  %v7473_v48 = vpop.f32.mrf.mxu1 }
 0x7ca   : > { %7718 = vst [vmem:[%s11305_s27 + $0x18] sm:$0xff] %v7472_v57  ;;  %v7055_v22 = vadd.f32 %v7054_v25, %v11166_v0  ;;  %7666 = vmatprep.mubr.bf16.mxu1 %v7280_v27  ;;  %v7208_v11 = vmax.f32 %v7053_v3, 0.0 }
 0x7cb   : > { %v7056_v46 = vpop.f32.mrf.mxu0  ;;  %v7476_v54 = vpop.f32.mrf.mxu1  ;;  %7667 = vmatmul.mubr.bf16.gmra.mxu1 %v7279_v53 }
 0x7cc   : > { %v7057_v38 = vadd.f32 %v7056_v46, %v11163_v29  ;;  %v7477_v51 = vadd.f32 %v11298_v41, %v7476_v54  ;;  %v7209_v14 = vmax.f32 %v7055_v22, 0.0 }
 0x7cd   : > { %v7060_v18 = vpop.f32.mrf.mxu0  ;;  %v7478_v32 = vpop.f32.mrf.mxu1 }
 0x7ce   : > { %v7210_v50 = vmax.f32 %v7057_v38, 0.0  ;;  %7719 = vst [vmem:[%s11305_s27 + $0x20] sm:$0xff] %v7477_v51  ;;  %v7281_v19 = vpack.c.bf16 %v7209_v14, %v7207_v28  ;;  %v7061_v61 = vadd.f32 %v7060_v18, %v11166_v0 }
 0x7cf   : > { %v7062_v15 = vpop.f32.mrf.mxu0  ;;  %v7479_v33 = vpop.f32.mrf.mxu1 }
 0x7d0   : > { %v7282_v35 = vpack.c.bf16 %v7210_v50, %v7208_v11  ;;  %v7480_v1 = vadd.f32 %v11298_v41, %v7479_v33  ;;  %v7063_v55 = vadd.f32 %v7062_v15, %v11163_v29  ;;  %v7211_v36 = vmax.f32 %v7061_v61, 0.0 }
 0x7d1   : > { %v7064_v62 = vpop.f32.mrf.mxu0  ;;  %v7481_v63 = vpop.f32.mrf.mxu1 }
 0x7d2   : > { %7720 = vst [vmem:[%s11305_s27 + $0x28] sm:$0xff] %v7480_v1  ;;  %v7065_v47 = vadd.f32 %v7064_v62, %v11166_v0  ;;  %7674 = vmatprep.mubr.bf16.mxu1 %v7282_v35  ;;  %v7212_v49 = vmax.f32 %v7063_v55, 0.0 }
 0x7d3   : > { %v7066_v21 = vpop.f32.mrf.mxu0  ;;  %v7484_v40 = vpop.f32.mrf.mxu1  ;;  %7675 = vmatmul.mubr.bf16.gmra.mxu1 %v7281_v19 }
 0x7d4   : > { %v7067_v24 = vadd.f32 %v7066_v21, %v11163_v29  ;;  %v7485_v16 = vadd.f32 %v11298_v41, %v7484_v40  ;;  %v7213_v26 = vmax.f32 %v7065_v47, 0.0 }
 0x7d5   : > { %v7070_v5 = vpop.f32.mrf.mxu0  ;;  %v7486_v42 = vpop.f32.mrf.mxu1 }
 0x7d6   : > { %v7214_v2 = vmax.f32 %v7067_v24, 0.0  ;;  %7721 = vst [vmem:[%s11305_s27 + $0x30] sm:$0xff] %v7485_v16  ;;  %v7283_v13 = vpack.c.bf16 %v7213_v26, %v7211_v36  ;;  %v7071_v60 = vadd.f32 %v7070_v5, %v11166_v0 }
 0x7d7   : > { %v7072_v56 = vpop.f32.mrf.mxu0  ;;  %v7487_v34 = vpop.f32.mrf.mxu1 }
 0x7d8   : > { %v7284_v10 = vpack.c.bf16 %v7214_v2, %v7212_v49  ;;  %v7488_v45 = vadd.f32 %v11298_v41, %v7487_v34  ;;  %v7073_v4 = vadd.f32 %v7072_v56, %v11163_v29  ;;  %v7215_v7 = vmax.f32 %v7071_v60, 0.0 }
 0x7d9   : > { %v7074_v44 = vpop.f32.mrf.mxu0  ;;  %v7489_v12 = vpop.f32.mrf.mxu1 }
 0x7da   : > { %7722 = vst [vmem:[%s11305_s27 + $0x38] sm:$0xff] %v7488_v45  ;;  %v7075_v8 = vadd.f32 %v7074_v44, %v11166_v0  ;;  %7682 = vmatprep.mubr.bf16.mxu1 %v7284_v10  ;;  %v7216_v31 = vmax.f32 %v7073_v4, 0.0 }
 0x7db   : > { %v7076_v37 = vpop.f32.mrf.mxu0  ;;  %v7492_v17 = vpop.f32.mrf.mxu1  ;;  %7683 = vmatmul.mubr.bf16.gmra.mxu1 %v7283_v13 }
 0x7dc   : > { %v7077_v20 = vadd.f32 %v7076_v37, %v11163_v29  ;;  %v7493_v39 = vadd.f32 %v11298_v41, %v7492_v17  ;;  %v7217_v58 = vmax.f32 %v7075_v8, 0.0 }
 0x7dd   : > { %v7080_v52 = vpop.f32.mrf.mxu0  ;;  %v7494_v6 = vpop.f32.mrf.mxu1 }
 0x7de   : > { %v7218_v43 = vmax.f32 %v7077_v20, 0.0  ;;  %7723 = vst [vmem:[%s11305_s27 + $0x40] sm:$0xff] %v7493_v39  ;;  %v7285_v57 = vpack.c.bf16 %v7217_v58, %v7215_v7  ;;  %v7081_v22 = vadd.f32 %v7080_v52, %v11166_v0 }
 0x7df   : > { %v7082_v9 = vpop.f32.mrf.mxu0  ;;  %v7495_v23 = vpop.f32.mrf.mxu1 }
 0x7e0   : > { %v7286_v59 = vpack.c.bf16 %v7218_v43, %v7216_v31  ;;  %v7496_v27 = vadd.f32 %v11298_v41, %v7495_v23  ;;  %v7083_v48 = vadd.f32 %v7082_v9, %v11163_v29  ;;  %v7219_v50 = vmax.f32 %v7081_v22, 0.0 }
 0x7e1   : > { %v7084_v53 = vpop.f32.mrf.mxu0  ;;  %v7497_v25 = vpop.f32.mrf.mxu1 }
 0x7e2   : > { %7724 = vst [vmem:[%s11305_s27 + $0x48] sm:$0xff] %v7496_v27  ;;  %v7085_v3 = vadd.f32 %v7084_v53, %v11166_v0  ;;  %7690 = vmatprep.mubr.bf16.mxu1 %v7286_v59  ;;  %v7220_v32 = vmax.f32 %v7083_v48, 0.0 }
 0x7e3   : > { %v7086_v30 = vpop.f32.mrf.mxu0  ;;  %v7500_v46 = vpop.f32.mrf.mxu1  ;;  %7691 = vmatmul.mubr.bf16.gmra.mxu1 %v7285_v57 }
 0x7e4   : > { %v7087_v54 = vadd.f32 %v7086_v30, %v11163_v29  ;;  %v7501_v38 = vadd.f32 %v11298_v41, %v7500_v46  ;;  %v7221_v51 = vmax.f32 %v7085_v3, 0.0 }
 0x7e5   : > { %v7090_v14 = vpop.f32.mrf.mxu0  ;;  %v7502_v18 = vpop.f32.mrf.mxu1 }
 0x7e6   : > { %v7222_v11 = vmax.f32 %v7087_v54, 0.0  ;;  %7725 = vst [vmem:[%s11305_s27 + $0x50] sm:$0xff] %v7501_v38  ;;  %v7287_v1 = vpack.c.bf16 %v7221_v51, %v7219_v50  ;;  %v7091_v47 = vadd.f32 %v7090_v14, %v11166_v0 }
 0x7e7   : > { %v7092_v28 = vpop.f32.mrf.mxu0  ;;  %v7503_v15 = vpop.f32.mrf.mxu1 }
 0x7e8   : > { %v7288_v33 = vpack.c.bf16 %v7222_v11, %v7220_v32  ;;  %v7504_v35 = vadd.f32 %v11298_v41, %v7503_v15  ;;  %v7093_v63 = vadd.f32 %v7092_v28, %v11163_v29  ;;  %v7223_v49 = vmax.f32 %v7091_v47, 0.0 }
 0x7e9   : > { %v7094_v19 = vpop.f32.mrf.mxu0  ;;  %v7505_v62 = vpop.f32.mrf.mxu1 }
 0x7ea   : > { %7726 = vst [vmem:[%s11305_s27 + $0x58] sm:$0xff] %v7504_v35  ;;  %v7095_v55 = vadd.f32 %v7094_v19, %v11166_v0  ;;  %7698 = vmatprep.mubr.bf16.mxu1 %v7288_v33  ;;  %v7224_v5 = vmax.f32 %v7093_v63, 0.0 }
 0x7eb   : > { %v7096_v61 = vpop.f32.mrf.mxu0  ;;  %v7508_v21 = vpop.f32.mrf.mxu1  ;;  %7699 = vmatmul.mubr.bf16.gmra.mxu1 %v7287_v1 }
 0x7ec   : > { %v7097_v40 = vadd.f32 %v7096_v61, %v11163_v29  ;;  %v7509_v24 = vadd.f32 %v11298_v41, %v7508_v21  ;;  %v7225_v16 = vmax.f32 %v7095_v55, 0.0 }
 0x7ed   : > { %v7510_v26 = vpop.f32.mrf.mxu1 }
 0x7ee   : > { %v7226_v42 = vmax.f32 %v7097_v40, 0.0  ;;  %7727 = vst [vmem:[%s11305_s27 + $0x60] sm:$0xff] %v7509_v24  ;;  %v7289_v56 = vpack.c.bf16 %v7225_v16, %v7223_v49 }
 0x7ef   : > { %v7511_v2 = vpop.f32.mrf.mxu1 }
 0x7f0   : > { %v7290_v36 = vpack.c.bf16 %v7226_v42, %v7224_v5  ;;  %v7512_v0 = vadd.f32 %v11298_v41, %v7511_v2 }
 0x7f1   : > { %v7513_v34 = vpop.f32.mrf.mxu1 }
 0x7f2   : > { %7728 = vst [vmem:[%s11305_s27 + $0x68] sm:$0xff] %v7512_v0  ;;  %7706 = vmatprep.mubr.bf16.mxu1 %v7290_v36 }
 0x7f3   : > { %v7516_v29 = vpop.f32.mrf.mxu1  ;;  %7707 = vmatmul.mubr.bf16.gmra.mxu1 %v7289_v56 }
 0x7f4   : > { %v7517_v10 = vadd.f32 %v11298_v41, %v7516_v29 }
 0x7f5   : > { %v7518_v45 = vpop.f32.mrf.mxu1 }
 0x7f6   : > { %7729 = vst [vmem:[%s11305_s27 + $0x70] sm:$0xff] %v7517_v10 }
 0x7f7   : > { %v7519_v13 = vpop.f32.mrf.mxu1 }
 0x7f8   : > { %v7520_v44 = vadd.f32 %v11298_v41, %v7519_v13 }
 0x7f9   : > { %v7521_v12 = vpop.f32.mrf.mxu1 }
 0x7fa   : > { %7730 = vst [vmem:[%s11305_s27 + $0x78] sm:$0xff] %v7520_v44 }
 0x7fb   : > { %v7524_v4 = vpop.f32.mrf.mxu1 }
 0x7fc   : > { %v7525_v8 = vadd.f32 %v11298_v41, %v7524_v4 }
 0x7fd   : > { %v7526_v60 = vpop.f32.mrf.mxu1 }
 0x7fe   : > { %7731 = vst [vmem:[%s11305_s27 + $0x80] sm:$0xff] %v7525_v8 }
 0x7ff   : > { %v7527_v37 = vpop.f32.mrf.mxu1 }
 0x800   : > { %v7528_v17 = vadd.f32 %v11298_v41, %v7527_v37 }
 0x801   : > { %v7529_v20 = vpop.f32.mrf.mxu1 }
 0x802   : > { %7732 = vst [vmem:[%s11305_s27 + $0x88] sm:$0xff] %v7528_v17 }
 0x803   : > { %v7532_v39 = vpop.f32.mrf.mxu1 }
 0x804   : > { %v7533_v58 = vadd.f32 %v11298_v41, %v7532_v39 }
 0x805   : > { %v7534_v52 = vpop.f32.mrf.mxu1 }
 0x806   : > { %7733 = vst [vmem:[%s11305_s27 + $0x90] sm:$0xff] %v7533_v58 }
 0x807   : > { %v7535_v6 = vpop.f32.mrf.mxu1 }
 0x808   : > { %v7536_v31 = vadd.f32 %v11298_v41, %v7535_v6 }
 0x809   : > { %v7537_v43 = vpop.f32.mrf.mxu1 }
 0x80a   : > { %7734 = vst [vmem:[%s11305_s27 + $0x98] sm:$0xff] %v7536_v31 }
 0x80b   : > { %v7540_v7 = vpop.f32.mrf.mxu1 }
 0x80c   : > { %v7541_v9 = vadd.f32 %v11298_v41, %v7540_v7 }
 0x80d   : > { %v7542_v23 = vpop.f32.mrf.mxu1 }
 0x80e   : > { %7735 = vst [vmem:[%s11305_s27 + $0xa0] sm:$0xff] %v7541_v9 }
 0x80f   : > { %v7543_v59 = vpop.f32.mrf.mxu1 }
 0x810   : > { %v7544_v27 = vadd.f32 %v11298_v41, %v7543_v59 }
 0x811   : > { %v7545_v57 = vpop.f32.mrf.mxu1 }
 0x812   : > { %7736 = vst [vmem:[%s11305_s27 + $0xa8] sm:$0xff] %v7544_v27 }
 0x813   : > { %v7548_v53 = vpop.f32.mrf.mxu1 }
 0x814   : > { %v7549_v25 = vadd.f32 %v11298_v41, %v7548_v53 }
 0x815   : > { %v7550_v48 = vpop.f32.mrf.mxu1 }
 0x816   : > { %7737 = vst [vmem:[%s11305_s27 + $0xb0] sm:$0xff] %v7549_v25 }
 0x817   : > { %v7551_v3 = vpop.f32.mrf.mxu1 }
 0x818   : > { %v7552_v22 = vadd.f32 %v11298_v41, %v7551_v3 }
 0x819   : > { %v7553_v30 = vpop.f32.mrf.mxu1 }
 0x81a   : > { %7738 = vst [vmem:[%s11305_s27 + $0xb8] sm:$0xff] %v7552_v22 }
 0x81b   : > { %v7556_v46 = vpop.f32.mrf.mxu1 }
 0x81c   : > { %v7557_v54 = vadd.f32 %v11298_v41, %v7556_v46 }
 0x81d   : > { %v7558_v38 = vpop.f32.mrf.mxu1 }
 0x81e   : > { %7739 = vst [vmem:[%s11305_s27 + $0xc0] sm:$0xff] %v7557_v54 }
 0x81f   : > { %v7559_v51 = vpop.f32.mrf.mxu1 }
 0x820   : > { %v7560_v14 = vadd.f32 %v11298_v41, %v7559_v51 }
 0x821   : > { %v7561_v18 = vpop.f32.mrf.mxu1 }
 0x822   : > { %7740 = vst [vmem:[%s11305_s27 + $0xc8] sm:$0xff] %v7560_v14 }
 0x823   : > { %v7564_v32 = vpop.f32.mrf.mxu1 }
 0x824   : > { %v7565_v11 = vadd.f32 %v11298_v41, %v7564_v32 }
 0x825   : > { %v7566_v50 = vpop.f32.mrf.mxu1 }
 0x826   : > { %7741 = vst [vmem:[%s11305_s27 + $0xd0] sm:$0xff] %v7565_v11 }
 0x827   : > { %v7567_v28 = vpop.f32.mrf.mxu1 }
 0x828   : > { %v7568_v15 = vadd.f32 %v11298_v41, %v7567_v28 }
 0x829   : > { %v7569_v33 = vpop.f32.mrf.mxu1 }
 0x82a   : > { %7742 = vst [vmem:[%s11305_s27 + $0xd8] sm:$0xff] %v7568_v15 }
 0x82b   : > { %v7572_v35 = vpop.f32.mrf.mxu1 }
 0x82c   : > { %v7573_v1 = vadd.f32 %v11298_v41, %v7572_v35 }
 0x82d   : > { %v7574_v19 = vpop.f32.mrf.mxu1 }
 0x82e   : > { %7743 = vst [vmem:[%s11305_s27 + $0xe0] sm:$0xff] %v7573_v1 }
 0x82f   : > { %v7575_v62 = vpop.f32.mrf.mxu1 }
 0x830   : > { %v7576_v63 = vadd.f32 %v11298_v41, %v7575_v62 }
 0x831   : > { %v7577_v55 = vpop.f32.mrf.mxu1 }
 0x832   : > { %7744 = vst [vmem:[%s11305_s27 + $0xe8] sm:$0xff] %v7576_v63 }
 0x833   : > { %v7580_v47 = vpop.f32.mrf.mxu1 }
 0x834   : > { %v7581_v61 = vadd.f32 %v11298_v41, %v7580_v47 }
 0x835   : > { %v7582_v21 = vpop.f32.mrf.mxu1 }
 0x836   : > { %7745 = vst [vmem:[%s11305_s27 + $0xf0] sm:$0xff] %v7581_v61 }
 0x837   : > { %v7583_v40 = vpop.f32.mrf.mxu1 }
 0x838   : > { %v7584_v24 = vadd.f32 %v11298_v41, %v7583_v40 }
 0x839   : > { %v7585_v16 = vpop.f32.mrf.mxu1 }
 0x83a   : > { %7746 = vst [vmem:[%s11305_s27 + $0xf8] sm:$0xff] %v7584_v24 }
 0x83b   : > { %v7588_v26 = vpop.f32.mrf.mxu1 }
 0x83c   : > { %v7589_v5 = vadd.f32 %v11298_v41, %v7588_v26 }
 0x83d   : > { %v7590_v42 = vpop.f32.mrf.mxu1 }
 0x83e   : > { %7747 = vst [vmem:[%s11305_s27 + $0x100] sm:$0xff] %v7589_v5 }
 0x83f   : > { %v7591_v49 = vpop.f32.mrf.mxu1 }
 0x840   : > { %v7592_v2 = vadd.f32 %v11298_v41, %v7591_v49 }
 0x841   : > { %v7593_v36 = vpop.f32.mrf.mxu1 }
 0x842   : > { %7748 = vst [vmem:[%s11305_s27 + $0x108] sm:$0xff] %v7592_v2 }
 0x843   : > { %v7596_v0 = vpop.f32.mrf.mxu1 }
 0x844   : > { %v7597_v56 = vadd.f32 %v11298_v41, %v7596_v0 }
 0x845   : > { %v7598_v34 = vpop.f32.mrf.mxu1 }
 0x846   : > { %7749 = vst [vmem:[%s11305_s27 + $0x110] sm:$0xff] %v7597_v56 }
 0x847   : > { %v7599_v29 = vpop.f32.mrf.mxu1 }
 0x848   : > { %v7600_v10 = vadd.f32 %v11298_v41, %v7599_v29 }
 0x849   : > { %v7601_v45 = vpop.f32.mrf.mxu1 }
 0x84a   : > { %7750 = vst [vmem:[%s11305_s27 + $0x118] sm:$0xff] %v7600_v10 }
 0x84b   : > { %v7604_v13 = vpop.f32.mrf.mxu1 }
 0x84c   : > { %v7605_v44 = vadd.f32 %v11298_v41, %v7604_v13 }
 0x84d   : > { %v7606_v12 = vpop.f32.mrf.mxu1 }
 0x84e   : > { %7751 = vst [vmem:[%s11305_s27 + $0x120] sm:$0xff] %v7605_v44 }
 0x84f   : > { %v7607_v4 = vpop.f32.mrf.mxu1 }
 0x850   : > { %v7608_v8 = vadd.f32 %v11298_v41, %v7607_v4 }
 0x851   : > { %v7609_v60 = vpop.f32.mrf.mxu1 }
 0x852   : > { %7752 = vst [vmem:[%s11305_s27 + $0x128] sm:$0xff] %v7608_v8 }
 0x853   : > { %v7612_v37 = vpop.f32.mrf.mxu1 }
 0x854   : > { %v7613_v17 = vadd.f32 %v11298_v41, %v7612_v37 }
 0x855   : > { %v7614_v20 = vpop.f32.mrf.mxu1 }
 0x856   : > { %7753 = vst [vmem:[%s11305_s27 + $0x130] sm:$0xff] %v7613_v17 }
 0x857   : > { %v7615_v39 = vpop.f32.mrf.mxu1 }
 0x858   : > { %v7616_v58 = vadd.f32 %v11298_v41, %v7615_v39 }
 0x859   : > { %v7617_v52 = vpop.f32.mrf.mxu1 }
 0x85a   : > { %7754 = vst [vmem:[%s11305_s27 + $0x138] sm:$0xff] %v7616_v58 }
 0x85b   : > { %v7620_v6 = vpop.f32.mrf.mxu1 }
 0x85c   : > { %v7621_v31 = vadd.f32 %v11298_v41, %v7620_v6 }
 0x85d   : > { %v7622_v43 = vpop.f32.mrf.mxu1 }
 0x85e   : > { %7755 = vst [vmem:[%s11305_s27 + $0x140] sm:$0xff] %v7621_v31 }
 0x85f   : > { %v7623_v7 = vpop.f32.mrf.mxu1 }
 0x860   : > { %v7624_v9 = vadd.f32 %v11298_v41, %v7623_v7 }
 0x861   : > { %v7625_v23 = vpop.f32.mrf.mxu1 }
 0x862   : > { %7756 = vst [vmem:[%s11305_s27 + $0x148] sm:$0xff] %v7624_v9 }
 0x863   : > { %v7628_v59 = vpop.f32.mrf.mxu1 }
 0x864   : > { %v7629_v27 = vadd.f32 %v11298_v41, %v7628_v59 }
 0x865   : > { %v7630_v57 = vpop.f32.mrf.mxu1 }
 0x866   : > { %7757 = vst [vmem:[%s11305_s27 + $0x150] sm:$0xff] %v7629_v27 }
 0x867   : > { %v7631_v53 = vpop.f32.mrf.mxu1 }
 0x868   : > { %v7632_v25 = vadd.f32 %v11298_v41, %v7631_v53 }
 0x869   : > { %v7633_v48 = vpop.f32.mrf.mxu1 }
 0x86a   : > { %7758 = vst [vmem:[%s11305_s27 + $0x158] sm:$0xff] %v7632_v25 }
 0x86b   : > { %v7636_v3 = vpop.f32.mrf.mxu1 }
 0x86c   : > { %v7637_v22 = vadd.f32 %v11298_v41, %v7636_v3 }
 0x86d   : > { %v7638_v30 = vpop.f32.mrf.mxu1 }
 0x86e   : > { %7759 = vst [vmem:[%s11305_s27 + $0x160] sm:$0xff] %v7637_v22 }
 0x86f   : > { %v7639_v46 = vpop.f32.mrf.mxu1 }
 0x870   : > { %v7640_v54 = vadd.f32 %v11298_v41, %v7639_v46 }
 0x871   : > { %v7641_v38 = vpop.f32.mrf.mxu1 }
 0x872   : > { %7760 = vst [vmem:[%s11305_s27 + $0x168] sm:$0xff] %v7640_v54 }
 0x873   : > { %v7644_v51 = vpop.f32.mrf.mxu1 }
 0x874   : > { %v7645_v14 = vadd.f32 %v11298_v41, %v7644_v51 }
 0x875   : > { %v7646_v18 = vpop.f32.mrf.mxu1 }
 0x876   : > { %7761 = vst [vmem:[%s11305_s27 + $0x170] sm:$0xff] %v7645_v14 }
 0x877   : > { %v7647_v32 = vpop.f32.mrf.mxu1 }
 0x878   : > { %v7648_v11 = vadd.f32 %v11298_v41, %v7647_v32 }
 0x879   : > { %v7649_v50 = vpop.f32.mrf.mxu1 }
 0x87a   : > { %7762 = vst [vmem:[%s11305_s27 + $0x178] sm:$0xff] %v7648_v11 }
 0x87b   : > { %v7652_v28 = vpop.f32.mrf.mxu1 }
 0x87c   : > { %v7653_v15 = vadd.f32 %v11298_v41, %v7652_v28 }
 0x87d   : > { %v7654_v33 = vpop.f32.mrf.mxu1 }
 0x87e   : > { %7763 = vst [vmem:[%s11305_s27 + $0x180] sm:$0xff] %v7653_v15 }
 0x87f   : > { %v7655_v35 = vpop.f32.mrf.mxu1 }
 0x880   : > { %v7656_v1 = vadd.f32 %v11298_v41, %v7655_v35 }
 0x881   : > { %v7657_v19 = vpop.f32.mrf.mxu1 }
 0x882   : > { %7764 = vst [vmem:[%s11305_s27 + $0x188] sm:$0xff] %v7656_v1 }
 0x883   : > { %v7660_v62 = vpop.f32.mrf.mxu1 }
 0x884   : > { %v7661_v63 = vadd.f32 %v11298_v41, %v7660_v62 }
 0x885   : > { %v7662_v55 = vpop.f32.mrf.mxu1 }
 0x886   : > { %7765 = vst [vmem:[%s11305_s27 + $0x190] sm:$0xff] %v7661_v63 }
 0x887   : > { %v7663_v47 = vpop.f32.mrf.mxu1 }
 0x888   : > { %v7664_v61 = vadd.f32 %v11298_v41, %v7663_v47 }
 0x889   : > { %v7665_v21 = vpop.f32.mrf.mxu1 }
 0x88a   : > { %7766 = vst [vmem:[%s11305_s27 + $0x198] sm:$0xff] %v7664_v61 }
 0x88b   : > { %v7668_v40 = vpop.f32.mrf.mxu1 }
 0x88c   : > { %v7669_v24 = vadd.f32 %v11298_v41, %v7668_v40 }
 0x88d   : > { %v7670_v16 = vpop.f32.mrf.mxu1 }
 0x88e   : > { %7767 = vst [vmem:[%s11305_s27 + $0x1a0] sm:$0xff] %v7669_v24 }
 0x88f   : > { %v7671_v26 = vpop.f32.mrf.mxu1 }
 0x890   : > { %v7672_v5 = vadd.f32 %v11298_v41, %v7671_v26 }
 0x891   : > { %v7673_v42 = vpop.f32.mrf.mxu1 }
 0x892   : > { %7768 = vst [vmem:[%s11305_s27 + $0x1a8] sm:$0xff] %v7672_v5 }
 0x893   : > { %v7676_v49 = vpop.f32.mrf.mxu1 }
 0x894   : > { %v7677_v2 = vadd.f32 %v11298_v41, %v7676_v49 }
 0x895   : > { %v7678_v36 = vpop.f32.mrf.mxu1 }
 0x896   : > { %7769 = vst [vmem:[%s11305_s27 + $0x1b0] sm:$0xff] %v7677_v2 }
 0x897   : > { %v7679_v0 = vpop.f32.mrf.mxu1 }
 0x898   : > { %v7680_v56 = vadd.f32 %v11298_v41, %v7679_v0 }
 0x899   : > { %v7681_v34 = vpop.f32.mrf.mxu1 }
 0x89a   : > { %7770 = vst [vmem:[%s11305_s27 + $0x1b8] sm:$0xff] %v7680_v56 }
 0x89b   : > { %v7684_v29 = vpop.f32.mrf.mxu1 }
 0x89c   : > { %v7685_v10 = vadd.f32 %v11298_v41, %v7684_v29 }
 0x89d   : > { %v7686_v45 = vpop.f32.mrf.mxu1 }
 0x89e   : > { %7771 = vst [vmem:[%s11305_s27 + $0x1c0] sm:$0xff] %v7685_v10 }
 0x89f   : > { %v7687_v13 = vpop.f32.mrf.mxu1 }
 0x8a0   : > { %v7688_v44 = vadd.f32 %v11298_v41, %v7687_v13 }
 0x8a1   : > { %v7689_v12 = vpop.f32.mrf.mxu1 }
 0x8a2   : > { %7772 = vst [vmem:[%s11305_s27 + $0x1c8] sm:$0xff] %v7688_v44 }
 0x8a3   : > { %v7692_v4 = vpop.f32.mrf.mxu1 }
 0x8a4   : > { %v7693_v8 = vadd.f32 %v11298_v41, %v7692_v4 }
 0x8a5   : > { %v7694_v60 = vpop.f32.mrf.mxu1 }
 0x8a6   : > { %7773 = vst [vmem:[%s11305_s27 + $0x1d0] sm:$0xff] %v7693_v8 }
 0x8a7   : > { %v7695_v37 = vpop.f32.mrf.mxu1 }
 0x8a8   : > { %v7696_v17 = vadd.f32 %v11298_v41, %v7695_v37 }
 0x8a9   : > { %v7697_v20 = vpop.f32.mrf.mxu1 }
 0x8aa   : > { %7774 = vst [vmem:[%s11305_s27 + $0x1d8] sm:$0xff] %v7696_v17 }
 0x8ab   : > { %v7700_v39 = vpop.f32.mrf.mxu1 }
 0x8ac   : > { %v7701_v58 = vadd.f32 %v11298_v41, %v7700_v39 }
 0x8ad   : > { %v7702_v52 = vpop.f32.mrf.mxu1 }
 0x8ae   : > { %7775 = vst [vmem:[%s11305_s27 + $0x1e0] sm:$0xff] %v7701_v58 }
 0x8af   : > { %v7703_v6 = vpop.f32.mrf.mxu1 }
 0x8b0   : > { %v7704_v31 = vadd.f32 %v11298_v41, %v7703_v6 }
 0x8b1   : > { %v7705_v43 = vpop.f32.mrf.mxu1 }
 0x8b2   : > { %7776 = vst [vmem:[%s11305_s27 + $0x1e8] sm:$0xff] %v7704_v31 }
 0x8b3   : > { %v7708_v7 = vpop.f32.mrf.mxu1 }
 0x8b4   : > { %v7709_v9 = vadd.f32 %v11298_v41, %v7708_v7 }
 0x8b5   : > { %v7710_v23 = vpop.f32.mrf.mxu1 }
 0x8b6   : > { %7777 = vst [vmem:[%s11305_s27 + $0x1f0] sm:$0xff] %v7709_v9 }
 0x8b7   : > { %v7711_v59 = vpop.f32.mrf.mxu1 }
 0x8b8   : > { %v7712_v27 = vadd.f32 %v11298_v41, %v7711_v59 }
 0x8b9   : > { %v7713_v57 = vpop.f32.mrf.mxu1 }
 0x8ba   : > { %7778 = vst [vmem:[%s11305_s27 + $0x1f8] sm:$0xff] %v7712_v27 }
 0x8bb PF: > { %s32_s1 = sadd.s32 1, %s8767_s1  }
 0x8bc   : > { %p29_p2 = scmp.ge.s32.totalorder %s32_s1, 4  }
 0x8be   :  { %31 = sbr.rel (!%p29_p2) target bundleno = 8 (0x8), region = 139 }
 0x8c3   :  { %7801 = vsyncpa [#allocation3], 1 }
 0x8c4   :  { %7803 = vsyncpa [#allocation3 + $0x1], 1 }
 0x8c5   :  { %7804 = vsyncpa [#allocation5], 1 }

</bundles_post_ra>
